<compile_context>
chip_gen: v6e
topology: v6e:2x2x1
jax: 0.10.0
libtpu: 0.0.40
codegen_flags: <defaults>
</compile_context>

<pallas_src>
import functools
import math

import jax
import jax.numpy as jnp
import numpy as np
from jax.experimental import pallas as pl
from jax.experimental.pallas import tpu as pltpu


# ---------------- NATTEN index helpers (host-side, cached, trace-time only) ----------------

def _window_start(idx, length, kernel_size, dilation):
    nb = kernel_size // 2
    out = np.empty_like(idx)
    for t, i in enumerate(idx):
        if dilation <= 1:
            out[t] = min(max(i - nb, 0), length - kernel_size)
        else:
            ni = i - nb * dilation
            if ni < 0:
                out[t] = i % dilation
            elif i + nb * dilation >= length:
                imodd = i % dilation
                a = (length // dilation) * dilation
                b = length - a
                if imodd < b:
                    out[t] = length - b + imodd - 2 * nb * dilation
                else:
                    out[t] = a + imodd - kernel_size * dilation
            else:
                out[t] = ni
    return out


def _pb_start(idx, length, kernel_size, dilation):
    nb = kernel_size // 2
    out = np.empty_like(idx)
    for t, i in enumerate(idx):
        if dilation <= 1:
            out[t] = nb + (nb - i if i < nb else 0) + (
                length - i - 1 - nb if i + nb >= length else 0)
        elif i - nb * dilation < 0:
            out[t] = kernel_size - 1 - (i // dilation)
        elif i + nb * dilation >= length:
            out[t] = (length - i - 1) // dilation
        else:
            out[t] = nb
    return out


@functools.lru_cache(maxsize=None)
def _natten_indices(H, W, K, d):
    """Neighbor pixel indices (HW, KK) and flattened rpb indices (HW, KK)."""
    rows = _window_start(np.arange(H), H, K, d)[:, None] + np.arange(K) * d     # (H, K)
    cols = _window_start(np.arange(W), W, K, d)[:, None] + np.arange(K) * d     # (W, K)
    nbr = (rows[:, None, :, None] * W + cols[None, :, None, :]).reshape(H * W, K * K)
    prow = _pb_start(np.arange(H), H, K, d)[:, None] + np.arange(K)             # (H, K)
    pcol = _pb_start(np.arange(W), W, K, d)[:, None] + np.arange(K)             # (W, K)
    pb = (prow[:, None, :, None] * (2 * K - 1) + pcol[None, :, None, :]).reshape(H * W, K * K)
    return nbr.astype(np.int32), pb.astype(np.int32)


# ---------------- Pallas kernel: attention + fused 1x1 conv, one (batch, HW-tile) per step ----------------

def _tna_fused_kernel(q_ref, kg_ref, vg_ref, rpb_ref, wz_ref, bz_ref, o_ref, feat_ref,
                      *, scale, frames, heads, head_dim, kk):
    """q_ref:    (nh, hd, T)          f32 queries, HW tile on lanes
       kg_ref:   (F*nh*KK, hd, T)     bf16 pre-gathered neighbor keys
       vg_ref:   (F*nh*KK, hd, T)     bf16 pre-gathered neighbor values
       rpb_ref:  (nh*KK, T)           bf16 relative position bias, dense 2-D
       wz_ref:   (C, F*C) bf16        bz_ref: (C, 1) f32
       o_ref:    (C, T)               f32 lane-dense output slab
       feat_ref: (F*C, T)             bf16 VMEM scratch for the attention features
    """
    f32 = jnp.float32

    for h in range(heads):
        q_h = q_ref[h].astype(f32) * scale                                      # (hd, T)
        for f in range(frames):
            base = (f * heads + h) * kk
            # Logits for the KK neighborhood slots, each a lane-dense (1, T) row.
            logits = []
            for n in range(kk):
                k_n = kg_ref[base + n].astype(f32)                              # (hd, T)
                l_n = jnp.sum(q_h * k_n, axis=0, keepdims=True)                 # (1, T)
                r = h * kk + n
                logits.append(l_n + rpb_ref[r:r + 1, :].astype(f32))
            # Single-pass softmax over the KK slots; normalization deferred.
            m = functools.reduce(jnp.maximum, logits)
            p = [jnp.exp(l - m) for l in logits]
            denom = functools.reduce(jnp.add, p)
            inv = pl.reciprocal(denom, approx=True)                             # EUP slot
            acc = p[0] * vg_ref[base].astype(f32)
            for n in range(1, kk):
                acc = acc + p[n] * vg_ref[base + n].astype(f32)
            feat = acc * inv                                                    # (hd, T)
            # Row order (frame, head, head_dim) == PyTorch channel f*C + h*hd + d.
            col = (f * heads + h) * head_dim
            feat_ref[col:col + head_dim, :] = feat.astype(feat_ref.dtype)

    # Fused 1x1-conv epilogue: one MXU matmul from the VMEM scratch slab.
    y = jnp.dot(wz_ref[...], feat_ref[...], preferred_element_type=jnp.float32)  # (C, T)
    o_ref[...] = (y + bz_ref[...].astype(f32)).astype(o_ref.dtype)


# ---------------- wrapper ----------------

def _pick_tile(hw):
    for t in (1024, 512, 256, 128):
        if hw % t == 0:
            return t
    return hw  # fall back: whole extent as a single block


def tna_forward(q, k, v, rpb, wz, bz, *, num_heads, kernel_size, frames_num, dilation=None):
    B, C, H, W = q.shape
    nh = num_heads
    hd = C // nh
    K = kernel_size
    F = frames_num
    KK = K * K
    HW = H * W
    FC = F * C
    scale = hd ** (-0.5)
    d = 1 if dilation is None else dilation
    if H < K * d or W < K * d:
        # TODO(synk): reflect-padding branch of the original forward is not implemented
        # (it references an undefined `x` in the PyTorch source anyway).
        raise NotImplementedError("H/W smaller than window_size not supported")

    # ---- static index tables (cached; only touched at trace time under jit) ----
    nbr_np, pb_np = _natten_indices(H, W, K, d)
    nbr_t = jnp.asarray(nbr_np.T)                                   # (KK, HW) int32
    pb_t = jnp.asarray(pb_np.T)                                     # (KK, HW) int32

    # ---- layout plumbing: NCHW -> (..., hd, HW) with HW on the lane axis (pure reshapes) ----
    q_t = q.reshape(B, nh, hd, HW)                                  # queries stay f32 (small stream)

    # ---- device-side neighborhood gather in bf16, emitting the kernel layout directly ----
    # gidx[n, dd, p] = dd*HW + nbr[p, n]  -> take over the flattened (hd*HW) axis yields
    # (B, F*nh, KK, hd, HW) with no transpose afterwards.
    gidx = (jnp.arange(hd, dtype=jnp.int32)[None, :, None] * HW
            + nbr_t[:, None, :])                                    # (KK, hd, HW)
    kb = k.astype(jnp.bfloat16).reshape(B, F * nh, hd * HW)
    vb = v.astype(jnp.bfloat16).reshape(B, F * nh, hd * HW)
    k_g = jnp.take(kb, gidx, axis=-1, mode="clip").reshape(B, F * nh * KK, hd, HW)
    v_g = jnp.take(vb, gidx, axis=-1, mode="clip").reshape(B, F * nh * KK, hd, HW)

    # ---- relative position bias gathered on device, dense 2-D, bf16 ----
    rpb_flat = rpb.reshape(nh, (2 * K - 1) * (2 * K - 1))
    rpb_g = jnp.take(rpb_flat, pb_t, axis=-1, mode="clip")          # (nh, KK, HW)
    rpb_g = rpb_g.reshape(nh * KK, HW).astype(jnp.bfloat16)

    wz2 = wz.astype(jnp.bfloat16)                                   # (C, F*C) pre-cast
    bz2 = bz.astype(jnp.float32).reshape(C, 1)

    # ---- HW-tile grid: many pipelined steps per core, bounded per-step VMEM ----
    T = _pick_tile(HW)
    grid = (B, HW // T)

    out = pl.pallas_call(
        functools.partial(_tna_fused_kernel, scale=scale, frames=F, heads=nh,
                          head_dim=hd, kk=KK),
        out_shape=jax.ShapeDtypeStruct((B, C, HW), jnp.float32),
        grid=grid,
        in_specs=[
            pl.BlockSpec((None, nh, hd, T), lambda b, t: (b, 0, 0, t)),
            pl.BlockSpec((None, F * nh * KK, hd, T), lambda b, t: (b, 0, 0, t)),
            pl.BlockSpec((None, F * nh * KK, hd, T), lambda b, t: (b, 0, 0, t)),
            pl.BlockSpec((nh * KK, T), lambda b, t: (0, t)),
            pl.BlockSpec((C, FC), lambda b, t: (0, 0)),
            pl.BlockSpec((C, 1), lambda b, t: (0, 0)),
        ],
        out_specs=pl.BlockSpec((None, C, T), lambda b, t: (b, 0, t)),
        scratch_shapes=[pltpu.VMEM((FC, T), jnp.bfloat16)],
        compiler_params=pltpu.CompilerParams(
            dimension_semantics=("parallel", "parallel"),
            vmem_limit_bytes=32 * 1024 * 1024),
    )(q_t, k_g, v_g, rpb_g, wz2, bz2)

    return out.reshape(B, C, H, W)


# ---------------- pure-JAX reference (index-based gather, for sanity check) ----------------

def reference_forward(q, k, v, rpb, wz, bz, *, num_heads, kernel_size, frames_num, dilation=1):
    B, C, H, W = q.shape
    nh = num_heads
    hd = C // nh
    K = kernel_size
    F = frames_num
    scale = hd ** (-0.5)
    rows = _window_start(np.arange(H), H, K, dilation)[:, None] + np.arange(K) * dilation
    cols = _window_start(np.arange(W), W, K, dilation)[:, None] + np.arange(K) * dilation
    prow = _pb_start(np.arange(H), H, K, dilation)[:, None] + np.arange(K)
    pcol = _pb_start(np.arange(W), W, K, dilation)[:, None] + np.arange(K)

    q_t = q.reshape(B, nh, hd, H, W).transpose(0, 1, 3, 4, 2) * scale
    k_n = k.reshape(B, F, nh, hd, H, W).transpose(0, 1, 2, 4, 5, 3)
    v_n = v.reshape(B, F, nh, hd, H, W).transpose(0, 1, 2, 4, 5, 3)

    outs = []
    for f in range(F):
        logits = []
        for ki in range(K):
            for kj in range(K):
                kk_g = k_n[:, f][:, :, rows[:, ki]][:, :, :, cols[:, kj]]
                bias = rpb[:, prow[:, ki]][:, :, pcol[:, kj]]
                logits.append(jnp.sum(q_t * kk_g, axis=-1) + bias[None])
        logits = jnp.stack(logits, axis=-1)
        attn = jax.nn.softmax(logits, axis=-1)
        out = jnp.zeros_like(q_t)
        n = 0
        for ki in range(K):
            for kj in range(K):
                vv_g = v_n[:, f][:, :, rows[:, ki]][:, :, :, cols[:, kj]]
                out = out + attn[..., n:n + 1] * vv_g
                n += 1
        outs.append(out.transpose(0, 1, 4, 2, 3).reshape(B, C, H, W))
    x_n = jnp.concatenate(outs, axis=1)
    y = jnp.einsum('oc,bchw->bohw', wz, x_n,
                   precision=jax.lax.Precision.HIGHEST) + bz[None, :, None, None]
    return y


# ---------------- main ----------------

if __name__ == "__main__":
    B, dim, num_heads, frames_num, kernel_size, H, W = 2, 32, 2, 3, 3, 16, 16

    key = jax.random.PRNGKey(0)
    kq, kk_, kv, kr, kw, kb = jax.random.split(key, 6)

    q = jax.random.normal(kq, (B, dim, H, W), dtype=jnp.float32)
    k = jax.random.normal(kk_, (B, frames_num * dim, H, W), dtype=jnp.float32)
    v = jax.random.normal(kv, (B, frames_num * dim, H, W), dtype=jnp.float32)

    # parameters (deterministic, mimicking the module's __init__ shapes / init style)
    rpb = jnp.clip(0.02 * jax.random.normal(kr, (num_heads, 2 * kernel_size - 1,
                                                 2 * kernel_size - 1),
                                            dtype=jnp.float32), -2.0, 2.0)
    fan_in = frames_num * dim
    bound = 1.0 / math.sqrt(fan_in)
    wz = jax.random.uniform(kw, (dim, frames_num * dim), jnp.float32, -bound, bound)
    bz = jax.random.uniform(kb, (dim,), jnp.float32, -bound, bound)

    fwd = jax.jit(functools.partial(tna_forward, num_heads=num_heads,
                                    kernel_size=kernel_size,
                                    frames_num=frames_num, dilation=None))
    out = fwd(q, k, v, rpb, wz, bz)
    out = jax.block_until_ready(out)
    assert out.shape == (B, dim, H, W), out.shape

    ref = reference_forward(q, k, v, rpb, wz, bz,
                            num_heads=num_heads, kernel_size=kernel_size,
                            frames_num=frames_num, dilation=1)
    max_err = float(jnp.max(jnp.abs(out - ref)))
    mean_err = float(jnp.mean(jnp.abs(out - ref)))
    # bf16 K/V/W_z streams + approx reciprocal vs a HIGHEST-precision f32 reference.
    assert max_err < 5e-2, f"mismatch vs reference: max={max_err} mean={mean_err}"
    assert mean_err < 1e-2, f"mismatch vs reference: max={max_err} mean={mean_err}"

    print("KERNEL_OK")
</pallas_src>

<mosaic_0001>
module attributes {stable_mosaic.version = 11 : i64} {
  func.func @_tna_fused_kernel(%arg0: i32, %arg1: i32, %arg2: memref<1x2x16x256xf32, #tpu.memory_space<vmem>>, %arg3: memref<1x54x16x256xbf16, #tpu.memory_space<vmem>>, %arg4: memref<1x54x16x256xbf16, #tpu.memory_space<vmem>>, %arg5: memref<18x256xbf16, #tpu.memory_space<vmem>>, %arg6: memref<32x96xbf16, #tpu.memory_space<vmem>>, %arg7: memref<32x1xf32, #tpu.memory_space<vmem>>, %arg8: memref<1x32x256xf32, #tpu.memory_space<vmem>>, %arg9: memref<96x256xbf16, #tpu.memory_space<vmem>>) attributes {dimension_semantics = [#tpu.dimension_semantics<parallel>, #tpu.dimension_semantics<parallel>], iteration_bounds = array<i64: 2, 1>, scalar_prefetch = 0 : i64, scratch_operands = 1 : i64, tpu.core_type = #tpu.core_type<tc>, window_params = [{transform_indices = @transform_0, window_bounds = array<i64: 1, 2, 16, 256>}, {transform_indices = @transform_1, window_bounds = array<i64: 1, 54, 16, 256>}, {transform_indices = @transform_2, window_bounds = array<i64: 1, 54, 16, 256>}, {transform_indices = @transform_3, window_bounds = array<i64: 18, 256>}, {pipeline_mode = #tpu.pipeline_mode<synchronous>, transform_indices = @transform_4, window_bounds = array<i64: 32, 96>}, {pipeline_mode = #tpu.pipeline_mode<synchronous>, transform_indices = @transform_5, window_bounds = array<i64: 32, 1>}, {transform_indices = @transform_6, window_bounds = array<i64: 1, 32, 256>}]} {
    %c0 = arith.constant 0 : index
    %c0_0 = arith.constant 0 : index
    %c0_1 = arith.constant 0 : index
    %c0_2 = arith.constant 0 : index
    %0 = vector.load %arg2[%c0, %c0_0, %c0_1, %c0_2] : memref<1x2x16x256xf32, #tpu.memory_space<vmem>>, vector<1x1x16x256xf32>
    %1 = vector.shape_cast %0 : vector<1x1x16x256xf32> to vector<16x256xf32>
    %cst = arith.constant 2.500000e-01 : f32
    %2 = vector.broadcast %cst : f32 to vector<16x256xf32>
    %3 = arith.mulf %1, %2 : vector<16x256xf32>
    %c0_3 = arith.constant 0 : index
    %c0_4 = arith.constant 0 : index
    %c0_5 = arith.constant 0 : index
    %c0_6 = arith.constant 0 : index
    %4 = vector.load %arg3[%c0_3, %c0_4, %c0_5, %c0_6] : memref<1x54x16x256xbf16, #tpu.memory_space<vmem>>, vector<1x1x16x256xbf16>
    %5 = vector.shape_cast %4 : vector<1x1x16x256xbf16> to vector<16x256xbf16>
    %6 = arith.extf %5 : vector<16x256xbf16> to vector<16x256xf32>
    %7 = arith.mulf %3, %6 : vector<16x256xf32>
    %cst_7 = arith.constant dense<0.000000e+00> : vector<256xf32>
    %8 = vector.multi_reduction <add>, %7, %cst_7 [0] : vector<16x256xf32> to vector<256xf32>
    %9 = vector.shape_cast %8 : vector<256xf32> to vector<1x256xf32>
    %c0_8 = arith.constant 0 : index
    %c0_9 = arith.constant 0 : index
    %10 = vector.load %arg5[%c0_8, %c0_9] : memref<18x256xbf16, #tpu.memory_space<vmem>>, vector<1x256xbf16>
    %11 = arith.extf %10 : vector<1x256xbf16> to vector<1x256xf32>
    %12 = arith.addf %9, %11 : vector<1x256xf32>
    %c0_10 = arith.constant 0 : index
    %c1 = arith.constant 1 : index
    %c0_11 = arith.constant 0 : index
    %c0_12 = arith.constant 0 : index
    %13 = vector.load %arg3[%c0_10, %c1, %c0_11, %c0_12] : memref<1x54x16x256xbf16, #tpu.memory_space<vmem>>, vector<1x1x16x256xbf16>
    %14 = vector.shape_cast %13 : vector<1x1x16x256xbf16> to vector<16x256xbf16>
    %15 = arith.extf %14 : vector<16x256xbf16> to vector<16x256xf32>
    %16 = arith.mulf %3, %15 : vector<16x256xf32>
    %cst_13 = arith.constant dense<0.000000e+00> : vector<256xf32>
    %17 = vector.multi_reduction <add>, %16, %cst_13 [0] : vector<16x256xf32> to vector<256xf32>
    %18 = vector.shape_cast %17 : vector<256xf32> to vector<1x256xf32>
    %c1_14 = arith.constant 1 : index
    %c0_15 = arith.constant 0 : index
    %19 = vector.load %arg5[%c1_14, %c0_15] : memref<18x256xbf16, #tpu.memory_space<vmem>>, vector<1x256xbf16>
    %20 = arith.extf %19 : vector<1x256xbf16> to vector<1x256xf32>
    %21 = arith.addf %18, %20 : vector<1x256xf32>
    %c0_16 = arith.constant 0 : index
    %c2 = arith.constant 2 : index
    %c0_17 = arith.constant 0 : index
    %c0_18 = arith.constant 0 : index
    %22 = vector.load %arg3[%c0_16, %c2, %c0_17, %c0_18] : memref<1x54x16x256xbf16, #tpu.memory_space<vmem>>, vector<1x1x16x256xbf16>
    %23 = vector.shape_cast %22 : vector<1x1x16x256xbf16> to vector<16x256xbf16>
    %24 = arith.extf %23 : vector<16x256xbf16> to vector<16x256xf32>
    %25 = arith.mulf %3, %24 : vector<16x256xf32>
    %cst_19 = arith.constant dense<0.000000e+00> : vector<256xf32>
    %26 = vector.multi_reduction <add>, %25, %cst_19 [0] : vector<16x256xf32> to vector<256xf32>
    %27 = vector.shape_cast %26 : vector<256xf32> to vector<1x256xf32>
    %c2_20 = arith.constant 2 : index
    %c0_21 = arith.constant 0 : index
    %28 = vector.load %arg5[%c2_20, %c0_21] : memref<18x256xbf16, #tpu.memory_space<vmem>>, vector<1x256xbf16>
    %29 = arith.extf %28 : vector<1x256xbf16> to vector<1x256xf32>
    %30 = arith.addf %27, %29 : vector<1x256xf32>
    %c0_22 = arith.constant 0 : index
    %c3 = arith.constant 3 : index
    %c0_23 = arith.constant 0 : index
    %c0_24 = arith.constant 0 : index
    %31 = vector.load %arg3[%c0_22, %c3, %c0_23, %c0_24] : memref<1x54x16x256xbf16, #tpu.memory_space<vmem>>, vector<1x1x16x256xbf16>
    %32 = vector.shape_cast %31 : vector<1x1x16x256xbf16> to vector<16x256xbf16>
    %33 = arith.extf %32 : vector<16x256xbf16> to vector<16x256xf32>
    %34 = arith.mulf %3, %33 : vector<16x256xf32>
    %cst_25 = arith.constant dense<0.000000e+00> : vector<256xf32>
    %35 = vector.multi_reduction <add>, %34, %cst_25 [0] : vector<16x256xf32> to vector<256xf32>
    %36 = vector.shape_cast %35 : vector<256xf32> to vector<1x256xf32>
    %c3_26 = arith.constant 3 : index
    %c0_27 = arith.constant 0 : index
    %37 = vector.load %arg5[%c3_26, %c0_27] : memref<18x256xbf16, #tpu.memory_space<vmem>>, vector<1x256xbf16>
    %38 = arith.extf %37 : vector<1x256xbf16> to vector<1x256xf32>
    %39 = arith.addf %36, %38 : vector<1x256xf32>
    %c0_28 = arith.constant 0 : index
    %c4 = arith.constant 4 : index
    %c0_29 = arith.constant 0 : index
    %c0_30 = arith.constant 0 : index
    %40 = vector.load %arg3[%c0_28, %c4, %c0_29, %c0_30] : memref<1x54x16x256xbf16, #tpu.memory_space<vmem>>, vector<1x1x16x256xbf16>
    %41 = vector.shape_cast %40 : vector<1x1x16x256xbf16> to vector<16x256xbf16>
    %42 = arith.extf %41 : vector<16x256xbf16> to vector<16x256xf32>
    %43 = arith.mulf %3, %42 : vector<16x256xf32>
    %cst_31 = arith.constant dense<0.000000e+00> : vector<256xf32>
    %44 = vector.multi_reduction <add>, %43, %cst_31 [0] : vector<16x256xf32> to vector<256xf32>
    %45 = vector.shape_cast %44 : vector<256xf32> to vector<1x256xf32>
    %c4_32 = arith.constant 4 : index
    %c0_33 = arith.constant 0 : index
    %46 = vector.load %arg5[%c4_32, %c0_33] : memref<18x256xbf16, #tpu.memory_space<vmem>>, vector<1x256xbf16>
    %47 = arith.extf %46 : vector<1x256xbf16> to vector<1x256xf32>
    %48 = arith.addf %45, %47 : vector<1x256xf32>
    %c0_34 = arith.constant 0 : index
    %c5 = arith.constant 5 : index
    %c0_35 = arith.constant 0 : index
    %c0_36 = arith.constant 0 : index
    %49 = vector.load %arg3[%c0_34, %c5, %c0_35, %c0_36] : memref<1x54x16x256xbf16, #tpu.memory_space<vmem>>, vector<1x1x16x256xbf16>
    %50 = vector.shape_cast %49 : vector<1x1x16x256xbf16> to vector<16x256xbf16>
    %51 = arith.extf %50 : vector<16x256xbf16> to vector<16x256xf32>
    %52 = arith.mulf %3, %51 : vector<16x256xf32>
    %cst_37 = arith.constant dense<0.000000e+00> : vector<256xf32>
    %53 = vector.multi_reduction <add>, %52, %cst_37 [0] : vector<16x256xf32> to vector<256xf32>
    %54 = vector.shape_cast %53 : vector<256xf32> to vector<1x256xf32>
    %c5_38 = arith.constant 5 : index
    %c0_39 = arith.constant 0 : index
    %55 = vector.load %arg5[%c5_38, %c0_39] : memref<18x256xbf16, #tpu.memory_space<vmem>>, vector<1x256xbf16>
    %56 = arith.extf %55 : vector<1x256xbf16> to vector<1x256xf32>
    %57 = arith.addf %54, %56 : vector<1x256xf32>
    %c0_40 = arith.constant 0 : index
    %c6 = arith.constant 6 : index
    %c0_41 = arith.constant 0 : index
    %c0_42 = arith.constant 0 : index
    %58 = vector.load %arg3[%c0_40, %c6, %c0_41, %c0_42] : memref<1x54x16x256xbf16, #tpu.memory_space<vmem>>, vector<1x1x16x256xbf16>
    %59 = vector.shape_cast %58 : vector<1x1x16x256xbf16> to vector<16x256xbf16>
    %60 = arith.extf %59 : vector<16x256xbf16> to vector<16x256xf32>
    %61 = arith.mulf %3, %60 : vector<16x256xf32>
    %cst_43 = arith.constant dense<0.000000e+00> : vector<256xf32>
    %62 = vector.multi_reduction <add>, %61, %cst_43 [0] : vector<16x256xf32> to vector<256xf32>
    %63 = vector.shape_cast %62 : vector<256xf32> to vector<1x256xf32>
    %c6_44 = arith.constant 6 : index
    %c0_45 = arith.constant 0 : index
    %64 = vector.load %arg5[%c6_44, %c0_45] : memref<18x256xbf16, #tpu.memory_space<vmem>>, vector<1x256xbf16>
    %65 = arith.extf %64 : vector<1x256xbf16> to vector<1x256xf32>
    %66 = arith.addf %63, %65 : vector<1x256xf32>
    %c0_46 = arith.constant 0 : index
    %c7 = arith.constant 7 : index
    %c0_47 = arith.constant 0 : index
    %c0_48 = arith.constant 0 : index
    %67 = vector.load %arg3[%c0_46, %c7, %c0_47, %c0_48] : memref<1x54x16x256xbf16, #tpu.memory_space<vmem>>, vector<1x1x16x256xbf16>
    %68 = vector.shape_cast %67 : vector<1x1x16x256xbf16> to vector<16x256xbf16>
    %69 = arith.extf %68 : vector<16x256xbf16> to vector<16x256xf32>
    %70 = arith.mulf %3, %69 : vector<16x256xf32>
    %cst_49 = arith.constant dense<0.000000e+00> : vector<256xf32>
    %71 = vector.multi_reduction <add>, %70, %cst_49 [0] : vector<16x256xf32> to vector<256xf32>
    %72 = vector.shape_cast %71 : vector<256xf32> to vector<1x256xf32>
    %c7_50 = arith.constant 7 : index
    %c0_51 = arith.constant 0 : index
    %73 = vector.load %arg5[%c7_50, %c0_51] : memref<18x256xbf16, #tpu.memory_space<vmem>>, vector<1x256xbf16>
    %74 = arith.extf %73 : vector<1x256xbf16> to vector<1x256xf32>
    %75 = arith.addf %72, %74 : vector<1x256xf32>
    %c0_52 = arith.constant 0 : index
    %c8 = arith.constant 8 : index
    %c0_53 = arith.constant 0 : index
    %c0_54 = arith.constant 0 : index
    %76 = vector.load %arg3[%c0_52, %c8, %c0_53, %c0_54] : memref<1x54x16x256xbf16, #tpu.memory_space<vmem>>, vector<1x1x16x256xbf16>
    %77 = vector.shape_cast %76 : vector<1x1x16x256xbf16> to vector<16x256xbf16>
    %78 = arith.extf %77 : vector<16x256xbf16> to vector<16x256xf32>
    %79 = arith.mulf %3, %78 : vector<16x256xf32>
    %cst_55 = arith.constant dense<0.000000e+00> : vector<256xf32>
    %80 = vector.multi_reduction <add>, %79, %cst_55 [0] : vector<16x256xf32> to vector<256xf32>
    %81 = vector.shape_cast %80 : vector<256xf32> to vector<1x256xf32>
    %c8_56 = arith.constant 8 : index
    %c0_57 = arith.constant 0 : index
    %82 = vector.load %arg5[%c8_56, %c0_57] : memref<18x256xbf16, #tpu.memory_space<vmem>>, vector<1x256xbf16>
    %83 = arith.extf %82 : vector<1x256xbf16> to vector<1x256xf32>
    %84 = arith.addf %81, %83 : vector<1x256xf32>
    %85 = arith.maximumf %12, %21 : vector<1x256xf32>
    %86 = arith.maximumf %85, %30 : vector<1x256xf32>
    %87 = arith.maximumf %86, %39 : vector<1x256xf32>
    %88 = arith.maximumf %87, %48 : vector<1x256xf32>
    %89 = arith.maximumf %88, %57 : vector<1x256xf32>
    %90 = arith.maximumf %89, %66 : vector<1x256xf32>
    %91 = arith.maximumf %90, %75 : vector<1x256xf32>
    %92 = arith.maximumf %91, %84 : vector<1x256xf32>
    %93 = arith.subf %12, %92 : vector<1x256xf32>
    %94 = math.exp %93 : vector<1x256xf32>
    %95 = arith.subf %21, %92 : vector<1x256xf32>
    %96 = math.exp %95 : vector<1x256xf32>
    %97 = arith.subf %30, %92 : vector<1x256xf32>
    %98 = math.exp %97 : vector<1x256xf32>
    %99 = arith.subf %39, %92 : vector<1x256xf32>
    %100 = math.exp %99 : vector<1x256xf32>
    %101 = arith.subf %48, %92 : vector<1x256xf32>
    %102 = math.exp %101 : vector<1x256xf32>
    %103 = arith.subf %57, %92 : vector<1x256xf32>
    %104 = math.exp %103 : vector<1x256xf32>
    %105 = arith.subf %66, %92 : vector<1x256xf32>
    %106 = math.exp %105 : vector<1x256xf32>
    %107 = arith.subf %75, %92 : vector<1x256xf32>
    %108 = math.exp %107 : vector<1x256xf32>
    %109 = arith.subf %84, %92 : vector<1x256xf32>
    %110 = math.exp %109 : vector<1x256xf32>
    %111 = arith.addf %94, %96 : vector<1x256xf32>
    %112 = arith.addf %111, %98 : vector<1x256xf32>
    %113 = arith.addf %112, %100 : vector<1x256xf32>
    %114 = arith.addf %113, %102 : vector<1x256xf32>
    %115 = arith.addf %114, %104 : vector<1x256xf32>
    %116 = arith.addf %115, %106 : vector<1x256xf32>
    %117 = arith.addf %116, %108 : vector<1x256xf32>
    %118 = arith.addf %117, %110 : vector<1x256xf32>
    %119 = tpu.reciprocal %118 {approx = true} : vector<1x256xf32> -> vector<1x256xf32>
    %c0_58 = arith.constant 0 : index
    %c0_59 = arith.constant 0 : index
    %c0_60 = arith.constant 0 : index
    %c0_61 = arith.constant 0 : index
    %120 = vector.load %arg4[%c0_58, %c0_59, %c0_60, %c0_61] : memref<1x54x16x256xbf16, #tpu.memory_space<vmem>>, vector<1x1x16x256xbf16>
    %121 = vector.shape_cast %120 : vector<1x1x16x256xbf16> to vector<16x256xbf16>
    %122 = arith.extf %121 : vector<16x256xbf16> to vector<16x256xf32>
    %123 = vector.broadcast %94 : vector<1x256xf32> to vector<16x256xf32>
    %124 = arith.mulf %123, %122 : vector<16x256xf32>
    %c0_62 = arith.constant 0 : index
    %c1_63 = arith.constant 1 : index
    %c0_64 = arith.constant 0 : index
    %c0_65 = arith.constant 0 : index
    %125 = vector.load %arg4[%c0_62, %c1_63, %c0_64, %c0_65] : memref<1x54x16x256xbf16, #tpu.memory_space<vmem>>, vector<1x1x16x256xbf16>
    %126 = vector.shape_cast %125 : vector<1x1x16x256xbf16> to vector<16x256xbf16>
    %127 = arith.extf %126 : vector<16x256xbf16> to vector<16x256xf32>
    %128 = vector.broadcast %96 : vector<1x256xf32> to vector<16x256xf32>
    %129 = arith.mulf %128, %127 : vector<16x256xf32>
    %130 = arith.addf %124, %129 : vector<16x256xf32>
    %c0_66 = arith.constant 0 : index
    %c2_67 = arith.constant 2 : index
    %c0_68 = arith.constant 0 : index
    %c0_69 = arith.constant 0 : index
    %131 = vector.load %arg4[%c0_66, %c2_67, %c0_68, %c0_69] : memref<1x54x16x256xbf16, #tpu.memory_space<vmem>>, vector<1x1x16x256xbf16>
    %132 = vector.shape_cast %131 : vector<1x1x16x256xbf16> to vector<16x256xbf16>
    %133 = arith.extf %132 : vector<16x256xbf16> to vector<16x256xf32>
    %134 = vector.broadcast %98 : vector<1x256xf32> to vector<16x256xf32>
    %135 = arith.mulf %134, %133 : vector<16x256xf32>
    %136 = arith.addf %130, %135 : vector<16x256xf32>
    %c0_70 = arith.constant 0 : index
    %c3_71 = arith.constant 3 : index
    %c0_72 = arith.constant 0 : index
    %c0_73 = arith.constant 0 : index
    %137 = vector.load %arg4[%c0_70, %c3_71, %c0_72, %c0_73] : memref<1x54x16x256xbf16, #tpu.memory_space<vmem>>, vector<1x1x16x256xbf16>
    %138 = vector.shape_cast %137 : vector<1x1x16x256xbf16> to vector<16x256xbf16>
    %139 = arith.extf %138 : vector<16x256xbf16> to vector<16x256xf32>
    %140 = vector.broadcast %100 : vector<1x256xf32> to vector<16x256xf32>
    %141 = arith.mulf %140, %139 : vector<16x256xf32>
    %142 = arith.addf %136, %141 : vector<16x256xf32>
    %c0_74 = arith.constant 0 : index
    %c4_75 = arith.constant 4 : index
    %c0_76 = arith.constant 0 : index
    %c0_77 = arith.constant 0 : index
    %143 = vector.load %arg4[%c0_74, %c4_75, %c0_76, %c0_77] : memref<1x54x16x256xbf16, #tpu.memory_space<vmem>>, vector<1x1x16x256xbf16>
    %144 = vector.shape_cast %143 : vector<1x1x16x256xbf16> to vector<16x256xbf16>
    %145 = arith.extf %144 : vector<16x256xbf16> to vector<16x256xf32>
    %146 = vector.broadcast %102 : vector<1x256xf32> to vector<16x256xf32>
    %147 = arith.mulf %146, %145 : vector<16x256xf32>
    %148 = arith.addf %142, %147 : vector<16x256xf32>
    %c0_78 = arith.constant 0 : index
    %c5_79 = arith.constant 5 : index
    %c0_80 = arith.constant 0 : index
    %c0_81 = arith.constant 0 : index
    %149 = vector.load %arg4[%c0_78, %c5_79, %c0_80, %c0_81] : memref<1x54x16x256xbf16, #tpu.memory_space<vmem>>, vector<1x1x16x256xbf16>
    %150 = vector.shape_cast %149 : vector<1x1x16x256xbf16> to vector<16x256xbf16>
    %151 = arith.extf %150 : vector<16x256xbf16> to vector<16x256xf32>
    %152 = vector.broadcast %104 : vector<1x256xf32> to vector<16x256xf32>
    %153 = arith.mulf %152, %151 : vector<16x256xf32>
    %154 = arith.addf %148, %153 : vector<16x256xf32>
    %c0_82 = arith.constant 0 : index
    %c6_83 = arith.constant 6 : index
    %c0_84 = arith.constant 0 : index
    %c0_85 = arith.constant 0 : index
    %155 = vector.load %arg4[%c0_82, %c6_83, %c0_84, %c0_85] : memref<1x54x16x256xbf16, #tpu.memory_space<vmem>>, vector<1x1x16x256xbf16>
    %156 = vector.shape_cast %155 : vector<1x1x16x256xbf16> to vector<16x256xbf16>
    %157 = arith.extf %156 : vector<16x256xbf16> to vector<16x256xf32>
    %158 = vector.broadcast %106 : vector<1x256xf32> to vector<16x256xf32>
    %159 = arith.mulf %158, %157 : vector<16x256xf32>
    %160 = arith.addf %154, %159 : vector<16x256xf32>
    %c0_86 = arith.constant 0 : index
    %c7_87 = arith.constant 7 : index
    %c0_88 = arith.constant 0 : index
    %c0_89 = arith.constant 0 : index
    %161 = vector.load %arg4[%c0_86, %c7_87, %c0_88, %c0_89] : memref<1x54x16x256xbf16, #tpu.memory_space<vmem>>, vector<1x1x16x256xbf16>
    %162 = vector.shape_cast %161 : vector<1x1x16x256xbf16> to vector<16x256xbf16>
    %163 = arith.extf %162 : vector<16x256xbf16> to vector<16x256xf32>
    %164 = vector.broadcast %108 : vector<1x256xf32> to vector<16x256xf32>
    %165 = arith.mulf %164, %163 : vector<16x256xf32>
    %166 = arith.addf %160, %165 : vector<16x256xf32>
    %c0_90 = arith.constant 0 : index
    %c8_91 = arith.constant 8 : index
    %c0_92 = arith.constant 0 : index
    %c0_93 = arith.constant 0 : index
    %167 = vector.load %arg4[%c0_90, %c8_91, %c0_92, %c0_93] : memref<1x54x16x256xbf16, #tpu.memory_space<vmem>>, vector<1x1x16x256xbf16>
    %168 = vector.shape_cast %167 : vector<1x1x16x256xbf16> to vector<16x256xbf16>
    %169 = arith.extf %168 : vector<16x256xbf16> to vector<16x256xf32>
    %170 = vector.broadcast %110 : vector<1x256xf32> to vector<16x256xf32>
    %171 = arith.mulf %170, %169 : vector<16x256xf32>
    %172 = arith.addf %166, %171 : vector<16x256xf32>
    %173 = vector.broadcast %119 : vector<1x256xf32> to vector<16x256xf32>
    %174 = arith.mulf %172, %173 : vector<16x256xf32>
    %175 = arith.truncf %174 : vector<16x256xf32> to vector<16x256xbf16>
    %c0_94 = arith.constant 0 : index
    %c0_95 = arith.constant 0 : index
    %176 = vector.load %arg9[%c0_94, %c0_95] : memref<96x256xbf16, #tpu.memory_space<vmem>>, vector<16x256xbf16>
    tpu.vector_store %arg9[%c0_94, %c0_95], %175 {strides = array<i32>} : memref<96x256xbf16, #tpu.memory_space<vmem>>, vector<16x256xbf16>,
    %c0_96 = arith.constant 0 : index
    %c18 = arith.constant 18 : index
    %c0_97 = arith.constant 0 : index
    %c0_98 = arith.constant 0 : index
    %177 = vector.load %arg3[%c0_96, %c18, %c0_97, %c0_98] : memref<1x54x16x256xbf16, #tpu.memory_space<vmem>>, vector<1x1x16x256xbf16>
    %178 = vector.shape_cast %177 : vector<1x1x16x256xbf16> to vector<16x256xbf16>
    %179 = arith.extf %178 : vector<16x256xbf16> to vector<16x256xf32>
    %180 = arith.mulf %3, %179 : vector<16x256xf32>
    %cst_99 = arith.constant dense<0.000000e+00> : vector<256xf32>
    %181 = vector.multi_reduction <add>, %180, %cst_99 [0] : vector<16x256xf32> to vector<256xf32>
    %182 = vector.shape_cast %181 : vector<256xf32> to vector<1x256xf32>
    %c0_100 = arith.constant 0 : index
    %c0_101 = arith.constant 0 : index
    %183 = vector.load %arg5[%c0_100, %c0_101] : memref<18x256xbf16, #tpu.memory_space<vmem>>, vector<1x256xbf16>
    %184 = arith.extf %183 : vector<1x256xbf16> to vector<1x256xf32>
    %185 = arith.addf %182, %184 : vector<1x256xf32>
    %c0_102 = arith.constant 0 : index
    %c19 = arith.constant 19 : index
    %c0_103 = arith.constant 0 : index
    %c0_104 = arith.constant 0 : index
    %186 = vector.load %arg3[%c0_102, %c19, %c0_103, %c0_104] : memref<1x54x16x256xbf16, #tpu.memory_space<vmem>>, vector<1x1x16x256xbf16>
    %187 = vector.shape_cast %186 : vector<1x1x16x256xbf16> to vector<16x256xbf16>
    %188 = arith.extf %187 : vector<16x256xbf16> to vector<16x256xf32>
    %189 = arith.mulf %3, %188 : vector<16x256xf32>
    %cst_105 = arith.constant dense<0.000000e+00> : vector<256xf32>
    %190 = vector.multi_reduction <add>, %189, %cst_105 [0] : vector<16x256xf32> to vector<256xf32>
    %191 = vector.shape_cast %190 : vector<256xf32> to vector<1x256xf32>
    %c1_106 = arith.constant 1 : index
    %c0_107 = arith.constant 0 : index
    %192 = vector.load %arg5[%c1_106, %c0_107] : memref<18x256xbf16, #tpu.memory_space<vmem>>, vector<1x256xbf16>
    %193 = arith.extf %192 : vector<1x256xbf16> to vector<1x256xf32>
    %194 = arith.addf %191, %193 : vector<1x256xf32>
    %c0_108 = arith.constant 0 : index
    %c20 = arith.constant 20 : index
    %c0_109 = arith.constant 0 : index
    %c0_110 = arith.constant 0 : index
    %195 = vector.load %arg3[%c0_108, %c20, %c0_109, %c0_110] : memref<1x54x16x256xbf16, #tpu.memory_space<vmem>>, vector<1x1x16x256xbf16>
    %196 = vector.shape_cast %195 : vector<1x1x16x256xbf16> to vector<16x256xbf16>
    %197 = arith.extf %196 : vector<16x256xbf16> to vector<16x256xf32>
    %198 = arith.mulf %3, %197 : vector<16x256xf32>
    %cst_111 = arith.constant dense<0.000000e+00> : vector<256xf32>
    %199 = vector.multi_reduction <add>, %198, %cst_111 [0] : vector<16x256xf32> to vector<256xf32>
    %200 = vector.shape_cast %199 : vector<256xf32> to vector<1x256xf32>
    %c2_112 = arith.constant 2 : index
    %c0_113 = arith.constant 0 : index
    %201 = vector.load %arg5[%c2_112, %c0_113] : memref<18x256xbf16, #tpu.memory_space<vmem>>, vector<1x256xbf16>
    %202 = arith.extf %201 : vector<1x256xbf16> to vector<1x256xf32>
    %203 = arith.addf %200, %202 : vector<1x256xf32>
    %c0_114 = arith.constant 0 : index
    %c21 = arith.constant 21 : index
    %c0_115 = arith.constant 0 : index
    %c0_116 = arith.constant 0 : index
    %204 = vector.load %arg3[%c0_114, %c21, %c0_115, %c0_116] : memref<1x54x16x256xbf16, #tpu.memory_space<vmem>>, vector<1x1x16x256xbf16>
    %205 = vector.shape_cast %204 : vector<1x1x16x256xbf16> to vector<16x256xbf16>
    %206 = arith.extf %205 : vector<16x256xbf16> to vector<16x256xf32>
    %207 = arith.mulf %3, %206 : vector<16x256xf32>
    %cst_117 = arith.constant dense<0.000000e+00> : vector<256xf32>
    %208 = vector.multi_reduction <add>, %207, %cst_117 [0] : vector<16x256xf32> to vector<256xf32>
    %209 = vector.shape_cast %208 : vector<256xf32> to vector<1x256xf32>
    %c3_118 = arith.constant 3 : index
    %c0_119 = arith.constant 0 : index
    %210 = vector.load %arg5[%c3_118, %c0_119] : memref<18x256xbf16, #tpu.memory_space<vmem>>, vector<1x256xbf16>
    %211 = arith.extf %210 : vector<1x256xbf16> to vector<1x256xf32>
    %212 = arith.addf %209, %211 : vector<1x256xf32>
    %c0_120 = arith.constant 0 : index
    %c22 = arith.constant 22 : index
    %c0_121 = arith.constant 0 : index
    %c0_122 = arith.constant 0 : index
    %213 = vector.load %arg3[%c0_120, %c22, %c0_121, %c0_122] : memref<1x54x16x256xbf16, #tpu.memory_space<vmem>>, vector<1x1x16x256xbf16>
    %214 = vector.shape_cast %213 : vector<1x1x16x256xbf16> to vector<16x256xbf16>
    %215 = arith.extf %214 : vector<16x256xbf16> to vector<16x256xf32>
    %216 = arith.mulf %3, %215 : vector<16x256xf32>
    %cst_123 = arith.constant dense<0.000000e+00> : vector<256xf32>
    %217 = vector.multi_reduction <add>, %216, %cst_123 [0] : vector<16x256xf32> to vector<256xf32>
    %218 = vector.shape_cast %217 : vector<256xf32> to vector<1x256xf32>
    %c4_124 = arith.constant 4 : index
    %c0_125 = arith.constant 0 : index
    %219 = vector.load %arg5[%c4_124, %c0_125] : memref<18x256xbf16, #tpu.memory_space<vmem>>, vector<1x256xbf16>
    %220 = arith.extf %219 : vector<1x256xbf16> to vector<1x256xf32>
    %221 = arith.addf %218, %220 : vector<1x256xf32>
    %c0_126 = arith.constant 0 : index
    %c23 = arith.constant 23 : index
    %c0_127 = arith.constant 0 : index
    %c0_128 = arith.constant 0 : index
    %222 = vector.load %arg3[%c0_126, %c23, %c0_127, %c0_128] : memref<1x54x16x256xbf16, #tpu.memory_space<vmem>>, vector<1x1x16x256xbf16>
    %223 = vector.shape_cast %222 : vector<1x1x16x256xbf16> to vector<16x256xbf16>
    %224 = arith.extf %223 : vector<16x256xbf16> to vector<16x256xf32>
    %225 = arith.mulf %3, %224 : vector<16x256xf32>
    %cst_129 = arith.constant dense<0.000000e+00> : vector<256xf32>
    %226 = vector.multi_reduction <add>, %225, %cst_129 [0] : vector<16x256xf32> to vector<256xf32>
    %227 = vector.shape_cast %226 : vector<256xf32> to vector<1x256xf32>
    %c5_130 = arith.constant 5 : index
    %c0_131 = arith.constant 0 : index
    %228 = vector.load %arg5[%c5_130, %c0_131] : memref<18x256xbf16, #tpu.memory_space<vmem>>, vector<1x256xbf16>
    %229 = arith.extf %228 : vector<1x256xbf16> to vector<1x256xf32>
    %230 = arith.addf %227, %229 : vector<1x256xf32>
    %c0_132 = arith.constant 0 : index
    %c24 = arith.constant 24 : index
    %c0_133 = arith.constant 0 : index
    %c0_134 = arith.constant 0 : index
    %231 = vector.load %arg3[%c0_132, %c24, %c0_133, %c0_134] : memref<1x54x16x256xbf16, #tpu.memory_space<vmem>>, vector<1x1x16x256xbf16>
    %232 = vector.shape_cast %231 : vector<1x1x16x256xbf16> to vector<16x256xbf16>
    %233 = arith.extf %232 : vector<16x256xbf16> to vector<16x256xf32>
    %234 = arith.mulf %3, %233 : vector<16x256xf32>
    %cst_135 = arith.constant dense<0.000000e+00> : vector<256xf32>
    %235 = vector.multi_reduction <add>, %234, %cst_135 [0] : vector<16x256xf32> to vector<256xf32>
    %236 = vector.shape_cast %235 : vector<256xf32> to vector<1x256xf32>
    %c6_136 = arith.constant 6 : index
    %c0_137 = arith.constant 0 : index
    %237 = vector.load %arg5[%c6_136, %c0_137] : memref<18x256xbf16, #tpu.memory_space<vmem>>, vector<1x256xbf16>
    %238 = arith.extf %237 : vector<1x256xbf16> to vector<1x256xf32>
    %239 = arith.addf %236, %238 : vector<1x256xf32>
    %c0_138 = arith.constant 0 : index
    %c25 = arith.constant 25 : index
    %c0_139 = arith.constant 0 : index
    %c0_140 = arith.constant 0 : index
    %240 = vector.load %arg3[%c0_138, %c25, %c0_139, %c0_140] : memref<1x54x16x256xbf16, #tpu.memory_space<vmem>>, vector<1x1x16x256xbf16>
    %241 = vector.shape_cast %240 : vector<1x1x16x256xbf16> to vector<16x256xbf16>
    %242 = arith.extf %241 : vector<16x256xbf16> to vector<16x256xf32>
    %243 = arith.mulf %3, %242 : vector<16x256xf32>
    %cst_141 = arith.constant dense<0.000000e+00> : vector<256xf32>
    %244 = vector.multi_reduction <add>, %243, %cst_141 [0] : vector<16x256xf32> to vector<256xf32>
    %245 = vector.shape_cast %244 : vector<256xf32> to vector<1x256xf32>
    %c7_142 = arith.constant 7 : index
    %c0_143 = arith.constant 0 : index
    %246 = vector.load %arg5[%c7_142, %c0_143] : memref<18x256xbf16, #tpu.memory_space<vmem>>, vector<1x256xbf16>
    %247 = arith.extf %246 : vector<1x256xbf16> to vector<1x256xf32>
    %248 = arith.addf %245, %247 : vector<1x256xf32>
    %c0_144 = arith.constant 0 : index
    %c26 = arith.constant 26 : index
    %c0_145 = arith.constant 0 : index
    %c0_146 = arith.constant 0 : index
    %249 = vector.load %arg3[%c0_144, %c26, %c0_145, %c0_146] : memref<1x54x16x256xbf16, #tpu.memory_space<vmem>>, vector<1x1x16x256xbf16>
    %250 = vector.shape_cast %249 : vector<1x1x16x256xbf16> to vector<16x256xbf16>
    %251 = arith.extf %250 : vector<16x256xbf16> to vector<16x256xf32>
    %252 = arith.mulf %3, %251 : vector<16x256xf32>
    %cst_147 = arith.constant dense<0.000000e+00> : vector<256xf32>
    %253 = vector.multi_reduction <add>, %252, %cst_147 [0] : vector<16x256xf32> to vector<256xf32>
    %254 = vector.shape_cast %253 : vector<256xf32> to vector<1x256xf32>
    %c8_148 = arith.constant 8 : index
    %c0_149 = arith.constant 0 : index
    %255 = vector.load %arg5[%c8_148, %c0_149] : memref<18x256xbf16, #tpu.memory_space<vmem>>, vector<1x256xbf16>
    %256 = arith.extf %255 : vector<1x256xbf16> to vector<1x256xf32>
    %257 = arith.addf %254, %256 : vector<1x256xf32>
    %258 = arith.maximumf %185, %194 : vector<1x256xf32>
    %259 = arith.maximumf %258, %203 : vector<1x256xf32>
    %260 = arith.maximumf %259, %212 : vector<1x256xf32>
    %261 = arith.maximumf %260, %221 : vector<1x256xf32>
    %262 = arith.maximumf %261, %230 : vector<1x256xf32>
    %263 = arith.maximumf %262, %239 : vector<1x256xf32>
    %264 = arith.maximumf %263, %248 : vector<1x256xf32>
    %265 = arith.maximumf %264, %257 : vector<1x256xf32>
    %266 = arith.subf %185, %265 : vector<1x256xf32>
    %267 = math.exp %266 : vector<1x256xf32>
    %268 = arith.subf %194, %265 : vector<1x256xf32>
    %269 = math.exp %268 : vector<1x256xf32>
    %270 = arith.subf %203, %265 : vector<1x256xf32>
    %271 = math.exp %270 : vector<1x256xf32>
    %272 = arith.subf %212, %265 : vector<1x256xf32>
    %273 = math.exp %272 : vector<1x256xf32>
    %274 = arith.subf %221, %265 : vector<1x256xf32>
    %275 = math.exp %274 : vector<1x256xf32>
    %276 = arith.subf %230, %265 : vector<1x256xf32>
    %277 = math.exp %276 : vector<1x256xf32>
    %278 = arith.subf %239, %265 : vector<1x256xf32>
    %279 = math.exp %278 : vector<1x256xf32>
    %280 = arith.subf %248, %265 : vector<1x256xf32>
    %281 = math.exp %280 : vector<1x256xf32>
    %282 = arith.subf %257, %265 : vector<1x256xf32>
    %283 = math.exp %282 : vector<1x256xf32>
    %284 = arith.addf %267, %269 : vector<1x256xf32>
    %285 = arith.addf %284, %271 : vector<1x256xf32>
    %286 = arith.addf %285, %273 : vector<1x256xf32>
    %287 = arith.addf %286, %275 : vector<1x256xf32>
    %288 = arith.addf %287, %277 : vector<1x256xf32>
    %289 = arith.addf %288, %279 : vector<1x256xf32>
    %290 = arith.addf %289, %281 : vector<1x256xf32>
    %291 = arith.addf %290, %283 : vector<1x256xf32>
    %292 = tpu.reciprocal %291 {approx = true} : vector<1x256xf32> -> vector<1x256xf32>
    %c0_150 = arith.constant 0 : index
    %c18_151 = arith.constant 18 : index
    %c0_152 = arith.constant 0 : index
    %c0_153 = arith.constant 0 : index
    %293 = vector.load %arg4[%c0_150, %c18_151, %c0_152, %c0_153] : memref<1x54x16x256xbf16, #tpu.memory_space<vmem>>, vector<1x1x16x256xbf16>
    %294 = vector.shape_cast %293 : vector<1x1x16x256xbf16> to vector<16x256xbf16>
    %295 = arith.extf %294 : vector<16x256xbf16> to vector<16x256xf32>
    %296 = vector.broadcast %267 : vector<1x256xf32> to vector<16x256xf32>
    %297 = arith.mulf %296, %295 : vector<16x256xf32>
    %c0_154 = arith.constant 0 : index
    %c19_155 = arith.constant 19 : index
    %c0_156 = arith.constant 0 : index
    %c0_157 = arith.constant 0 : index
    %298 = vector.load %arg4[%c0_154, %c19_155, %c0_156, %c0_157] : memref<1x54x16x256xbf16, #tpu.memory_space<vmem>>, vector<1x1x16x256xbf16>
    %299 = vector.shape_cast %298 : vector<1x1x16x256xbf16> to vector<16x256xbf16>
    %300 = arith.extf %299 : vector<16x256xbf16> to vector<16x256xf32>
    %301 = vector.broadcast %269 : vector<1x256xf32> to vector<16x256xf32>
    %302 = arith.mulf %301, %300 : vector<16x256xf32>
    %303 = arith.addf %297, %302 : vector<16x256xf32>
    %c0_158 = arith.constant 0 : index
    %c20_159 = arith.constant 20 : index
    %c0_160 = arith.constant 0 : index
    %c0_161 = arith.constant 0 : index
    %304 = vector.load %arg4[%c0_158, %c20_159, %c0_160, %c0_161] : memref<1x54x16x256xbf16, #tpu.memory_space<vmem>>, vector<1x1x16x256xbf16>
    %305 = vector.shape_cast %304 : vector<1x1x16x256xbf16> to vector<16x256xbf16>
    %306 = arith.extf %305 : vector<16x256xbf16> to vector<16x256xf32>
    %307 = vector.broadcast %271 : vector<1x256xf32> to vector<16x256xf32>
    %308 = arith.mulf %307, %306 : vector<16x256xf32>
    %309 = arith.addf %303, %308 : vector<16x256xf32>
    %c0_162 = arith.constant 0 : index
    %c21_163 = arith.constant 21 : index
    %c0_164 = arith.constant 0 : index
    %c0_165 = arith.constant 0 : index
    %310 = vector.load %arg4[%c0_162, %c21_163, %c0_164, %c0_165] : memref<1x54x16x256xbf16, #tpu.memory_space<vmem>>, vector<1x1x16x256xbf16>
    %311 = vector.shape_cast %310 : vector<1x1x16x256xbf16> to vector<16x256xbf16>
    %312 = arith.extf %311 : vector<16x256xbf16> to vector<16x256xf32>
    %313 = vector.broadcast %273 : vector<1x256xf32> to vector<16x256xf32>
    %314 = arith.mulf %313, %312 : vector<16x256xf32>
    %315 = arith.addf %309, %314 : vector<16x256xf32>
    %c0_166 = arith.constant 0 : index
    %c22_167 = arith.constant 22 : index
    %c0_168 = arith.constant 0 : index
    %c0_169 = arith.constant 0 : index
    %316 = vector.load %arg4[%c0_166, %c22_167, %c0_168, %c0_169] : memref<1x54x16x256xbf16, #tpu.memory_space<vmem>>, vector<1x1x16x256xbf16>
    %317 = vector.shape_cast %316 : vector<1x1x16x256xbf16> to vector<16x256xbf16>
    %318 = arith.extf %317 : vector<16x256xbf16> to vector<16x256xf32>
    %319 = vector.broadcast %275 : vector<1x256xf32> to vector<16x256xf32>
    %320 = arith.mulf %319, %318 : vector<16x256xf32>
    %321 = arith.addf %315, %320 : vector<16x256xf32>
    %c0_170 = arith.constant 0 : index
    %c23_171 = arith.constant 23 : index
    %c0_172 = arith.constant 0 : index
    %c0_173 = arith.constant 0 : index
    %322 = vector.load %arg4[%c0_170, %c23_171, %c0_172, %c0_173] : memref<1x54x16x256xbf16, #tpu.memory_space<vmem>>, vector<1x1x16x256xbf16>
    %323 = vector.shape_cast %322 : vector<1x1x16x256xbf16> to vector<16x256xbf16>
    %324 = arith.extf %323 : vector<16x256xbf16> to vector<16x256xf32>
    %325 = vector.broadcast %277 : vector<1x256xf32> to vector<16x256xf32>
    %326 = arith.mulf %325, %324 : vector<16x256xf32>
    %327 = arith.addf %321, %326 : vector<16x256xf32>
    %c0_174 = arith.constant 0 : index
    %c24_175 = arith.constant 24 : index
    %c0_176 = arith.constant 0 : index
    %c0_177 = arith.constant 0 : index
    %328 = vector.load %arg4[%c0_174, %c24_175, %c0_176, %c0_177] : memref<1x54x16x256xbf16, #tpu.memory_space<vmem>>, vector<1x1x16x256xbf16>
    %329 = vector.shape_cast %328 : vector<1x1x16x256xbf16> to vector<16x256xbf16>
    %330 = arith.extf %329 : vector<16x256xbf16> to vector<16x256xf32>
    %331 = vector.broadcast %279 : vector<1x256xf32> to vector<16x256xf32>
    %332 = arith.mulf %331, %330 : vector<16x256xf32>
    %333 = arith.addf %327, %332 : vector<16x256xf32>
    %c0_178 = arith.constant 0 : index
    %c25_179 = arith.constant 25 : index
    %c0_180 = arith.constant 0 : index
    %c0_181 = arith.constant 0 : index
    %334 = vector.load %arg4[%c0_178, %c25_179, %c0_180, %c0_181] : memref<1x54x16x256xbf16, #tpu.memory_space<vmem>>, vector<1x1x16x256xbf16>
    %335 = vector.shape_cast %334 : vector<1x1x16x256xbf16> to vector<16x256xbf16>
    %336 = arith.extf %335 : vector<16x256xbf16> to vector<16x256xf32>
    %337 = vector.broadcast %281 : vector<1x256xf32> to vector<16x256xf32>
    %338 = arith.mulf %337, %336 : vector<16x256xf32>
    %339 = arith.addf %333, %338 : vector<16x256xf32>
    %c0_182 = arith.constant 0 : index
    %c26_183 = arith.constant 26 : index
    %c0_184 = arith.constant 0 : index
    %c0_185 = arith.constant 0 : index
    %340 = vector.load %arg4[%c0_182, %c26_183, %c0_184, %c0_185] : memref<1x54x16x256xbf16, #tpu.memory_space<vmem>>, vector<1x1x16x256xbf16>
    %341 = vector.shape_cast %340 : vector<1x1x16x256xbf16> to vector<16x256xbf16>
    %342 = arith.extf %341 : vector<16x256xbf16> to vector<16x256xf32>
    %343 = vector.broadcast %283 : vector<1x256xf32> to vector<16x256xf32>
    %344 = arith.mulf %343, %342 : vector<16x256xf32>
    %345 = arith.addf %339, %344 : vector<16x256xf32>
    %346 = vector.broadcast %292 : vector<1x256xf32> to vector<16x256xf32>
    %347 = arith.mulf %345, %346 : vector<16x256xf32>
    %348 = arith.truncf %347 : vector<16x256xf32> to vector<16x256xbf16>
    %c32 = arith.constant 32 : index
    %c0_186 = arith.constant 0 : index
    %349 = vector.load %arg9[%c32, %c0_186] : memref<96x256xbf16, #tpu.memory_space<vmem>>, vector<16x256xbf16>
    tpu.vector_store %arg9[%c32, %c0_186], %348 {strides = array<i32>} : memref<96x256xbf16, #tpu.memory_space<vmem>>, vector<16x256xbf16>,
    %c0_187 = arith.constant 0 : index
    %c36 = arith.constant 36 : index
    %c0_188 = arith.constant 0 : index
    %c0_189 = arith.constant 0 : index
    %350 = vector.load %arg3[%c0_187, %c36, %c0_188, %c0_189] : memref<1x54x16x256xbf16, #tpu.memory_space<vmem>>, vector<1x1x16x256xbf16>
    %351 = vector.shape_cast %350 : vector<1x1x16x256xbf16> to vector<16x256xbf16>
    %352 = arith.extf %351 : vector<16x256xbf16> to vector<16x256xf32>
    %353 = arith.mulf %3, %352 : vector<16x256xf32>
    %cst_190 = arith.constant dense<0.000000e+00> : vector<256xf32>
    %354 = vector.multi_reduction <add>, %353, %cst_190 [0] : vector<16x256xf32> to vector<256xf32>
    %355 = vector.shape_cast %354 : vector<256xf32> to vector<1x256xf32>
    %c0_191 = arith.constant 0 : index
    %c0_192 = arith.constant 0 : index
    %356 = vector.load %arg5[%c0_191, %c0_192] : memref<18x256xbf16, #tpu.memory_space<vmem>>, vector<1x256xbf16>
    %357 = arith.extf %356 : vector<1x256xbf16> to vector<1x256xf32>
    %358 = arith.addf %355, %357 : vector<1x256xf32>
    %c0_193 = arith.constant 0 : index
    %c37 = arith.constant 37 : index
    %c0_194 = arith.constant 0 : index
    %c0_195 = arith.constant 0 : index
    %359 = vector.load %arg3[%c0_193, %c37, %c0_194, %c0_195] : memref<1x54x16x256xbf16, #tpu.memory_space<vmem>>, vector<1x1x16x256xbf16>
    %360 = vector.shape_cast %359 : vector<1x1x16x256xbf16> to vector<16x256xbf16>
    %361 = arith.extf %360 : vector<16x256xbf16> to vector<16x256xf32>
    %362 = arith.mulf %3, %361 : vector<16x256xf32>
    %cst_196 = arith.constant dense<0.000000e+00> : vector<256xf32>
    %363 = vector.multi_reduction <add>, %362, %cst_196 [0] : vector<16x256xf32> to vector<256xf32>
    %364 = vector.shape_cast %363 : vector<256xf32> to vector<1x256xf32>
    %c1_197 = arith.constant 1 : index
    %c0_198 = arith.constant 0 : index
    %365 = vector.load %arg5[%c1_197, %c0_198] : memref<18x256xbf16, #tpu.memory_space<vmem>>, vector<1x256xbf16>
    %366 = arith.extf %365 : vector<1x256xbf16> to vector<1x256xf32>
    %367 = arith.addf %364, %366 : vector<1x256xf32>
    %c0_199 = arith.constant 0 : index
    %c38 = arith.constant 38 : index
    %c0_200 = arith.constant 0 : index
    %c0_201 = arith.constant 0 : index
    %368 = vector.load %arg3[%c0_199, %c38, %c0_200, %c0_201] : memref<1x54x16x256xbf16, #tpu.memory_space<vmem>>, vector<1x1x16x256xbf16>
    %369 = vector.shape_cast %368 : vector<1x1x16x256xbf16> to vector<16x256xbf16>
    %370 = arith.extf %369 : vector<16x256xbf16> to vector<16x256xf32>
    %371 = arith.mulf %3, %370 : vector<16x256xf32>
    %cst_202 = arith.constant dense<0.000000e+00> : vector<256xf32>
    %372 = vector.multi_reduction <add>, %371, %cst_202 [0] : vector<16x256xf32> to vector<256xf32>
    %373 = vector.shape_cast %372 : vector<256xf32> to vector<1x256xf32>
    %c2_203 = arith.constant 2 : index
    %c0_204 = arith.constant 0 : index
    %374 = vector.load %arg5[%c2_203, %c0_204] : memref<18x256xbf16, #tpu.memory_space<vmem>>, vector<1x256xbf16>
    %375 = arith.extf %374 : vector<1x256xbf16> to vector<1x256xf32>
    %376 = arith.addf %373, %375 : vector<1x256xf32>
    %c0_205 = arith.constant 0 : index
    %c39 = arith.constant 39 : index
    %c0_206 = arith.constant 0 : index
    %c0_207 = arith.constant 0 : index
    %377 = vector.load %arg3[%c0_205, %c39, %c0_206, %c0_207] : memref<1x54x16x256xbf16, #tpu.memory_space<vmem>>, vector<1x1x16x256xbf16>
    %378 = vector.shape_cast %377 : vector<1x1x16x256xbf16> to vector<16x256xbf16>
    %379 = arith.extf %378 : vector<16x256xbf16> to vector<16x256xf32>
    %380 = arith.mulf %3, %379 : vector<16x256xf32>
    %cst_208 = arith.constant dense<0.000000e+00> : vector<256xf32>
    %381 = vector.multi_reduction <add>, %380, %cst_208 [0] : vector<16x256xf32> to vector<256xf32>
    %382 = vector.shape_cast %381 : vector<256xf32> to vector<1x256xf32>
    %c3_209 = arith.constant 3 : index
    %c0_210 = arith.constant 0 : index
    %383 = vector.load %arg5[%c3_209, %c0_210] : memref<18x256xbf16, #tpu.memory_space<vmem>>, vector<1x256xbf16>
    %384 = arith.extf %383 : vector<1x256xbf16> to vector<1x256xf32>
    %385 = arith.addf %382, %384 : vector<1x256xf32>
    %c0_211 = arith.constant 0 : index
    %c40 = arith.constant 40 : index
    %c0_212 = arith.constant 0 : index
    %c0_213 = arith.constant 0 : index
    %386 = vector.load %arg3[%c0_211, %c40, %c0_212, %c0_213] : memref<1x54x16x256xbf16, #tpu.memory_space<vmem>>, vector<1x1x16x256xbf16>
    %387 = vector.shape_cast %386 : vector<1x1x16x256xbf16> to vector<16x256xbf16>
    %388 = arith.extf %387 : vector<16x256xbf16> to vector<16x256xf32>
    %389 = arith.mulf %3, %388 : vector<16x256xf32>
    %cst_214 = arith.constant dense<0.000000e+00> : vector<256xf32>
    %390 = vector.multi_reduction <add>, %389, %cst_214 [0] : vector<16x256xf32> to vector<256xf32>
    %391 = vector.shape_cast %390 : vector<256xf32> to vector<1x256xf32>
    %c4_215 = arith.constant 4 : index
    %c0_216 = arith.constant 0 : index
    %392 = vector.load %arg5[%c4_215, %c0_216] : memref<18x256xbf16, #tpu.memory_space<vmem>>, vector<1x256xbf16>
    %393 = arith.extf %392 : vector<1x256xbf16> to vector<1x256xf32>
    %394 = arith.addf %391, %393 : vector<1x256xf32>
    %c0_217 = arith.constant 0 : index
    %c41 = arith.constant 41 : index
    %c0_218 = arith.constant 0 : index
    %c0_219 = arith.constant 0 : index
    %395 = vector.load %arg3[%c0_217, %c41, %c0_218, %c0_219] : memref<1x54x16x256xbf16, #tpu.memory_space<vmem>>, vector<1x1x16x256xbf16>
    %396 = vector.shape_cast %395 : vector<1x1x16x256xbf16> to vector<16x256xbf16>
    %397 = arith.extf %396 : vector<16x256xbf16> to vector<16x256xf32>
    %398 = arith.mulf %3, %397 : vector<16x256xf32>
    %cst_220 = arith.constant dense<0.000000e+00> : vector<256xf32>
    %399 = vector.multi_reduction <add>, %398, %cst_220 [0] : vector<16x256xf32> to vector<256xf32>
    %400 = vector.shape_cast %399 : vector<256xf32> to vector<1x256xf32>
    %c5_221 = arith.constant 5 : index
    %c0_222 = arith.constant 0 : index
    %401 = vector.load %arg5[%c5_221, %c0_222] : memref<18x256xbf16, #tpu.memory_space<vmem>>, vector<1x256xbf16>
    %402 = arith.extf %401 : vector<1x256xbf16> to vector<1x256xf32>
    %403 = arith.addf %400, %402 : vector<1x256xf32>
    %c0_223 = arith.constant 0 : index
    %c42 = arith.constant 42 : index
    %c0_224 = arith.constant 0 : index
    %c0_225 = arith.constant 0 : index
    %404 = vector.load %arg3[%c0_223, %c42, %c0_224, %c0_225] : memref<1x54x16x256xbf16, #tpu.memory_space<vmem>>, vector<1x1x16x256xbf16>
    %405 = vector.shape_cast %404 : vector<1x1x16x256xbf16> to vector<16x256xbf16>
    %406 = arith.extf %405 : vector<16x256xbf16> to vector<16x256xf32>
    %407 = arith.mulf %3, %406 : vector<16x256xf32>
    %cst_226 = arith.constant dense<0.000000e+00> : vector<256xf32>
    %408 = vector.multi_reduction <add>, %407, %cst_226 [0] : vector<16x256xf32> to vector<256xf32>
    %409 = vector.shape_cast %408 : vector<256xf32> to vector<1x256xf32>
    %c6_227 = arith.constant 6 : index
    %c0_228 = arith.constant 0 : index
    %410 = vector.load %arg5[%c6_227, %c0_228] : memref<18x256xbf16, #tpu.memory_space<vmem>>, vector<1x256xbf16>
    %411 = arith.extf %410 : vector<1x256xbf16> to vector<1x256xf32>
    %412 = arith.addf %409, %411 : vector<1x256xf32>
    %c0_229 = arith.constant 0 : index
    %c43 = arith.constant 43 : index
    %c0_230 = arith.constant 0 : index
    %c0_231 = arith.constant 0 : index
    %413 = vector.load %arg3[%c0_229, %c43, %c0_230, %c0_231] : memref<1x54x16x256xbf16, #tpu.memory_space<vmem>>, vector<1x1x16x256xbf16>
    %414 = vector.shape_cast %413 : vector<1x1x16x256xbf16> to vector<16x256xbf16>
    %415 = arith.extf %414 : vector<16x256xbf16> to vector<16x256xf32>
    %416 = arith.mulf %3, %415 : vector<16x256xf32>
    %cst_232 = arith.constant dense<0.000000e+00> : vector<256xf32>
    %417 = vector.multi_reduction <add>, %416, %cst_232 [0] : vector<16x256xf32> to vector<256xf32>
    %418 = vector.shape_cast %417 : vector<256xf32> to vector<1x256xf32>
    %c7_233 = arith.constant 7 : index
    %c0_234 = arith.constant 0 : index
    %419 = vector.load %arg5[%c7_233, %c0_234] : memref<18x256xbf16, #tpu.memory_space<vmem>>, vector<1x256xbf16>
    %420 = arith.extf %419 : vector<1x256xbf16> to vector<1x256xf32>
    %421 = arith.addf %418, %420 : vector<1x256xf32>
    %c0_235 = arith.constant 0 : index
    %c44 = arith.constant 44 : index
    %c0_236 = arith.constant 0 : index
    %c0_237 = arith.constant 0 : index
    %422 = vector.load %arg3[%c0_235, %c44, %c0_236, %c0_237] : memref<1x54x16x256xbf16, #tpu.memory_space<vmem>>, vector<1x1x16x256xbf16>
    %423 = vector.shape_cast %422 : vector<1x1x16x256xbf16> to vector<16x256xbf16>
    %424 = arith.extf %423 : vector<16x256xbf16> to vector<16x256xf32>
    %425 = arith.mulf %3, %424 : vector<16x256xf32>
    %cst_238 = arith.constant dense<0.000000e+00> : vector<256xf32>
    %426 = vector.multi_reduction <add>, %425, %cst_238 [0] : vector<16x256xf32> to vector<256xf32>
    %427 = vector.shape_cast %426 : vector<256xf32> to vector<1x256xf32>
    %c8_239 = arith.constant 8 : index
    %c0_240 = arith.constant 0 : index
    %428 = vector.load %arg5[%c8_239, %c0_240] : memref<18x256xbf16, #tpu.memory_space<vmem>>, vector<1x256xbf16>
    %429 = arith.extf %428 : vector<1x256xbf16> to vector<1x256xf32>
    %430 = arith.addf %427, %429 : vector<1x256xf32>
    %431 = arith.maximumf %358, %367 : vector<1x256xf32>
    %432 = arith.maximumf %431, %376 : vector<1x256xf32>
    %433 = arith.maximumf %432, %385 : vector<1x256xf32>
    %434 = arith.maximumf %433, %394 : vector<1x256xf32>
    %435 = arith.maximumf %434, %403 : vector<1x256xf32>
    %436 = arith.maximumf %435, %412 : vector<1x256xf32>
    %437 = arith.maximumf %436, %421 : vector<1x256xf32>
    %438 = arith.maximumf %437, %430 : vector<1x256xf32>
    %439 = arith.subf %358, %438 : vector<1x256xf32>
    %440 = math.exp %439 : vector<1x256xf32>
    %441 = arith.subf %367, %438 : vector<1x256xf32>
    %442 = math.exp %441 : vector<1x256xf32>
    %443 = arith.subf %376, %438 : vector<1x256xf32>
    %444 = math.exp %443 : vector<1x256xf32>
    %445 = arith.subf %385, %438 : vector<1x256xf32>
    %446 = math.exp %445 : vector<1x256xf32>
    %447 = arith.subf %394, %438 : vector<1x256xf32>
    %448 = math.exp %447 : vector<1x256xf32>
    %449 = arith.subf %403, %438 : vector<1x256xf32>
    %450 = math.exp %449 : vector<1x256xf32>
    %451 = arith.subf %412, %438 : vector<1x256xf32>
    %452 = math.exp %451 : vector<1x256xf32>
    %453 = arith.subf %421, %438 : vector<1x256xf32>
    %454 = math.exp %453 : vector<1x256xf32>
    %455 = arith.subf %430, %438 : vector<1x256xf32>
    %456 = math.exp %455 : vector<1x256xf32>
    %457 = arith.addf %440, %442 : vector<1x256xf32>
    %458 = arith.addf %457, %444 : vector<1x256xf32>
    %459 = arith.addf %458, %446 : vector<1x256xf32>
    %460 = arith.addf %459, %448 : vector<1x256xf32>
    %461 = arith.addf %460, %450 : vector<1x256xf32>
    %462 = arith.addf %461, %452 : vector<1x256xf32>
    %463 = arith.addf %462, %454 : vector<1x256xf32>
    %464 = arith.addf %463, %456 : vector<1x256xf32>
    %465 = tpu.reciprocal %464 {approx = true} : vector<1x256xf32> -> vector<1x256xf32>
    %c0_241 = arith.constant 0 : index
    %c36_242 = arith.constant 36 : index
    %c0_243 = arith.constant 0 : index
    %c0_244 = arith.constant 0 : index
    %466 = vector.load %arg4[%c0_241, %c36_242, %c0_243, %c0_244] : memref<1x54x16x256xbf16, #tpu.memory_space<vmem>>, vector<1x1x16x256xbf16>
    %467 = vector.shape_cast %466 : vector<1x1x16x256xbf16> to vector<16x256xbf16>
    %468 = arith.extf %467 : vector<16x256xbf16> to vector<16x256xf32>
    %469 = vector.broadcast %440 : vector<1x256xf32> to vector<16x256xf32>
    %470 = arith.mulf %469, %468 : vector<16x256xf32>
    %c0_245 = arith.constant 0 : index
    %c37_246 = arith.constant 37 : index
    %c0_247 = arith.constant 0 : index
    %c0_248 = arith.constant 0 : index
    %471 = vector.load %arg4[%c0_245, %c37_246, %c0_247, %c0_248] : memref<1x54x16x256xbf16, #tpu.memory_space<vmem>>, vector<1x1x16x256xbf16>
    %472 = vector.shape_cast %471 : vector<1x1x16x256xbf16> to vector<16x256xbf16>
    %473 = arith.extf %472 : vector<16x256xbf16> to vector<16x256xf32>
    %474 = vector.broadcast %442 : vector<1x256xf32> to vector<16x256xf32>
    %475 = arith.mulf %474, %473 : vector<16x256xf32>
    %476 = arith.addf %470, %475 : vector<16x256xf32>
    %c0_249 = arith.constant 0 : index
    %c38_250 = arith.constant 38 : index
    %c0_251 = arith.constant 0 : index
    %c0_252 = arith.constant 0 : index
    %477 = vector.load %arg4[%c0_249, %c38_250, %c0_251, %c0_252] : memref<1x54x16x256xbf16, #tpu.memory_space<vmem>>, vector<1x1x16x256xbf16>
    %478 = vector.shape_cast %477 : vector<1x1x16x256xbf16> to vector<16x256xbf16>
    %479 = arith.extf %478 : vector<16x256xbf16> to vector<16x256xf32>
    %480 = vector.broadcast %444 : vector<1x256xf32> to vector<16x256xf32>
    %481 = arith.mulf %480, %479 : vector<16x256xf32>
    %482 = arith.addf %476, %481 : vector<16x256xf32>
    %c0_253 = arith.constant 0 : index
    %c39_254 = arith.constant 39 : index
    %c0_255 = arith.constant 0 : index
    %c0_256 = arith.constant 0 : index
    %483 = vector.load %arg4[%c0_253, %c39_254, %c0_255, %c0_256] : memref<1x54x16x256xbf16, #tpu.memory_space<vmem>>, vector<1x1x16x256xbf16>
    %484 = vector.shape_cast %483 : vector<1x1x16x256xbf16> to vector<16x256xbf16>
    %485 = arith.extf %484 : vector<16x256xbf16> to vector<16x256xf32>
    %486 = vector.broadcast %446 : vector<1x256xf32> to vector<16x256xf32>
    %487 = arith.mulf %486, %485 : vector<16x256xf32>
    %488 = arith.addf %482, %487 : vector<16x256xf32>
    %c0_257 = arith.constant 0 : index
    %c40_258 = arith.constant 40 : index
    %c0_259 = arith.constant 0 : index
    %c0_260 = arith.constant 0 : index
    %489 = vector.load %arg4[%c0_257, %c40_258, %c0_259, %c0_260] : memref<1x54x16x256xbf16, #tpu.memory_space<vmem>>, vector<1x1x16x256xbf16>
    %490 = vector.shape_cast %489 : vector<1x1x16x256xbf16> to vector<16x256xbf16>
    %491 = arith.extf %490 : vector<16x256xbf16> to vector<16x256xf32>
    %492 = vector.broadcast %448 : vector<1x256xf32> to vector<16x256xf32>
    %493 = arith.mulf %492, %491 : vector<16x256xf32>
    %494 = arith.addf %488, %493 : vector<16x256xf32>
    %c0_261 = arith.constant 0 : index
    %c41_262 = arith.constant 41 : index
    %c0_263 = arith.constant 0 : index
    %c0_264 = arith.constant 0 : index
    %495 = vector.load %arg4[%c0_261, %c41_262, %c0_263, %c0_264] : memref<1x54x16x256xbf16, #tpu.memory_space<vmem>>, vector<1x1x16x256xbf16>
    %496 = vector.shape_cast %495 : vector<1x1x16x256xbf16> to vector<16x256xbf16>
    %497 = arith.extf %496 : vector<16x256xbf16> to vector<16x256xf32>
    %498 = vector.broadcast %450 : vector<1x256xf32> to vector<16x256xf32>
    %499 = arith.mulf %498, %497 : vector<16x256xf32>
    %500 = arith.addf %494, %499 : vector<16x256xf32>
    %c0_265 = arith.constant 0 : index
    %c42_266 = arith.constant 42 : index
    %c0_267 = arith.constant 0 : index
    %c0_268 = arith.constant 0 : index
    %501 = vector.load %arg4[%c0_265, %c42_266, %c0_267, %c0_268] : memref<1x54x16x256xbf16, #tpu.memory_space<vmem>>, vector<1x1x16x256xbf16>
    %502 = vector.shape_cast %501 : vector<1x1x16x256xbf16> to vector<16x256xbf16>
    %503 = arith.extf %502 : vector<16x256xbf16> to vector<16x256xf32>
    %504 = vector.broadcast %452 : vector<1x256xf32> to vector<16x256xf32>
    %505 = arith.mulf %504, %503 : vector<16x256xf32>
    %506 = arith.addf %500, %505 : vector<16x256xf32>
    %c0_269 = arith.constant 0 : index
    %c43_270 = arith.constant 43 : index
    %c0_271 = arith.constant 0 : index
    %c0_272 = arith.constant 0 : index
    %507 = vector.load %arg4[%c0_269, %c43_270, %c0_271, %c0_272] : memref<1x54x16x256xbf16, #tpu.memory_space<vmem>>, vector<1x1x16x256xbf16>
    %508 = vector.shape_cast %507 : vector<1x1x16x256xbf16> to vector<16x256xbf16>
    %509 = arith.extf %508 : vector<16x256xbf16> to vector<16x256xf32>
    %510 = vector.broadcast %454 : vector<1x256xf32> to vector<16x256xf32>
    %511 = arith.mulf %510, %509 : vector<16x256xf32>
    %512 = arith.addf %506, %511 : vector<16x256xf32>
    %c0_273 = arith.constant 0 : index
    %c44_274 = arith.constant 44 : index
    %c0_275 = arith.constant 0 : index
    %c0_276 = arith.constant 0 : index
    %513 = vector.load %arg4[%c0_273, %c44_274, %c0_275, %c0_276] : memref<1x54x16x256xbf16, #tpu.memory_space<vmem>>, vector<1x1x16x256xbf16>
    %514 = vector.shape_cast %513 : vector<1x1x16x256xbf16> to vector<16x256xbf16>
    %515 = arith.extf %514 : vector<16x256xbf16> to vector<16x256xf32>
    %516 = vector.broadcast %456 : vector<1x256xf32> to vector<16x256xf32>
    %517 = arith.mulf %516, %515 : vector<16x256xf32>
    %518 = arith.addf %512, %517 : vector<16x256xf32>
    %519 = vector.broadcast %465 : vector<1x256xf32> to vector<16x256xf32>
    %520 = arith.mulf %518, %519 : vector<16x256xf32>
    %521 = arith.truncf %520 : vector<16x256xf32> to vector<16x256xbf16>
    %c64 = arith.constant 64 : index
    %c0_277 = arith.constant 0 : index
    %522 = vector.load %arg9[%c64, %c0_277] : memref<96x256xbf16, #tpu.memory_space<vmem>>, vector<16x256xbf16>
    tpu.vector_store %arg9[%c64, %c0_277], %521 {strides = array<i32>} : memref<96x256xbf16, #tpu.memory_space<vmem>>, vector<16x256xbf16>,
    %c0_278 = arith.constant 0 : index
    %c1_279 = arith.constant 1 : index
    %c0_280 = arith.constant 0 : index
    %c0_281 = arith.constant 0 : index
    %523 = vector.load %arg2[%c0_278, %c1_279, %c0_280, %c0_281] : memref<1x2x16x256xf32, #tpu.memory_space<vmem>>, vector<1x1x16x256xf32>
    %524 = vector.shape_cast %523 : vector<1x1x16x256xf32> to vector<16x256xf32>
    %cst_282 = arith.constant 2.500000e-01 : f32
    %525 = vector.broadcast %cst_282 : f32 to vector<16x256xf32>
    %526 = arith.mulf %524, %525 : vector<16x256xf32>
    %c0_283 = arith.constant 0 : index
    %c9 = arith.constant 9 : index
    %c0_284 = arith.constant 0 : index
    %c0_285 = arith.constant 0 : index
    %527 = vector.load %arg3[%c0_283, %c9, %c0_284, %c0_285] : memref<1x54x16x256xbf16, #tpu.memory_space<vmem>>, vector<1x1x16x256xbf16>
    %528 = vector.shape_cast %527 : vector<1x1x16x256xbf16> to vector<16x256xbf16>
    %529 = arith.extf %528 : vector<16x256xbf16> to vector<16x256xf32>
    %530 = arith.mulf %526, %529 : vector<16x256xf32>
    %cst_286 = arith.constant dense<0.000000e+00> : vector<256xf32>
    %531 = vector.multi_reduction <add>, %530, %cst_286 [0] : vector<16x256xf32> to vector<256xf32>
    %532 = vector.shape_cast %531 : vector<256xf32> to vector<1x256xf32>
    %c9_287 = arith.constant 9 : index
    %c0_288 = arith.constant 0 : index
    %533 = vector.load %arg5[%c9_287, %c0_288] : memref<18x256xbf16, #tpu.memory_space<vmem>>, vector<1x256xbf16>
    %534 = arith.extf %533 : vector<1x256xbf16> to vector<1x256xf32>
    %535 = arith.addf %532, %534 : vector<1x256xf32>
    %c0_289 = arith.constant 0 : index
    %c10 = arith.constant 10 : index
    %c0_290 = arith.constant 0 : index
    %c0_291 = arith.constant 0 : index
    %536 = vector.load %arg3[%c0_289, %c10, %c0_290, %c0_291] : memref<1x54x16x256xbf16, #tpu.memory_space<vmem>>, vector<1x1x16x256xbf16>
    %537 = vector.shape_cast %536 : vector<1x1x16x256xbf16> to vector<16x256xbf16>
    %538 = arith.extf %537 : vector<16x256xbf16> to vector<16x256xf32>
    %539 = arith.mulf %526, %538 : vector<16x256xf32>
    %cst_292 = arith.constant dense<0.000000e+00> : vector<256xf32>
    %540 = vector.multi_reduction <add>, %539, %cst_292 [0] : vector<16x256xf32> to vector<256xf32>
    %541 = vector.shape_cast %540 : vector<256xf32> to vector<1x256xf32>
    %c10_293 = arith.constant 10 : index
    %c0_294 = arith.constant 0 : index
    %542 = vector.load %arg5[%c10_293, %c0_294] : memref<18x256xbf16, #tpu.memory_space<vmem>>, vector<1x256xbf16>
    %543 = arith.extf %542 : vector<1x256xbf16> to vector<1x256xf32>
    %544 = arith.addf %541, %543 : vector<1x256xf32>
    %c0_295 = arith.constant 0 : index
    %c11 = arith.constant 11 : index
    %c0_296 = arith.constant 0 : index
    %c0_297 = arith.constant 0 : index
    %545 = vector.load %arg3[%c0_295, %c11, %c0_296, %c0_297] : memref<1x54x16x256xbf16, #tpu.memory_space<vmem>>, vector<1x1x16x256xbf16>
    %546 = vector.shape_cast %545 : vector<1x1x16x256xbf16> to vector<16x256xbf16>
    %547 = arith.extf %546 : vector<16x256xbf16> to vector<16x256xf32>
    %548 = arith.mulf %526, %547 : vector<16x256xf32>
    %cst_298 = arith.constant dense<0.000000e+00> : vector<256xf32>
    %549 = vector.multi_reduction <add>, %548, %cst_298 [0] : vector<16x256xf32> to vector<256xf32>
    %550 = vector.shape_cast %549 : vector<256xf32> to vector<1x256xf32>
    %c11_299 = arith.constant 11 : index
    %c0_300 = arith.constant 0 : index
    %551 = vector.load %arg5[%c11_299, %c0_300] : memref<18x256xbf16, #tpu.memory_space<vmem>>, vector<1x256xbf16>
    %552 = arith.extf %551 : vector<1x256xbf16> to vector<1x256xf32>
    %553 = arith.addf %550, %552 : vector<1x256xf32>
    %c0_301 = arith.constant 0 : index
    %c12 = arith.constant 12 : index
    %c0_302 = arith.constant 0 : index
    %c0_303 = arith.constant 0 : index
    %554 = vector.load %arg3[%c0_301, %c12, %c0_302, %c0_303] : memref<1x54x16x256xbf16, #tpu.memory_space<vmem>>, vector<1x1x16x256xbf16>
    %555 = vector.shape_cast %554 : vector<1x1x16x256xbf16> to vector<16x256xbf16>
    %556 = arith.extf %555 : vector<16x256xbf16> to vector<16x256xf32>
    %557 = arith.mulf %526, %556 : vector<16x256xf32>
    %cst_304 = arith.constant dense<0.000000e+00> : vector<256xf32>
    %558 = vector.multi_reduction <add>, %557, %cst_304 [0] : vector<16x256xf32> to vector<256xf32>
    %559 = vector.shape_cast %558 : vector<256xf32> to vector<1x256xf32>
    %c12_305 = arith.constant 12 : index
    %c0_306 = arith.constant 0 : index
    %560 = vector.load %arg5[%c12_305, %c0_306] : memref<18x256xbf16, #tpu.memory_space<vmem>>, vector<1x256xbf16>
    %561 = arith.extf %560 : vector<1x256xbf16> to vector<1x256xf32>
    %562 = arith.addf %559, %561 : vector<1x256xf32>
    %c0_307 = arith.constant 0 : index
    %c13 = arith.constant 13 : index
    %c0_308 = arith.constant 0 : index
    %c0_309 = arith.constant 0 : index
    %563 = vector.load %arg3[%c0_307, %c13, %c0_308, %c0_309] : memref<1x54x16x256xbf16, #tpu.memory_space<vmem>>, vector<1x1x16x256xbf16>
    %564 = vector.shape_cast %563 : vector<1x1x16x256xbf16> to vector<16x256xbf16>
    %565 = arith.extf %564 : vector<16x256xbf16> to vector<16x256xf32>
    %566 = arith.mulf %526, %565 : vector<16x256xf32>
    %cst_310 = arith.constant dense<0.000000e+00> : vector<256xf32>
    %567 = vector.multi_reduction <add>, %566, %cst_310 [0] : vector<16x256xf32> to vector<256xf32>
    %568 = vector.shape_cast %567 : vector<256xf32> to vector<1x256xf32>
    %c13_311 = arith.constant 13 : index
    %c0_312 = arith.constant 0 : index
    %569 = vector.load %arg5[%c13_311, %c0_312] : memref<18x256xbf16, #tpu.memory_space<vmem>>, vector<1x256xbf16>
    %570 = arith.extf %569 : vector<1x256xbf16> to vector<1x256xf32>
    %571 = arith.addf %568, %570 : vector<1x256xf32>
    %c0_313 = arith.constant 0 : index
    %c14 = arith.constant 14 : index
    %c0_314 = arith.constant 0 : index
    %c0_315 = arith.constant 0 : index
    %572 = vector.load %arg3[%c0_313, %c14, %c0_314, %c0_315] : memref<1x54x16x256xbf16, #tpu.memory_space<vmem>>, vector<1x1x16x256xbf16>
    %573 = vector.shape_cast %572 : vector<1x1x16x256xbf16> to vector<16x256xbf16>
    %574 = arith.extf %573 : vector<16x256xbf16> to vector<16x256xf32>
    %575 = arith.mulf %526, %574 : vector<16x256xf32>
    %cst_316 = arith.constant dense<0.000000e+00> : vector<256xf32>
    %576 = vector.multi_reduction <add>, %575, %cst_316 [0] : vector<16x256xf32> to vector<256xf32>
    %577 = vector.shape_cast %576 : vector<256xf32> to vector<1x256xf32>
    %c14_317 = arith.constant 14 : index
    %c0_318 = arith.constant 0 : index
    %578 = vector.load %arg5[%c14_317, %c0_318] : memref<18x256xbf16, #tpu.memory_space<vmem>>, vector<1x256xbf16>
    %579 = arith.extf %578 : vector<1x256xbf16> to vector<1x256xf32>
    %580 = arith.addf %577, %579 : vector<1x256xf32>
    %c0_319 = arith.constant 0 : index
    %c15 = arith.constant 15 : index
    %c0_320 = arith.constant 0 : index
    %c0_321 = arith.constant 0 : index
    %581 = vector.load %arg3[%c0_319, %c15, %c0_320, %c0_321] : memref<1x54x16x256xbf16, #tpu.memory_space<vmem>>, vector<1x1x16x256xbf16>
    %582 = vector.shape_cast %581 : vector<1x1x16x256xbf16> to vector<16x256xbf16>
    %583 = arith.extf %582 : vector<16x256xbf16> to vector<16x256xf32>
    %584 = arith.mulf %526, %583 : vector<16x256xf32>
    %cst_322 = arith.constant dense<0.000000e+00> : vector<256xf32>
    %585 = vector.multi_reduction <add>, %584, %cst_322 [0] : vector<16x256xf32> to vector<256xf32>
    %586 = vector.shape_cast %585 : vector<256xf32> to vector<1x256xf32>
    %c15_323 = arith.constant 15 : index
    %c0_324 = arith.constant 0 : index
    %587 = vector.load %arg5[%c15_323, %c0_324] : memref<18x256xbf16, #tpu.memory_space<vmem>>, vector<1x256xbf16>
    %588 = arith.extf %587 : vector<1x256xbf16> to vector<1x256xf32>
    %589 = arith.addf %586, %588 : vector<1x256xf32>
    %c0_325 = arith.constant 0 : index
    %c16 = arith.constant 16 : index
    %c0_326 = arith.constant 0 : index
    %c0_327 = arith.constant 0 : index
    %590 = vector.load %arg3[%c0_325, %c16, %c0_326, %c0_327] : memref<1x54x16x256xbf16, #tpu.memory_space<vmem>>, vector<1x1x16x256xbf16>
    %591 = vector.shape_cast %590 : vector<1x1x16x256xbf16> to vector<16x256xbf16>
    %592 = arith.extf %591 : vector<16x256xbf16> to vector<16x256xf32>
    %593 = arith.mulf %526, %592 : vector<16x256xf32>
    %cst_328 = arith.constant dense<0.000000e+00> : vector<256xf32>
    %594 = vector.multi_reduction <add>, %593, %cst_328 [0] : vector<16x256xf32> to vector<256xf32>
    %595 = vector.shape_cast %594 : vector<256xf32> to vector<1x256xf32>
    %c16_329 = arith.constant 16 : index
    %c0_330 = arith.constant 0 : index
    %596 = vector.load %arg5[%c16_329, %c0_330] : memref<18x256xbf16, #tpu.memory_space<vmem>>, vector<1x256xbf16>
    %597 = arith.extf %596 : vector<1x256xbf16> to vector<1x256xf32>
    %598 = arith.addf %595, %597 : vector<1x256xf32>
    %c0_331 = arith.constant 0 : index
    %c17 = arith.constant 17 : index
    %c0_332 = arith.constant 0 : index
    %c0_333 = arith.constant 0 : index
    %599 = vector.load %arg3[%c0_331, %c17, %c0_332, %c0_333] : memref<1x54x16x256xbf16, #tpu.memory_space<vmem>>, vector<1x1x16x256xbf16>
    %600 = vector.shape_cast %599 : vector<1x1x16x256xbf16> to vector<16x256xbf16>
    %601 = arith.extf %600 : vector<16x256xbf16> to vector<16x256xf32>
    %602 = arith.mulf %526, %601 : vector<16x256xf32>
    %cst_334 = arith.constant dense<0.000000e+00> : vector<256xf32>
    %603 = vector.multi_reduction <add>, %602, %cst_334 [0] : vector<16x256xf32> to vector<256xf32>
    %604 = vector.shape_cast %603 : vector<256xf32> to vector<1x256xf32>
    %c17_335 = arith.constant 17 : index
    %c0_336 = arith.constant 0 : index
    %605 = vector.load %arg5[%c17_335, %c0_336] : memref<18x256xbf16, #tpu.memory_space<vmem>>, vector<1x256xbf16>
    %606 = arith.extf %605 : vector<1x256xbf16> to vector<1x256xf32>
    %607 = arith.addf %604, %606 : vector<1x256xf32>
    %608 = arith.maximumf %535, %544 : vector<1x256xf32>
    %609 = arith.maximumf %608, %553 : vector<1x256xf32>
    %610 = arith.maximumf %609, %562 : vector<1x256xf32>
    %611 = arith.maximumf %610, %571 : vector<1x256xf32>
    %612 = arith.maximumf %611, %580 : vector<1x256xf32>
    %613 = arith.maximumf %612, %589 : vector<1x256xf32>
    %614 = arith.maximumf %613, %598 : vector<1x256xf32>
    %615 = arith.maximumf %614, %607 : vector<1x256xf32>
    %616 = arith.subf %535, %615 : vector<1x256xf32>
    %617 = math.exp %616 : vector<1x256xf32>
    %618 = arith.subf %544, %615 : vector<1x256xf32>
    %619 = math.exp %618 : vector<1x256xf32>
    %620 = arith.subf %553, %615 : vector<1x256xf32>
    %621 = math.exp %620 : vector<1x256xf32>
    %622 = arith.subf %562, %615 : vector<1x256xf32>
    %623 = math.exp %622 : vector<1x256xf32>
    %624 = arith.subf %571, %615 : vector<1x256xf32>
    %625 = math.exp %624 : vector<1x256xf32>
    %626 = arith.subf %580, %615 : vector<1x256xf32>
    %627 = math.exp %626 : vector<1x256xf32>
    %628 = arith.subf %589, %615 : vector<1x256xf32>
    %629 = math.exp %628 : vector<1x256xf32>
    %630 = arith.subf %598, %615 : vector<1x256xf32>
    %631 = math.exp %630 : vector<1x256xf32>
    %632 = arith.subf %607, %615 : vector<1x256xf32>
    %633 = math.exp %632 : vector<1x256xf32>
    %634 = arith.addf %617, %619 : vector<1x256xf32>
    %635 = arith.addf %634, %621 : vector<1x256xf32>
    %636 = arith.addf %635, %623 : vector<1x256xf32>
    %637 = arith.addf %636, %625 : vector<1x256xf32>
    %638 = arith.addf %637, %627 : vector<1x256xf32>
    %639 = arith.addf %638, %629 : vector<1x256xf32>
    %640 = arith.addf %639, %631 : vector<1x256xf32>
    %641 = arith.addf %640, %633 : vector<1x256xf32>
    %642 = tpu.reciprocal %641 {approx = true} : vector<1x256xf32> -> vector<1x256xf32>
    %c0_337 = arith.constant 0 : index
    %c9_338 = arith.constant 9 : index
    %c0_339 = arith.constant 0 : index
    %c0_340 = arith.constant 0 : index
    %643 = vector.load %arg4[%c0_337, %c9_338, %c0_339, %c0_340] : memref<1x54x16x256xbf16, #tpu.memory_space<vmem>>, vector<1x1x16x256xbf16>
    %644 = vector.shape_cast %643 : vector<1x1x16x256xbf16> to vector<16x256xbf16>
    %645 = arith.extf %644 : vector<16x256xbf16> to vector<16x256xf32>
    %646 = vector.broadcast %617 : vector<1x256xf32> to vector<16x256xf32>
    %647 = arith.mulf %646, %645 : vector<16x256xf32>
    %c0_341 = arith.constant 0 : index
    %c10_342 = arith.constant 10 : index
    %c0_343 = arith.constant 0 : index
    %c0_344 = arith.constant 0 : index
    %648 = vector.load %arg4[%c0_341, %c10_342, %c0_343, %c0_344] : memref<1x54x16x256xbf16, #tpu.memory_space<vmem>>, vector<1x1x16x256xbf16>
    %649 = vector.shape_cast %648 : vector<1x1x16x256xbf16> to vector<16x256xbf16>
    %650 = arith.extf %649 : vector<16x256xbf16> to vector<16x256xf32>
    %651 = vector.broadcast %619 : vector<1x256xf32> to vector<16x256xf32>
    %652 = arith.mulf %651, %650 : vector<16x256xf32>
    %653 = arith.addf %647, %652 : vector<16x256xf32>
    %c0_345 = arith.constant 0 : index
    %c11_346 = arith.constant 11 : index
    %c0_347 = arith.constant 0 : index
    %c0_348 = arith.constant 0 : index
    %654 = vector.load %arg4[%c0_345, %c11_346, %c0_347, %c0_348] : memref<1x54x16x256xbf16, #tpu.memory_space<vmem>>, vector<1x1x16x256xbf16>
    %655 = vector.shape_cast %654 : vector<1x1x16x256xbf16> to vector<16x256xbf16>
    %656 = arith.extf %655 : vector<16x256xbf16> to vector<16x256xf32>
    %657 = vector.broadcast %621 : vector<1x256xf32> to vector<16x256xf32>
    %658 = arith.mulf %657, %656 : vector<16x256xf32>
    %659 = arith.addf %653, %658 : vector<16x256xf32>
    %c0_349 = arith.constant 0 : index
    %c12_350 = arith.constant 12 : index
    %c0_351 = arith.constant 0 : index
    %c0_352 = arith.constant 0 : index
    %660 = vector.load %arg4[%c0_349, %c12_350, %c0_351, %c0_352] : memref<1x54x16x256xbf16, #tpu.memory_space<vmem>>, vector<1x1x16x256xbf16>
    %661 = vector.shape_cast %660 : vector<1x1x16x256xbf16> to vector<16x256xbf16>
    %662 = arith.extf %661 : vector<16x256xbf16> to vector<16x256xf32>
    %663 = vector.broadcast %623 : vector<1x256xf32> to vector<16x256xf32>
    %664 = arith.mulf %663, %662 : vector<16x256xf32>
    %665 = arith.addf %659, %664 : vector<16x256xf32>
    %c0_353 = arith.constant 0 : index
    %c13_354 = arith.constant 13 : index
    %c0_355 = arith.constant 0 : index
    %c0_356 = arith.constant 0 : index
    %666 = vector.load %arg4[%c0_353, %c13_354, %c0_355, %c0_356] : memref<1x54x16x256xbf16, #tpu.memory_space<vmem>>, vector<1x1x16x256xbf16>
    %667 = vector.shape_cast %666 : vector<1x1x16x256xbf16> to vector<16x256xbf16>
    %668 = arith.extf %667 : vector<16x256xbf16> to vector<16x256xf32>
    %669 = vector.broadcast %625 : vector<1x256xf32> to vector<16x256xf32>
    %670 = arith.mulf %669, %668 : vector<16x256xf32>
    %671 = arith.addf %665, %670 : vector<16x256xf32>
    %c0_357 = arith.constant 0 : index
    %c14_358 = arith.constant 14 : index
    %c0_359 = arith.constant 0 : index
    %c0_360 = arith.constant 0 : index
    %672 = vector.load %arg4[%c0_357, %c14_358, %c0_359, %c0_360] : memref<1x54x16x256xbf16, #tpu.memory_space<vmem>>, vector<1x1x16x256xbf16>
    %673 = vector.shape_cast %672 : vector<1x1x16x256xbf16> to vector<16x256xbf16>
    %674 = arith.extf %673 : vector<16x256xbf16> to vector<16x256xf32>
    %675 = vector.broadcast %627 : vector<1x256xf32> to vector<16x256xf32>
    %676 = arith.mulf %675, %674 : vector<16x256xf32>
    %677 = arith.addf %671, %676 : vector<16x256xf32>
    %c0_361 = arith.constant 0 : index
    %c15_362 = arith.constant 15 : index
    %c0_363 = arith.constant 0 : index
    %c0_364 = arith.constant 0 : index
    %678 = vector.load %arg4[%c0_361, %c15_362, %c0_363, %c0_364] : memref<1x54x16x256xbf16, #tpu.memory_space<vmem>>, vector<1x1x16x256xbf16>
    %679 = vector.shape_cast %678 : vector<1x1x16x256xbf16> to vector<16x256xbf16>
    %680 = arith.extf %679 : vector<16x256xbf16> to vector<16x256xf32>
    %681 = vector.broadcast %629 : vector<1x256xf32> to vector<16x256xf32>
    %682 = arith.mulf %681, %680 : vector<16x256xf32>
    %683 = arith.addf %677, %682 : vector<16x256xf32>
    %c0_365 = arith.constant 0 : index
    %c16_366 = arith.constant 16 : index
    %c0_367 = arith.constant 0 : index
    %c0_368 = arith.constant 0 : index
    %684 = vector.load %arg4[%c0_365, %c16_366, %c0_367, %c0_368] : memref<1x54x16x256xbf16, #tpu.memory_space<vmem>>, vector<1x1x16x256xbf16>
    %685 = vector.shape_cast %684 : vector<1x1x16x256xbf16> to vector<16x256xbf16>
    %686 = arith.extf %685 : vector<16x256xbf16> to vector<16x256xf32>
    %687 = vector.broadcast %631 : vector<1x256xf32> to vector<16x256xf32>
    %688 = arith.mulf %687, %686 : vector<16x256xf32>
    %689 = arith.addf %683, %688 : vector<16x256xf32>
    %c0_369 = arith.constant 0 : index
    %c17_370 = arith.constant 17 : index
    %c0_371 = arith.constant 0 : index
    %c0_372 = arith.constant 0 : index
    %690 = vector.load %arg4[%c0_369, %c17_370, %c0_371, %c0_372] : memref<1x54x16x256xbf16, #tpu.memory_space<vmem>>, vector<1x1x16x256xbf16>
    %691 = vector.shape_cast %690 : vector<1x1x16x256xbf16> to vector<16x256xbf16>
    %692 = arith.extf %691 : vector<16x256xbf16> to vector<16x256xf32>
    %693 = vector.broadcast %633 : vector<1x256xf32> to vector<16x256xf32>
    %694 = arith.mulf %693, %692 : vector<16x256xf32>
    %695 = arith.addf %689, %694 : vector<16x256xf32>
    %696 = vector.broadcast %642 : vector<1x256xf32> to vector<16x256xf32>
    %697 = arith.mulf %695, %696 : vector<16x256xf32>
    %698 = arith.truncf %697 : vector<16x256xf32> to vector<16x256xbf16>
    %c16_373 = arith.constant 16 : index
    %c0_374 = arith.constant 0 : index
    %699 = vector.load %arg9[%c16_373, %c0_374] : memref<96x256xbf16, #tpu.memory_space<vmem>>, vector<16x256xbf16>
    tpu.vector_store %arg9[%c16_373, %c0_374], %698 {strides = array<i32>} : memref<96x256xbf16, #tpu.memory_space<vmem>>, vector<16x256xbf16>,
    %c0_375 = arith.constant 0 : index
    %c27 = arith.constant 27 : index
    %c0_376 = arith.constant 0 : index
    %c0_377 = arith.constant 0 : index
    %700 = vector.load %arg3[%c0_375, %c27, %c0_376, %c0_377] : memref<1x54x16x256xbf16, #tpu.memory_space<vmem>>, vector<1x1x16x256xbf16>
    %701 = vector.shape_cast %700 : vector<1x1x16x256xbf16> to vector<16x256xbf16>
    %702 = arith.extf %701 : vector<16x256xbf16> to vector<16x256xf32>
    %703 = arith.mulf %526, %702 : vector<16x256xf32>
    %cst_378 = arith.constant dense<0.000000e+00> : vector<256xf32>
    %704 = vector.multi_reduction <add>, %703, %cst_378 [0] : vector<16x256xf32> to vector<256xf32>
    %705 = vector.shape_cast %704 : vector<256xf32> to vector<1x256xf32>
    %c9_379 = arith.constant 9 : index
    %c0_380 = arith.constant 0 : index
    %706 = vector.load %arg5[%c9_379, %c0_380] : memref<18x256xbf16, #tpu.memory_space<vmem>>, vector<1x256xbf16>
    %707 = arith.extf %706 : vector<1x256xbf16> to vector<1x256xf32>
    %708 = arith.addf %705, %707 : vector<1x256xf32>
    %c0_381 = arith.constant 0 : index
    %c28 = arith.constant 28 : index
    %c0_382 = arith.constant 0 : index
    %c0_383 = arith.constant 0 : index
    %709 = vector.load %arg3[%c0_381, %c28, %c0_382, %c0_383] : memref<1x54x16x256xbf16, #tpu.memory_space<vmem>>, vector<1x1x16x256xbf16>
    %710 = vector.shape_cast %709 : vector<1x1x16x256xbf16> to vector<16x256xbf16>
    %711 = arith.extf %710 : vector<16x256xbf16> to vector<16x256xf32>
    %712 = arith.mulf %526, %711 : vector<16x256xf32>
    %cst_384 = arith.constant dense<0.000000e+00> : vector<256xf32>
    %713 = vector.multi_reduction <add>, %712, %cst_384 [0] : vector<16x256xf32> to vector<256xf32>
    %714 = vector.shape_cast %713 : vector<256xf32> to vector<1x256xf32>
    %c10_385 = arith.constant 10 : index
    %c0_386 = arith.constant 0 : index
    %715 = vector.load %arg5[%c10_385, %c0_386] : memref<18x256xbf16, #tpu.memory_space<vmem>>, vector<1x256xbf16>
    %716 = arith.extf %715 : vector<1x256xbf16> to vector<1x256xf32>
    %717 = arith.addf %714, %716 : vector<1x256xf32>
    %c0_387 = arith.constant 0 : index
    %c29 = arith.constant 29 : index
    %c0_388 = arith.constant 0 : index
    %c0_389 = arith.constant 0 : index
    %718 = vector.load %arg3[%c0_387, %c29, %c0_388, %c0_389] : memref<1x54x16x256xbf16, #tpu.memory_space<vmem>>, vector<1x1x16x256xbf16>
    %719 = vector.shape_cast %718 : vector<1x1x16x256xbf16> to vector<16x256xbf16>
    %720 = arith.extf %719 : vector<16x256xbf16> to vector<16x256xf32>
    %721 = arith.mulf %526, %720 : vector<16x256xf32>
    %cst_390 = arith.constant dense<0.000000e+00> : vector<256xf32>
    %722 = vector.multi_reduction <add>, %721, %cst_390 [0] : vector<16x256xf32> to vector<256xf32>
    %723 = vector.shape_cast %722 : vector<256xf32> to vector<1x256xf32>
    %c11_391 = arith.constant 11 : index
    %c0_392 = arith.constant 0 : index
    %724 = vector.load %arg5[%c11_391, %c0_392] : memref<18x256xbf16, #tpu.memory_space<vmem>>, vector<1x256xbf16>
    %725 = arith.extf %724 : vector<1x256xbf16> to vector<1x256xf32>
    %726 = arith.addf %723, %725 : vector<1x256xf32>
    %c0_393 = arith.constant 0 : index
    %c30 = arith.constant 30 : index
    %c0_394 = arith.constant 0 : index
    %c0_395 = arith.constant 0 : index
    %727 = vector.load %arg3[%c0_393, %c30, %c0_394, %c0_395] : memref<1x54x16x256xbf16, #tpu.memory_space<vmem>>, vector<1x1x16x256xbf16>
    %728 = vector.shape_cast %727 : vector<1x1x16x256xbf16> to vector<16x256xbf16>
    %729 = arith.extf %728 : vector<16x256xbf16> to vector<16x256xf32>
    %730 = arith.mulf %526, %729 : vector<16x256xf32>
    %cst_396 = arith.constant dense<0.000000e+00> : vector<256xf32>
    %731 = vector.multi_reduction <add>, %730, %cst_396 [0] : vector<16x256xf32> to vector<256xf32>
    %732 = vector.shape_cast %731 : vector<256xf32> to vector<1x256xf32>
    %c12_397 = arith.constant 12 : index
    %c0_398 = arith.constant 0 : index
    %733 = vector.load %arg5[%c12_397, %c0_398] : memref<18x256xbf16, #tpu.memory_space<vmem>>, vector<1x256xbf16>
    %734 = arith.extf %733 : vector<1x256xbf16> to vector<1x256xf32>
    %735 = arith.addf %732, %734 : vector<1x256xf32>
    %c0_399 = arith.constant 0 : index
    %c31 = arith.constant 31 : index
    %c0_400 = arith.constant 0 : index
    %c0_401 = arith.constant 0 : index
    %736 = vector.load %arg3[%c0_399, %c31, %c0_400, %c0_401] : memref<1x54x16x256xbf16, #tpu.memory_space<vmem>>, vector<1x1x16x256xbf16>
    %737 = vector.shape_cast %736 : vector<1x1x16x256xbf16> to vector<16x256xbf16>
    %738 = arith.extf %737 : vector<16x256xbf16> to vector<16x256xf32>
    %739 = arith.mulf %526, %738 : vector<16x256xf32>
    %cst_402 = arith.constant dense<0.000000e+00> : vector<256xf32>
    %740 = vector.multi_reduction <add>, %739, %cst_402 [0] : vector<16x256xf32> to vector<256xf32>
    %741 = vector.shape_cast %740 : vector<256xf32> to vector<1x256xf32>
    %c13_403 = arith.constant 13 : index
    %c0_404 = arith.constant 0 : index
    %742 = vector.load %arg5[%c13_403, %c0_404] : memref<18x256xbf16, #tpu.memory_space<vmem>>, vector<1x256xbf16>
    %743 = arith.extf %742 : vector<1x256xbf16> to vector<1x256xf32>
    %744 = arith.addf %741, %743 : vector<1x256xf32>
    %c0_405 = arith.constant 0 : index
    %c32_406 = arith.constant 32 : index
    %c0_407 = arith.constant 0 : index
    %c0_408 = arith.constant 0 : index
    %745 = vector.load %arg3[%c0_405, %c32_406, %c0_407, %c0_408] : memref<1x54x16x256xbf16, #tpu.memory_space<vmem>>, vector<1x1x16x256xbf16>
    %746 = vector.shape_cast %745 : vector<1x1x16x256xbf16> to vector<16x256xbf16>
    %747 = arith.extf %746 : vector<16x256xbf16> to vector<16x256xf32>
    %748 = arith.mulf %526, %747 : vector<16x256xf32>
    %cst_409 = arith.constant dense<0.000000e+00> : vector<256xf32>
    %749 = vector.multi_reduction <add>, %748, %cst_409 [0] : vector<16x256xf32> to vector<256xf32>
    %750 = vector.shape_cast %749 : vector<256xf32> to vector<1x256xf32>
    %c14_410 = arith.constant 14 : index
    %c0_411 = arith.constant 0 : index
    %751 = vector.load %arg5[%c14_410, %c0_411] : memref<18x256xbf16, #tpu.memory_space<vmem>>, vector<1x256xbf16>
    %752 = arith.extf %751 : vector<1x256xbf16> to vector<1x256xf32>
    %753 = arith.addf %750, %752 : vector<1x256xf32>
    %c0_412 = arith.constant 0 : index
    %c33 = arith.constant 33 : index
    %c0_413 = arith.constant 0 : index
    %c0_414 = arith.constant 0 : index
    %754 = vector.load %arg3[%c0_412, %c33, %c0_413, %c0_414] : memref<1x54x16x256xbf16, #tpu.memory_space<vmem>>, vector<1x1x16x256xbf16>
    %755 = vector.shape_cast %754 : vector<1x1x16x256xbf16> to vector<16x256xbf16>
    %756 = arith.extf %755 : vector<16x256xbf16> to vector<16x256xf32>
    %757 = arith.mulf %526, %756 : vector<16x256xf32>
    %cst_415 = arith.constant dense<0.000000e+00> : vector<256xf32>
    %758 = vector.multi_reduction <add>, %757, %cst_415 [0] : vector<16x256xf32> to vector<256xf32>
    %759 = vector.shape_cast %758 : vector<256xf32> to vector<1x256xf32>
    %c15_416 = arith.constant 15 : index
    %c0_417 = arith.constant 0 : index
    %760 = vector.load %arg5[%c15_416, %c0_417] : memref<18x256xbf16, #tpu.memory_space<vmem>>, vector<1x256xbf16>
    %761 = arith.extf %760 : vector<1x256xbf16> to vector<1x256xf32>
    %762 = arith.addf %759, %761 : vector<1x256xf32>
    %c0_418 = arith.constant 0 : index
    %c34 = arith.constant 34 : index
    %c0_419 = arith.constant 0 : index
    %c0_420 = arith.constant 0 : index
    %763 = vector.load %arg3[%c0_418, %c34, %c0_419, %c0_420] : memref<1x54x16x256xbf16, #tpu.memory_space<vmem>>, vector<1x1x16x256xbf16>
    %764 = vector.shape_cast %763 : vector<1x1x16x256xbf16> to vector<16x256xbf16>
    %765 = arith.extf %764 : vector<16x256xbf16> to vector<16x256xf32>
    %766 = arith.mulf %526, %765 : vector<16x256xf32>
    %cst_421 = arith.constant dense<0.000000e+00> : vector<256xf32>
    %767 = vector.multi_reduction <add>, %766, %cst_421 [0] : vector<16x256xf32> to vector<256xf32>
    %768 = vector.shape_cast %767 : vector<256xf32> to vector<1x256xf32>
    %c16_422 = arith.constant 16 : index
    %c0_423 = arith.constant 0 : index
    %769 = vector.load %arg5[%c16_422, %c0_423] : memref<18x256xbf16, #tpu.memory_space<vmem>>, vector<1x256xbf16>
    %770 = arith.extf %769 : vector<1x256xbf16> to vector<1x256xf32>
    %771 = arith.addf %768, %770 : vector<1x256xf32>
    %c0_424 = arith.constant 0 : index
    %c35 = arith.constant 35 : index
    %c0_425 = arith.constant 0 : index
    %c0_426 = arith.constant 0 : index
    %772 = vector.load %arg3[%c0_424, %c35, %c0_425, %c0_426] : memref<1x54x16x256xbf16, #tpu.memory_space<vmem>>, vector<1x1x16x256xbf16>
    %773 = vector.shape_cast %772 : vector<1x1x16x256xbf16> to vector<16x256xbf16>
    %774 = arith.extf %773 : vector<16x256xbf16> to vector<16x256xf32>
    %775 = arith.mulf %526, %774 : vector<16x256xf32>
    %cst_427 = arith.constant dense<0.000000e+00> : vector<256xf32>
    %776 = vector.multi_reduction <add>, %775, %cst_427 [0] : vector<16x256xf32> to vector<256xf32>
    %777 = vector.shape_cast %776 : vector<256xf32> to vector<1x256xf32>
    %c17_428 = arith.constant 17 : index
    %c0_429 = arith.constant 0 : index
    %778 = vector.load %arg5[%c17_428, %c0_429] : memref<18x256xbf16, #tpu.memory_space<vmem>>, vector<1x256xbf16>
    %779 = arith.extf %778 : vector<1x256xbf16> to vector<1x256xf32>
    %780 = arith.addf %777, %779 : vector<1x256xf32>
    %781 = arith.maximumf %708, %717 : vector<1x256xf32>
    %782 = arith.maximumf %781, %726 : vector<1x256xf32>
    %783 = arith.maximumf %782, %735 : vector<1x256xf32>
    %784 = arith.maximumf %783, %744 : vector<1x256xf32>
    %785 = arith.maximumf %784, %753 : vector<1x256xf32>
    %786 = arith.maximumf %785, %762 : vector<1x256xf32>
    %787 = arith.maximumf %786, %771 : vector<1x256xf32>
    %788 = arith.maximumf %787, %780 : vector<1x256xf32>
    %789 = arith.subf %708, %788 : vector<1x256xf32>
    %790 = math.exp %789 : vector<1x256xf32>
    %791 = arith.subf %717, %788 : vector<1x256xf32>
    %792 = math.exp %791 : vector<1x256xf32>
    %793 = arith.subf %726, %788 : vector<1x256xf32>
    %794 = math.exp %793 : vector<1x256xf32>
    %795 = arith.subf %735, %788 : vector<1x256xf32>
    %796 = math.exp %795 : vector<1x256xf32>
    %797 = arith.subf %744, %788 : vector<1x256xf32>
    %798 = math.exp %797 : vector<1x256xf32>
    %799 = arith.subf %753, %788 : vector<1x256xf32>
    %800 = math.exp %799 : vector<1x256xf32>
    %801 = arith.subf %762, %788 : vector<1x256xf32>
    %802 = math.exp %801 : vector<1x256xf32>
    %803 = arith.subf %771, %788 : vector<1x256xf32>
    %804 = math.exp %803 : vector<1x256xf32>
    %805 = arith.subf %780, %788 : vector<1x256xf32>
    %806 = math.exp %805 : vector<1x256xf32>
    %807 = arith.addf %790, %792 : vector<1x256xf32>
    %808 = arith.addf %807, %794 : vector<1x256xf32>
    %809 = arith.addf %808, %796 : vector<1x256xf32>
    %810 = arith.addf %809, %798 : vector<1x256xf32>
    %811 = arith.addf %810, %800 : vector<1x256xf32>
    %812 = arith.addf %811, %802 : vector<1x256xf32>
    %813 = arith.addf %812, %804 : vector<1x256xf32>
    %814 = arith.addf %813, %806 : vector<1x256xf32>
    %815 = tpu.reciprocal %814 {approx = true} : vector<1x256xf32> -> vector<1x256xf32>
    %c0_430 = arith.constant 0 : index
    %c27_431 = arith.constant 27 : index
    %c0_432 = arith.constant 0 : index
    %c0_433 = arith.constant 0 : index
    %816 = vector.load %arg4[%c0_430, %c27_431, %c0_432, %c0_433] : memref<1x54x16x256xbf16, #tpu.memory_space<vmem>>, vector<1x1x16x256xbf16>
    %817 = vector.shape_cast %816 : vector<1x1x16x256xbf16> to vector<16x256xbf16>
    %818 = arith.extf %817 : vector<16x256xbf16> to vector<16x256xf32>
    %819 = vector.broadcast %790 : vector<1x256xf32> to vector<16x256xf32>
    %820 = arith.mulf %819, %818 : vector<16x256xf32>
    %c0_434 = arith.constant 0 : index
    %c28_435 = arith.constant 28 : index
    %c0_436 = arith.constant 0 : index
    %c0_437 = arith.constant 0 : index
    %821 = vector.load %arg4[%c0_434, %c28_435, %c0_436, %c0_437] : memref<1x54x16x256xbf16, #tpu.memory_space<vmem>>, vector<1x1x16x256xbf16>
    %822 = vector.shape_cast %821 : vector<1x1x16x256xbf16> to vector<16x256xbf16>
    %823 = arith.extf %822 : vector<16x256xbf16> to vector<16x256xf32>
    %824 = vector.broadcast %792 : vector<1x256xf32> to vector<16x256xf32>
    %825 = arith.mulf %824, %823 : vector<16x256xf32>
    %826 = arith.addf %820, %825 : vector<16x256xf32>
    %c0_438 = arith.constant 0 : index
    %c29_439 = arith.constant 29 : index
    %c0_440 = arith.constant 0 : index
    %c0_441 = arith.constant 0 : index
    %827 = vector.load %arg4[%c0_438, %c29_439, %c0_440, %c0_441] : memref<1x54x16x256xbf16, #tpu.memory_space<vmem>>, vector<1x1x16x256xbf16>
    %828 = vector.shape_cast %827 : vector<1x1x16x256xbf16> to vector<16x256xbf16>
    %829 = arith.extf %828 : vector<16x256xbf16> to vector<16x256xf32>
    %830 = vector.broadcast %794 : vector<1x256xf32> to vector<16x256xf32>
    %831 = arith.mulf %830, %829 : vector<16x256xf32>
    %832 = arith.addf %826, %831 : vector<16x256xf32>
    %c0_442 = arith.constant 0 : index
    %c30_443 = arith.constant 30 : index
    %c0_444 = arith.constant 0 : index
    %c0_445 = arith.constant 0 : index
    %833 = vector.load %arg4[%c0_442, %c30_443, %c0_444, %c0_445] : memref<1x54x16x256xbf16, #tpu.memory_space<vmem>>, vector<1x1x16x256xbf16>
    %834 = vector.shape_cast %833 : vector<1x1x16x256xbf16> to vector<16x256xbf16>
    %835 = arith.extf %834 : vector<16x256xbf16> to vector<16x256xf32>
    %836 = vector.broadcast %796 : vector<1x256xf32> to vector<16x256xf32>
    %837 = arith.mulf %836, %835 : vector<16x256xf32>
    %838 = arith.addf %832, %837 : vector<16x256xf32>
    %c0_446 = arith.constant 0 : index
    %c31_447 = arith.constant 31 : index
    %c0_448 = arith.constant 0 : index
    %c0_449 = arith.constant 0 : index
    %839 = vector.load %arg4[%c0_446, %c31_447, %c0_448, %c0_449] : memref<1x54x16x256xbf16, #tpu.memory_space<vmem>>, vector<1x1x16x256xbf16>
    %840 = vector.shape_cast %839 : vector<1x1x16x256xbf16> to vector<16x256xbf16>
    %841 = arith.extf %840 : vector<16x256xbf16> to vector<16x256xf32>
    %842 = vector.broadcast %798 : vector<1x256xf32> to vector<16x256xf32>
    %843 = arith.mulf %842, %841 : vector<16x256xf32>
    %844 = arith.addf %838, %843 : vector<16x256xf32>
    %c0_450 = arith.constant 0 : index
    %c32_451 = arith.constant 32 : index
    %c0_452 = arith.constant 0 : index
    %c0_453 = arith.constant 0 : index
    %845 = vector.load %arg4[%c0_450, %c32_451, %c0_452, %c0_453] : memref<1x54x16x256xbf16, #tpu.memory_space<vmem>>, vector<1x1x16x256xbf16>
    %846 = vector.shape_cast %845 : vector<1x1x16x256xbf16> to vector<16x256xbf16>
    %847 = arith.extf %846 : vector<16x256xbf16> to vector<16x256xf32>
    %848 = vector.broadcast %800 : vector<1x256xf32> to vector<16x256xf32>
    %849 = arith.mulf %848, %847 : vector<16x256xf32>
    %850 = arith.addf %844, %849 : vector<16x256xf32>
    %c0_454 = arith.constant 0 : index
    %c33_455 = arith.constant 33 : index
    %c0_456 = arith.constant 0 : index
    %c0_457 = arith.constant 0 : index
    %851 = vector.load %arg4[%c0_454, %c33_455, %c0_456, %c0_457] : memref<1x54x16x256xbf16, #tpu.memory_space<vmem>>, vector<1x1x16x256xbf16>
    %852 = vector.shape_cast %851 : vector<1x1x16x256xbf16> to vector<16x256xbf16>
    %853 = arith.extf %852 : vector<16x256xbf16> to vector<16x256xf32>
    %854 = vector.broadcast %802 : vector<1x256xf32> to vector<16x256xf32>
    %855 = arith.mulf %854, %853 : vector<16x256xf32>
    %856 = arith.addf %850, %855 : vector<16x256xf32>
    %c0_458 = arith.constant 0 : index
    %c34_459 = arith.constant 34 : index
    %c0_460 = arith.constant 0 : index
    %c0_461 = arith.constant 0 : index
    %857 = vector.load %arg4[%c0_458, %c34_459, %c0_460, %c0_461] : memref<1x54x16x256xbf16, #tpu.memory_space<vmem>>, vector<1x1x16x256xbf16>
    %858 = vector.shape_cast %857 : vector<1x1x16x256xbf16> to vector<16x256xbf16>
    %859 = arith.extf %858 : vector<16x256xbf16> to vector<16x256xf32>
    %860 = vector.broadcast %804 : vector<1x256xf32> to vector<16x256xf32>
    %861 = arith.mulf %860, %859 : vector<16x256xf32>
    %862 = arith.addf %856, %861 : vector<16x256xf32>
    %c0_462 = arith.constant 0 : index
    %c35_463 = arith.constant 35 : index
    %c0_464 = arith.constant 0 : index
    %c0_465 = arith.constant 0 : index
    %863 = vector.load %arg4[%c0_462, %c35_463, %c0_464, %c0_465] : memref<1x54x16x256xbf16, #tpu.memory_space<vmem>>, vector<1x1x16x256xbf16>
    %864 = vector.shape_cast %863 : vector<1x1x16x256xbf16> to vector<16x256xbf16>
    %865 = arith.extf %864 : vector<16x256xbf16> to vector<16x256xf32>
    %866 = vector.broadcast %806 : vector<1x256xf32> to vector<16x256xf32>
    %867 = arith.mulf %866, %865 : vector<16x256xf32>
    %868 = arith.addf %862, %867 : vector<16x256xf32>
    %869 = vector.broadcast %815 : vector<1x256xf32> to vector<16x256xf32>
    %870 = arith.mulf %868, %869 : vector<16x256xf32>
    %871 = arith.truncf %870 : vector<16x256xf32> to vector<16x256xbf16>
    %c48 = arith.constant 48 : index
    %c0_466 = arith.constant 0 : index
    %872 = vector.load %arg9[%c48, %c0_466] : memref<96x256xbf16, #tpu.memory_space<vmem>>, vector<16x256xbf16>
    tpu.vector_store %arg9[%c48, %c0_466], %871 {strides = array<i32>} : memref<96x256xbf16, #tpu.memory_space<vmem>>, vector<16x256xbf16>,
    %c0_467 = arith.constant 0 : index
    %c45 = arith.constant 45 : index
    %c0_468 = arith.constant 0 : index
    %c0_469 = arith.constant 0 : index
    %873 = vector.load %arg3[%c0_467, %c45, %c0_468, %c0_469] : memref<1x54x16x256xbf16, #tpu.memory_space<vmem>>, vector<1x1x16x256xbf16>
    %874 = vector.shape_cast %873 : vector<1x1x16x256xbf16> to vector<16x256xbf16>
    %875 = arith.extf %874 : vector<16x256xbf16> to vector<16x256xf32>
    %876 = arith.mulf %526, %875 : vector<16x256xf32>
    %cst_470 = arith.constant dense<0.000000e+00> : vector<256xf32>
    %877 = vector.multi_reduction <add>, %876, %cst_470 [0] : vector<16x256xf32> to vector<256xf32>
    %878 = vector.shape_cast %877 : vector<256xf32> to vector<1x256xf32>
    %c9_471 = arith.constant 9 : index
    %c0_472 = arith.constant 0 : index
    %879 = vector.load %arg5[%c9_471, %c0_472] : memref<18x256xbf16, #tpu.memory_space<vmem>>, vector<1x256xbf16>
    %880 = arith.extf %879 : vector<1x256xbf16> to vector<1x256xf32>
    %881 = arith.addf %878, %880 : vector<1x256xf32>
    %c0_473 = arith.constant 0 : index
    %c46 = arith.constant 46 : index
    %c0_474 = arith.constant 0 : index
    %c0_475 = arith.constant 0 : index
    %882 = vector.load %arg3[%c0_473, %c46, %c0_474, %c0_475] : memref<1x54x16x256xbf16, #tpu.memory_space<vmem>>, vector<1x1x16x256xbf16>
    %883 = vector.shape_cast %882 : vector<1x1x16x256xbf16> to vector<16x256xbf16>
    %884 = arith.extf %883 : vector<16x256xbf16> to vector<16x256xf32>
    %885 = arith.mulf %526, %884 : vector<16x256xf32>
    %cst_476 = arith.constant dense<0.000000e+00> : vector<256xf32>
    %886 = vector.multi_reduction <add>, %885, %cst_476 [0] : vector<16x256xf32> to vector<256xf32>
    %887 = vector.shape_cast %886 : vector<256xf32> to vector<1x256xf32>
    %c10_477 = arith.constant 10 : index
    %c0_478 = arith.constant 0 : index
    %888 = vector.load %arg5[%c10_477, %c0_478] : memref<18x256xbf16, #tpu.memory_space<vmem>>, vector<1x256xbf16>
    %889 = arith.extf %888 : vector<1x256xbf16> to vector<1x256xf32>
    %890 = arith.addf %887, %889 : vector<1x256xf32>
    %c0_479 = arith.constant 0 : index
    %c47 = arith.constant 47 : index
    %c0_480 = arith.constant 0 : index
    %c0_481 = arith.constant 0 : index
    %891 = vector.load %arg3[%c0_479, %c47, %c0_480, %c0_481] : memref<1x54x16x256xbf16, #tpu.memory_space<vmem>>, vector<1x1x16x256xbf16>
    %892 = vector.shape_cast %891 : vector<1x1x16x256xbf16> to vector<16x256xbf16>
    %893 = arith.extf %892 : vector<16x256xbf16> to vector<16x256xf32>
    %894 = arith.mulf %526, %893 : vector<16x256xf32>
    %cst_482 = arith.constant dense<0.000000e+00> : vector<256xf32>
    %895 = vector.multi_reduction <add>, %894, %cst_482 [0] : vector<16x256xf32> to vector<256xf32>
    %896 = vector.shape_cast %895 : vector<256xf32> to vector<1x256xf32>
    %c11_483 = arith.constant 11 : index
    %c0_484 = arith.constant 0 : index
    %897 = vector.load %arg5[%c11_483, %c0_484] : memref<18x256xbf16, #tpu.memory_space<vmem>>, vector<1x256xbf16>
    %898 = arith.extf %897 : vector<1x256xbf16> to vector<1x256xf32>
    %899 = arith.addf %896, %898 : vector<1x256xf32>
    %c0_485 = arith.constant 0 : index
    %c48_486 = arith.constant 48 : index
    %c0_487 = arith.constant 0 : index
    %c0_488 = arith.constant 0 : index
    %900 = vector.load %arg3[%c0_485, %c48_486, %c0_487, %c0_488] : memref<1x54x16x256xbf16, #tpu.memory_space<vmem>>, vector<1x1x16x256xbf16>
    %901 = vector.shape_cast %900 : vector<1x1x16x256xbf16> to vector<16x256xbf16>
    %902 = arith.extf %901 : vector<16x256xbf16> to vector<16x256xf32>
    %903 = arith.mulf %526, %902 : vector<16x256xf32>
    %cst_489 = arith.constant dense<0.000000e+00> : vector<256xf32>
    %904 = vector.multi_reduction <add>, %903, %cst_489 [0] : vector<16x256xf32> to vector<256xf32>
    %905 = vector.shape_cast %904 : vector<256xf32> to vector<1x256xf32>
    %c12_490 = arith.constant 12 : index
    %c0_491 = arith.constant 0 : index
    %906 = vector.load %arg5[%c12_490, %c0_491] : memref<18x256xbf16, #tpu.memory_space<vmem>>, vector<1x256xbf16>
    %907 = arith.extf %906 : vector<1x256xbf16> to vector<1x256xf32>
    %908 = arith.addf %905, %907 : vector<1x256xf32>
    %c0_492 = arith.constant 0 : index
    %c49 = arith.constant 49 : index
    %c0_493 = arith.constant 0 : index
    %c0_494 = arith.constant 0 : index
    %909 = vector.load %arg3[%c0_492, %c49, %c0_493, %c0_494] : memref<1x54x16x256xbf16, #tpu.memory_space<vmem>>, vector<1x1x16x256xbf16>
    %910 = vector.shape_cast %909 : vector<1x1x16x256xbf16> to vector<16x256xbf16>
    %911 = arith.extf %910 : vector<16x256xbf16> to vector<16x256xf32>
    %912 = arith.mulf %526, %911 : vector<16x256xf32>
    %cst_495 = arith.constant dense<0.000000e+00> : vector<256xf32>
    %913 = vector.multi_reduction <add>, %912, %cst_495 [0] : vector<16x256xf32> to vector<256xf32>
    %914 = vector.shape_cast %913 : vector<256xf32> to vector<1x256xf32>
    %c13_496 = arith.constant 13 : index
    %c0_497 = arith.constant 0 : index
    %915 = vector.load %arg5[%c13_496, %c0_497] : memref<18x256xbf16, #tpu.memory_space<vmem>>, vector<1x256xbf16>
    %916 = arith.extf %915 : vector<1x256xbf16> to vector<1x256xf32>
    %917 = arith.addf %914, %916 : vector<1x256xf32>
    %c0_498 = arith.constant 0 : index
    %c50 = arith.constant 50 : index
    %c0_499 = arith.constant 0 : index
    %c0_500 = arith.constant 0 : index
    %918 = vector.load %arg3[%c0_498, %c50, %c0_499, %c0_500] : memref<1x54x16x256xbf16, #tpu.memory_space<vmem>>, vector<1x1x16x256xbf16>
    %919 = vector.shape_cast %918 : vector<1x1x16x256xbf16> to vector<16x256xbf16>
    %920 = arith.extf %919 : vector<16x256xbf16> to vector<16x256xf32>
    %921 = arith.mulf %526, %920 : vector<16x256xf32>
    %cst_501 = arith.constant dense<0.000000e+00> : vector<256xf32>
    %922 = vector.multi_reduction <add>, %921, %cst_501 [0] : vector<16x256xf32> to vector<256xf32>
    %923 = vector.shape_cast %922 : vector<256xf32> to vector<1x256xf32>
    %c14_502 = arith.constant 14 : index
    %c0_503 = arith.constant 0 : index
    %924 = vector.load %arg5[%c14_502, %c0_503] : memref<18x256xbf16, #tpu.memory_space<vmem>>, vector<1x256xbf16>
    %925 = arith.extf %924 : vector<1x256xbf16> to vector<1x256xf32>
    %926 = arith.addf %923, %925 : vector<1x256xf32>
    %c0_504 = arith.constant 0 : index
    %c51 = arith.constant 51 : index
    %c0_505 = arith.constant 0 : index
    %c0_506 = arith.constant 0 : index
    %927 = vector.load %arg3[%c0_504, %c51, %c0_505, %c0_506] : memref<1x54x16x256xbf16, #tpu.memory_space<vmem>>, vector<1x1x16x256xbf16>
    %928 = vector.shape_cast %927 : vector<1x1x16x256xbf16> to vector<16x256xbf16>
    %929 = arith.extf %928 : vector<16x256xbf16> to vector<16x256xf32>
    %930 = arith.mulf %526, %929 : vector<16x256xf32>
    %cst_507 = arith.constant dense<0.000000e+00> : vector<256xf32>
    %931 = vector.multi_reduction <add>, %930, %cst_507 [0] : vector<16x256xf32> to vector<256xf32>
    %932 = vector.shape_cast %931 : vector<256xf32> to vector<1x256xf32>
    %c15_508 = arith.constant 15 : index
    %c0_509 = arith.constant 0 : index
    %933 = vector.load %arg5[%c15_508, %c0_509] : memref<18x256xbf16, #tpu.memory_space<vmem>>, vector<1x256xbf16>
    %934 = arith.extf %933 : vector<1x256xbf16> to vector<1x256xf32>
    %935 = arith.addf %932, %934 : vector<1x256xf32>
    %c0_510 = arith.constant 0 : index
    %c52 = arith.constant 52 : index
    %c0_511 = arith.constant 0 : index
    %c0_512 = arith.constant 0 : index
    %936 = vector.load %arg3[%c0_510, %c52, %c0_511, %c0_512] : memref<1x54x16x256xbf16, #tpu.memory_space<vmem>>, vector<1x1x16x256xbf16>
    %937 = vector.shape_cast %936 : vector<1x1x16x256xbf16> to vector<16x256xbf16>
    %938 = arith.extf %937 : vector<16x256xbf16> to vector<16x256xf32>
    %939 = arith.mulf %526, %938 : vector<16x256xf32>
    %cst_513 = arith.constant dense<0.000000e+00> : vector<256xf32>
    %940 = vector.multi_reduction <add>, %939, %cst_513 [0] : vector<16x256xf32> to vector<256xf32>
    %941 = vector.shape_cast %940 : vector<256xf32> to vector<1x256xf32>
    %c16_514 = arith.constant 16 : index
    %c0_515 = arith.constant 0 : index
    %942 = vector.load %arg5[%c16_514, %c0_515] : memref<18x256xbf16, #tpu.memory_space<vmem>>, vector<1x256xbf16>
    %943 = arith.extf %942 : vector<1x256xbf16> to vector<1x256xf32>
    %944 = arith.addf %941, %943 : vector<1x256xf32>
    %c0_516 = arith.constant 0 : index
    %c53 = arith.constant 53 : index
    %c0_517 = arith.constant 0 : index
    %c0_518 = arith.constant 0 : index
    %945 = vector.load %arg3[%c0_516, %c53, %c0_517, %c0_518] : memref<1x54x16x256xbf16, #tpu.memory_space<vmem>>, vector<1x1x16x256xbf16>
    %946 = vector.shape_cast %945 : vector<1x1x16x256xbf16> to vector<16x256xbf16>
    %947 = arith.extf %946 : vector<16x256xbf16> to vector<16x256xf32>
    %948 = arith.mulf %526, %947 : vector<16x256xf32>
    %cst_519 = arith.constant dense<0.000000e+00> : vector<256xf32>
    %949 = vector.multi_reduction <add>, %948, %cst_519 [0] : vector<16x256xf32> to vector<256xf32>
    %950 = vector.shape_cast %949 : vector<256xf32> to vector<1x256xf32>
    %c17_520 = arith.constant 17 : index
    %c0_521 = arith.constant 0 : index
    %951 = vector.load %arg5[%c17_520, %c0_521] : memref<18x256xbf16, #tpu.memory_space<vmem>>, vector<1x256xbf16>
    %952 = arith.extf %951 : vector<1x256xbf16> to vector<1x256xf32>
    %953 = arith.addf %950, %952 : vector<1x256xf32>
    %954 = arith.maximumf %881, %890 : vector<1x256xf32>
    %955 = arith.maximumf %954, %899 : vector<1x256xf32>
    %956 = arith.maximumf %955, %908 : vector<1x256xf32>
    %957 = arith.maximumf %956, %917 : vector<1x256xf32>
    %958 = arith.maximumf %957, %926 : vector<1x256xf32>
    %959 = arith.maximumf %958, %935 : vector<1x256xf32>
    %960 = arith.maximumf %959, %944 : vector<1x256xf32>
    %961 = arith.maximumf %960, %953 : vector<1x256xf32>
    %962 = arith.subf %881, %961 : vector<1x256xf32>
    %963 = math.exp %962 : vector<1x256xf32>
    %964 = arith.subf %890, %961 : vector<1x256xf32>
    %965 = math.exp %964 : vector<1x256xf32>
    %966 = arith.subf %899, %961 : vector<1x256xf32>
    %967 = math.exp %966 : vector<1x256xf32>
    %968 = arith.subf %908, %961 : vector<1x256xf32>
    %969 = math.exp %968 : vector<1x256xf32>
    %970 = arith.subf %917, %961 : vector<1x256xf32>
    %971 = math.exp %970 : vector<1x256xf32>
    %972 = arith.subf %926, %961 : vector<1x256xf32>
    %973 = math.exp %972 : vector<1x256xf32>
    %974 = arith.subf %935, %961 : vector<1x256xf32>
    %975 = math.exp %974 : vector<1x256xf32>
    %976 = arith.subf %944, %961 : vector<1x256xf32>
    %977 = math.exp %976 : vector<1x256xf32>
    %978 = arith.subf %953, %961 : vector<1x256xf32>
    %979 = math.exp %978 : vector<1x256xf32>
    %980 = arith.addf %963, %965 : vector<1x256xf32>
    %981 = arith.addf %980, %967 : vector<1x256xf32>
    %982 = arith.addf %981, %969 : vector<1x256xf32>
    %983 = arith.addf %982, %971 : vector<1x256xf32>
    %984 = arith.addf %983, %973 : vector<1x256xf32>
    %985 = arith.addf %984, %975 : vector<1x256xf32>
    %986 = arith.addf %985, %977 : vector<1x256xf32>
    %987 = arith.addf %986, %979 : vector<1x256xf32>
    %988 = tpu.reciprocal %987 {approx = true} : vector<1x256xf32> -> vector<1x256xf32>
    %c0_522 = arith.constant 0 : index
    %c45_523 = arith.constant 45 : index
    %c0_524 = arith.constant 0 : index
    %c0_525 = arith.constant 0 : index
    %989 = vector.load %arg4[%c0_522, %c45_523, %c0_524, %c0_525] : memref<1x54x16x256xbf16, #tpu.memory_space<vmem>>, vector<1x1x16x256xbf16>
    %990 = vector.shape_cast %989 : vector<1x1x16x256xbf16> to vector<16x256xbf16>
    %991 = arith.extf %990 : vector<16x256xbf16> to vector<16x256xf32>
    %992 = vector.broadcast %963 : vector<1x256xf32> to vector<16x256xf32>
    %993 = arith.mulf %992, %991 : vector<16x256xf32>
    %c0_526 = arith.constant 0 : index
    %c46_527 = arith.constant 46 : index
    %c0_528 = arith.constant 0 : index
    %c0_529 = arith.constant 0 : index
    %994 = vector.load %arg4[%c0_526, %c46_527, %c0_528, %c0_529] : memref<1x54x16x256xbf16, #tpu.memory_space<vmem>>, vector<1x1x16x256xbf16>
    %995 = vector.shape_cast %994 : vector<1x1x16x256xbf16> to vector<16x256xbf16>
    %996 = arith.extf %995 : vector<16x256xbf16> to vector<16x256xf32>
    %997 = vector.broadcast %965 : vector<1x256xf32> to vector<16x256xf32>
    %998 = arith.mulf %997, %996 : vector<16x256xf32>
    %999 = arith.addf %993, %998 : vector<16x256xf32>
    %c0_530 = arith.constant 0 : index
    %c47_531 = arith.constant 47 : index
    %c0_532 = arith.constant 0 : index
    %c0_533 = arith.constant 0 : index
    %1000 = vector.load %arg4[%c0_530, %c47_531, %c0_532, %c0_533] : memref<1x54x16x256xbf16, #tpu.memory_space<vmem>>, vector<1x1x16x256xbf16>
    %1001 = vector.shape_cast %1000 : vector<1x1x16x256xbf16> to vector<16x256xbf16>
    %1002 = arith.extf %1001 : vector<16x256xbf16> to vector<16x256xf32>
    %1003 = vector.broadcast %967 : vector<1x256xf32> to vector<16x256xf32>
    %1004 = arith.mulf %1003, %1002 : vector<16x256xf32>
    %1005 = arith.addf %999, %1004 : vector<16x256xf32>
    %c0_534 = arith.constant 0 : index
    %c48_535 = arith.constant 48 : index
    %c0_536 = arith.constant 0 : index
    %c0_537 = arith.constant 0 : index
    %1006 = vector.load %arg4[%c0_534, %c48_535, %c0_536, %c0_537] : memref<1x54x16x256xbf16, #tpu.memory_space<vmem>>, vector<1x1x16x256xbf16>
    %1007 = vector.shape_cast %1006 : vector<1x1x16x256xbf16> to vector<16x256xbf16>
    %1008 = arith.extf %1007 : vector<16x256xbf16> to vector<16x256xf32>
    %1009 = vector.broadcast %969 : vector<1x256xf32> to vector<16x256xf32>
    %1010 = arith.mulf %1009, %1008 : vector<16x256xf32>
    %1011 = arith.addf %1005, %1010 : vector<16x256xf32>
    %c0_538 = arith.constant 0 : index
    %c49_539 = arith.constant 49 : index
    %c0_540 = arith.constant 0 : index
    %c0_541 = arith.constant 0 : index
    %1012 = vector.load %arg4[%c0_538, %c49_539, %c0_540, %c0_541] : memref<1x54x16x256xbf16, #tpu.memory_space<vmem>>, vector<1x1x16x256xbf16>
    %1013 = vector.shape_cast %1012 : vector<1x1x16x256xbf16> to vector<16x256xbf16>
    %1014 = arith.extf %1013 : vector<16x256xbf16> to vector<16x256xf32>
    %1015 = vector.broadcast %971 : vector<1x256xf32> to vector<16x256xf32>
    %1016 = arith.mulf %1015, %1014 : vector<16x256xf32>
    %1017 = arith.addf %1011, %1016 : vector<16x256xf32>
    %c0_542 = arith.constant 0 : index
    %c50_543 = arith.constant 50 : index
    %c0_544 = arith.constant 0 : index
    %c0_545 = arith.constant 0 : index
    %1018 = vector.load %arg4[%c0_542, %c50_543, %c0_544, %c0_545] : memref<1x54x16x256xbf16, #tpu.memory_space<vmem>>, vector<1x1x16x256xbf16>
    %1019 = vector.shape_cast %1018 : vector<1x1x16x256xbf16> to vector<16x256xbf16>
    %1020 = arith.extf %1019 : vector<16x256xbf16> to vector<16x256xf32>
    %1021 = vector.broadcast %973 : vector<1x256xf32> to vector<16x256xf32>
    %1022 = arith.mulf %1021, %1020 : vector<16x256xf32>
    %1023 = arith.addf %1017, %1022 : vector<16x256xf32>
    %c0_546 = arith.constant 0 : index
    %c51_547 = arith.constant 51 : index
    %c0_548 = arith.constant 0 : index
    %c0_549 = arith.constant 0 : index
    %1024 = vector.load %arg4[%c0_546, %c51_547, %c0_548, %c0_549] : memref<1x54x16x256xbf16, #tpu.memory_space<vmem>>, vector<1x1x16x256xbf16>
    %1025 = vector.shape_cast %1024 : vector<1x1x16x256xbf16> to vector<16x256xbf16>
    %1026 = arith.extf %1025 : vector<16x256xbf16> to vector<16x256xf32>
    %1027 = vector.broadcast %975 : vector<1x256xf32> to vector<16x256xf32>
    %1028 = arith.mulf %1027, %1026 : vector<16x256xf32>
    %1029 = arith.addf %1023, %1028 : vector<16x256xf32>
    %c0_550 = arith.constant 0 : index
    %c52_551 = arith.constant 52 : index
    %c0_552 = arith.constant 0 : index
    %c0_553 = arith.constant 0 : index
    %1030 = vector.load %arg4[%c0_550, %c52_551, %c0_552, %c0_553] : memref<1x54x16x256xbf16, #tpu.memory_space<vmem>>, vector<1x1x16x256xbf16>
    %1031 = vector.shape_cast %1030 : vector<1x1x16x256xbf16> to vector<16x256xbf16>
    %1032 = arith.extf %1031 : vector<16x256xbf16> to vector<16x256xf32>
    %1033 = vector.broadcast %977 : vector<1x256xf32> to vector<16x256xf32>
    %1034 = arith.mulf %1033, %1032 : vector<16x256xf32>
    %1035 = arith.addf %1029, %1034 : vector<16x256xf32>
    %c0_554 = arith.constant 0 : index
    %c53_555 = arith.constant 53 : index
    %c0_556 = arith.constant 0 : index
    %c0_557 = arith.constant 0 : index
    %1036 = vector.load %arg4[%c0_554, %c53_555, %c0_556, %c0_557] : memref<1x54x16x256xbf16, #tpu.memory_space<vmem>>, vector<1x1x16x256xbf16>
    %1037 = vector.shape_cast %1036 : vector<1x1x16x256xbf16> to vector<16x256xbf16>
    %1038 = arith.extf %1037 : vector<16x256xbf16> to vector<16x256xf32>
    %1039 = vector.broadcast %979 : vector<1x256xf32> to vector<16x256xf32>
    %1040 = arith.mulf %1039, %1038 : vector<16x256xf32>
    %1041 = arith.addf %1035, %1040 : vector<16x256xf32>
    %1042 = vector.broadcast %988 : vector<1x256xf32> to vector<16x256xf32>
    %1043 = arith.mulf %1041, %1042 : vector<16x256xf32>
    %1044 = arith.truncf %1043 : vector<16x256xf32> to vector<16x256xbf16>
    %c80 = arith.constant 80 : index
    %c0_558 = arith.constant 0 : index
    %1045 = vector.load %arg9[%c80, %c0_558] : memref<96x256xbf16, #tpu.memory_space<vmem>>, vector<16x256xbf16>
    tpu.vector_store %arg9[%c80, %c0_558], %1044 {strides = array<i32>} : memref<96x256xbf16, #tpu.memory_space<vmem>>, vector<16x256xbf16>,
    %c0_559 = arith.constant 0 : index
    %c0_560 = arith.constant 0 : index
    %1046 = vector.load %arg6[%c0_559, %c0_560] : memref<32x96xbf16, #tpu.memory_space<vmem>>, vector<32x96xbf16>
    %c0_561 = arith.constant 0 : index
    %c0_562 = arith.constant 0 : index
    %1047 = vector.load %arg9[%c0_561, %c0_562] : memref<96x256xbf16, #tpu.memory_space<vmem>>, vector<96x256xbf16>
    %cst_563 = arith.constant dense<0.000000e+00> : vector<32x256xf32>
    %1048 = tpu.matmul %1046, %1047, %cst_563 {dimension_numbers = #tpu.dot_dimension_numbers<[1], [0], [0], [1], [0, 0, 1, 1], [], []>} : vector<32x96xbf16>, vector<96x256xbf16>, vector<32x256xf32> -> vector<32x256xf32>
    %c0_564 = arith.constant 0 : index
    %c0_565 = arith.constant 0 : index
    %1049 = vector.load %arg7[%c0_564, %c0_565] : memref<32x1xf32, #tpu.memory_space<vmem>>, vector<32x1xf32>
    %1050 = vector.broadcast %1049 : vector<32x1xf32> to vector<32x256xf32>
    %1051 = arith.addf %1048, %1050 : vector<32x256xf32>
    %c0_566 = arith.constant 0 : index
    %c0_567 = arith.constant 0 : index
    %c0_568 = arith.constant 0 : index
    %1052 = vector.load %arg8[%c0_566, %c0_567, %c0_568] : memref<1x32x256xf32, #tpu.memory_space<vmem>>, vector<1x32x256xf32>
    %1053 = vector.shape_cast %1052 : vector<1x32x256xf32> to vector<32x256xf32>
    %1054 = vector.shape_cast %1051 : vector<32x256xf32> to vector<1x32x256xf32>
    tpu.vector_store %arg8[%c0_566, %c0_567, %c0_568], %1054 {strides = array<i32>} : memref<1x32x256xf32, #tpu.memory_space<vmem>>, vector<1x32x256xf32>,
    return
  }
  func.func @transform_0(%arg0: i32, %arg1: i32) -> (i32, i32, i32, i32) {
    %c0_i32 = arith.constant 0 : i32
    %c0_i32_0 = arith.constant 0 : i32
    %c0_i32_1 = arith.constant 0 : i32
    return %arg0, %c0_i32, %c0_i32_0, %arg1 : i32, i32, i32, i32
  }
  func.func @transform_1(%arg0: i32, %arg1: i32) -> (i32, i32, i32, i32) {
    %c0_i32 = arith.constant 0 : i32
    %c0_i32_0 = arith.constant 0 : i32
    %c0_i32_1 = arith.constant 0 : i32
    return %arg0, %c0_i32, %c0_i32_0, %arg1 : i32, i32, i32, i32
  }
  func.func @transform_2(%arg0: i32, %arg1: i32) -> (i32, i32, i32, i32) {
    %c0_i32 = arith.constant 0 : i32
    %c0_i32_0 = arith.constant 0 : i32
    %c0_i32_1 = arith.constant 0 : i32
    return %arg0, %c0_i32, %c0_i32_0, %arg1 : i32, i32, i32, i32
  }
  func.func @transform_3(%arg0: i32, %arg1: i32) -> (i32, i32) {
    %c0_i32 = arith.constant 0 : i32
    %c0_i32_0 = arith.constant 0 : i32
    return %c0_i32, %arg1 : i32, i32
  }
  func.func @transform_4(%arg0: i32, %arg1: i32) -> (i32, i32) {
    %c0_i32 = arith.constant 0 : i32
    %c0_i32_0 = arith.constant 0 : i32
    %c0_i32_1 = arith.constant 0 : i32
    return %c0_i32, %c0_i32_0 : i32, i32
  }
  func.func @transform_5(%arg0: i32, %arg1: i32) -> (i32, i32) {
    %c0_i32 = arith.constant 0 : i32
    %c0_i32_0 = arith.constant 0 : i32
    %c0_i32_1 = arith.constant 0 : i32
    return %c0_i32, %c0_i32_0 : i32, i32
  }
  func.func @transform_6(%arg0: i32, %arg1: i32) -> (i32, i32, i32) {
    %c0_i32 = arith.constant 0 : i32
    %c0_i32_0 = arith.constant 0 : i32
    return %arg0, %c0_i32, %arg1 : i32, i32, i32
  }
}

</mosaic_0001>

<bundles_post_ra>
// kernel: tna_forward.1
= control target key start
LH: loop header
LB: loop body
LE: loop exit
PB: predicated region body
PF: predicated region fallthrough
CT: control target
= control target key end

     0   :  { %s5478_s21 = smov 0   ;;  %s5480_s22 = smov 0   ;;  %s8201_s0 = inlined_call_operand.vmem [shape: f32[2,2,16,256], index: 0, kind: input, shape index: {}]   ;;  %s8202_s1 = inlined_call_operand.vmem [shape: bf16[2,54,16,256], index: 1, kind: input, shape index: {}]   ;;  %s8203_s2 = inlined_call_operand.vmem [shape: bf16[2,54,16,256], index: 2, kind: input, shape index: {}]   ;;  %s8204_s3 = inlined_call_operand.vmem [shape: bf16[18,256], index: 3, kind: input, shape index: {}]   ;;  %s8205_s4 = inlined_call_operand.vmem [shape: bf16[32,96], index: 4, kind: input, shape index: {}]   ;;  %s8206_s5 = inlined_call_operand.vmem [shape: f32[32,1], index: 5, kind: input, shape index: {}]   ;;  %s8207_s6 = inlined_call_operand.vmem [shape: f32[2,32,256], index: 6, kind: output, shape index: {}]  }
   0x1   :  { %s5482_s23 = smov 0  }
   0x2 LB: > { %s28_s24 = sadd.s32 1, %s5436_s22  ;;  %p4856_p0 = scmp.ge.s32.totalorder %s5440_s23, 1  ;;  %s5440_s23 = sphi %s5482_s23, %s16_s23   ;;  %s5436_s22 = sphi %s5480_s22, %s8579_s22   ;;  %s5432_s21 = sphi %s5478_s21, %s8578_s21  }
   0x3   : > { %p30_p1 = scmp.ge.s32.totalorder %s28_s24, 2  ;;  %p278_p2 = scmp.lt.s32.totalorder %s5440_s23, 3 }
   0x5   : > { %s8581_s24 = smov (%p30_p1, %s28_s24), 0  ;;  %p279_p3 = pnand %p4856_p0, %p278_p2 }
   0x7   : > { %282 = sbr.rel (%p279_p3) target bundleno = 988 (0x3dc), region = 44 }
   0xc   : > { %p340_p4 = scmp.lt.s32.totalorder %s5432_s21, 1  ;;  %v5499_v0 = vld [vmem:[%s8204_s3] sm:$0x11]  ;;  %v5504_v1 = vld [vmem:[%s8204_s3] sm:$0x22]  ;;  %vm4645_vm0 = vcmask 785408  }
   0xd   : > { %v5509_v2 = vld [vmem:[%s8204_s3] sm:$0x44]  ;;  %v5516_v3 = vld [vmem:[%s8204_s3] sm:$0x88]  ;;  %v5523_v4 = vld [vmem:[%s8204_s3 + $0x8] sm:$0x11]  ;;  %v419_v5 = vunpack.c.l.bf16 %v5499_v0  ;;  %v420_v6 = vunpack.c.h.bf16 %v5499_v0  ;;  %v476_v7 = vunpack.c.l.bf16 %v5504_v1  ;;  %v477_v8 = vunpack.c.h.bf16 %v5504_v1 }
   0xe   : > { %s8583_s21 = smov (!%p340_p4, %s5432_s21), 1  ;;  %v533_v12 = vunpack.c.l.bf16 %v5509_v2  ;;  %v534_v13 = vunpack.c.h.bf16 %v5509_v2  ;;  %v590_v14 = vunpack.c.l.bf16 %v5516_v3  ;;  %v591_v15 = vunpack.c.h.bf16 %v5516_v3 }
   0xf   : > { %s5109_s9 = sshll.u32 %s8583_s21, 6  ;;  %s5147_s10 = smul.u32 864, %s8583_s21  ;;  %v647_v22 = vunpack.c.l.bf16 %v5523_v4 }
  0x10   : > { %s5530_s15 = scalar_lea.vmem %s8201_s0, %s5109_s9  ;;  %s383_s14 = scalar_lea.vmem %s8207_s6, %s5109_s9 }
  0x11   : > { %s5541_s18 = scalar_lea.vmem %s8202_s1, %s5147_s10  ;;  %v386_v9 = vld [vmem:[%s5530_s15] sm:$0xff]  ;;  %v387_v10 = vld [vmem:[%s5530_s15 + $0x8] sm:$0xff]  ;;  %v388_v11 = vld [vmem:[%s5530_s15 + $0x10] sm:$0xff]  ;;  %s5756_s25 = scalar_lea.vmem %s8203_s2, %s5147_s10 }
  0x12   : > { %v389_v16 = vld [vmem:[%s5530_s15 + $0x18] sm:$0xff]  ;;  %v5551_v17 = vmul.f32 0.25, %v386_v9  ;;  %v5553_v18 = vmul.f32 0.25, %v387_v10  ;;  %v5555_v19 = vmul.f32 0.25, %v388_v11  ;;  %v394_v20 = vld [vmem:[%s5541_s18] sm:$0xff]  ;;  %v395_v21 = vld [vmem:[%s5541_s18 + $0x8] sm:$0xff] }
  0x13   : > { %v5560_v23 = vmul.f32 0.25, %v389_v16  ;;  %v396_v24 = vunpack.c.l.bf16 %v394_v20  ;;  %v397_v25 = vunpack.c.h.bf16 %v394_v20  ;;  %v398_v26 = vunpack.c.l.bf16 %v395_v21  ;;  %v4863_v27 = vld [vmem:[%s5541_s18 + $0x10] sm:$0xff]  ;;  %v4864_v28 = vld [vmem:[%s5541_s18 + $0x18] sm:$0xff]  ;;  %v4865_v33 = vld [vmem:[%s5541_s18 + $0x20] sm:$0xff] }
  0x14   : > { %8272 = vst [vmem:[#allocation3_spill] sm:$0xff] %v5553_v18  ;;  %8273 = vst [vmem:[#allocation4_spill] sm:$0xff] %v5555_v19  ;;  %v399_v29 = vunpack.c.h.bf16 %v395_v21  ;;  %v426_v30 = vunpack.c.l.bf16 %v4863_v27  ;;  %v427_v31 = vunpack.c.h.bf16 %v4863_v27  ;;  %v428_v32 = vunpack.c.l.bf16 %v4864_v28  ;;  %v4866_v38 = vld [vmem:[%s5541_s18 + $0x28] sm:$0xff]  ;;  %v4867_v51 = vld [vmem:[%s5541_s18 + $0x30] sm:$0xff] }
  0x15   : > { %8274 = vst [vmem:[#allocation5_spill] sm:$0xff] %v5560_v23  ;;  %v400_v34 = vmul.f32 %v396_v24, %v5551_v17  ;;  %v401_v35 = vmul.f32 %v397_v25, %v5553_v18  ;;  %v402_v36 = vmul.f32 %v398_v26, %v5555_v19  ;;  %v429_v37 = vunpack.c.h.bf16 %v4864_v28  ;;  %v4868_v60 = vld [vmem:[%s5541_s18 + $0x38] sm:$0xff] }
  0x16   : > { %v403_v39 = vmul.f32 %v399_v29, %v5560_v23  ;;  %v430_v40 = vmul.f32 %v426_v30, %v5551_v17  ;;  %v431_v41 = vmul.f32 %v427_v31, %v5553_v18  ;;  %v432_v42 = vmul.f32 %v428_v32, %v5555_v19 }
  0x17   : > { %v404_v43 = vadd.f32 %v402_v36, %v400_v34  ;;  %v433_v44 = vmul.f32 %v429_v37, %v5560_v23  ;;  %v453_v45 = vunpack.c.l.bf16 %v4865_v33  ;;  %v454_v46 = vunpack.c.h.bf16 %v4865_v33 }
  0x18   : > { %v411_v47 = vadd.f32 %v403_v39, %v401_v35  ;;  %v434_v48 = vadd.f32 %v432_v42, %v430_v40  ;;  %v455_v49 = vunpack.c.l.bf16 %v4866_v38  ;;  %v456_v50 = vunpack.c.h.bf16 %v4866_v38 }
  0x19   : > { %v405_v52 = vrot.slane %v404_v43, 4  ;;  %v441_v53 = vadd.f32 %v433_v44, %v431_v41  ;;  %v457_v54 = vmul.f32 %v453_v45, %v5551_v17  ;;  %v458_v55 = vmul.f32 %v454_v46, %v5553_v18 }
  0x1a   : > { %v412_v56 = vrot.slane %v411_v47, 4  ;;  %v435_v57 = vrot.slane %v434_v48, 4  ;;  %v459_v58 = vmul.f32 %v455_v49, %v5555_v19  ;;  %v460_v59 = vmul.f32 %v456_v50, %v5560_v23 }
  0x1b   : > { %v406_v61 = vadd.f32 %v405_v52, %v404_v43  ;;  %v442_v62 = vrot.slane %v441_v53, 4  ;;  %v483_v63 = vunpack.c.l.bf16 %v4867_v51  ;;  %v484_v9 = vunpack.c.h.bf16 %v4867_v51 }
  0x1c   : > { %v413_v10 = vadd.f32 %v412_v56, %v411_v47  ;;  %v436_v11 = vadd.f32 %v435_v57, %v434_v48  ;;  %v461_v16 = vadd.f32 %v459_v58, %v457_v54  ;;  %v468_v20 = vadd.f32 %v460_v59, %v458_v55  ;;  %v4869_v55 = vld [vmem:[%s5541_s18 + $0x40] sm:$0xff] }
  0x1d   : > { %v407_v21 = vrot.slane %v406_v61, 2  ;;  %v443_v24 = vadd.f32 %v442_v62, %v441_v53  ;;  %v485_v25 = vunpack.c.l.bf16 %v4868_v60  ;;  %v486_v26 = vunpack.c.h.bf16 %v4868_v60  ;;  %v4870_v60 = vld [vmem:[%s5541_s18 + $0x48] sm:$0xff] }
  0x1e   : > { %v414_v27 = vrot.slane %v413_v10, 2  ;;  %v437_v28 = vrot.slane %v436_v11, 2  ;;  %v462_v29 = vrot.slane %v461_v16, 4  ;;  %v469_v30 = vrot.slane %v468_v20, 4 }
  0x1f   : > { %v408_v31 = vadd.f32 %v407_v21, %v406_v61  ;;  %v444_v32 = vrot.slane %v443_v24, 2  ;;  %v487_v33 = vmul.f32 %v483_v63, %v5551_v17  ;;  %v488_v34 = vmul.f32 %v484_v9, %v5553_v18 }
  0x20   : > { %v415_v35 = vadd.f32 %v414_v27, %v413_v10  ;;  %v438_v36 = vadd.f32 %v437_v28, %v436_v11  ;;  %v463_v37 = vadd.f32 %v462_v29, %v461_v16  ;;  %v470_v38 = vadd.f32 %v469_v30, %v468_v20  ;;  %v4871_v27 = vld [vmem:[%s5541_s18 + $0x50] sm:$0xff] }
  0x21   : > { %v409_v39 = vrot.slane %v408_v31, 1  ;;  %v445_v40 = vadd.f32 %v444_v32, %v443_v24  ;;  %v489_v41 = vmul.f32 %v485_v25, %v5555_v19  ;;  %v490_v42 = vmul.f32 %v486_v26, %v5560_v23 }
  0x22   : > { %v416_v43 = vrot.slane %v415_v35, 1  ;;  %v439_v44 = vrot.slane %v438_v36, 1  ;;  %v464_v45 = vrot.slane %v463_v37, 2  ;;  %v471_v46 = vrot.slane %v470_v38, 2 }
  0x23   : > { %v410_v47 = vadd.f32 %v409_v39, %v408_v31  ;;  %v446_v48 = vrot.slane %v445_v40, 1  ;;  %v491_v49 = vadd.f32 %v489_v41, %v487_v33  ;;  %v498_v50 = vadd.f32 %v490_v42, %v488_v34  ;;  %v4872_v31 = vld [vmem:[%s5541_s18 + $0x58] sm:$0xff]  ;;  %v4873_v42 = vld [vmem:[%s5541_s18 + $0x60] sm:$0xff] }
  0x24   : > { %v417_v51 = vadd.f32 %v416_v43, %v415_v35  ;;  %v440_v52 = vadd.f32 %v439_v44, %v438_v36  ;;  %v465_v53 = vadd.f32 %v464_v45, %v463_v37  ;;  %v472_v54 = vadd.f32 %v471_v46, %v470_v38 }
  0x25   : > { %v5587_v56 = vadd.f32 %v419_v5, %v410_v47  ;;  %v447_v57 = vadd.f32 %v446_v48, %v445_v40  ;;  %v492_v58 = vrot.slane %v491_v49, 4  ;;  %v499_v59 = vrot.slane %v498_v50, 4 }
  0x26   : > { %v5592_v61 = vadd.f32 %v420_v6, %v417_v51  ;;  %v5596_v62 = vadd.f32 %v440_v52, %v419_v5  ;;  %v466_v63 = vrot.slane %v465_v53, 1  ;;  %v473_v9 = vrot.slane %v472_v54, 1  ;;  %v4874_v51 = vld [vmem:[%s5541_s18 + $0x68] sm:$0xff] }
  0x27   : > { %v5600_v10 = vadd.f32 %v447_v57, %v420_v6  ;;  %v493_v11 = vadd.f32 %v492_v58, %v491_v49  ;;  %v500_v16 = vadd.f32 %v499_v59, %v498_v50  ;;  %v510_v20 = vunpack.c.l.bf16 %v4869_v55 }
  0x28   : > { %v467_v21 = vadd.f32 %v466_v63, %v465_v53  ;;  %v474_v24 = vadd.f32 %v473_v9, %v472_v54  ;;  %v511_v25 = vunpack.c.h.bf16 %v4869_v55  ;;  %v512_v26 = vunpack.c.l.bf16 %v4870_v60 }
  0x29   : > { %v494_v28 = vrot.slane %v493_v11, 2  ;;  %v501_v29 = vrot.slane %v500_v16, 2  ;;  %v513_v5 = vunpack.c.h.bf16 %v4870_v60  ;;  %v514_v30 = vmul.f32 %v510_v20, %v5551_v17 }
  0x2a   : > { %v5607_v0 = vadd.f32 %v476_v7, %v467_v21  ;;  %v5611_v6 = vadd.f32 %v477_v8, %v474_v24  ;;  %v515_v32 = vmul.f32 %v511_v25, %v5553_v18  ;;  %v516_v33 = vmul.f32 %v512_v26, %v5555_v19  ;;  %v4875_v26 = vld [vmem:[%s5541_s18 + $0x70] sm:$0xff] }
  0x2b   : > { %v495_v34 = vadd.f32 %v494_v28, %v493_v11  ;;  %v502_v35 = vadd.f32 %v501_v29, %v500_v16  ;;  %v517_v36 = vmul.f32 %v513_v5, %v5560_v23  ;;  %v540_v37 = vunpack.c.l.bf16 %v4871_v27 }
  0x2c   : > { %v518_v38 = vadd.f32 %v516_v33, %v514_v30  ;;  %v541_v39 = vunpack.c.h.bf16 %v4871_v27  ;;  %v542_v40 = vunpack.c.l.bf16 %v4872_v31  ;;  %v543_v41 = vunpack.c.h.bf16 %v4872_v31  ;;  %v4876_v31 = vld [vmem:[%s5541_s18 + $0x78] sm:$0xff] }
  0x2d   : > { %v496_v43 = vrot.slane %v495_v34, 1  ;;  %v503_v44 = vrot.slane %v502_v35, 1  ;;  %v525_v45 = vadd.f32 %v517_v36, %v515_v32  ;;  %v544_v46 = vmul.f32 %v540_v37, %v5551_v17 }
  0x2e   : > { %v519_v47 = vrot.slane %v518_v38, 4  ;;  %v545_v48 = vmul.f32 %v541_v39, %v5553_v18  ;;  %v546_v49 = vmul.f32 %v542_v40, %v5555_v19  ;;  %v547_v50 = vmul.f32 %v543_v41, %v5560_v23 }
  0x2f   : > { %v497_v52 = vadd.f32 %v496_v43, %v495_v34  ;;  %v504_v53 = vadd.f32 %v503_v44, %v502_v35  ;;  %v526_v54 = vrot.slane %v525_v45, 4  ;;  %v567_v55 = vunpack.c.l.bf16 %v4873_v42 }
  0x30   : > { %v520_v57 = vadd.f32 %v519_v47, %v518_v38  ;;  %v548_v58 = vadd.f32 %v546_v49, %v544_v46  ;;  %v555_v59 = vadd.f32 %v547_v50, %v545_v48  ;;  %v568_v60 = vunpack.c.h.bf16 %v4873_v42 }
  0x31   : > { %v5624_v63 = vadd.f32 %v497_v52, %v476_v7  ;;  %v5628_v9 = vadd.f32 %v504_v53, %v477_v8  ;;  %v527_v11 = vadd.f32 %v526_v54, %v525_v45  ;;  %v569_v16 = vunpack.c.l.bf16 %v4874_v51  ;;  %v4877_v52 = vld [vmem:[%s5541_s18 + $0x80] sm:$0xff] }
  0x32   : > { %v521_v20 = vrot.slane %v520_v57, 2  ;;  %v549_v21 = vrot.slane %v548_v58, 4  ;;  %v556_v24 = vrot.slane %v555_v59, 4  ;;  %v570_v25 = vunpack.c.h.bf16 %v4874_v51 }
  0x33   : > { %v528_v27 = vrot.slane %v527_v11, 2  ;;  %v571_v28 = vmul.f32 %v567_v55, %v5551_v17  ;;  %v572_v29 = vmul.f32 %v568_v60, %v5553_v18  ;;  %v573_v7 = vmul.f32 %v569_v16, %v5555_v19  ;;  %v4878_v16 = vld [vmem:[%s5541_s18 + $0x88] sm:$0xff] }
  0x34   : > { %v522_v5 = vadd.f32 %v521_v20, %v520_v57  ;;  %v550_v30 = vadd.f32 %v549_v21, %v548_v58  ;;  %v557_v1 = vadd.f32 %v556_v24, %v555_v59  ;;  %v574_v8 = vmul.f32 %v570_v25, %v5560_v23 }
  0x35   : > { %v529_v32 = vadd.f32 %v528_v27, %v527_v11  ;;  %v575_v33 = vadd.f32 %v573_v7, %v571_v28  ;;  %v597_v34 = vunpack.c.l.bf16 %v4875_v26  ;;  %v598_v35 = vunpack.c.h.bf16 %v4875_v26 }
  0x36   : > { %v523_v36 = vrot.slane %v522_v5, 1  ;;  %v551_v37 = vrot.slane %v550_v30, 2  ;;  %v558_v38 = vrot.slane %v557_v1, 2  ;;  %v582_v39 = vadd.f32 %v574_v8, %v572_v29 }
  0x37   : > { %v530_v40 = vrot.slane %v529_v32, 1  ;;  %v576_v41 = vrot.slane %v575_v33, 4  ;;  %v599_v42 = vunpack.c.l.bf16 %v4876_v31  ;;  %v600_v43 = vunpack.c.h.bf16 %v4876_v31 }
  0x38   : > { %v524_v44 = vadd.f32 %v523_v36, %v522_v5  ;;  %v552_v45 = vadd.f32 %v551_v37, %v550_v30  ;;  %v559_v46 = vadd.f32 %v558_v38, %v557_v1  ;;  %v583_v47 = vrot.slane %v582_v39, 4 }
  0x39   : > { %v531_v48 = vadd.f32 %v530_v40, %v529_v32  ;;  %v577_v49 = vadd.f32 %v576_v41, %v575_v33  ;;  %v601_v50 = vmul.f32 %v597_v34, %v5551_v17  ;;  %v602_v51 = vmul.f32 %v598_v35, %v5553_v18 }
  0x3a   : > { %v5641_v53 = vadd.f32 %v533_v12, %v524_v44  ;;  %v553_v54 = vrot.slane %v552_v45, 1  ;;  %v560_v55 = vrot.slane %v559_v46, 1  ;;  %v584_v57 = vadd.f32 %v583_v47, %v582_v39 }
  0x3b   : > { %v5645_v58 = vadd.f32 %v534_v13, %v531_v48  ;;  %v578_v59 = vrot.slane %v577_v49, 2  ;;  %v603_v60 = vmul.f32 %v599_v42, %v5555_v19  ;;  %v604_v11 = vmul.f32 %v600_v43, %v5560_v23 }
  0x3c   : > { %v554_v20 = vadd.f32 %v553_v54, %v552_v45  ;;  %v561_v21 = vadd.f32 %v560_v55, %v559_v46  ;;  %v585_v24 = vrot.slane %v584_v57, 2  ;;  %v624_v25 = vunpack.c.l.bf16 %v4877_v52 }
  0x3d   : > { %v579_v26 = vadd.f32 %v578_v59, %v577_v49  ;;  %v605_v27 = vadd.f32 %v603_v60, %v601_v50  ;;  %v612_v28 = vadd.f32 %v604_v11, %v602_v51  ;;  %v625_v29 = vunpack.c.h.bf16 %v4877_v52 }
  0x3e   : > { %v5652_v7 = vadd.f32 %v554_v20, %v533_v12  ;;  %v5656_v5 = vadd.f32 %v561_v21, %v534_v13  ;;  %v586_v30 = vadd.f32 %v585_v24, %v584_v57  ;;  %v626_v1 = vunpack.c.l.bf16 %v4878_v16 }
  0x3f   : > { %v580_v8 = vrot.slane %v579_v26, 1  ;;  %v606_v31 = vrot.slane %v605_v27, 4  ;;  %v613_v32 = vrot.slane %v612_v28, 4  ;;  %v627_v33 = vunpack.c.h.bf16 %v4878_v16 }
  0x40   : > { %v587_v34 = vrot.slane %v586_v30, 1  ;;  %v628_v35 = vmul.f32 %v624_v25, %v5551_v17  ;;  %v629_v36 = vmul.f32 %v625_v29, %v5553_v18  ;;  %v630_v37 = vmul.f32 %v626_v1, %v5555_v19 }
  0x41   : > { %v581_v38 = vadd.f32 %v580_v8, %v579_v26  ;;  %v607_v12 = vadd.f32 %v606_v31, %v605_v27  ;;  %v614_v39 = vadd.f32 %v613_v32, %v612_v28  ;;  %v631_v2 = vmul.f32 %v627_v33, %v5560_v23 }
  0x42   : > { %v588_v13 = vadd.f32 %v587_v34, %v586_v30  ;;  %v632_v40 = vadd.f32 %v630_v37, %v628_v35  ;;  %v653_v41 = vrot.slane %v5596_v62, 1  ;;  %v654_v42 = vrot.slane %v5600_v10, 1 }
  0x43   : > { %v5666_v43 = vadd.f32 %v590_v14, %v581_v38  ;;  %v608_v44 = vrot.slane %v607_v12, 2  ;;  %v615_v45 = vrot.slane %v614_v39, 2  ;;  %v639_v46 = vadd.f32 %v631_v2, %v629_v36 }
  0x44   : > { %v5670_v47 = vadd.f32 %v591_v15, %v588_v13  ;;  %v633_v48 = vrot.slane %v632_v40, 4  ;;  %v657_v49 = vmax.f32 %v5587_v56, %v653_v41  ;;  %v658_v50 = vmax.f32 %v5592_v61, %v654_v42 }
  0x45   : > { %v609_v51 = vadd.f32 %v608_v44, %v607_v12  ;;  %v616_v52 = vadd.f32 %v615_v45, %v614_v39  ;;  %v640_v54 = vrot.slane %v639_v46, 4  ;;  %v661_v55 = vrot.slane %v5607_v0, 2 }
  0x46   : > { %v634_v57 = vadd.f32 %v633_v48, %v632_v40  ;;  %v662_v59 = vrot.slane %v5611_v6, 2  ;;  %v669_v60 = vrot.slane %v5624_v63, 3  ;;  %v670_v11 = vrot.slane %v5628_v9, 3 }
  0x47   : > { %v610_v16 = vrot.slane %v609_v51, 1  ;;  %v617_v20 = vrot.slane %v616_v52, 1  ;;  %v641_v21 = vadd.f32 %v640_v54, %v639_v46  ;;  %v665_v24 = vmax.f32 %v657_v49, %v661_v55 }
  0x48   : > { %v635_v25 = vrot.slane %v634_v57, 2  ;;  %v666_v26 = vmax.f32 %v658_v50, %v662_v59  ;;  %v677_v27 = vrot.slane %v5641_v53, 4  ;;  %v678_v28 = vrot.slane %v5645_v58, 4 }
  0x49   : > { %v611_v29 = vadd.f32 %v610_v16, %v609_v51  ;;  %v618_v30 = vadd.f32 %v617_v20, %v616_v52  ;;  %v642_v1 = vrot.slane %v641_v21, 2  ;;  %v673_v8 = vmax.f32 %v665_v24, %v669_v60 }
  0x4a   : > { %v636_v31 = vadd.f32 %v635_v25, %v634_v57  ;;  %v674_v32 = vmax.f32 %v666_v26, %v670_v11  ;;  %v685_v33 = vrot.slane %v5652_v7, 5  ;;  %v686_v34 = vrot.slane %v5656_v5, 5 }
  0x4b   : > { %v5684_v35 = vadd.f32 %v611_v29, %v590_v14  ;;  %v5688_v36 = vadd.f32 %v618_v30, %v591_v15  ;;  %v643_v37 = vadd.f32 %v642_v1, %v641_v21  ;;  %v681_v38 = vmax.f32 %v673_v8, %v677_v27 }
  0x4c   : > { %v637_v12 = vrot.slane %v636_v31, 1  ;;  %v682_v39 = vmax.f32 %v674_v32, %v678_v28  ;;  %v693_v2 = vrot.slane %v5666_v43, 6  ;;  %v694_v13 = vrot.slane %v5670_v47, 6 }
  0x4d   : > { %v644_v40 = vrot.slane %v643_v37, 1  ;;  %v648_v41 = vunpack.c.h.bf16 %v5523_v4  ;;  %v689_v42 = vmax.f32 %v681_v38, %v685_v33  ;;  %v701_v44 = vrot.slane %v5684_v35, 7 }
  0x4e   : > { %v638_v14 = vadd.f32 %v637_v12, %v636_v31  ;;  %v690_v45 = vmax.f32 %v682_v39, %v686_v34  ;;  %v702_v3 = vrot.slane %v5688_v36, 7 }
  0x4f   : > { %v645_v15 = vadd.f32 %v644_v40, %v643_v37  ;;  %v697_v46 = vmax.f32 %v689_v42, %v693_v2 }
  0x50   : > { %v5697_v48 = vadd.f32 %v647_v22, %v638_v14  ;;  %v698_v49 = vmax.f32 %v690_v45, %v694_v13 }
  0x51   : > { %v5699_v50 = vadd.f32 %v648_v41, %v645_v15  ;;  %v705_v51 = vmax.f32 %v697_v46, %v701_v44 }
  0x52   : > { %v706_v52 = vmax.f32 %v698_v49, %v702_v3 }
  0x53   : > { %v5702_v54 = vmax.f32 %v705_v51, %v5697_v48 }
  0x54   : > { %v5705_v55 = vmax.f32 %v706_v52, %v5699_v50 }
  0x55   : > { %v709_v57 = vsub.f32 %v5587_v56, %v5702_v54  ;;  %v717_v59 = vrot.slane %v5702_v54, 7  ;;  %v727_v4 = vrot.slane %v5702_v54, 6  ;;  %v737_v22 = vrot.slane %v5702_v54, 5 }
  0x56   : > { %v710_v60 = vsub.f32 %v5592_v61, %v5705_v55  ;;  %v718_v11 = vrot.slane %v5705_v55, 7  ;;  %v728_v16 = vrot.slane %v5705_v55, 6  ;;  %v738_v20 = vrot.slane %v5705_v55, 5 }
  0x57   : > { %v711_v21 = vmul.f32 1.442695, %v709_v57  ;;  %v721_v24 = vsub.f32 %v5596_v62, %v717_v59  ;;  %v731_v56 = vsub.f32 %v5607_v0, %v727_v4  ;;  %v741_v25 = vsub.f32 %v5624_v63, %v737_v22 }
  0x58   : > { %v713_v26 = vmul.f32 1.442695, %v710_v60  ;;  %v722_v27 = vsub.f32 %v5600_v10, %v718_v11  ;;  %v732_v28 = vsub.f32 %v5611_v6, %v728_v16  ;;  %v742_v61 = vsub.f32 %v5628_v9, %v738_v20 }
  0x59   : > { %5177 = vpow2.f32 %v711_v21  ;;  %v723_v29 = vmul.f32 1.442695, %v721_v24  ;;  %v733_v30 = vmul.f32 1.442695, %v731_v56  ;;  %v743_v31 = vmul.f32 1.442695, %v741_v25 }
  0x5a   : > { %5179 = vpow2.f32 %v713_v26  ;;  %v725_v1 = vmul.f32 1.442695, %v722_v27  ;;  %v735_v8 = vmul.f32 1.442695, %v732_v28  ;;  %v747_v62 = vrot.slane %v5702_v54, 4  ;;  %v853_v21 = vld [vmem:[%s5756_s25] sm:$0xff] }
  0x5b   : > { %5181 = vpow2.f32 %v723_v29  ;;  %v748_v0 = vrot.slane %v5705_v55, 4  ;;  %v757_v63 = vrot.slane %v5702_v54, 3  ;;  %v745_v10 = vmul.f32 1.442695, %v742_v61  ;;  %v4879_v61 = vld [vmem:[%s5756_s25 + $0x10] sm:$0xff] }
  0x5c   : > { %5183 = vpow2.f32 %v725_v1  ;;  %v758_v6 = vrot.slane %v5705_v55, 3  ;;  %v767_v9 = vrot.slane %v5702_v54, 2  ;;  %v751_v32 = vsub.f32 %v5641_v53, %v747_v62 }
  0x5d   : > { %5185 = vpow2.f32 %v733_v30  ;;  %v752_v33 = vsub.f32 %v5645_v58, %v748_v0  ;;  %v761_v34 = vsub.f32 %v5652_v7, %v757_v63  ;;  %v768_v37 = vrot.slane %v5705_v55, 2 }
  0x5e   : > { %5187 = vpow2.f32 %v735_v8  ;;  %v753_v38 = vmul.f32 1.442695, %v751_v32  ;;  %v762_v39 = vsub.f32 %v5656_v5, %v758_v6  ;;  %v771_v13 = vsub.f32 %v5666_v43, %v767_v9  ;;  %v4880_v6 = vld [vmem:[%s5756_s25 + $0x18] sm:$0xff] }
  0x5f   : > { %5189 = vpow2.f32 %v743_v31  ;;  %v755_v12 = vmul.f32 1.442695, %v752_v33  ;;  %v763_v2 = vmul.f32 1.442695, %v761_v34  ;;  %v777_v40 = vrot.slane %v5702_v54, 1 }
  0x60   : > { %5191 = vpow2.f32 %v745_v10  ;;  %v859_v53 = vlaneseq  ;;  %v765_v58 = vmul.f32 1.442695, %v762_v39  ;;  %v772_v7 = vsub.f32 %v5670_v47, %v768_v37 }
  0x61   : > { %5193 = vpow2.f32 %v753_v38  ;;  %v778_v41 = vrot.slane %v5705_v55, 1  ;;  %v773_v42 = vmul.f32 1.442695, %v771_v13  ;;  %v781_v44 = vsub.f32 %v5684_v35, %v777_v40  ;;  %v4881_v13 = vld [vmem:[%s5756_s25 + $0x20] sm:$0xff]  ;;  %v4882_v40 = vld [vmem:[%s5756_s25 + $0x28] sm:$0xff] }
  0x62   : > { %5195 = vpow2.f32 %v755_v12  ;;  %v5738_v5 = vshrl.u32 %v859_v53, 7  ;;  %v775_v43 = vmul.f32 1.442695, %v772_v7  ;;  %v787_v11 = vsub.f32 %v5697_v48, %v5702_v54  ;;  %v854_v54 = vld [vmem:[%s5756_s25 + $0x8] sm:$0xff] }
  0x63   : > { %5197 = vpow2.f32 %v763_v2  ;;  %v782_v3 = vsub.f32 %v5688_v36, %v778_v41  ;;  %v783_v46 = vmul.f32 1.442695, %v781_v44  ;;  %v788_v48 = vsub.f32 %v5699_v50, %v5705_v55 }
  0x64   : > { %5199 = vpow2.f32 %v765_v58  ;;  %v5744_v57 = vsub.s32 0, %v5738_v5  ;;  %v5747_v35 = vsub.s32 1, %v5738_v5  ;;  %v5769_v26 = vsub.s32 2, %v5738_v5 }
  0x65   : > { %5201 = vpow2.f32 %v773_v42  ;;  %v785_v36 = vmul.f32 1.442695, %v782_v3  ;;  %v5772_v27 = vsub.s32 3, %v5738_v5  ;;  %v5781_v29 = vsub.s32 4, %v5738_v5 }
  0x66   : > { %v5178_v14 = vpop.eup %5177  ;;  %8275 = vst [vmem:[#allocation6_spill] sm:$0xff] %v5744_v57  ;;  %8276 = vst [vmem:[#allocation7_spill] sm:$0xff] %v5747_v35  ;;  %5203 = vpow2.f32 %v775_v43  ;;  %v5784_v30 = vsub.s32 5, %v5738_v5  ;;  %v5787_v1 = vsub.s32 6, %v5738_v5  ;;  %v855_v62 = vunpack.c.l.bf16 %v853_v21 }
  0x67   : > { %v5180_v45 = vpop.eup %5179  ;;  %5205 = vpow2.f32 %v783_v46  ;;  %8277 = vst [vmem:[#allocation8_spill] sm:$0xff] %v5769_v26  ;;  %8278 = vst [vmem:[#allocation9_spill] sm:$0xff] %v5772_v27  ;;  %v789_v50 = vmul.f32 1.442695, %v787_v11  ;;  %v856_v10 = vunpack.c.h.bf16 %v853_v21  ;;  %v857_v32 = vunpack.c.l.bf16 %v854_v54 }
  0x68   : > { %v5182_v15 = vpop.eup %5181  ;;  %8279 = vst [vmem:[#allocation10_spill] sm:$0xff] %v5781_v29  ;;  %8280 = vst [vmem:[#allocation11_spill] sm:$0xff] %v5784_v30  ;;  %5207 = vpow2.f32 %v785_v36  ;;  %v858_v33 = vunpack.c.h.bf16 %v854_v54  ;;  %v862_v34 = vrot.slane %v5178_v14, %v5744_v57  ;;  %v874_v37 = vunpack.c.l.bf16 %v4879_v61 }
  0x69   : > { %v5184_v49 = vpop.eup %5183  ;;  %v795_v47 = vrot.slane %v5182_v15, 1  ;;  %8281 = vst [vmem:[#allocation12_spill] sm:$0xff] %v5787_v1  ;;  %v791_v38 = vmul.f32 1.442695, %v788_v48  ;;  %v866_v12 = vrot.slane %v5180_v45, %v5744_v57  ;;  %v875_v39 = vunpack.c.h.bf16 %v4879_v61 }
  0x6a   : > { %v5741_v51 = vpop.eup %5185  ;;  %v796_v52 = vrot.slane %v5184_v49, 1  ;;  %v881_v2 = vrot.slane %v5182_v15, %v5747_v35  ;;  %v876_v7 = vunpack.c.l.bf16 %v4880_v6  ;;  %v885_v41 = vrot.slane %v5184_v49, %v5747_v35 }
  0x6b   : > { %v5749_v59 = vpop.eup %5187  ;;  %v799_v4 = vadd.f32 %v5178_v14, %v795_v47  ;;  %v803_v22 = vrot.slane %v5741_v51, 2  ;;  %5209 = vpow2.f32 %v789_v50  ;;  %v867_v3 = vmul.f32 %v862_v34, %v855_v62 }
  0x6c   : > { %v5759_v60 = vpop.eup %5189  ;;  %v800_v16 = vadd.f32 %v5180_v45, %v796_v52  ;;  %v804_v20 = vrot.slane %v5749_v59, 2  ;;  %v877_v45 = vunpack.c.h.bf16 %v4880_v6  ;;  %v897_v15 = vunpack.c.l.bf16 %v4881_v13  ;;  %v4883_v52 = vld [vmem:[%s5756_s25 + $0x30] sm:$0xff] }
  0x6d   : > { %v5765_v24 = vpop.eup %5191  ;;  %v807_v56 = vadd.f32 %v803_v22, %v799_v4  ;;  %v811_v25 = vrot.slane %v5759_v60, 3  ;;  %v898_v46 = vunpack.c.h.bf16 %v4881_v13  ;;  %v899_v47 = vunpack.c.l.bf16 %v4882_v40  ;;  %v4884_v22 = vld [vmem:[%s5756_s25 + $0x38] sm:$0xff] }
  0x6e   : > { %v5774_v28 = vpop.eup %5193  ;;  %v808_v8 = vadd.f32 %v804_v20, %v800_v16  ;;  %v812_v31 = vrot.slane %v5765_v24, 3  ;;  %5211 = vpow2.f32 %v791_v38  ;;  %v868_v36 = vmul.f32 %v866_v12, %v856_v10 }
  0x6f   : > { %v5790_v0 = vpop.eup %5195  ;;  %v815_v55 = vadd.f32 %v811_v25, %v807_v56  ;;  %v819_v63 = vrot.slane %v5774_v28, 4  ;;  %v886_v4 = vmul.f32 %v881_v2, %v874_v37  ;;  %v904_v49 = vrot.slane %v5741_v51, %v5769_v26  ;;  %v4885_v37 = vld [vmem:[%s5756_s25 + $0x40] sm:$0xff] }
  0x70   : > { %v5794_v9 = vpop.eup %5197  ;;  %v816_v53 = vadd.f32 %v812_v31, %v808_v8  ;;  %v820_v58 = vrot.slane %v5790_v0, 4  ;;  %v887_v20 = vmul.f32 %v885_v41, %v875_v39  ;;  %v908_v21 = vrot.slane %v5749_v59, %v5769_v26 }
  0x71   : > { %v5803_v42 = vpop.eup %5199  ;;  %v823_v44 = vadd.f32 %v819_v63, %v815_v55  ;;  %v827_v14 = vrot.slane %v5794_v9, 5  ;;  %v900_v54 = vunpack.c.h.bf16 %v4882_v40  ;;  %v920_v61 = vunpack.c.l.bf16 %v4883_v52 }
  0x72   : > { %v5806_v43 = vpop.eup %5201  ;;  %v824_v11 = vadd.f32 %v820_v58, %v816_v53  ;;  %v828_v16 = vrot.slane %v5803_v42, 5  ;;  %v869_v31 = vmul.f32 %v862_v34, %v857_v32  ;;  %v888_v51 = vmul.f32 %v881_v2, %v876_v7 }
  0x73   : > { %v5815_v56 = vpop.eup %5203  ;;  %v831_v25 = vadd.f32 %v827_v14, %v823_v44  ;;  %v835_v48 = vrot.slane %v5806_v43, 6  ;;  %v921_v62 = vunpack.c.h.bf16 %v4883_v52  ;;  %v922_v50 = vunpack.c.l.bf16 %v4884_v22 }
  0x74   : > { %v5818_v8 = vpop.eup %5205  ;;  %v870_v55 = vmul.f32 %v866_v12, %v858_v33  ;;  %v889_v63 = vmul.f32 %v885_v41, %v877_v45  ;;  %v890_v10 = vadd.f32 %v886_v4, %v867_v3  ;;  %v909_v6 = vmul.f32 %v904_v49, %v897_v15  ;;  %v4886_v45 = vld [vmem:[%s5756_s25 + $0x48] sm:$0xff] }
  0x75   : > { %v832_v38 = vadd.f32 %v828_v16, %v824_v11  ;;  %v836_v59 = vrot.slane %v5815_v56, 6  ;;  %v891_v39 = vadd.f32 %v887_v20, %v868_v36  ;;  %v910_v13 = vmul.f32 %v908_v21, %v898_v46  ;;  %v5822_v53 = vpop.eup %5207  ;;  %v5834_v36 = vld [vmem:[%s5756_s25 + $0x50] sm:$0xff] }
  0x76   : > { %v839_v40 = vadd.f32 %v835_v48, %v831_v25  ;;  %v843_v58 = vrot.slane %v5818_v8, 7  ;;  %v927_v32 = vrot.slane %v5759_v60, %v5772_v27  ;;  %v931_v33 = vrot.slane %v5765_v24, %v5772_v27 }
  0x77   : > { %v892_v34 = vadd.f32 %v888_v51, %v869_v31  ;;  %v911_v12 = vmul.f32 %v904_v49, %v899_v47  ;;  %v923_v2 = vunpack.c.h.bf16 %v4884_v22  ;;  %v943_v7 = vunpack.c.l.bf16 %v4885_v37  ;;  %v5839_v22 = vld [vmem:[%s5756_s25 + $0x58] sm:$0xff]  ;;  %v4897_v31 = vld [vmem:[%s5541_s18 + $0x120] sm:$0xff] }
  0x78   : > { %v893_v41 = vadd.f32 %v889_v63, %v870_v55  ;;  %v912_v44 = vmul.f32 %v908_v21, %v900_v54  ;;  %v913_v14 = vadd.f32 %v909_v6, %v890_v10  ;;  %v944_v3 = vunpack.c.h.bf16 %v4885_v37  ;;  %v5841_v11 = vpop.eup %5209 }
  0x79   : > { %v840_v15 = vadd.f32 %v836_v59, %v832_v38  ;;  %v844_v46 = vrot.slane %v5822_v53, 7  ;;  %v914_v52 = vadd.f32 %v910_v13, %v891_v39  ;;  %v950_v60 = vrot.slane %v5774_v28, %v5781_v29  ;;  %8282 = vst [vmem:[#allocation13_spill] sm:$0xff] %v5841_v11  ;;  %v5855_v59 = vld [vmem:[%s5756_s25 + $0x68] sm:$0xff] }
  0x7a   : > { %v847_v24 = vadd.f32 %v843_v58, %v839_v40  ;;  %v932_v47 = vmul.f32 %v927_v32, %v920_v61  ;;  %v933_v4 = vmul.f32 %v931_v33, %v921_v62  ;;  %v954_v49 = vrot.slane %v5790_v0, %v5781_v29  ;;  %v4898_v40 = vld [vmem:[%s5541_s18 + $0x128] sm:$0xff] }
  0x7b   : > { %v915_v16 = vadd.f32 %v911_v12, %v892_v34  ;;  %v934_v20 = vmul.f32 %v927_v32, %v922_v50  ;;  %v945_v21 = vunpack.c.l.bf16 %v4886_v45  ;;  %v946_v25 = vunpack.c.h.bf16 %v4886_v45  ;;  %v5846_v51 = vpop.eup %5211  ;;  %v5851_v50 = vld [vmem:[%s5756_s25 + $0x60] sm:$0xff] }
  0x7c   : > { %v916_v28 = vadd.f32 %v912_v44, %v893_v41  ;;  %v935_v48 = vmul.f32 %v931_v33, %v923_v2  ;;  %v966_v54 = vunpack.c.l.bf16 %v5834_v36  ;;  %8283 = vst [vmem:[#allocation14_spill] sm:$0xff] %v5846_v51  ;;  %v848_v0 = vadd.f32 %v844_v46, %v840_v15  ;;  %v4899_v46 = vld [vmem:[%s5541_s18 + $0x130] sm:$0xff] }
  0x7d   : > { %v955_v62 = vmul.f32 %v950_v60, %v943_v7  ;;  %v968_v55 = vunpack.c.l.bf16 %v5839_v22  ;;  %v849_v10 = vadd.f32 %v5841_v11, %v847_v24  ;;  %v936_v6 = vadd.f32 %v932_v47, %v913_v14  ;;  %v5879_v47 = vld [vmem:[%s8204_s3] sm:$0x11] }
  0x7e   : > { %v937_v37 = vadd.f32 %v933_v4, %v914_v52  ;;  %v956_v38 = vmul.f32 %v954_v49, %v944_v3  ;;  %v938_v39 = vadd.f32 %v934_v20, %v915_v16  ;;  %v957_v13 = vmul.f32 %v950_v60, %v945_v21  ;;  %v4900_v21 = vld [vmem:[%s5541_s18 + $0x138] sm:$0xff] }
  0x7f   : > { %v1084_v58 = vunpack.c.l.bf16 %v4897_v31  ;;  %v1085_v32 = vunpack.c.h.bf16 %v4897_v31  ;;  %v939_v33 = vadd.f32 %v935_v48, %v916_v28  ;;  %v958_v34 = vmul.f32 %v954_v49, %v946_v25 }
  0x80   : > { %v5861_v7 = vadd.f32 %v5846_v51, %v848_v0  ;;  %v973_v41 = vrot.slane %v5794_v9, %v5784_v30  ;;  %5213 = vrcp.f32 %v849_v10  ;;  %v5867_v45 = vadd.f32 %v955_v62, %v936_v6  ;;  %v4901_v0 = vld [vmem:[%s5541_s18 + $0x140] sm:$0xff] }
  0x81   : > { %v1086_v3 = vunpack.c.l.bf16 %v4898_v40  ;;  %v1087_v15 = vunpack.c.h.bf16 %v4898_v40  ;;  %v5870_v52 = vadd.f32 %v956_v38, %v937_v37  ;;  %v5872_v60 = vadd.f32 %v957_v13, %v938_v39  ;;  %v4902_v39 = vld [vmem:[%s5541_s18 + $0x148] sm:$0xff] }
  0x82   : > { %v1088_v24 = vmul.f32 %v1084_v58, %v5551_v17  ;;  %v1089_v9 = vmul.f32 %v1085_v32, %v5553_v18  ;;  %v5881_v4 = vadd.f32 %v958_v34, %v939_v33  ;;  %v5885_v49 = vrot.slane %v5803_v42, %v5784_v30 }
  0x83   : > { %v1090_v16 = vmul.f32 %v1086_v3, %v5555_v19  ;;  %v1091_v20 = vmul.f32 %v1087_v15, %v5560_v23  ;;  %v5890_v25 = vmul.f32 %v973_v41, %v966_v54  ;;  %v5892_v28 = vmul.f32 %v973_v41, %v968_v55  ;;  %v5913_v41 = vld [vmem:[%s8204_s3] sm:$0x22] }
  0x84   : > { %v1114_v48 = vunpack.c.l.bf16 %v4899_v46  ;;  %v1115_v31 = vunpack.c.h.bf16 %v4899_v46  ;;  %v5897_v62 = vrot.slane %v5806_v43, %v5787_v1  ;;  %v5901_v42 = vrot.slane %v5815_v56, %v5787_v1 }
  0x85   : > { %v1092_v37 = vadd.f32 %v1090_v16, %v1088_v24  ;;  %v1099_v54 = vadd.f32 %v1091_v20, %v1089_v9  ;;  %v1116_v38 = vunpack.c.l.bf16 %v4900_v21  ;;  %v1117_v55 = vunpack.c.h.bf16 %v4900_v21 }
  0x86   : > { %v1118_v13 = vmul.f32 %v1114_v48, %v5551_v17  ;;  %v1119_v40 = vmul.f32 %v1115_v31, %v5553_v18  ;;  %v1141_v43 = vunpack.c.l.bf16 %v4901_v0  ;;  %v1142_v58 = vunpack.c.h.bf16 %v4901_v0  ;;  %v4903_v48 = vld [vmem:[%s5541_s18 + $0x150] sm:$0xff] }
  0x87   : > { %v1093_v32 = vrot.slane %v1092_v37, 4  ;;  %v1100_v33 = vrot.slane %v1099_v54, 4  ;;  %v1120_v56 = vmul.f32 %v1116_v38, %v5555_v19  ;;  %v1121_v34 = vmul.f32 %v1117_v55, %v5560_v23 }
  0x88   : > { %v1143_v3 = vunpack.c.l.bf16 %v4902_v39  ;;  %v1144_v15 = vunpack.c.h.bf16 %v4902_v39  ;;  %v1145_v46 = vmul.f32 %v1141_v43, %v5551_v17  ;;  %v1146_v24 = vmul.f32 %v1142_v58, %v5553_v18  ;;  %v4904_v43 = vld [vmem:[%s5541_s18 + $0x158] sm:$0xff] }
  0x89   : > { %v1094_v9 = vadd.f32 %v1093_v32, %v1092_v37  ;;  %v1101_v16 = vadd.f32 %v1100_v33, %v1099_v54  ;;  %v1122_v20 = vadd.f32 %v1120_v56, %v1118_v13  ;;  %v1129_v21 = vadd.f32 %v1121_v34, %v1119_v40 }
  0x8a   : > { %v1147_v31 = vmul.f32 %v1143_v3, %v5555_v19  ;;  %v1148_v0 = vmul.f32 %v1144_v15, %v5560_v23  ;;  %v1171_v37 = vunpack.c.l.bf16 %v4903_v48  ;;  %v1172_v54 = vunpack.c.h.bf16 %v4903_v48 }
  0x8b   : > { %v1095_v14 = vrot.slane %v1094_v9, 2  ;;  %v1102_v39 = vrot.slane %v1101_v16, 2  ;;  %v1123_v44 = vrot.slane %v1122_v20, 4  ;;  %v1130_v2 = vrot.slane %v1129_v21, 4 }
  0x8c   : > { %v1149_v12 = vadd.f32 %v1147_v31, %v1145_v46  ;;  %v1156_v58 = vadd.f32 %v1148_v0, %v1146_v24  ;;  %v1173_v15 = vunpack.c.l.bf16 %v4904_v43  ;;  %v1174_v63 = vunpack.c.h.bf16 %v4904_v43  ;;  %v4905_v0 = vld [vmem:[%s5541_s18 + $0x160] sm:$0xff] }
  0x8d   : > { %v5923_v13 = vpop.eup %5213  ;;  %v1096_v40 = vadd.f32 %v1095_v14, %v1094_v9  ;;  %v1103_v32 = vadd.f32 %v1102_v39, %v1101_v16  ;;  %v1124_v33 = vadd.f32 %v1123_v44, %v1122_v20  ;;  %v1131_v56 = vadd.f32 %v1130_v2, %v1129_v21 }
  0x8e   : > { %8284 = vst [vmem:[#allocation15_spill] sm:$0xff] %v5923_v13  ;;  %v1150_v34 = vrot.slane %v1149_v12, 4  ;;  %v1157_v3 = vrot.slane %v1156_v58, 4  ;;  %v1175_v24 = vmul.f32 %v1171_v37, %v5551_v17  ;;  %v1176_v48 = vmul.f32 %v1172_v54, %v5553_v18 }
  0x8f   : > { %v1097_v61 = vrot.slane %v1096_v40, 1  ;;  %v1104_v55 = vrot.slane %v1103_v32, 1  ;;  %v1125_v38 = vrot.slane %v1124_v33, 2  ;;  %v1132_v6 = vrot.slane %v1131_v56, 2 }
  0x90   : > { %v1151_v10 = vadd.f32 %v1150_v34, %v1149_v12  ;;  %v1158_v46 = vadd.f32 %v1157_v3, %v1156_v58  ;;  %v1177_v20 = vmul.f32 %v1173_v15, %v5555_v19  ;;  %v1178_v21 = vmul.f32 %v1174_v63, %v5560_v23 }
  0x91   : > { %v1098_v31 = vadd.f32 %v1097_v61, %v1096_v40  ;;  %v1105_v14 = vadd.f32 %v1104_v55, %v1103_v32  ;;  %v1126_v44 = vadd.f32 %v1125_v38, %v1124_v33  ;;  %v1133_v2 = vadd.f32 %v1132_v6, %v1131_v56  ;;  %v4906_v40 = vld [vmem:[%s5541_s18 + $0x168] sm:$0xff] }
  0x92   : > { %v1152_v9 = vrot.slane %v1151_v10, 2  ;;  %v1159_v16 = vrot.slane %v1158_v46, 2  ;;  %v8285_v39 = vunpack.c.l.bf16 %v5879_v47  ;;  %v8286_v43 = vunpack.c.h.bf16 %v5879_v47 }
  0x93   : > { %v1127_v61 = vrot.slane %v1126_v44, 1  ;;  %v1134_v55 = vrot.slane %v1133_v2, 1  ;;  %v1179_v6 = vadd.f32 %v1177_v20, %v1175_v24  ;;  %v1186_v54 = vadd.f32 %v1178_v21, %v1176_v48 }
  0x94   : > { %v5932_v12 = vadd.f32 %v8285_v39, %v1098_v31  ;;  %v5936_v58 = vadd.f32 %v8286_v43, %v1105_v14  ;;  %v1153_v37 = vadd.f32 %v1152_v9, %v1151_v10  ;;  %v1160_v38 = vadd.f32 %v1159_v16, %v1158_v46  ;;  %v5950_v16 = vld [vmem:[%s8204_s3] sm:$0x44] }
  0x95   : > { %v1128_v32 = vadd.f32 %v1127_v61, %v1126_v44  ;;  %v1135_v33 = vadd.f32 %v1134_v55, %v1133_v2  ;;  %v1198_v56 = vunpack.c.l.bf16 %v4905_v0  ;;  %v1199_v63 = vunpack.c.h.bf16 %v4905_v0  ;;  %v4907_v61 = vld [vmem:[%s5541_s18 + $0x170] sm:$0xff] }
  0x96   : > { %v1154_v34 = vrot.slane %v1153_v37, 1  ;;  %v1161_v3 = vrot.slane %v1160_v38, 1  ;;  %v1180_v15 = vrot.slane %v1179_v6, 4  ;;  %v1187_v31 = vrot.slane %v1186_v54, 4 }
  0x97   : > { %v5941_v14 = vadd.f32 %v1128_v32, %v8285_v39  ;;  %v5945_v10 = vadd.f32 %v1135_v33, %v8286_v43  ;;  %v1200_v46 = vunpack.c.l.bf16 %v4906_v40  ;;  %v1201_v24 = vunpack.c.h.bf16 %v4906_v40  ;;  %v4908_v32 = vld [vmem:[%s5541_s18 + $0x178] sm:$0xff] }
  0x98   : > { %v1155_v48 = vadd.f32 %v1154_v34, %v1153_v37  ;;  %v1162_v44 = vadd.f32 %v1161_v3, %v1160_v38  ;;  %v1181_v2 = vadd.f32 %v1180_v15, %v1179_v6  ;;  %v1188_v9 = vadd.f32 %v1187_v31, %v1186_v54 }
  0x99   : > { %v1202_v20 = vmul.f32 %v1198_v56, %v5551_v17  ;;  %v1203_v21 = vmul.f32 %v1199_v63, %v5553_v18  ;;  %v1204_v47 = vmul.f32 %v1200_v46, %v5555_v19  ;;  %v1205_v0 = vmul.f32 %v1201_v24, %v5560_v23 }
  0x9a   : > { %v8287_v55 = vunpack.c.l.bf16 %v5913_v41  ;;  %v8288_v38 = vunpack.c.h.bf16 %v5913_v41  ;;  %v1182_v54 = vrot.slane %v1181_v2, 2  ;;  %v1189_v40 = vrot.slane %v1188_v9, 2 }
  0x9b   : > { %v1206_v33 = vadd.f32 %v1204_v47, %v1202_v20  ;;  %v1213_v56 = vadd.f32 %v1205_v0, %v1203_v21  ;;  %v1228_v31 = vunpack.c.l.bf16 %v4907_v61  ;;  %v1229_v39 = vunpack.c.h.bf16 %v4907_v61 }
  0x9c   : > { %v5959_v37 = vadd.f32 %v8287_v55, %v1155_v48  ;;  %v5963_v6 = vadd.f32 %v8288_v38, %v1162_v44  ;;  %v1183_v3 = vadd.f32 %v1182_v54, %v1181_v2  ;;  %v1190_v15 = vadd.f32 %v1189_v40, %v1188_v9  ;;  %v4909_v44 = vld [vmem:[%s5541_s18 + $0x180] sm:$0xff]  ;;  %v4910_v9 = vld [vmem:[%s5541_s18 + $0x188] sm:$0xff] }
  0x9d   : > { %v1207_v43 = vrot.slane %v1206_v33, 4  ;;  %v1214_v46 = vrot.slane %v1213_v56, 4  ;;  %v1230_v24 = vunpack.c.l.bf16 %v4908_v32  ;;  %v1231_v48 = vunpack.c.h.bf16 %v4908_v32 }
  0x9e   : > { %v1184_v55 = vrot.slane %v1183_v3, 1  ;;  %v1191_v38 = vrot.slane %v1190_v15, 1  ;;  %v1232_v13 = vmul.f32 %v1228_v31, %v5551_v17  ;;  %v1233_v20 = vmul.f32 %v1229_v39, %v5553_v18 }
  0x9f   : > { %v1208_v21 = vadd.f32 %v1207_v43, %v1206_v33  ;;  %v1215_v47 = vadd.f32 %v1214_v46, %v1213_v56  ;;  %v1234_v0 = vmul.f32 %v1230_v24, %v5555_v19  ;;  %v1235_v2 = vmul.f32 %v1231_v48, %v5560_v23 }
  0xa0   : > { %v1185_v54 = vadd.f32 %v1184_v55, %v1183_v3  ;;  %v1192_v61 = vadd.f32 %v1191_v38, %v1190_v15  ;;  %v1255_v40 = vunpack.c.l.bf16 %v4909_v44  ;;  %v1256_v34 = vunpack.c.h.bf16 %v4909_v44 }
  0xa1   : > { %v1209_v63 = vrot.slane %v1208_v21, 2  ;;  %v1216_v32 = vrot.slane %v1215_v47, 2  ;;  %v1236_v1 = vadd.f32 %v1234_v0, %v1232_v13  ;;  %v1243_v30 = vadd.f32 %v1235_v2, %v1233_v20  ;;  %v5985_v13 = vld [vmem:[%s8204_s3] sm:$0x88] }
  0xa2   : > { %v8289_v29 = vunpack.c.l.bf16 %v5913_v41  ;;  %v8290_v33 = vunpack.c.h.bf16 %v5913_v41  ;;  %v1257_v39 = vunpack.c.l.bf16 %v4910_v9  ;;  %v1258_v43 = vunpack.c.h.bf16 %v4910_v9 }
  0xa3   : > { %v1210_v46 = vadd.f32 %v1209_v63, %v1208_v21  ;;  %v1217_v3 = vadd.f32 %v1216_v32, %v1215_v47  ;;  %v1237_v15 = vrot.slane %v1236_v1, 4  ;;  %v1244_v24 = vrot.slane %v1243_v30, 4  ;;  %v4911_v21 = vld [vmem:[%s5541_s18 + $0x190] sm:$0xff]  ;;  %v4912_v32 = vld [vmem:[%s5541_s18 + $0x198] sm:$0xff] }
  0xa4   : > { %v5976_v31 = vadd.f32 %v1185_v54, %v8289_v29  ;;  %v5980_v56 = vadd.f32 %v1192_v61, %v8290_v33  ;;  %v1259_v48 = vmul.f32 %v1255_v40, %v5551_v17  ;;  %v1260_v29 = vmul.f32 %v1256_v34, %v5553_v18 }
  0xa5   : > { %v1261_v41 = vmul.f32 %v1257_v39, %v5555_v19  ;;  %v1262_v44 = vmul.f32 %v1258_v43, %v5560_v23  ;;  %v1211_v55 = vrot.slane %v1210_v46, 1  ;;  %v1218_v38 = vrot.slane %v1217_v3, 1 }
  0xa6   : > { %v1238_v63 = vadd.f32 %v1237_v15, %v1236_v1  ;;  %v1245_v20 = vadd.f32 %v1244_v24, %v1243_v30  ;;  %v1285_v43 = vunpack.c.l.bf16 %v4911_v21  ;;  %v1286_v27 = vunpack.c.h.bf16 %v4911_v21 }
  0xa7   : > { %v1263_v47 = vadd.f32 %v1261_v41, %v1259_v48  ;;  %v1270_v0 = vadd.f32 %v1262_v44, %v1260_v29  ;;  %v1212_v54 = vadd.f32 %v1211_v55, %v1210_v46  ;;  %v1219_v61 = vadd.f32 %v1218_v38, %v1217_v3  ;;  %v4913_v55 = vld [vmem:[%s5541_s18 + $0x1a0] sm:$0xff] }
  0xa8   : > { %v1239_v34 = vrot.slane %v1238_v63, 2  ;;  %v1246_v40 = vrot.slane %v1245_v20, 2  ;;  %v8291_v1 = vunpack.c.l.bf16 %v5950_v16  ;;  %v8292_v15 = vunpack.c.h.bf16 %v5950_v16 }
  0xa9   : > { %v1264_v33 = vrot.slane %v1263_v47, 4  ;;  %v1271_v39 = vrot.slane %v1270_v0, 4  ;;  %v1287_v41 = vunpack.c.l.bf16 %v4912_v32  ;;  %v1288_v44 = vunpack.c.h.bf16 %v4912_v32 }
  0xaa   : > { %v5997_v30 = vadd.f32 %v8291_v1, %v1212_v54  ;;  %v6001_v24 = vadd.f32 %v8292_v15, %v1219_v61  ;;  %v1240_v48 = vadd.f32 %v1239_v34, %v1238_v63  ;;  %v1247_v46 = vadd.f32 %v1246_v40, %v1245_v20  ;;  %v4914_v15 = vld [vmem:[%s5541_s18 + $0x1a8] sm:$0xff] }
  0xab   : > { %v1265_v3 = vadd.f32 %v1264_v33, %v1263_v47  ;;  %v1272_v29 = vadd.f32 %v1271_v39, %v1270_v0  ;;  %v1289_v21 = vmul.f32 %v1285_v43, %v5551_v17  ;;  %v1290_v2 = vmul.f32 %v1286_v27, %v5553_v18 }
  0xac   : > { %v1241_v38 = vrot.slane %v1240_v48, 1  ;;  %v1248_v9 = vrot.slane %v1247_v46, 1  ;;  %v1291_v26 = vmul.f32 %v1287_v41, %v5555_v19  ;;  %v1292_v61 = vmul.f32 %v1288_v44, %v5560_v23 }
  0xad   : > { %v1266_v54 = vrot.slane %v1265_v3, 2  ;;  %v1273_v1 = vrot.slane %v1272_v29, 2  ;;  %v1312_v47 = vunpack.c.l.bf16 %v4913_v55  ;;  %v1313_v0 = vunpack.c.h.bf16 %v4913_v55 }
  0xae   : > { %v1242_v63 = vadd.f32 %v1241_v38, %v1240_v48  ;;  %v1249_v20 = vadd.f32 %v1248_v9, %v1247_v46  ;;  %v1293_v32 = vadd.f32 %v1291_v26, %v1289_v21  ;;  %v1300_v33 = vadd.f32 %v1292_v61, %v1290_v2  ;;  %v6020_v46 = vld [vmem:[%s8204_s3 + $0x8] sm:$0x11] }
  0xaf   : > { %v1267_v34 = vadd.f32 %v1266_v54, %v1265_v3  ;;  %v1274_v40 = vadd.f32 %v1273_v1, %v1272_v29  ;;  %v8293_v39 = vunpack.c.l.bf16 %v5950_v16  ;;  %v8294_v27 = vunpack.c.h.bf16 %v5950_v16 }
  0xb0   : > { %v1314_v41 = vunpack.c.l.bf16 %v4914_v15  ;;  %v1315_v51 = vunpack.c.h.bf16 %v4914_v15  ;;  %v1294_v48 = vrot.slane %v1293_v32, 4  ;;  %v1301_v9 = vrot.slane %v1300_v33, 4 }
  0xb1   : > { %v6011_v43 = vadd.f32 %v1242_v63, %v8293_v39  ;;  %v6015_v35 = vadd.f32 %v1249_v20, %v8294_v27  ;;  %v1268_v44 = vrot.slane %v1267_v34, 1  ;;  %v1275_v11 = vrot.slane %v1274_v40, 1 }
  0xb2   : > { %v1316_v26 = vmul.f32 %v1312_v47, %v5551_v17  ;;  %v1317_v2 = vmul.f32 %v1313_v0, %v5553_v18  ;;  %v1318_v3 = vmul.f32 %v1314_v41, %v5555_v19  ;;  %v1319_v16 = vmul.f32 %v1315_v51, %v5560_v23 }
  0xb3   : > { %v1269_v29 = vadd.f32 %v1268_v44, %v1267_v34  ;;  %v1276_v55 = vadd.f32 %v1275_v11, %v1274_v40  ;;  %v1295_v38 = vadd.f32 %v1294_v48, %v1293_v32  ;;  %v1302_v21 = vadd.f32 %v1301_v9, %v1300_v33 }
  0xb4   : > { %v1320_v54 = vadd.f32 %v1318_v3, %v1316_v26  ;;  %v1327_v1 = vadd.f32 %v1319_v16, %v1317_v2  ;;  %v1335_v61 = vunpack.c.l.bf16 %v6020_v46  ;;  %v1336_v15 = vunpack.c.h.bf16 %v6020_v46 }
  0xb5   : > { %v8295_v63 = vunpack.c.l.bf16 %v5985_v13  ;;  %v8296_v47 = vunpack.c.h.bf16 %v5985_v13  ;;  %v1296_v39 = vrot.slane %v1295_v38, 2  ;;  %v1303_v51 = vrot.slane %v1302_v21, 2 }
  0xb6   : > { %v1321_v34 = vrot.slane %v1320_v54, 4  ;;  %v1328_v11 = vrot.slane %v1327_v1, 4  ;;  %v1341_v40 = vrot.slane %v5941_v14, 1  ;;  %v1342_v32 = vrot.slane %v5945_v10, 1 }
  0xb7   : > { %v6030_v20 = vadd.f32 %v8295_v63, %v1269_v29  ;;  %v6034_v0 = vadd.f32 %v8296_v47, %v1276_v55  ;;  %v1297_v33 = vadd.f32 %v1296_v39, %v1295_v38  ;;  %v1304_v27 = vadd.f32 %v1303_v51, %v1302_v21 }
  0xb8   : > { %v1349_v41 = vrot.slane %v5959_v37, 2  ;;  %v1350_v44 = vrot.slane %v5963_v6, 2  ;;  %v1322_v48 = vadd.f32 %v1321_v34, %v1320_v54  ;;  %v1329_v9 = vadd.f32 %v1328_v11, %v1327_v1 }
  0xb9   : > { %v1345_v46 = vmax.f32 %v5932_v12, %v1341_v40  ;;  %v1346_v26 = vmax.f32 %v5936_v58, %v1342_v32  ;;  %v1298_v2 = vrot.slane %v1297_v33, 1  ;;  %v1305_v3 = vrot.slane %v1304_v27, 1 }
  0xba   : > { %v1357_v16 = vrot.slane %v5976_v31, 3  ;;  %v1358_v29 = vrot.slane %v5980_v56, 3  ;;  %v1323_v55 = vrot.slane %v1322_v48, 2  ;;  %v1330_v63 = vrot.slane %v1329_v9, 2 }
  0xbb   : > { %v1353_v38 = vmax.f32 %v1345_v46, %v1349_v41  ;;  %v1354_v21 = vmax.f32 %v1346_v26, %v1350_v44  ;;  %v1299_v47 = vadd.f32 %v1298_v2, %v1297_v33  ;;  %v1306_v39 = vadd.f32 %v1305_v3, %v1304_v27 }
  0xbc   : > { %v1365_v51 = vrot.slane %v5997_v30, 4  ;;  %v1366_v54 = vrot.slane %v6001_v24, 4  ;;  %v1324_v1 = vadd.f32 %v1323_v55, %v1322_v48  ;;  %v1331_v34 = vadd.f32 %v1330_v63, %v1329_v9 }
  0xbd   : > { %v1361_v11 = vmax.f32 %v1353_v38, %v1357_v16  ;;  %v1362_v40 = vmax.f32 %v1354_v21, %v1358_v29  ;;  %v8297_v32 = vunpack.c.l.bf16 %v5985_v13  ;;  %v8298_v19 = vunpack.c.h.bf16 %v5985_v13  ;;  %v6061_v13 = vld [vmem:[%s5756_s25 + $0x70] sm:$0xff] }
  0xbe   : > { %v1373_v33 = vrot.slane %v6011_v43, 5  ;;  %v1374_v27 = vrot.slane %v6015_v35, 5  ;;  %v1325_v41 = vrot.slane %v1324_v1, 1  ;;  %v1332_v44 = vrot.slane %v1331_v34, 1 }
  0xbf   : > { %v6048_v23 = vadd.f32 %v1299_v47, %v8297_v32  ;;  %v6052_v18 = vadd.f32 %v1306_v39, %v8298_v19  ;;  %v1369_v48 = vmax.f32 %v1361_v11, %v1365_v51  ;;  %v1370_v46 = vmax.f32 %v1362_v40, %v1366_v54  ;;  %v6090_v32 = vld [vmem:[%s5756_s25 + $0x80] sm:$0xff] }
  0xc0   : > { %v1381_v9 = vrot.slane %v6030_v20, 6  ;;  %v1382_v26 = vrot.slane %v6034_v0, 6  ;;  %v1326_v19 = vadd.f32 %v1325_v41, %v1324_v1  ;;  %v1333_v16 = vadd.f32 %v1332_v44, %v1331_v34  ;;  %v6075_v1 = vld [vmem:[%s5756_s25 + $0x78] sm:$0xff] }
  0xc1   : > { %v1389_v2 = vrot.slane %v6048_v23, 7  ;;  %v1390_v3 = vrot.slane %v6052_v18, 7  ;;  %v1377_v29 = vmax.f32 %v1369_v48, %v1373_v33  ;;  %v1378_v55 = vmax.f32 %v1370_v46, %v1374_v27 }
  0xc2   : > { %v8299_v63 = vunpack.c.h.bf16 %v5834_v36  ;;  %v8300_v21 = vunpack.c.h.bf16 %v5839_v22  ;;  %v982_v39 = vadd.f32 %v5890_v25, %v5867_v45  ;;  %v8301_v51 = vunpack.c.l.bf16 %v5851_v50 }
  0xc3   : > { %v6077_v34 = vadd.f32 %v1335_v61, %v1326_v19  ;;  %v6079_v11 = vadd.f32 %v1336_v15, %v1333_v16  ;;  %v1385_v36 = vmax.f32 %v1377_v29, %v1381_v9  ;;  %v1386_v40 = vmax.f32 %v1378_v55, %v1382_v26 }
  0xc4   : > { %v979_v38 = vmul.f32 %v5885_v49, %v8299_v63  ;;  %v981_v47 = vmul.f32 %v5885_v49, %v8300_v21  ;;  %v1001_v54 = vmul.f32 %v5897_v62, %v8301_v51  ;;  %5215 = vrcp.f32 %v5861_v7 }
  0xc5   : > { %v1012_v22 = vunpack.c.l.bf16 %v6061_v13  ;;  %v1013_v49 = vunpack.c.h.bf16 %v6061_v13  ;;  %v6086_v45 = vadd.f32 %v5892_v28, %v5872_v60  ;;  %v1014_v25 = vunpack.c.l.bf16 %v6075_v1 }
  0xc6   : > { %v1393_v61 = vmax.f32 %v1385_v36, %v1389_v2  ;;  %v1394_v33 = vmax.f32 %v1386_v40, %v1390_v3  ;;  %v6093_v15 = vadd.f32 %v979_v38, %v5870_v52  ;;  %v6096_v27 = vadd.f32 %v981_v47, %v5881_v4 }
  0xc7   : > { %v8302_v7 = vunpack.c.h.bf16 %v5851_v50  ;;  %v8303_v60 = vunpack.c.l.bf16 %v5855_v59  ;;  %v8304_v44 = vunpack.c.h.bf16 %v5855_v59  ;;  %v6113_v52 = vadd.f32 %v1001_v54, %v982_v39 }
  0xc8   : > { %v6116_v4 = vmax.f32 %v1393_v61, %v6077_v34  ;;  %v6119_v50 = vmax.f32 %v1394_v33, %v6079_v11  ;;  %v1015_v46 = vunpack.c.h.bf16 %v6075_v1  ;;  %v6123_v9 = vsub.s32 7, %v5738_v5 }
  0xc9   : > { %v6101_v41 = vmul.f32 %v5901_v42, %v8302_v7  ;;  %v6106_v28 = vmul.f32 %v5897_v62, %v8303_v60  ;;  %v6111_v48 = vmul.f32 %v5901_v42, %v8304_v44  ;;  %8305 = vst [vmem:[#allocation16_spill] sm:$0xff] %v6113_v52  ;;  %v1035_v62 = vunpack.c.l.bf16 %v6090_v32 }
  0xca   : > { %8306 = vst [vmem:[#allocation17_spill] sm:$0xff] %v6123_v9  ;;  %v1036_v59 = vunpack.c.h.bf16 %v6090_v32  ;;  %v1397_v42 = vsub.f32 %v5932_v12, %v6116_v4  ;;  %v1398_v26 = vsub.f32 %v5936_v58, %v6119_v50  ;;  %v1405_v2 = vrot.slane %v6116_v4, 7 }
  0xcb   : > { %v1406_v3 = vrot.slane %v6119_v50, 7  ;;  %v1415_v19 = vrot.slane %v6116_v4, 6  ;;  %v1416_v16 = vrot.slane %v6119_v50, 6  ;;  %v1425_v5 = vrot.slane %v6116_v4, 5 }
  0xcc   : > { %v1426_v29 = vrot.slane %v6119_v50, 5  ;;  %v1399_v55 = vmul.f32 1.442695, %v1397_v42  ;;  %v1401_v63 = vmul.f32 1.442695, %v1398_v26  ;;  %v1409_v38 = vsub.f32 %v5941_v14, %v1405_v2  ;;  %v6154_v26 = vld [vmem:[%s5756_s25 + $0x88] sm:$0xff] }
  0xcd   : > { %v1410_v12 = vsub.f32 %v5945_v10, %v1406_v3  ;;  %v1419_v58 = vsub.f32 %v5959_v37, %v1415_v19  ;;  %v1420_v21 = vsub.f32 %v5963_v6, %v1416_v16  ;;  %v1429_v47 = vsub.f32 %v5976_v31, %v1425_v5 }
  0xce   : > { %v1430_v39 = vsub.f32 %v5980_v56, %v1426_v29  ;;  %5217 = vpow2.f32 %v1399_v55  ;;  %v1411_v51 = vmul.f32 1.442695, %v1409_v38  ;;  %v1435_v36 = vrot.slane %v6116_v4, 4 }
  0xcf   : > { %v1413_v54 = vmul.f32 1.442695, %v1410_v12  ;;  %5219 = vpow2.f32 %v1401_v63  ;;  %v1421_v40 = vmul.f32 1.442695, %v1419_v58  ;;  %v1423_v61 = vmul.f32 1.442695, %v1420_v21 }
  0xd0   : > { %v1431_v14 = vmul.f32 1.442695, %v1429_v47  ;;  %5221 = vpow2.f32 %v1411_v51  ;;  %v1433_v10 = vmul.f32 1.442695, %v1430_v39  ;;  %v1436_v37 = vrot.slane %v6119_v50, 4  ;;  %v8309_v12 = vld [vmem:[#allocation14_spill] sm:$0xff] }
  0xd1   : > { %v1439_v6 = vsub.f32 %v5997_v30, %v1435_v36  ;;  %5223 = vpow2.f32 %v1413_v54  ;;  %v1445_v31 = vrot.slane %v6116_v4, 3  ;;  %v1446_v56 = vrot.slane %v6119_v50, 3  ;;  %v6149_v7 = vpop.eup %5215 }
  0xd2   : > { %v1455_v33 = vrot.slane %v6116_v4, 2  ;;  %8307 = vst [vmem:[#allocation18_spill] sm:$0xff] %v6149_v7  ;;  %5225 = vpow2.f32 %v1421_v40  ;;  %v1440_v60 = vsub.f32 %v6001_v24, %v1436_v37  ;;  %v1456_v42 = vrot.slane %v6119_v50, 2  ;;  %v6287_v37 = vld [vmem:[%s5756_s25 + $0x160] sm:$0xff] }
  0xd3   : > { %v1441_v44 = vmul.f32 1.442695, %v1439_v6  ;;  %5227 = vpow2.f32 %v1423_v61  ;;  %v1449_v30 = vsub.f32 %v6011_v43, %v1445_v31  ;;  %v1450_v2 = vsub.f32 %v6015_v35, %v1446_v56 }
  0xd4   : > { %v1459_v3 = vsub.f32 %v6030_v20, %v1455_v33  ;;  %5229 = vpow2.f32 %v1431_v14  ;;  %v1443_v19 = vmul.f32 1.442695, %v1440_v60  ;;  %v1460_v16 = vsub.f32 %v6034_v0, %v1456_v42  ;;  %v8308_v20 = vld [vmem:[#allocation13_spill] sm:$0xff]  ;;  %v6239_v42 = vld [vmem:[%s5756_s25 + $0x148] sm:$0xff] }
  0xd5   : > { %v1465_v5 = vrot.slane %v6116_v4, 1  ;;  %v1019_v24 = vrot.slane %v5818_v8, %v6123_v9  ;;  %5231 = vpow2.f32 %v1433_v10  ;;  %v1451_v29 = vmul.f32 1.442695, %v1449_v30 }
  0xd6   : > { %v1453_v55 = vmul.f32 1.442695, %v1450_v2  ;;  %v1023_v63 = vrot.slane %v5822_v53, %v6123_v9  ;;  %v1037_v43 = vunpack.c.l.bf16 %v6154_v26  ;;  %5233 = vpow2.f32 %v1441_v44 }
  0xd7   : > { %v1466_v35 = vrot.slane %v6119_v50, 1  ;;  %v1042_v38 = vrot.slane %v8308_v20, %v5744_v57  ;;  %5235 = vpow2.f32 %v1443_v19  ;;  %v1461_v0 = vmul.f32 1.442695, %v1459_v3 }
  0xd8   : > { %v1469_v8 = vsub.f32 %v6048_v23, %v1465_v5  ;;  %v6172_v58 = vrot.slane %v8309_v12, %v5744_v57  ;;  %5237 = vpow2.f32 %v1451_v29  ;;  %v1463_v53 = vmul.f32 1.442695, %v1460_v16 }
  0xd9   : > { %v1470_v21 = vsub.f32 %v6052_v18, %v1466_v35  ;;  %v6177_v47 = vadd.f32 %v6101_v41, %v6093_v15  ;;  %v6181_v39 = vadd.f32 %v6106_v28, %v6086_v45  ;;  %v6185_v23 = vadd.f32 %v6111_v48, %v6096_v27  ;;  %v6201_v41 = vld [vmem:[%s5756_s25 + $0x120] sm:$0xff]  ;;  %v6204_v27 = vld [vmem:[%s5756_s25 + $0x128] sm:$0xff]  ;;  %v6218_v48 = vld [vmem:[%s5756_s25 + $0x138] sm:$0xff] }
  0xda   : > { %5239 = vpow2.f32 %v1453_v55  ;;  %v6189_v51 = vmul.f32 %v1019_v24, %v1012_v22  ;;  %v6193_v18 = vmul.f32 %v1023_v63, %v1013_v49  ;;  %v6197_v15 = vmul.f32 %v1019_v24, %v1014_v25  ;;  %v6215_v25 = vld [vmem:[%s5756_s25 + $0x130] sm:$0xff] }
  0xdb   : > { %8310 = vst [vmem:[#allocation13_spill] sm:$0xff] %v6181_v39  ;;  %v5218_v28 = vpop.eup %5217  ;;  %v6208_v22 = vmul.f32 %v1023_v63, %v1015_v46  ;;  %v6212_v13 = vmul.f32 %v1042_v38, %v1035_v62  ;;  %5241 = vpow2.f32 %v1461_v0  ;;  %v1471_v49 = vmul.f32 1.442695, %v1469_v8  ;;  %v6228_v46 = vld [vmem:[%s5756_s25 + $0x140] sm:$0xff] }
  0xdc   : > { %8311 = vst [vmem:[#allocation14_spill] sm:$0xff] %v6189_v51  ;;  %8312 = vst [vmem:[#allocation19_spill] sm:$0xff] %v6197_v15  ;;  %v5220_v54 = vpop.eup %5219  ;;  %v6223_v36 = vmul.f32 %v6172_v58, %v1036_v59  ;;  %v6225_v40 = vmul.f32 %v1042_v38, %v1037_v43  ;;  %5243 = vpow2.f32 %v1463_v53  ;;  %v1473_v1 = vmul.f32 1.442695, %v1470_v21  ;;  %v6250_v43 = vld [vmem:[%s5756_s25 + $0x150] sm:$0xff]  ;;  %v6263_v21 = vld [vmem:[%s5756_s25 + $0x158] sm:$0xff] }
  0xdd   : > { %8313 = vst [vmem:[#allocation20_spill] sm:$0xff] %v6212_v13  ;;  %v5222_v62 = vpop.eup %5221  ;;  %v1544_v61 = vunpack.c.l.bf16 %v6201_v41  ;;  %v1545_v14 = vunpack.c.h.bf16 %v6201_v41  ;;  %v1546_v10 = vunpack.c.l.bf16 %v6204_v27  ;;  %v1563_v59 = vunpack.c.l.bf16 %v6215_v25  ;;  %v4926_v15 = vld [vmem:[%s5756_s25 + $0x178] sm:$0xff] }
  0xde   : > { %8314 = vst [vmem:[#allocation21_spill] sm:$0xff] %v6223_v36  ;;  %8315 = vst [vmem:[#allocation22_spill] sm:$0xff] %v6225_v40  ;;  %v5224_v32 = vpop.eup %5223  ;;  %v1483_v6 = vrot.slane %v5222_v62, 1  ;;  %v1564_v31 = vunpack.c.h.bf16 %v6215_v25  ;;  %v1565_v56 = vunpack.c.l.bf16 %v6218_v48  ;;  %5245 = vpow2.f32 %v1471_v49 }
  0xdf   : > { %v5226_v33 = vpop.eup %5225  ;;  %v1484_v60 = vrot.slane %v5224_v32, 1  ;;  %v1566_v44 = vunpack.c.h.bf16 %v6218_v48  ;;  %v1586_v30 = vunpack.c.l.bf16 %v6228_v46  ;;  %5247 = vpow2.f32 %v1473_v1 }
  0xe0   : > { %v5228_v2 = vpop.eup %5227  ;;  %v1475_v3 = vsub.f32 %v6077_v34, %v6116_v4  ;;  %v1487_v19 = vadd.f32 %v5218_v28, %v1483_v6  ;;  %v1491_v16 = vrot.slane %v5226_v33, 2  ;;  %v1476_v24 = vsub.f32 %v6079_v11, %v6119_v50  ;;  %v8316_v50 = vld [vmem:[#allocation7_spill] sm:$0xff] }
  0xe1   : > { %v6244_v5 = vpop.eup %5229  ;;  %v1488_v29 = vadd.f32 %v5220_v54, %v1484_v60  ;;  %v1492_v55 = vrot.slane %v5228_v2, 2  ;;  %v1551_v34 = vrot.slane %v5218_v28, %v5744_v57  ;;  %v1588_v4 = vunpack.c.l.bf16 %v6239_v42 }
  0xe2   : > { %v6252_v35 = vpop.eup %5231  ;;  %v1495_v20 = vadd.f32 %v1491_v16, %v1487_v19  ;;  %v1499_v38 = vrot.slane %v6244_v5, 3  ;;  %v1570_v12 = vrot.slane %v5222_v62, %v8316_v50  ;;  %v1589_v53 = vunpack.c.h.bf16 %v6239_v42 }
  0xe3   : > { %v6257_v0 = vpop.eup %5233  ;;  %v1496_v8 = vadd.f32 %v1492_v55, %v1488_v29  ;;  %v1500_v11 = vrot.slane %v6252_v35, 3  ;;  %v1477_v49 = vmul.f32 1.442695, %v1475_v3  ;;  %v1609_v28 = vunpack.c.l.bf16 %v6250_v43 }
  0xe4   : > { %v6265_v41 = vpop.eup %5235  ;;  %v1503_v25 = vadd.f32 %v1499_v38, %v1495_v20  ;;  %v1507_v48 = vrot.slane %v6257_v0, 4  ;;  %v1479_v6 = vmul.f32 1.442695, %v1476_v24  ;;  %v1555_v62 = vrot.slane %v5220_v54, %v5744_v57  ;;  %v8317_v24 = vld [vmem:[#allocation8_spill] sm:$0xff] }
  0xe5   : > { %v6269_v1 = vpop.eup %5237  ;;  %v1504_v60 = vadd.f32 %v1500_v11, %v1496_v8  ;;  %v1508_v19 = vrot.slane %v6265_v41, 4  ;;  %v1556_v42 = vmul.f32 %v1551_v34, %v1544_v61  ;;  %v1574_v29 = vrot.slane %v5224_v32, %v8316_v50 }
  0xe6   : > { %v1611_v55 = vunpack.c.l.bf16 %v6263_v21  ;;  %v1511_v20 = vadd.f32 %v1507_v48, %v1503_v25  ;;  %v1515_v38 = vrot.slane %v6269_v1, 5  ;;  %v1575_v45 = vmul.f32 %v1570_v12, %v1563_v59 }
  0xe7   : > { %v6273_v16 = vpop.eup %5239  ;;  %v1593_v8 = vrot.slane %v5226_v33, %v8317_v24  ;;  %5249 = vpow2.f32 %v1477_v49  ;;  %v1512_v54 = vadd.f32 %v1508_v19, %v1504_v60  ;;  %v1612_v32 = vunpack.c.h.bf16 %v6263_v21  ;;  %v6293_v60 = vld [vmem:[%s5756_s25 + $0x168] sm:$0xff] }
  0xe8   : > { %v6280_v11 = vpop.eup %5241  ;;  %v1516_v61 = vrot.slane %v6273_v16, 5  ;;  %5251 = vpow2.f32 %v1479_v6  ;;  %v1557_v63 = vmul.f32 %v1555_v62, %v1545_v14  ;;  %v1558_v25 = vmul.f32 %v1551_v34, %v1546_v10  ;;  %v6297_v6 = vld [vmem:[%s5756_s25 + $0x170] sm:$0xff] }
  0xe9   : > { %v6284_v3 = vpop.eup %5243  ;;  %v1577_v48 = vmul.f32 %v1570_v12, %v1565_v56  ;;  %v8318_v59 = vunpack.c.h.bf16 %v6204_v27  ;;  %v1576_v40 = vmul.f32 %v1574_v29, %v1564_v31  ;;  %v1578_v13 = vmul.f32 %v1574_v29, %v1566_v44  ;;  %v8319_v12 = vld [vmem:[#allocation9_spill] sm:$0xff] }
  0xea   : > { %v1597_v49 = vrot.slane %v5228_v2, %v8317_v24  ;;  %v1519_v19 = vadd.f32 %v1515_v38, %v1511_v20  ;;  %v1523_v21 = vrot.slane %v6280_v11, 6  ;;  %v1579_v7 = vadd.f32 %v1575_v45, %v1556_v42 }
  0xeb   : > { %v1559_v33 = vmul.f32 %v1555_v62, %v8318_v59  ;;  %v1598_v36 = vmul.f32 %v1593_v8, %v1586_v30  ;;  %v6299_v14 = vpop.eup %5245  ;;  %v1520_v10 = vadd.f32 %v1516_v61, %v1512_v54  ;;  %v1524_v56 = vrot.slane %v6284_v3, 6 }
  0xec   : > { %v1632_v27 = vunpack.c.l.bf16 %v6287_v37  ;;  %v1633_v31 = vunpack.c.h.bf16 %v6287_v37  ;;  %v6304_v44 = vpop.eup %5247  ;;  %v1581_v2 = vadd.f32 %v1577_v48, %v1558_v25  ;;  %v1600_v34 = vmul.f32 %v1593_v8, %v1588_v4  ;;  %v6315_v25 = vld [vmem:[%s5756_s25 + $0x180] sm:$0xff] }
  0xed   : > { %v1616_v45 = vrot.slane %v6244_v5, %v8319_v12  ;;  %v1634_v30 = vunpack.c.l.bf16 %v6293_v60  ;;  %v1580_v62 = vadd.f32 %v1576_v40, %v1557_v63  ;;  %v1582_v42 = vadd.f32 %v1578_v13, %v1559_v33 }
  0xee   : > { %v1635_v29 = vunpack.c.h.bf16 %v6293_v60  ;;  %v1655_v20 = vunpack.c.l.bf16 %v6297_v6  ;;  %v1527_v38 = vadd.f32 %v1523_v21, %v1519_v19  ;;  %v8320_v54 = vunpack.c.h.bf16 %v6228_v46  ;;  %v8321_v46 = vld [vmem:[#allocation10_spill] sm:$0xff] }
  0xef   : > { %v1601_v37 = vmul.f32 %v1597_v49, %v1589_v53  ;;  %v1602_v59 = vadd.f32 %v1598_v36, %v1579_v7  ;;  %v1528_v4 = vadd.f32 %v1524_v56, %v1520_v10  ;;  %v1531_v5 = vrot.slane %v6299_v14, 7  ;;  %v6328_v10 = vld [vmem:[%s5756_s25 + $0x188] sm:$0xff] }
  0xf0   : > { %v1599_v61 = vmul.f32 %v1597_v49, %v8320_v54  ;;  %v1532_v13 = vrot.slane %v6304_v44, 7  ;;  %v1620_v40 = vrot.slane %v6252_v35, %v8319_v12  ;;  %v1604_v63 = vadd.f32 %v1600_v34, %v1581_v2 }
  0xf1   : > { %v1621_v8 = vmul.f32 %v1616_v45, %v1609_v28  ;;  %v1623_v48 = vmul.f32 %v1616_v45, %v1611_v55  ;;  %v1639_v7 = vrot.slane %v6257_v0, %v8321_v46  ;;  %v1656_v36 = vunpack.c.h.bf16 %v6297_v6  ;;  %v6332_v28 = vld [vmem:[%s5756_s25 + $0x190] sm:$0xff] }
  0xf2   : > { %v1657_v53 = vunpack.c.l.bf16 %v4926_v15  ;;  %v1658_v33 = vunpack.c.h.bf16 %v4926_v15  ;;  %v1678_v49 = vunpack.c.l.bf16 %v6315_v25  ;;  %v1603_v60 = vadd.f32 %v1599_v61, %v1580_v62  ;;  %v6337_v15 = vld [vmem:[%s5756_s25 + $0x198] sm:$0xff]  ;;  %v8326_v61 = vld [vmem:[#allocation11_spill] sm:$0xff] }
  0xf3   : > { %v1605_v19 = vadd.f32 %v1601_v37, %v1582_v42  ;;  %v1643_v21 = vrot.slane %v6265_v41, %v8321_v46  ;;  %v1679_v35 = vunpack.c.h.bf16 %v6315_v25  ;;  %v1535_v55 = vadd.f32 %v1531_v5, %v1527_v38  ;;  %8323 = vst [vmem:[#allocation23_spill] sm:$0xff] %v6337_v15  ;;  %v4935_v5 = vld [vmem:[%s5541_s18 + $0x240] sm:$0xff] }
  0xf4   : > { %v1536_v56 = vadd.f32 %v1532_v13, %v1528_v4  ;;  %v8322_v0 = vunpack.c.h.bf16 %v6250_v43  ;;  %v1624_v2 = vmul.f32 %v1620_v40, %v1612_v32  ;;  %v6339_v34 = vpop.eup %5249  ;;  %v1625_v45 = vadd.f32 %v1621_v8, %v1602_v59  ;;  %v4938_v4 = vld [vmem:[%s5541_s18 + $0x258] sm:$0xff] }
  0xf5   : > { %8324 = vst [vmem:[#allocation24_spill] sm:$0xff] %v6339_v34  ;;  %v1627_v62 = vadd.f32 %v1623_v48, %v1604_v63  ;;  %v1644_v41 = vmul.f32 %v1639_v7, %v1632_v27  ;;  %v1646_v42 = vmul.f32 %v1639_v7, %v1634_v30  ;;  %v6341_v54 = vpop.eup %5251  ;;  %v1662_v38 = vrot.slane %v6269_v1, %v8326_v61  ;;  %v4936_v63 = vld [vmem:[%s5541_s18 + $0x248] sm:$0xff] }
  0xf6   : > { %v1622_v6 = vmul.f32 %v1620_v40, %v8322_v0  ;;  %8325 = vst [vmem:[#allocation25_spill] sm:$0xff] %v6341_v54  ;;  %v1645_v25 = vmul.f32 %v1643_v21, %v1633_v31  ;;  %v1628_v13 = vadd.f32 %v1624_v2, %v1605_v19  ;;  %v1647_v40 = vmul.f32 %v1643_v21, %v1635_v29  ;;  %v8327_v19 = vld [vmem:[#allocation12_spill] sm:$0xff] }
  0xf7   : > { %v1666_v1 = vrot.slane %v6273_v16, %v8326_v61  ;;  %v6356_v8 = vadd.f32 %v6339_v34, %v1535_v55  ;;  %v6359_v48 = vadd.f32 %v6341_v54, %v1536_v56  ;;  %v1648_v31 = vadd.f32 %v1644_v41, %v1625_v45  ;;  %v8329_v41 = vld [vmem:[#allocation4_spill] sm:$0xff] }
  0xf8   : > { %v1626_v30 = vadd.f32 %v1622_v6, %v1603_v60  ;;  %v1650_v7 = vadd.f32 %v1646_v42, %v1627_v62  ;;  %v1667_v0 = vmul.f32 %v1662_v38, %v1655_v20  ;;  %v1669_v59 = vmul.f32 %v1662_v38, %v1657_v53  ;;  %v8328_v53 = vld [vmem:[#allocation3_spill] sm:$0xff]  ;;  %v8330_v38 = vld [vmem:[#allocation5_spill] sm:$0xff] }
  0xf9   : > { %v1773_v27 = vunpack.c.l.bf16 %v4935_v5  ;;  %v1774_v60 = vunpack.c.h.bf16 %v4935_v5  ;;  %v6363_v29 = vrot.slane %v6280_v11, %v8327_v19  ;;  %v6367_v16 = vrot.slane %v6284_v3, %v8327_v19  ;;  %v4937_v11 = vld [vmem:[%s5541_s18 + $0x250] sm:$0xff] }
  0xfa   : > { %v1775_v21 = vunpack.c.l.bf16 %v4936_v63  ;;  %v1776_v55 = vunpack.c.h.bf16 %v4936_v63  ;;  %v1649_v56 = vadd.f32 %v1645_v25, %v1626_v30  ;;  %v1651_v6 = vadd.f32 %v1647_v40, %v1628_v13 }
  0xfb   : > { %v1668_v2 = vmul.f32 %v1666_v1, %v1656_v36  ;;  %v1670_v45 = vmul.f32 %v1666_v1, %v1658_v33  ;;  %v1777_v20 = vmul.f32 %v1773_v27, %v5551_v17  ;;  %v1778_v62 = vmul.f32 %v1774_v60, %v8328_v53  ;;  %v6390_v33 = vld [vmem:[%s8204_s3] sm:$0x11] }
  0xfc   : > { %v1779_v42 = vmul.f32 %v1775_v21, %v8329_v41  ;;  %v1780_v5 = vmul.f32 %v1776_v55, %v8330_v38  ;;  %v6375_v32 = vadd.f32 %v1667_v0, %v1648_v31  ;;  %v6377_v3 = vadd.f32 %v1669_v59, %v1650_v7  ;;  %v4939_v31 = vld [vmem:[%s5541_s18 + $0x260] sm:$0xff] }
  0xfd   : > { %v6381_v25 = vrot.slane %v6299_v14, %v6123_v9  ;;  %v6385_v36 = vrot.slane %v6304_v44, %v6123_v9  ;;  %v6393_v27 = vmul.f32 %v6363_v29, %v1678_v49  ;;  %v6396_v59 = vmul.f32 %v6367_v16, %v1679_v35  ;;  %v4940_v49 = vld [vmem:[%s5541_s18 + $0x268] sm:$0xff] }
  0xfe   : > { %v1781_v30 = vadd.f32 %v1779_v42, %v1777_v20  ;;  %v1788_v13 = vadd.f32 %v1780_v5, %v1778_v62  ;;  %v1803_v14 = vunpack.c.l.bf16 %v4937_v11  ;;  %v1804_v40 = vunpack.c.h.bf16 %v4937_v11  ;;  %v6413_v11 = vld [vmem:[%s8204_s3] sm:$0x22] }
  0xff   : > { %v1805_v1 = vunpack.c.l.bf16 %v4938_v4  ;;  %v1806_v63 = vunpack.c.h.bf16 %v4938_v4  ;;  %v6399_v44 = vadd.f32 %v1668_v2, %v1649_v56  ;;  %v6401_v7 = vadd.f32 %v1670_v45, %v1651_v6 }
 0x100   : > { %v1782_v21 = vrot.slane %v1781_v30, 4  ;;  %v1789_v55 = vrot.slane %v1788_v13, 4  ;;  %v1807_v35 = vmul.f32 %v1803_v14, %v5551_v17  ;;  %v1808_v20 = vmul.f32 %v1804_v40, %v8328_v53 }
 0x101   : > { %v1809_v62 = vmul.f32 %v1805_v1, %v8329_v41  ;;  %v1810_v4 = vmul.f32 %v1806_v63, %v8330_v38  ;;  %v1830_v56 = vunpack.c.l.bf16 %v4939_v31  ;;  %v1831_v2 = vunpack.c.h.bf16 %v4939_v31 }
 0x102   : > { %v1783_v6 = vadd.f32 %v1782_v21, %v1781_v30  ;;  %v1790_v45 = vadd.f32 %v1789_v55, %v1788_v13  ;;  %v1832_v42 = vunpack.c.l.bf16 %v4940_v49  ;;  %v1833_v5 = vunpack.c.h.bf16 %v4940_v49  ;;  %v4941_v13 = vld [vmem:[%s5541_s18 + $0x270] sm:$0xff] }
 0x103   : > { %v1811_v43 = vadd.f32 %v1809_v62, %v1807_v35  ;;  %v1818_v14 = vadd.f32 %v1810_v4, %v1808_v20  ;;  %v1834_v40 = vmul.f32 %v1830_v56, %v5551_v17  ;;  %v1835_v1 = vmul.f32 %v1831_v2, %v8328_v53  ;;  %v4942_v56 = vld [vmem:[%s5541_s18 + $0x278] sm:$0xff] }
 0x104   : > { %v1784_v63 = vrot.slane %v1783_v6, 2  ;;  %v1791_v37 = vrot.slane %v1790_v45, 2  ;;  %v1836_v31 = vmul.f32 %v1832_v42, %v8329_v41  ;;  %v1837_v30 = vmul.f32 %v1833_v5, %v8330_v38 }
 0x105   : > { %v1812_v49 = vrot.slane %v1811_v43, 4  ;;  %v1819_v21 = vrot.slane %v1818_v14, 4  ;;  %v1860_v39 = vunpack.c.l.bf16 %v4941_v13  ;;  %v1861_v51 = vunpack.c.h.bf16 %v4941_v13 }
 0x106   : > { %v1785_v35 = vadd.f32 %v1784_v63, %v1783_v6  ;;  %v1792_v20 = vadd.f32 %v1791_v37, %v1790_v45  ;;  %v1838_v62 = vadd.f32 %v1836_v31, %v1834_v40  ;;  %v1845_v4 = vadd.f32 %v1837_v30, %v1835_v1  ;;  %v4943_v1 = vld [vmem:[%s5541_s18 + $0x280] sm:$0xff] }
 0x107   : > { %v1813_v0 = vadd.f32 %v1812_v49, %v1811_v43  ;;  %v1820_v2 = vadd.f32 %v1819_v21, %v1818_v14  ;;  %v1862_v46 = vunpack.c.l.bf16 %v4942_v56  ;;  %v1863_v55 = vunpack.c.h.bf16 %v4942_v56 }
 0x108   : > { %v1786_v52 = vrot.slane %v1785_v35, 1  ;;  %v1793_v42 = vrot.slane %v1792_v20, 1  ;;  %v1839_v5 = vrot.slane %v1838_v62, 4  ;;  %v1846_v9 = vrot.slane %v1845_v4, 4 }
 0x109   : > { %v1814_v19 = vrot.slane %v1813_v0, 2  ;;  %v1821_v61 = vrot.slane %v1820_v2, 2  ;;  %v1864_v43 = vmul.f32 %v1860_v39, %v5551_v17  ;;  %v1865_v14 = vmul.f32 %v1861_v51, %v8328_v53  ;;  %v4944_v39 = vld [vmem:[%s5541_s18 + $0x288] sm:$0xff] }
 0x10a   : > { %v1787_v12 = vadd.f32 %v1786_v52, %v1785_v35  ;;  %v1794_v60 = vadd.f32 %v1793_v42, %v1792_v20  ;;  %v1840_v37 = vadd.f32 %v1839_v5, %v1838_v62  ;;  %v1847_v6 = vadd.f32 %v1846_v9, %v1845_v4 }
 0x10b   : > { %v1815_v45 = vadd.f32 %v1814_v19, %v1813_v0  ;;  %v1822_v40 = vadd.f32 %v1821_v61, %v1820_v2  ;;  %v8331_v63 = vunpack.c.l.bf16 %v6390_v33  ;;  %v8332_v30 = vunpack.c.h.bf16 %v6390_v33 }
 0x10c   : > { %v1841_v52 = vrot.slane %v1840_v37, 2  ;;  %v1848_v49 = vrot.slane %v1847_v6, 2  ;;  %v1866_v9 = vmul.f32 %v1862_v46, %v8329_v41  ;;  %v1867_v61 = vmul.f32 %v1863_v55, %v8330_v38 }
 0x10d   : > { %v6428_v31 = vadd.f32 %v8331_v63, %v1787_v12  ;;  %v6432_v13 = vadd.f32 %v8332_v30, %v1794_v60  ;;  %v1816_v21 = vrot.slane %v1815_v45, 1  ;;  %v1823_v35 = vrot.slane %v1822_v40, 1 }
 0x10e   : > { %v1842_v19 = vadd.f32 %v1841_v52, %v1840_v37  ;;  %v1849_v51 = vadd.f32 %v1848_v49, %v1847_v6  ;;  %v1887_v0 = vunpack.c.l.bf16 %v4943_v1  ;;  %v1888_v20 = vunpack.c.h.bf16 %v4943_v1 }
 0x10f   : > { %v1817_v62 = vadd.f32 %v1816_v21, %v1815_v45  ;;  %v1824_v12 = vadd.f32 %v1823_v35, %v1822_v40  ;;  %v1868_v4 = vadd.f32 %v1866_v9, %v1864_v43  ;;  %v1875_v56 = vadd.f32 %v1867_v61, %v1865_v14  ;;  %v6448_v45 = vld [vmem:[%s8204_s3] sm:$0x44]  ;;  %v4945_v35 = vld [vmem:[%s5541_s18 + $0x290] sm:$0xff]  ;;  %v4946_v9 = vld [vmem:[%s5541_s18 + $0x298] sm:$0xff] }
 0x110   : > { %v1843_v2 = vrot.slane %v1842_v19, 1  ;;  %v1850_v60 = vrot.slane %v1849_v51, 1  ;;  %v1889_v42 = vunpack.c.l.bf16 %v4944_v39  ;;  %v1890_v5 = vunpack.c.h.bf16 %v4944_v39 }
 0x111   : > { %v6439_v46 = vadd.f32 %v1817_v62, %v8331_v63  ;;  %v8333_v55 = vmov %v8332_v30  ;;  %v1869_v6 = vrot.slane %v1868_v4, 4  ;;  %v1876_v1 = vrot.slane %v1875_v56, 4 }
 0x112   : > { %v6443_v37 = vadd.f32 %v1824_v12, %v8333_v55  ;;  %v1844_v40 = vadd.f32 %v1843_v2, %v1842_v19  ;;  %v1851_v43 = vadd.f32 %v1850_v60, %v1849_v51  ;;  %v1891_v14 = vmul.f32 %v1887_v0, %v5551_v17 }
 0x113   : > { %v1892_v30 = vmul.f32 %v1888_v20, %v8328_v53  ;;  %v1870_v52 = vadd.f32 %v1869_v6, %v1868_v4  ;;  %v1877_v49 = vadd.f32 %v1876_v1, %v1875_v56  ;;  %v1893_v21 = vmul.f32 %v1889_v42, %v8329_v41 }
 0x114   : > { %v1894_v33 = vmul.f32 %v1890_v5, %v8330_v38  ;;  %v8334_v61 = vunpack.c.l.bf16 %v6413_v11  ;;  %v8335_v62 = vunpack.c.h.bf16 %v6413_v11  ;;  %v1917_v2 = vunpack.c.l.bf16 %v4945_v35 }
 0x115   : > { %v1871_v20 = vrot.slane %v1870_v52, 2  ;;  %v1878_v12 = vrot.slane %v1877_v49, 2  ;;  %v1895_v4 = vadd.f32 %v1893_v21, %v1891_v14  ;;  %v1918_v60 = vunpack.c.h.bf16 %v4945_v35  ;;  %v4948_v35 = vld [vmem:[%s5541_s18 + $0x2a8] sm:$0xff] }
 0x116   : > { %v6458_v39 = vadd.f32 %v8334_v61, %v1844_v40  ;;  %v6462_v19 = vadd.f32 %v8335_v62, %v1851_v43  ;;  %v1902_v56 = vadd.f32 %v1894_v33, %v1892_v30  ;;  %v1919_v42 = vunpack.c.l.bf16 %v4946_v9  ;;  %v4947_v40 = vld [vmem:[%s5541_s18 + $0x2a0] sm:$0xff] }
 0x117   : > { %v1920_v5 = vunpack.c.h.bf16 %v4946_v9  ;;  %v1872_v63 = vadd.f32 %v1871_v20, %v1870_v52  ;;  %v1879_v55 = vadd.f32 %v1878_v12, %v1877_v49  ;;  %v1896_v6 = vrot.slane %v1895_v4, 4 }
 0x118   : > { %v1903_v1 = vrot.slane %v1902_v56, 4  ;;  %v1921_v43 = vmul.f32 %v1917_v2, %v5551_v17  ;;  %v1922_v61 = vmul.f32 %v1918_v60, %v8328_v53  ;;  %v1923_v62 = vmul.f32 %v1919_v42, %v8329_v41 }
 0x119   : > { %v1924_v0 = vmul.f32 %v1920_v5, %v8330_v38  ;;  %v1873_v14 = vrot.slane %v1872_v63, 1  ;;  %v1880_v30 = vrot.slane %v1879_v55, 1  ;;  %v1897_v21 = vadd.f32 %v1896_v6, %v1895_v4 }
 0x11a   : > { %v1904_v33 = vadd.f32 %v1903_v1, %v1902_v56  ;;  %v1925_v51 = vadd.f32 %v1923_v62, %v1921_v43  ;;  %v1944_v52 = vunpack.c.l.bf16 %v4947_v40  ;;  %v1945_v49 = vunpack.c.h.bf16 %v4947_v40 }
 0x11b   : > { %v1932_v9 = vadd.f32 %v1924_v0, %v1922_v61  ;;  %v1874_v20 = vadd.f32 %v1873_v14, %v1872_v63  ;;  %v1881_v12 = vadd.f32 %v1880_v30, %v1879_v55  ;;  %v1898_v24 = vrot.slane %v1897_v21, 2  ;;  %v6483_v63 = vld [vmem:[%s8204_s3] sm:$0x88] }
 0x11c   : > { %v1905_v50 = vrot.slane %v1904_v33, 2  ;;  %v1926_v2 = vrot.slane %v1925_v51, 4  ;;  %v1946_v60 = vunpack.c.l.bf16 %v4948_v35  ;;  %v1947_v42 = vunpack.c.h.bf16 %v4948_v35 }
 0x11d   : > { %v1933_v54 = vrot.slane %v1932_v9, 4  ;;  %v8336_v5 = vunpack.c.l.bf16 %v6413_v11  ;;  %v8337_v4 = vunpack.c.h.bf16 %v6413_v11  ;;  %v1899_v0 = vadd.f32 %v1898_v24, %v1897_v21  ;;  %v4949_v24 = vld [vmem:[%s5541_s18 + $0x2b0] sm:$0xff] }
 0x11e   : > { %v1906_v6 = vadd.f32 %v1905_v50, %v1904_v33  ;;  %v1927_v55 = vadd.f32 %v1926_v2, %v1925_v51  ;;  %v1948_v40 = vmul.f32 %v1944_v52, %v5551_v17  ;;  %v1949_v43 = vmul.f32 %v1945_v49, %v8328_v53  ;;  %v4950_v52 = vld [vmem:[%s5541_s18 + $0x2b8] sm:$0xff] }
 0x11f   : > { %v6474_v34 = vadd.f32 %v1874_v20, %v8336_v5  ;;  %v6478_v56 = vadd.f32 %v1881_v12, %v8337_v4  ;;  %v1934_v1 = vadd.f32 %v1933_v54, %v1932_v9  ;;  %v1900_v61 = vrot.slane %v1899_v0, 1 }
 0x120   : > { %v1907_v62 = vrot.slane %v1906_v6, 1  ;;  %v1950_v11 = vmul.f32 %v1946_v60, %v8329_v41  ;;  %v1951_v14 = vmul.f32 %v1947_v42, %v8330_v38  ;;  %v1928_v50 = vrot.slane %v1927_v55, 2 }
 0x121   : > { %8338 = vst [vmem:[#allocation3_spill] sm:$0xff] %v6478_v56  ;;  %v1935_v30 = vrot.slane %v1934_v1, 2  ;;  %v1901_v51 = vadd.f32 %v1900_v61, %v1899_v0  ;;  %v1974_v12 = vunpack.c.l.bf16 %v4949_v24  ;;  %v1975_v2 = vunpack.c.h.bf16 %v4949_v24 }
 0x122   : > { %v1908_v54 = vadd.f32 %v1907_v62, %v1906_v6  ;;  %v1952_v35 = vadd.f32 %v1950_v11, %v1948_v40  ;;  %v1959_v9 = vadd.f32 %v1951_v14, %v1949_v43  ;;  %v1929_v49 = vadd.f32 %v1928_v50, %v1927_v55  ;;  %v4951_v62 = vld [vmem:[%s5541_s18 + $0x2c0] sm:$0xff] }
 0x123   : > { %v1936_v20 = vadd.f32 %v1935_v30, %v1934_v1  ;;  %v8339_v60 = vunpack.c.l.bf16 %v6448_v45  ;;  %v8340_v5 = vunpack.c.h.bf16 %v6448_v45  ;;  %v1976_v40 = vunpack.c.l.bf16 %v4950_v52 }
 0x124   : > { %v1953_v33 = vrot.slane %v1952_v35, 4  ;;  %v1960_v0 = vrot.slane %v1959_v9, 4  ;;  %v1930_v6 = vrot.slane %v1929_v49, 1  ;;  %v1977_v43 = vunpack.c.h.bf16 %v4950_v52 }
 0x125   : > { %v6495_v42 = vadd.f32 %v8339_v60, %v1901_v51  ;;  %v6499_v4 = vadd.f32 %v8340_v5, %v1908_v54  ;;  %v1937_v61 = vrot.slane %v1936_v20, 1  ;;  %v1978_v11 = vmul.f32 %v1974_v12, %v5551_v17  ;;  %v4952_v54 = vld [vmem:[%s5541_s18 + $0x2c8] sm:$0xff] }
 0x126   : > { %v1954_v55 = vadd.f32 %v1953_v33, %v1952_v35  ;;  %v1961_v1 = vadd.f32 %v1960_v0, %v1959_v9  ;;  %v1979_v14 = vmul.f32 %v1975_v2, %v8328_v53  ;;  %v1931_v24 = vadd.f32 %v1930_v6, %v1929_v49  ;;  %v6518_v6 = vld [vmem:[%s8204_s3 + $0x8] sm:$0x11] }
 0x127   : > { %v1938_v50 = vadd.f32 %v1937_v61, %v1936_v20  ;;  %v1980_v30 = vmul.f32 %v1976_v40, %v8329_v41  ;;  %v1981_v51 = vmul.f32 %v1977_v43, %v8330_v38  ;;  %v2001_v21 = vunpack.c.l.bf16 %v4951_v62 }
 0x128   : > { %v1955_v60 = vrot.slane %v1954_v55, 2  ;;  %v1962_v5 = vrot.slane %v1961_v1, 2  ;;  %v2002_v57 = vunpack.c.h.bf16 %v4951_v62  ;;  %v8341_v52 = vunpack.c.l.bf16 %v6448_v45 }
 0x129   : > { %v8342_v33 = vunpack.c.h.bf16 %v6448_v45  ;;  %v1982_v9 = vadd.f32 %v1980_v30, %v1978_v11  ;;  %v1989_v49 = vadd.f32 %v1981_v51, %v1979_v14  ;;  %v2003_v2 = vunpack.c.l.bf16 %v4952_v54 }
 0x12a   : > { %v6509_v15 = vadd.f32 %v1931_v24, %v8341_v52  ;;  %v1956_v20 = vadd.f32 %v1955_v60, %v1954_v55  ;;  %v1963_v12 = vadd.f32 %v1962_v5, %v1961_v1  ;;  %v2004_v0 = vunpack.c.h.bf16 %v4952_v54 }
 0x12b   : > { %v6513_v35 = vadd.f32 %v1938_v50, %v8342_v33  ;;  %v1983_v61 = vrot.slane %v1982_v9, 4  ;;  %v1990_v40 = vrot.slane %v1989_v49, 4  ;;  %v2005_v43 = vmul.f32 %v2001_v21, %v5551_v17 }
 0x12c   : > { %v2006_v62 = vmul.f32 %v2002_v57, %v8328_v53  ;;  %v1957_v45 = vrot.slane %v1956_v20, 1  ;;  %v1964_v24 = vrot.slane %v1963_v12, 1  ;;  %v2007_v11 = vmul.f32 %v2003_v2, %v8329_v41 }
 0x12d   : > { %v2008_v55 = vmul.f32 %v2004_v0, %v8330_v38  ;;  %v1984_v1 = vadd.f32 %v1983_v61, %v1982_v9  ;;  %v1991_v14 = vadd.f32 %v1990_v40, %v1989_v49  ;;  %v2024_v50 = vunpack.c.l.bf16 %v6518_v6 }
 0x12e   : > { %v2025_v30 = vunpack.c.h.bf16 %v6518_v6  ;;  %v1958_v51 = vadd.f32 %v1957_v45, %v1956_v20  ;;  %v1965_v54 = vadd.f32 %v1964_v24, %v1963_v12  ;;  %v2009_v60 = vadd.f32 %v2007_v11, %v2005_v43 }
 0x12f   : > { %v2016_v5 = vadd.f32 %v2008_v55, %v2006_v62  ;;  %v1985_v52 = vrot.slane %v1984_v1, 2  ;;  %v1992_v17 = vrot.slane %v1991_v14, 2  ;;  %v2030_v57 = vrot.slane %v6439_v46, 1 }
 0x130   : > { %v2031_v53 = vrot.slane %v6443_v37, 1  ;;  %v8343_v41 = vunpack.c.l.bf16 %v6483_v63  ;;  %v8344_v38 = vunpack.c.h.bf16 %v6483_v63  ;;  %v2010_v9 = vrot.slane %v2009_v60, 4 }
 0x131   : > { %v2017_v49 = vrot.slane %v2016_v5, 4  ;;  %v1986_v20 = vadd.f32 %v1985_v52, %v1984_v1  ;;  %v1993_v12 = vadd.f32 %v1992_v17, %v1991_v14  ;;  %v2034_v2 = vmax.f32 %v6428_v31, %v2030_v57 }
 0x132   : > { %v6530_v21 = vadd.f32 %v8343_v41, %v1958_v51  ;;  %v6534_v33 = vadd.f32 %v8344_v38, %v1965_v54  ;;  %v2035_v0 = vmax.f32 %v6432_v13, %v2031_v53  ;;  %v2011_v6 = vadd.f32 %v2010_v9, %v2009_v60 }
 0x133   : > { %v2018_v61 = vadd.f32 %v2017_v49, %v2016_v5  ;;  %v2038_v40 = vrot.slane %v6458_v39, 2  ;;  %v2039_v43 = vrot.slane %v6462_v19, 2  ;;  %v1987_v62 = vrot.slane %v1986_v20, 1 }
 0x134   : > { %v1994_v45 = vrot.slane %v1993_v12, 1  ;;  %v2046_v24 = vrot.slane %v6474_v34, 3  ;;  %v2047_v11 = vrot.slane %v6478_v56, 3  ;;  %v2012_v55 = vrot.slane %v2011_v6, 2 }
 0x135   : > { %v2019_v51 = vrot.slane %v2018_v61, 2  ;;  %v2042_v1 = vmax.f32 %v2034_v2, %v2038_v40  ;;  %v2043_v14 = vmax.f32 %v2035_v0, %v2039_v43  ;;  %v1988_v54 = vadd.f32 %v1987_v62, %v1986_v20 }
 0x136   : > { %v1995_v52 = vadd.f32 %v1994_v45, %v1993_v12  ;;  %v2054_v17 = vrot.slane %v6495_v42, 4  ;;  %v2055_v60 = vrot.slane %v6499_v4, 4  ;;  %v2013_v5 = vadd.f32 %v2012_v55, %v2011_v6 }
 0x137   : > { %v2020_v57 = vadd.f32 %v2019_v51, %v2018_v61  ;;  %v2050_v53 = vmax.f32 %v2042_v1, %v2046_v24  ;;  %v2051_v41 = vmax.f32 %v2043_v14, %v2047_v11  ;;  %v8345_v38 = vunpack.c.l.bf16 %v6483_v63 }
 0x138   : > { %v8346_v49 = vunpack.c.h.bf16 %v6483_v63  ;;  %v2062_v2 = vrot.slane %v6509_v15, 5  ;;  %v2063_v20 = vrot.slane %v6513_v35, 5  ;;  %v2014_v12 = vrot.slane %v2013_v5, 1 }
 0x139   : > { %v6546_v9 = vadd.f32 %v1988_v54, %v8345_v38  ;;  %v2021_v0 = vrot.slane %v2020_v57, 1  ;;  %v2058_v40 = vmax.f32 %v2050_v53, %v2054_v17  ;;  %v2059_v43 = vmax.f32 %v2051_v41, %v2055_v60 }
 0x13a   : > { %v6550_v56 = vadd.f32 %v1995_v52, %v8346_v49  ;;  %v2070_v6 = vrot.slane %v6530_v21, 6  ;;  %v2071_v61 = vrot.slane %v6534_v33, 6  ;;  %v2015_v24 = vadd.f32 %v2014_v12, %v2013_v5 }
 0x13b   : > { %v2078_v62 = vrot.slane %v6546_v9, 7  ;;  %v2022_v63 = vadd.f32 %v2021_v0, %v2020_v57  ;;  %v2066_v11 = vmax.f32 %v2058_v40, %v2062_v2  ;;  %v2067_v55 = vmax.f32 %v2059_v43, %v2063_v20 }
 0x13c   : > { %v2079_v45 = vrot.slane %v6550_v56, 7  ;;  %v8347_v51 = vunpack.c.l.bf16 %v6328_v10  ;;  %v8348_v14 = vunpack.c.h.bf16 %v6328_v10  ;;  %v1694_v52 = vadd.f32 %v6393_v27, %v6375_v32 }
 0x13d   : > { %v8349_v17 = vunpack.c.l.bf16 %v6332_v28  ;;  %v6569_v5 = vadd.f32 %v2024_v50, %v2015_v24  ;;  %v6571_v57 = vadd.f32 %v2025_v30, %v2022_v63  ;;  %v2074_v53 = vmax.f32 %v2066_v11, %v2070_v6 }
 0x13e   : > { %v1692_v1 = vmul.f32 %v6363_v29, %v8347_v51  ;;  %v1693_v54 = vmul.f32 %v6367_v16, %v8348_v14  ;;  %v2075_v41 = vmax.f32 %v2067_v55, %v2071_v61  ;;  %v6575_v29 = vadd.f32 %v6193_v18, %v6177_v47  ;;  %v6593_v47 = vld [vmem:[%s5756_s25 + $0x1a0] sm:$0xff]  ;;  %v6596_v18 = vld [vmem:[%s5756_s25 + $0x1a8] sm:$0xff] }
 0x13f   : > { %v1713_v60 = vmul.f32 %v6381_v25, %v8349_v17  ;;  %v8351_v10 = vunpack.c.h.bf16 %v6154_v26  ;;  %v1695_v32 = vadd.f32 %v6396_v59, %v6399_v44  ;;  %v8353_v27 = vunpack.c.h.bf16 %v6332_v28  ;;  %v8355_v44 = vld [vmem:[#allocation23_spill] sm:$0xff] }
 0x140   : > { %8350 = vst [vmem:[#allocation4_spill] sm:$0xff] %v6575_v29  ;;  %v6589_v30 = vadd.f32 %v6208_v22, %v6185_v23  ;;  %5253 = vrcp.f32 %v6356_v8  ;;  %v2082_v26 = vmax.f32 %v2074_v53, %v2078_v62  ;;  %v1696_v59 = vadd.f32 %v1692_v1, %v6377_v3  ;;  %v8359_v51 = vld [vmem:[#allocation3_spill] sm:$0xff]  ;;  %v4984_v29 = vld [vmem:[%s5541_s18 + $0xc8] sm:$0xff] }
 0x141   : > { %v6580_v16 = vmul.f32 %v6172_v58, %v8351_v10  ;;  %v1714_v50 = vmul.f32 %v6385_v36, %v8353_v27  ;;  %v2083_v58 = vmax.f32 %v2075_v41, %v2079_v45  ;;  %5255 = vrcp.f32 %v6359_v48 }
 0x142   : > { %8354 = vst [vmem:[#allocation26_spill] sm:$0xff] %v6589_v30  ;;  %v1697_v28 = vadd.f32 %v1693_v54, %v6401_v7  ;;  %v8356_v38 = vunpack.c.l.bf16 %v8355_v44  ;;  %v8357_v23 = vunpack.c.h.bf16 %v8355_v44  ;;  %v6607_v8 = vadd.f32 %v1713_v60, %v1694_v52 }
 0x143   : > { %8352 = vst [vmem:[#allocation5_spill] sm:$0xff] %v6580_v16  ;;  %v6610_v2 = vmax.f32 %v2082_v26, %v6569_v5  ;;  %v6613_v20 = vmax.f32 %v2083_v58, %v6571_v57  ;;  %v6615_v48 = vadd.f32 %v1714_v50, %v1695_v32  ;;  %v1724_v3 = vunpack.c.l.bf16 %v6593_v47 }
 0x144   : > { %v1715_v49 = vmul.f32 %v6381_v25, %v8356_v38  ;;  %v1716_v22 = vmul.f32 %v6385_v36, %v8357_v23 }
 0x145   : > { %8358 = vst [vmem:[#allocation23_spill] sm:$0xff] %v6615_v48  ;;  %v2086_v12 = vsub.f32 %v6428_v31, %v6610_v2  ;;  %v2087_v36 = vsub.f32 %v6432_v13, %v6613_v20  ;;  %v2094_v0 = vrot.slane %v6610_v2, 7  ;;  %v2095_v40 = vrot.slane %v6613_v20, 7 }
 0x146   : > { %v2104_v43 = vrot.slane %v6610_v2, 6  ;;  %v2105_v6 = vrot.slane %v6613_v20, 6  ;;  %v2114_v61 = vrot.slane %v6610_v2, 5  ;;  %v2115_v62 = vrot.slane %v6613_v20, 5 }
 0x147   : > { %v2088_v45 = vmul.f32 1.442695, %v2086_v12  ;;  %v2090_v24 = vmul.f32 1.442695, %v2087_v36  ;;  %v2098_v63 = vsub.f32 %v6439_v46, %v2094_v0  ;;  %v2099_v31 = vsub.f32 %v6443_v37, %v2095_v40  ;;  %v8362_v12 = vld [vmem:[#allocation6_spill] sm:$0xff]  ;;  %v8363_v36 = vld [vmem:[#allocation24_spill] sm:$0xff] }
 0x148   : > { %v2108_v13 = vsub.f32 %v6458_v39, %v2104_v43  ;;  %v2109_v11 = vsub.f32 %v6462_v19, %v2105_v6  ;;  %v2118_v55 = vsub.f32 %v6474_v34, %v2114_v61  ;;  %v2119_v1 = vsub.f32 %v8359_v51, %v2115_v62  ;;  %v6663_v6 = vld [vmem:[%s5756_s25 + $0x240] sm:$0xff] }
 0x149   : > { %5257 = vpow2.f32 %v2088_v45  ;;  %v2100_v14 = vmul.f32 1.442695, %v2098_v63  ;;  %v2102_v54 = vmul.f32 1.442695, %v2099_v31  ;;  %v2124_v52 = vrot.slane %v6610_v2, 4  ;;  %v6668_v45 = vld [vmem:[%s5756_s25 + $0x248] sm:$0xff] }
 0x14a   : > { %5259 = vpow2.f32 %v2090_v24  ;;  %v2110_v17 = vmul.f32 1.442695, %v2108_v13  ;;  %v2112_v60 = vmul.f32 1.442695, %v2109_v11  ;;  %v2120_v53 = vmul.f32 1.442695, %v2118_v55 }
 0x14b   : > { %5261 = vpow2.f32 %v2100_v14  ;;  %v2122_v46 = vmul.f32 1.442695, %v2119_v1  ;;  %v2125_v37 = vrot.slane %v6613_v20, 4  ;;  %v2128_v39 = vsub.f32 %v6495_v42, %v2124_v52  ;;  %v6671_v24 = vld [vmem:[%s5756_s25 + $0x250] sm:$0xff]  ;;  %v6679_v63 = vld [vmem:[%s5756_s25 + $0x258] sm:$0xff]  ;;  %v6689_v11 = vld [vmem:[%s5756_s25 + $0x260] sm:$0xff] }
 0x14c   : > { %5263 = vpow2.f32 %v2102_v54  ;;  %v2134_v34 = vrot.slane %v6610_v2, 3  ;;  %v2135_v19 = vrot.slane %v6613_v20, 3  ;;  %v2144_v41 = vrot.slane %v6610_v2, 2  ;;  %v6696_v14 = vld [vmem:[%s5756_s25 + $0x268] sm:$0xff] }
 0x14d   : > { %5265 = vpow2.f32 %v2110_v17  ;;  %v2129_v10 = vsub.f32 %v6499_v4, %v2125_v37  ;;  %v2130_v32 = vmul.f32 1.442695, %v2128_v39  ;;  %v2145_v27 = vrot.slane %v6613_v20, 2  ;;  %v6644_v50 = vpop.eup %5253 }
 0x14e   : > { %8360 = vst [vmem:[#allocation3_spill] sm:$0xff] %v6644_v50  ;;  %5267 = vpow2.f32 %v2112_v60  ;;  %v2138_v26 = vsub.f32 %v6509_v15, %v2134_v34  ;;  %v2139_v42 = vsub.f32 %v6513_v35, %v2135_v19  ;;  %v2148_v58 = vsub.f32 %v6530_v21, %v2144_v41  ;;  %v6649_v44 = vpop.eup %5255 }
 0x14f   : > { %8361 = vst [vmem:[#allocation27_spill] sm:$0xff] %v6649_v44  ;;  %5269 = vpow2.f32 %v2120_v53  ;;  %v2132_v38 = vmul.f32 1.442695, %v2129_v10  ;;  %v2149_v4 = vsub.f32 %v6534_v33, %v2145_v27  ;;  %v2154_v23 = vrot.slane %v6610_v2, 1  ;;  %v6704_v53 = vld [vmem:[%s5756_s25 + $0x278] sm:$0xff] }
 0x150   : > { %v6655_v0 = vrot.slane %v8363_v36, %v8362_v12  ;;  %5271 = vpow2.f32 %v2122_v46  ;;  %v2140_v15 = vmul.f32 1.442695, %v2138_v26  ;;  %v2142_v40 = vmul.f32 1.442695, %v2139_v42 }
 0x151   : > { %v6657_v35 = vadd.f32 %v1715_v49, %v1696_v59  ;;  %v6659_v21 = vadd.f32 %v1716_v22, %v1697_v28  ;;  %5273 = vpow2.f32 %v2130_v32  ;;  %v2155_v43 = vrot.slane %v6613_v20, 1  ;;  %v8366_v59 = vld [vmem:[#allocation25_spill] sm:$0xff] }
 0x152   : > { %5275 = vpow2.f32 %v2132_v38  ;;  %v2150_v61 = vmul.f32 1.442695, %v2148_v58  ;;  %v2158_v62 = vsub.f32 %v6546_v9, %v2154_v23  ;;  %v6675_v28 = vrot.slane %v8366_v59, %v8362_v12  ;;  %v6717_v23 = vld [vmem:[%s5756_s25 + $0x280] sm:$0xff] }
 0x153   : > { %8364 = vst [vmem:[#allocation24_spill] sm:$0xff] %v6657_v35  ;;  %8365 = vst [vmem:[#allocation28_spill] sm:$0xff] %v6659_v21  ;;  %5277 = vpow2.f32 %v2140_v15  ;;  %v2152_v49 = vmul.f32 1.442695, %v2149_v4  ;;  %v2159_v22 = vsub.f32 %v6550_v56, %v2155_v43  ;;  %v6684_v9 = vmul.f32 %v6655_v0, %v1724_v3  ;;  %v6699_v3 = vld [vmem:[%s5756_s25 + $0x270] sm:$0xff] }
 0x154   : > { %5279 = vpow2.f32 %v2142_v40  ;;  %v2233_v31 = vunpack.c.l.bf16 %v6663_v6  ;;  %v2234_v13 = vunpack.c.h.bf16 %v6663_v6  ;;  %v2235_v55 = vunpack.c.l.bf16 %v6668_v45 }
 0x155   : > { %8367 = vst [vmem:[#allocation25_spill] sm:$0xff] %v6684_v9  ;;  %v2252_v56 = vunpack.c.l.bf16 %v6671_v24  ;;  %5281 = vpow2.f32 %v2150_v61  ;;  %v2160_v52 = vmul.f32 1.442695, %v2158_v62  ;;  %v2254_v17 = vunpack.c.l.bf16 %v6679_v63  ;;  %v8368_v62 = vld [vmem:[#allocation7_spill] sm:$0xff] }
 0x156   : > { %v5258_v54 = vpop.eup %5257  ;;  %v2255_v60 = vunpack.c.h.bf16 %v6679_v63  ;;  %5283 = vpow2.f32 %v2152_v49  ;;  %v2162_v37 = vmul.f32 1.442695, %v2159_v22  ;;  %v2275_v39 = vunpack.c.l.bf16 %v6689_v11 }
 0x157   : > { %v5260_v46 = vpop.eup %5259  ;;  %v2164_v41 = vsub.f32 %v6569_v5, %v6610_v2  ;;  %v2277_v10 = vunpack.c.l.bf16 %v6696_v14  ;;  %5285 = vpow2.f32 %v2160_v52  ;;  %v2165_v5 = vsub.f32 %v6571_v57, %v6613_v20 }
 0x158   : > { %v5262_v19 = vpop.eup %5261  ;;  %v2240_v15 = vrot.slane %v5258_v54, %v8362_v12  ;;  %5287 = vpow2.f32 %v2162_v37  ;;  %v2244_v57 = vrot.slane %v5260_v46, %v8362_v12 }
 0x159   : > { %v5264_v26 = vpop.eup %5263  ;;  %v2172_v42 = vrot.slane %v5262_v19, 1  ;;  %v2259_v59 = vrot.slane %v5262_v19, %v8368_v62  ;;  %v2166_v22 = vmul.f32 1.442695, %v2164_v41  ;;  %v2168_v38 = vmul.f32 1.442695, %v2165_v5 }
 0x15a   : > { %v5266_v36 = vpop.eup %5265  ;;  %v2173_v2 = vrot.slane %v5264_v26, 1  ;;  %v2263_v20 = vrot.slane %v5264_v26, %v8368_v62  ;;  %v2247_v1 = vmul.f32 %v2240_v15, %v2235_v55  ;;  %v4962_v55 = vld [vmem:[%s5756_s25 + $0x288] sm:$0xff] }
 0x15b   : > { %v5268_v40 = vpop.eup %5267  ;;  %v2176_v43 = vadd.f32 %v5258_v54, %v2172_v42  ;;  %v2180_v61 = vrot.slane %v5266_v36, 2  ;;  %v2245_v42 = vmul.f32 %v2240_v15, %v2233_v31  ;;  %v2264_v41 = vmul.f32 %v2259_v59, %v2252_v56 }
 0x15c   : > { %v5270_v49 = vpop.eup %5269  ;;  %v2177_v63 = vadd.f32 %v5260_v46, %v2173_v2  ;;  %v2181_v33 = vrot.slane %v5268_v40, 2  ;;  %v8369_v2 = vld [vmem:[#allocation8_spill] sm:$0xff]  ;;  %v2266_v46 = vmul.f32 %v2259_v59, %v2254_v17  ;;  %v8370_v31 = vunpack.c.h.bf16 %v6668_v45 }
 0x15d   : > { %v5272_v7 = vpop.eup %5271  ;;  %v2184_v52 = vadd.f32 %v2180_v61, %v2176_v43  ;;  %v2188_v4 = vrot.slane %v5270_v49, 3  ;;  %v2282_v34 = vrot.slane %v5266_v36, %v8369_v2  ;;  %v2267_v5 = vmul.f32 %v2263_v20, %v2255_v60 }
 0x15e   : > { %v5274_v58 = vpop.eup %5273  ;;  %v2185_v37 = vadd.f32 %v2181_v33, %v2177_v63  ;;  %v2189_v54 = vrot.slane %v5272_v7, 3  ;;  %v2246_v33 = vmul.f32 %v2244_v57, %v2234_v13  ;;  %v2248_v26 = vmul.f32 %v2244_v57, %v8370_v31 }
 0x15f   : > { %v5276_v27 = vpop.eup %5275  ;;  %v2192_v19 = vadd.f32 %v2188_v4, %v2184_v52  ;;  %v2196_v32 = vrot.slane %v5274_v58, 4  ;;  %v8371_v4 = vunpack.c.h.bf16 %v6671_v24  ;;  %5289 = vpow2.f32 %v2166_v22 }
 0x160   : > { %v6727_v25 = vpop.eup %5277  ;;  %v2193_v43 = vadd.f32 %v2189_v54, %v2185_v37  ;;  %v2197_v61 = vrot.slane %v5276_v27, 4  ;;  %v2286_v52 = vrot.slane %v5268_v40, %v8369_v2  ;;  %v2268_v13 = vadd.f32 %v2264_v41, %v2245_v42  ;;  %v4963_v41 = vld [vmem:[%s5756_s25 + $0x290] sm:$0xff] }
 0x161   : > { %v6729_v51 = vpop.eup %5279  ;;  %v2265_v56 = vmul.f32 %v2263_v20, %v8371_v4  ;;  %v2200_v36 = vadd.f32 %v2196_v32, %v2192_v19  ;;  %v2204_v63 = vrot.slane %v6727_v25, 5  ;;  %v2287_v45 = vmul.f32 %v2282_v34, %v2275_v39  ;;  %v8372_v20 = vld [vmem:[#allocation9_spill] sm:$0xff]  ;;  %v8377_v4 = vld [vmem:[#allocation10_spill] sm:$0xff] }
 0x162   : > { %v6740_v17 = vpop.eup %5281  ;;  %v2201_v15 = vadd.f32 %v2197_v61, %v2193_v43  ;;  %v2205_v6 = vrot.slane %v6729_v51, 5  ;;  %5291 = vpow2.f32 %v2168_v38  ;;  %v2270_v24 = vadd.f32 %v2266_v46, %v2247_v1 }
 0x163   : > { %v6743_v59 = vpop.eup %5283  ;;  %v2289_v60 = vmul.f32 %v2282_v34, %v2277_v10  ;;  %v2322_v32 = vunpack.c.h.bf16 %v6717_v23  ;;  %v2269_v22 = vadd.f32 %v2265_v56, %v2246_v33  ;;  %v2271_v57 = vadd.f32 %v2267_v5, %v2248_v26 }
 0x164   : > { %v2305_v40 = vrot.slane %v5270_v49, %v8372_v20  ;;  %v2323_v37 = vunpack.c.l.bf16 %v4962_v55  ;;  %v2208_v54 = vadd.f32 %v2204_v63, %v2200_v36  ;;  %v8373_v19 = vunpack.c.h.bf16 %v6689_v11  ;;  %v6753_v38 = vpop.eup %5285 }
 0x165   : > { %v8374_v61 = vunpack.c.h.bf16 %v6696_v14  ;;  %v2309_v39 = vrot.slane %v5272_v7, %v8372_v20  ;;  %v2209_v1 = vadd.f32 %v2205_v6, %v2201_v15  ;;  %v2212_v34 = vrot.slane %v6740_v17, 6  ;;  %v5288_v46 = vpop.eup %5287 }
 0x166   : > { %v2288_v43 = vmul.f32 %v2286_v52, %v8373_v19  ;;  %v2213_v10 = vrot.slane %v6743_v59, 6  ;;  %v2291_v49 = vadd.f32 %v2287_v45, %v2268_v13  ;;  %v2293_v33 = vadd.f32 %v2289_v60, %v2270_v24  ;;  %v4964_v60 = vld [vmem:[%s5756_s25 + $0x298] sm:$0xff] }
 0x167   : > { %v2290_v42 = vmul.f32 %v2286_v52, %v8374_v61  ;;  %v8375_v11 = vunpack.c.l.bf16 %v6699_v3  ;;  %v8376_v14 = vunpack.c.l.bf16 %v6704_v53  ;;  %v2328_v7 = vrot.slane %v5274_v58, %v8377_v4 }
 0x168   : > { %v2324_v56 = vunpack.c.h.bf16 %v4962_v55  ;;  %v2332_v5 = vrot.slane %v5276_v27, %v8377_v4  ;;  %v2344_v36 = vunpack.c.l.bf16 %v4963_v41  ;;  %v2345_v63 = vunpack.c.h.bf16 %v4963_v41 }
 0x169   : > { %v2310_v31 = vmul.f32 %v2305_v40, %v8375_v11  ;;  %v2312_v26 = vmul.f32 %v2305_v40, %v8376_v14  ;;  %v2292_v52 = vadd.f32 %v2288_v43, %v2269_v22  ;;  %v2294_v15 = vadd.f32 %v2290_v42, %v2271_v57  ;;  %v4965_v22 = vld [vmem:[%s5756_s25 + $0x2a0] sm:$0xff]  ;;  %v4966_v57 = vld [vmem:[%s5756_s25 + $0x2a8] sm:$0xff] }
 0x16a   : > { %v8378_v6 = vunpack.c.h.bf16 %v6699_v3  ;;  %v8379_v45 = vunpack.c.h.bf16 %v6704_v53  ;;  %v2216_v19 = vadd.f32 %v2212_v34, %v2208_v54  ;;  %v2217_v40 = vadd.f32 %v2213_v10, %v2209_v1  ;;  %v8381_v53 = vld [vmem:[#allocation11_spill] sm:$0xff] }
 0x16b   : > { %v2220_v58 = vrot.slane %v6753_v38, 7  ;;  %v2221_v55 = vrot.slane %v5288_v46, 7  ;;  %v2314_v61 = vadd.f32 %v2310_v31, %v2291_v49  ;;  %v2316_v27 = vadd.f32 %v2312_v26, %v2293_v33 }
 0x16c   : > { %v2311_v13 = vmul.f32 %v2309_v39, %v8378_v6  ;;  %v2313_v24 = vmul.f32 %v2309_v39, %v8379_v45  ;;  %v8380_v11 = vunpack.c.l.bf16 %v6717_v23  ;;  %v2335_v41 = vmul.f32 %v2328_v7, %v2323_v37  ;;  %v6777_v49 = vpop.eup %5289  ;;  %v4967_v45 = vld [vmem:[%s5756_s25 + $0x2b0] sm:$0xff] }
 0x16d   : > { %v2334_v43 = vmul.f32 %v2332_v5, %v2322_v32  ;;  %v2346_v3 = vunpack.c.l.bf16 %v4964_v60  ;;  %v2347_v42 = vunpack.c.h.bf16 %v4964_v60  ;;  %v2351_v54 = vrot.slane %v6727_v25, %v8381_v53  ;;  %v4968_v60 = vld [vmem:[%s5756_s25 + $0x2b8] sm:$0xff] }
 0x16e   : > { %v2333_v14 = vmul.f32 %v2328_v7, %v8380_v11  ;;  %v2315_v39 = vadd.f32 %v2311_v13, %v2292_v52  ;;  %v2317_v1 = vadd.f32 %v2313_v24, %v2294_v15  ;;  %v2336_v34 = vmul.f32 %v2332_v5, %v2324_v56  ;;  %v8382_v5 = vld [vmem:[#allocation12_spill] sm:$0xff] }
 0x16f   : > { %v2355_v10 = vrot.slane %v6729_v51, %v8381_v53  ;;  %v2367_v23 = vunpack.c.l.bf16 %v4965_v22  ;;  %v2368_v37 = vunpack.c.h.bf16 %v4965_v22  ;;  %v2369_v33 = vunpack.c.l.bf16 %v4966_v57  ;;  %v6781_v25 = vpop.eup %5291  ;;  %v4974_v22 = vld [vmem:[%s5530_s15 + $0x28] sm:$0xff] }
 0x170   : > { %v2370_v31 = vunpack.c.h.bf16 %v4966_v57  ;;  %v2224_v32 = vadd.f32 %v2220_v58, %v2216_v19  ;;  %v2225_v26 = vadd.f32 %v2221_v55, %v2217_v40  ;;  %v2337_v7 = vadd.f32 %v2333_v14, %v2314_v61  ;;  %v8383_v14 = vld [vmem:[#allocation17_spill] sm:$0xff] }
 0x171   : > { %v2339_v6 = vadd.f32 %v2335_v41, %v2316_v27  ;;  %v2356_v52 = vmul.f32 %v2351_v54, %v2344_v36  ;;  %v2358_v56 = vmul.f32 %v2351_v54, %v2346_v3  ;;  %v2374_v51 = vrot.slane %v6740_v17, %v8382_v5  ;;  %v4977_v27 = vld [vmem:[%s5541_s18 + $0x90] sm:$0xff]  ;;  %v4973_v41 = vld [vmem:[%s5530_s15 + $0x20] sm:$0xff] }
 0x172   : > { %v2378_v15 = vrot.slane %v6743_v59, %v8382_v5  ;;  %v2338_v13 = vadd.f32 %v2334_v43, %v2315_v39  ;;  %v2340_v24 = vadd.f32 %v2336_v34, %v2317_v1  ;;  %v2357_v19 = vmul.f32 %v2355_v10, %v2345_v63  ;;  %v4975_v54 = vld [vmem:[%s5530_s15 + $0x30] sm:$0xff]  ;;  %v4976_v39 = vld [vmem:[%s5530_s15 + $0x38] sm:$0xff] }
 0x173   : > { %v2359_v40 = vmul.f32 %v2355_v10, %v2347_v42  ;;  %v2390_v58 = vunpack.c.l.bf16 %v4967_v45  ;;  %v2391_v55 = vunpack.c.h.bf16 %v4967_v45  ;;  %v2392_v61 = vunpack.c.l.bf16 %v4968_v60  ;;  %v4978_v1 = vld [vmem:[%s5541_s18 + $0x98] sm:$0xff] }
 0x174   : > { %v2393_v36 = vunpack.c.h.bf16 %v4968_v60  ;;  %v6789_v11 = vadd.f32 %v6777_v49, %v2224_v32  ;;  %v6792_v17 = vadd.f32 %v6781_v25, %v2225_v26  ;;  %v2397_v59 = vrot.slane %v6753_v38, %v8383_v14 }
 0x175   : > { %v2401_v63 = vrot.slane %v5288_v46, %v8383_v14  ;;  %v2360_v57 = vadd.f32 %v2356_v52, %v2337_v7  ;;  %v2362_v43 = vadd.f32 %v2358_v56, %v2339_v6  ;;  %v2379_v3 = vmul.f32 %v2374_v51, %v2367_v23  ;;  %v4979_v6 = vld [vmem:[%s5541_s18 + $0xa0] sm:$0xff] }
 0x176   : > { %v2380_v42 = vmul.f32 %v2378_v15, %v2368_v37  ;;  %v2361_v34 = vadd.f32 %v2357_v19, %v2338_v13  ;;  %v2363_v10 = vadd.f32 %v2359_v40, %v2340_v24  ;;  %v2471_v32 = vunpack.c.l.bf16 %v4977_v27  ;;  %v4980_v40 = vld [vmem:[%s5541_s18 + $0xa8] sm:$0xff] }
 0x177   : > { %v2472_v26 = vunpack.c.h.bf16 %v4977_v27  ;;  %v2381_v45 = vmul.f32 %v2374_v51, %v2369_v33  ;;  %v2382_v60 = vmul.f32 %v2378_v15, %v2370_v31  ;;  %v6802_v16 = vmul.f32 0.25, %v4973_v41  ;;  %v6820_v31 = vld [vmem:[%s8204_s3 + $0x8] sm:$0x11] }
 0x178   : > { %v6804_v38 = vmul.f32 0.25, %v4974_v22  ;;  %v6806_v46 = vmul.f32 0.25, %v4975_v54  ;;  %v6808_v7 = vmul.f32 0.25, %v4976_v39  ;;  %v2473_v23 = vunpack.c.l.bf16 %v4978_v1 }
 0x179   : > { %8384 = vst [vmem:[#allocation29_spill] sm:$0xff] %v6802_v16  ;;  %v2474_v37 = vunpack.c.h.bf16 %v4978_v1  ;;  %v6811_v52 = vadd.f32 %v2379_v3, %v2360_v57  ;;  %v6813_v56 = vmul.f32 %v2397_v59, %v2390_v58  ;;  %v2475_v13 = vmul.f32 %v2471_v32, %v6802_v16  ;;  %v4981_v1 = vld [vmem:[%s5541_s18 + $0xb0] sm:$0xff] }
 0x17a   : > { %8385 = vst [vmem:[#allocation30_spill] sm:$0xff] %v6804_v38  ;;  %8386 = vst [vmem:[#allocation31_spill] sm:$0xff] %v6806_v46  ;;  %v2476_v33 = vmul.f32 %v2472_v26, %v6804_v38  ;;  %v6822_v51 = vmul.f32 %v2401_v63, %v2391_v55  ;;  %v6824_v15 = vmul.f32 %v2397_v59, %v2392_v61  ;;  %v2501_v41 = vunpack.c.l.bf16 %v4979_v6  ;;  %v6836_v55 = vld [vmem:[%s8204_s3 + $0x8] sm:$0x22] }
 0x17b   : > { %8387 = vst [vmem:[#allocation32_spill] sm:$0xff] %v6808_v7  ;;  %v2477_v24 = vmul.f32 %v2473_v23, %v6806_v46  ;;  %v2478_v19 = vmul.f32 %v2474_v37, %v6808_v7  ;;  %v6829_v58 = vadd.f32 %v2380_v42, %v2361_v34  ;;  %v6831_v27 = vadd.f32 %v2381_v45, %v2362_v43  ;;  %v4982_v34 = vld [vmem:[%s5541_s18 + $0xb8] sm:$0xff] }
 0x17c   : > { %v2502_v22 = vunpack.c.h.bf16 %v4979_v6  ;;  %v6838_v61 = vadd.f32 %v2382_v60, %v2363_v10  ;;  %v6840_v59 = vmul.f32 %v2401_v63, %v2393_v36  ;;  %v2503_v39 = vunpack.c.l.bf16 %v4980_v40 }
 0x17d   : > { %v2479_v54 = vadd.f32 %v2477_v24, %v2475_v13  ;;  %v2486_v42 = vadd.f32 %v2478_v19, %v2476_v33  ;;  %v2504_v43 = vunpack.c.h.bf16 %v4980_v40  ;;  %v2505_v32 = vmul.f32 %v2501_v41, %v6802_v16 }
 0x17e   : > { %v2506_v26 = vmul.f32 %v2502_v22, %v6804_v38  ;;  %v2507_v60 = vmul.f32 %v2503_v39, %v6806_v46  ;;  %v2531_v37 = vunpack.c.l.bf16 %v4981_v1  ;;  %v2532_v6 = vunpack.c.h.bf16 %v4981_v1  ;;  %v4983_v22 = vld [vmem:[%s5541_s18 + $0xc0] sm:$0xff] }
 0x17f   : > { %v2480_v63 = vrot.slane %v2479_v54, 4  ;;  %v2487_v45 = vrot.slane %v2486_v42, 4  ;;  %v2508_v23 = vmul.f32 %v2504_v43, %v6808_v7  ;;  %v2533_v13 = vunpack.c.l.bf16 %v4982_v34 }
 0x180   : > { %v2534_v33 = vunpack.c.h.bf16 %v4982_v34  ;;  %v2509_v40 = vadd.f32 %v2507_v60, %v2505_v32  ;;  %v2535_v10 = vmul.f32 %v2531_v37, %v6802_v16  ;;  %v2536_v36 = vmul.f32 %v2532_v6, %v6804_v38 }
 0x181   : > { %v2481_v24 = vadd.f32 %v2480_v63, %v2479_v54  ;;  %v2488_v19 = vadd.f32 %v2487_v45, %v2486_v42  ;;  %v2516_v41 = vadd.f32 %v2508_v23, %v2506_v26  ;;  %v2537_v3 = vmul.f32 %v2533_v13, %v6806_v46 }
 0x182   : > { %v2538_v39 = vmul.f32 %v2534_v33, %v6808_v7  ;;  %v2510_v30 = vrot.slane %v2509_v40, 4  ;;  %v2558_v54 = vunpack.c.l.bf16 %v4983_v22  ;;  %v2559_v42 = vunpack.c.h.bf16 %v4983_v22 }
 0x183   : > { %v2482_v57 = vrot.slane %v2481_v24, 2  ;;  %v2489_v43 = vrot.slane %v2488_v19, 2  ;;  %v2517_v1 = vrot.slane %v2516_v41, 4  ;;  %v2539_v14 = vadd.f32 %v2537_v3, %v2535_v10 }
 0x184   : > { %v2546_v34 = vadd.f32 %v2538_v39, %v2536_v36  ;;  %v2511_v63 = vadd.f32 %v2510_v30, %v2509_v40  ;;  %v2560_v37 = vunpack.c.l.bf16 %v4984_v29  ;;  %v2561_v6 = vunpack.c.h.bf16 %v4984_v29 }
 0x185   : > { %v2483_v32 = vadd.f32 %v2482_v57, %v2481_v24  ;;  %v2490_v26 = vadd.f32 %v2489_v43, %v2488_v19  ;;  %v2518_v45 = vadd.f32 %v2517_v1, %v2516_v41  ;;  %v2540_v60 = vrot.slane %v2539_v14, 4 }
 0x186   : > { %v2547_v23 = vrot.slane %v2546_v34, 4  ;;  %v2512_v33 = vrot.slane %v2511_v63, 2  ;;  %v2562_v2 = vmul.f32 %v2558_v54, %v6802_v16  ;;  %v2563_v3 = vmul.f32 %v2559_v42, %v6804_v38 }
 0x187   : > { %v2484_v13 = vrot.slane %v2483_v32, 1  ;;  %v2491_v5 = vrot.slane %v2490_v26, 1  ;;  %v2519_v53 = vrot.slane %v2518_v45, 2  ;;  %v2541_v4 = vadd.f32 %v2540_v60, %v2539_v14  ;;  %v6865_v14 = vld [vmem:[%s8204_s3 + $0x8] sm:$0x44] }
 0x188   : > { %v2548_v20 = vadd.f32 %v2547_v23, %v2546_v34  ;;  %v2513_v57 = vadd.f32 %v2512_v33, %v2511_v63  ;;  %v2564_v40 = vmul.f32 %v2560_v37, %v6806_v46  ;;  %v2565_v29 = vmul.f32 %v2561_v6, %v6808_v7 }
 0x189   : > { %v2485_v10 = vadd.f32 %v2484_v13, %v2483_v32  ;;  %v2492_v36 = vadd.f32 %v2491_v5, %v2490_v26  ;;  %v2520_v30 = vadd.f32 %v2519_v53, %v2518_v45  ;;  %v2542_v24 = vrot.slane %v2541_v4, 2  ;;  %v4985_v32 = vld [vmem:[%s5541_s18 + $0xd0] sm:$0xff]  ;;  %v4986_v13 = vld [vmem:[%s5541_s18 + $0xd8] sm:$0xff] }
 0x18a   : > { %v2549_v19 = vrot.slane %v2548_v20, 2  ;;  %v8388_v41 = vunpack.c.l.bf16 %v6820_v31  ;;  %v8389_v5 = vunpack.c.h.bf16 %v6820_v31  ;;  %v2514_v53 = vrot.slane %v2513_v57, 1 }
 0x18b   : > { %v2521_v43 = vrot.slane %v2520_v30, 1  ;;  %v2543_v1 = vadd.f32 %v2542_v24, %v2541_v4  ;;  %v2566_v54 = vadd.f32 %v2564_v40, %v2562_v2  ;;  %v2573_v42 = vadd.f32 %v2565_v29, %v2563_v3 }
 0x18c   : > { %v6869_v22 = vadd.f32 %v8388_v41, %v2485_v10  ;;  %v6873_v39 = vadd.f32 %v8389_v5, %v2492_v36  ;;  %v2550_v34 = vadd.f32 %v2549_v19, %v2548_v20  ;;  %v2515_v26 = vadd.f32 %v2514_v53, %v2513_v57  ;;  %v4987_v19 = vld [vmem:[%s5541_s18 + $0xe0] sm:$0xff]  ;;  %v4988_v53 = vld [vmem:[%s5541_s18 + $0xe8] sm:$0xff] }
 0x18d   : > { %v2522_v63 = vadd.f32 %v2521_v43, %v2520_v30  ;;  %v8250_v45 = vunpack.c.l.bf16 %v6865_v14  ;;  %v2544_v23 = vrot.slane %v2543_v1, 1  ;;  %v2567_v31 = vrot.slane %v2566_v54, 4 }
 0x18e   : > { %v2551_v37 = vrot.slane %v2550_v34, 1  ;;  %v2574_v6 = vrot.slane %v2573_v42, 4  ;;  %v8390_v33 = vunpack.c.l.bf16 %v6836_v55  ;;  %v8391_v2 = vunpack.c.h.bf16 %v6836_v55 }
 0x18f   : > { %v2588_v3 = vunpack.c.l.bf16 %v4985_v32  ;;  %v2589_v10 = vunpack.c.h.bf16 %v4985_v32  ;;  %v2545_v36 = vadd.f32 %v2544_v23, %v2543_v1  ;;  %v2568_v30 = vadd.f32 %v2567_v31, %v2566_v54 }
 0x190   : > { %v6881_v4 = vadd.f32 %v8390_v33, %v2515_v26  ;;  %v6885_v20 = vadd.f32 %v8391_v2, %v2522_v63  ;;  %v2552_v57 = vadd.f32 %v2551_v37, %v2550_v34  ;;  %v2575_v24 = vadd.f32 %v2574_v6, %v2573_v42 }
 0x191   : > { %v2590_v40 = vunpack.c.l.bf16 %v4986_v13  ;;  %v2591_v29 = vunpack.c.h.bf16 %v4986_v13  ;;  %v2592_v41 = vmul.f32 %v2588_v3, %v6802_v16  ;;  %v2593_v5 = vmul.f32 %v2589_v10, %v6804_v38 }
 0x192   : > { %v8392_v43 = vmov %v8390_v33  ;;  %v8393_v63 = vmov %v8391_v2  ;;  %v2569_v1 = vrot.slane %v2568_v30, 2  ;;  %v2576_v34 = vrot.slane %v2575_v24, 2  ;;  %v6904_v2 = vld [vmem:[%s8204_s3 + $0x8] sm:$0x88] }
 0x193   : > { %v6893_v26 = vadd.f32 %v2545_v36, %v8392_v43  ;;  %v6897_v33 = vadd.f32 %v2552_v57, %v8393_v63  ;;  %v2594_v54 = vmul.f32 %v2590_v40, %v6806_v46  ;;  %v2595_v42 = vmul.f32 %v2591_v29, %v6808_v7 }
 0x194   : > { %v2615_v32 = vunpack.c.l.bf16 %v4987_v19  ;;  %v2616_v23 = vunpack.c.h.bf16 %v4987_v19  ;;  %v2570_v37 = vadd.f32 %v2569_v1, %v2568_v30  ;;  %v2577_v31 = vadd.f32 %v2576_v34, %v2575_v24  ;;  %v4989_v24 = vld [vmem:[%s5541_s18 + $0xf0] sm:$0xff] }
 0x195   : > { %v2617_v6 = vunpack.c.l.bf16 %v4988_v53  ;;  %v2618_v13 = vunpack.c.h.bf16 %v4988_v53  ;;  %v2596_v55 = vadd.f32 %v2594_v54, %v2592_v41  ;;  %v2603_v3 = vadd.f32 %v2595_v42, %v2593_v5  ;;  %v4990_v54 = vld [vmem:[%s5541_s18 + $0xf8] sm:$0xff] }
 0x196   : > { %v2619_v10 = vmul.f32 %v2615_v32, %v6802_v16  ;;  %v2620_v36 = vmul.f32 %v2616_v23, %v6804_v38  ;;  %v2571_v57 = vrot.slane %v2570_v37, 1  ;;  %v2578_v40 = vrot.slane %v2577_v31, 1 }
 0x197   : > { %v2621_v19 = vmul.f32 %v2617_v6, %v6806_v46  ;;  %v2622_v30 = vmul.f32 %v2618_v13, %v6808_v7  ;;  %v2597_v29 = vrot.slane %v2596_v55, 4  ;;  %v2604_v53 = vrot.slane %v2603_v3, 4 }
 0x198   : > { %v2572_v41 = vadd.f32 %v2571_v57, %v2570_v37  ;;  %v2579_v5 = vadd.f32 %v2578_v40, %v2577_v31  ;;  %v2645_v23 = vunpack.c.l.bf16 %v4989_v24  ;;  %v2646_v60 = vunpack.c.h.bf16 %v4989_v24  ;;  %v4991_v40 = vld [vmem:[%s5541_s18 + $0x100] sm:$0xff] }
 0x199   : > { %v2623_v1 = vadd.f32 %v2621_v19, %v2619_v10  ;;  %v2630_v34 = vadd.f32 %v2622_v30, %v2620_v36  ;;  %v2598_v42 = vadd.f32 %v2597_v29, %v2596_v55  ;;  %v2605_v32 = vadd.f32 %v2604_v53, %v2603_v3 }
 0x19a   : > { %v6916_v6 = vadd.f32 %v8250_v45, %v2572_v41  ;;  %v8394_v13 = vunpack.c.h.bf16 %v6865_v14  ;;  %v2647_v10 = vunpack.c.l.bf16 %v4990_v54  ;;  %v2648_v36 = vunpack.c.h.bf16 %v4990_v54 }
 0x19b   : > { %v2624_v63 = vrot.slane %v2623_v1, 4  ;;  %v2631_v37 = vrot.slane %v2630_v34, 4  ;;  %v2599_v31 = vrot.slane %v2598_v42, 2  ;;  %v2606_v57 = vrot.slane %v2605_v32, 2 }
 0x19c   : > { %v6920_v62 = vadd.f32 %v8394_v13, %v2579_v5  ;;  %v2649_v19 = vmul.f32 %v2645_v23, %v6802_v16  ;;  %v2650_v30 = vmul.f32 %v2646_v60, %v6804_v38  ;;  %v2651_v53 = vmul.f32 %v2647_v10, %v6806_v46  ;;  %v4992_v5 = vld [vmem:[%s5541_s18 + $0x108] sm:$0xff] }
 0x19d   : > { %v2625_v55 = vadd.f32 %v2624_v63, %v2623_v1  ;;  %v2632_v3 = vadd.f32 %v2631_v37, %v2630_v34  ;;  %v2600_v24 = vadd.f32 %v2599_v31, %v2598_v42  ;;  %v2607_v29 = vadd.f32 %v2606_v57, %v2605_v32 }
 0x19e   : > { %v2652_v41 = vmul.f32 %v2648_v36, %v6808_v7  ;;  %v2672_v45 = vunpack.c.l.bf16 %v4991_v40  ;;  %v2673_v44 = vunpack.c.h.bf16 %v4991_v40  ;;  %v2653_v21 = vadd.f32 %v2651_v53, %v2649_v19  ;;  %v6933_v19 = vld [vmem:[%s8204_s3 + $0x10] sm:$0x11] }
 0x19f   : > { %v2626_v13 = vrot.slane %v2625_v55, 2  ;;  %v2633_v43 = vrot.slane %v2632_v3, 2  ;;  %v2601_v50 = vrot.slane %v2600_v24, 1  ;;  %v2608_v54 = vrot.slane %v2607_v29, 1 }
 0x1a0   : > { %v2660_v63 = vadd.f32 %v2652_v41, %v2650_v30  ;;  %v2674_v23 = vunpack.c.l.bf16 %v4992_v5  ;;  %v2675_v37 = vunpack.c.h.bf16 %v4992_v5  ;;  %v2654_v32 = vrot.slane %v2653_v21, 4  ;;  %v4993_v41 = vld [vmem:[%s5541_s18 + $0x110] sm:$0xff] }
 0x1a1   : > { %v2627_v1 = vadd.f32 %v2626_v13, %v2625_v55  ;;  %v2634_v34 = vadd.f32 %v2633_v43, %v2632_v3  ;;  %v2602_v60 = vadd.f32 %v2601_v50, %v2600_v24  ;;  %v2609_v42 = vadd.f32 %v2608_v54, %v2607_v29 }
 0x1a2   : > { %v2661_v31 = vrot.slane %v2660_v63, 4  ;;  %v2676_v36 = vmul.f32 %v2672_v45, %v6802_v16  ;;  %v2677_v40 = vmul.f32 %v2673_v44, %v6804_v38  ;;  %v8395_v43 = vunpack.c.l.bf16 %v6865_v14 }
 0x1a3   : > { %v2628_v57 = vrot.slane %v2627_v1, 1  ;;  %v2635_v10 = vrot.slane %v2634_v34, 1  ;;  %v8396_v50 = vunpack.c.h.bf16 %v6865_v14  ;;  %v2655_v30 = vadd.f32 %v2654_v32, %v2653_v21 }
 0x1a4   : > { %v6937_v55 = vadd.f32 %v2602_v60, %v8395_v43  ;;  %v2662_v24 = vadd.f32 %v2661_v31, %v2660_v63  ;;  %v2678_v53 = vmul.f32 %v2674_v23, %v6806_v46  ;;  %v2679_v44 = vmul.f32 %v2675_v37, %v6808_v7  ;;  %v4994_v43 = vld [vmem:[%s5541_s18 + $0x118] sm:$0xff] }
 0x1a5   : > { %v6941_v3 = vadd.f32 %v2609_v42, %v8396_v50  ;;  %v2629_v29 = vadd.f32 %v2628_v57, %v2627_v1  ;;  %v2636_v45 = vadd.f32 %v2635_v10, %v2634_v34  ;;  %v2656_v5 = vrot.slane %v2655_v30, 2 }
 0x1a6   : > { %v2663_v13 = vrot.slane %v2662_v24, 2  ;;  %v8397_v14 = vunpack.c.l.bf16 %v6904_v2  ;;  %v8398_v21 = vunpack.c.h.bf16 %v6904_v2  ;;  %v2680_v1 = vadd.f32 %v2678_v53, %v2676_v36 }
 0x1a7   : > { %v2687_v34 = vadd.f32 %v2679_v44, %v2677_v40  ;;  %v2657_v23 = vadd.f32 %v2656_v5, %v2655_v30  ;;  %v2702_v32 = vunpack.c.l.bf16 %v4993_v41  ;;  %v2703_v31 = vunpack.c.h.bf16 %v4993_v41 }
 0x1a8   : > { %v6951_v42 = vadd.f32 %v8397_v14, %v2629_v29  ;;  %v6955_v63 = vadd.f32 %v8398_v21, %v2636_v45  ;;  %v2664_v37 = vadd.f32 %v2663_v13, %v2662_v24  ;;  %v2681_v57 = vrot.slane %v2680_v1, 4 }
 0x1a9   : > { %v2688_v10 = vrot.slane %v2687_v34, 4  ;;  %v2704_v50 = vunpack.c.l.bf16 %v4994_v43  ;;  %v2705_v54 = vunpack.c.h.bf16 %v4994_v43  ;;  %v2658_v60 = vrot.slane %v2657_v23, 1 }
 0x1aa   : > { %v2665_v35 = vrot.slane %v2664_v37, 1  ;;  %v2706_v48 = vmul.f32 %v2702_v32, %v6802_v16  ;;  %v2707_v29 = vmul.f32 %v2703_v31, %v6804_v38  ;;  %v2682_v14 = vadd.f32 %v2681_v57, %v2680_v1 }
 0x1ab   : > { %v2689_v9 = vadd.f32 %v2688_v10, %v2687_v34  ;;  %v2708_v45 = vmul.f32 %v2704_v50, %v6806_v46  ;;  %v2709_v36 = vmul.f32 %v2705_v54, %v6808_v7  ;;  %v2659_v40 = vadd.f32 %v2658_v60, %v2657_v23 }
 0x1ac   : > { %v2666_v30 = vadd.f32 %v2665_v35, %v2664_v37  ;;  %v2728_v24 = vrot.slane %v6881_v4, 1  ;;  %v2729_v53 = vrot.slane %v6885_v20, 1  ;;  %v2683_v44 = vrot.slane %v2682_v14, 2 }
 0x1ad   : > { %v2690_v41 = vrot.slane %v2689_v9, 2  ;;  %v2710_v5 = vadd.f32 %v2708_v45, %v2706_v48  ;;  %v2717_v13 = vadd.f32 %v2709_v36, %v2707_v29  ;;  %v8399_v43 = vunpack.c.l.bf16 %v6904_v2 }
 0x1ae   : > { %v8400_v1 = vunpack.c.h.bf16 %v6904_v2  ;;  %v2732_v54 = vmax.f32 %v6869_v22, %v2728_v24  ;;  %v2733_v35 = vmax.f32 %v6873_v39, %v2729_v53  ;;  %v2684_v60 = vadd.f32 %v2683_v44, %v2682_v14 }
 0x1af   : > { %v6965_v21 = vadd.f32 %v2659_v40, %v8399_v43  ;;  %v2691_v23 = vadd.f32 %v2690_v41, %v2689_v9  ;;  %v2711_v37 = vrot.slane %v2710_v5, 4  ;;  %v2718_v32 = vrot.slane %v2717_v13, 4  ;;  %v4969_v41 = vld [vmem:[%s5756_s25 + $0x2c0] sm:$0xff] }
 0x1b0   : > { %v6969_v34 = vadd.f32 %v2666_v30, %v8400_v1  ;;  %v2736_v31 = vrot.slane %v6893_v26, 2  ;;  %v2737_v48 = vrot.slane %v6897_v33, 2  ;;  %v2744_v57 = vrot.slane %v6916_v6, 3 }
 0x1b1   : > { %v2745_v10 = vrot.slane %v6920_v62, 3  ;;  %v2685_v2 = vrot.slane %v2684_v60, 1  ;;  %v2692_v50 = vrot.slane %v2691_v23, 1  ;;  %v2712_v29 = vadd.f32 %v2711_v37, %v2710_v5 }
 0x1b2   : > { %v2719_v45 = vadd.f32 %v2718_v32, %v2717_v13  ;;  %v2740_v36 = vmax.f32 %v2732_v54, %v2736_v31  ;;  %v2741_v40 = vmax.f32 %v2733_v35, %v2737_v48  ;;  %v2752_v14 = vrot.slane %v6937_v55, 4 }
 0x1b3   : > { %v2753_v9 = vrot.slane %v6941_v3, 4  ;;  %v2686_v30 = vadd.f32 %v2685_v2, %v2684_v60  ;;  %v2693_v24 = vadd.f32 %v2692_v50, %v2691_v23  ;;  %v2713_v53 = vrot.slane %v2712_v29, 2 }
 0x1b4   : > { %v2720_v44 = vrot.slane %v2719_v45, 2  ;;  %v2748_v43 = vmax.f32 %v2740_v36, %v2744_v57  ;;  %v2749_v1 = vmax.f32 %v2741_v40, %v2745_v10  ;;  %v2760_v7 = vrot.slane %v6951_v42, 5  ;;  %v4970_v57 = vld [vmem:[%s5756_s25 + $0x2c8] sm:$0xff] }
 0x1b5   : > { %v2761_v46 = vrot.slane %v6955_v63, 5  ;;  %v8401_v5 = vunpack.c.l.bf16 %v6933_v19  ;;  %v8402_v54 = vunpack.c.h.bf16 %v6933_v19  ;;  %v2714_v60 = vadd.f32 %v2713_v53, %v2712_v29 }
 0x1b6   : > { %v2721_v23 = vadd.f32 %v2720_v44, %v2719_v45  ;;  %v2756_v37 = vmax.f32 %v2748_v43, %v2752_v14  ;;  %v2757_v32 = vmax.f32 %v2749_v1, %v2753_v9  ;;  %v2768_v31 = vrot.slane %v6965_v21, 6 }
 0x1b7   : > { %v6984_v13 = vadd.f32 %v8401_v5, %v2686_v30  ;;  %v6988_v35 = vadd.f32 %v8402_v54, %v2693_v24  ;;  %v2769_v48 = vrot.slane %v6969_v34, 6  ;;  %v2413_v10 = vunpack.c.l.bf16 %v4969_v41 }
 0x1b8   : > { %v2420_v2 = vrot.slane %v6777_v49, %v8362_v12  ;;  %v2715_v50 = vrot.slane %v2714_v60, 1  ;;  %v2722_v36 = vrot.slane %v2721_v23, 1  ;;  %v2764_v40 = vmax.f32 %v2756_v37, %v2760_v7 }
 0x1b9   : > { %v2765_v30 = vmax.f32 %v2757_v32, %v2761_v46  ;;  %v2776_v24 = vrot.slane %v6984_v13, 7  ;;  %v2777_v29 = vrot.slane %v6988_v35, 7  ;;  %v2406_v45 = vadd.f32 %v6813_v56, %v6811_v52 }
 0x1ba   : > { %v2414_v14 = vunpack.c.h.bf16 %v4969_v41  ;;  %v2716_v9 = vadd.f32 %v2715_v50, %v2714_v60  ;;  %v2723_v53 = vadd.f32 %v2722_v36, %v2721_v23  ;;  %v2415_v44 = vunpack.c.l.bf16 %v4970_v57 }
 0x1bb   : > { %v2416_v43 = vunpack.c.h.bf16 %v4970_v57  ;;  %v2772_v1 = vmax.f32 %v2764_v40, %v2768_v31  ;;  %v2773_v5 = vmax.f32 %v2765_v30, %v2769_v48  ;;  %v2424_v49 = vrot.slane %v6781_v25, %v8362_v12 }
 0x1bc   : > { %v2425_v54 = vmul.f32 %v2420_v2, %v2413_v10  ;;  %v8403_v46 = vunpack.c.l.bf16 %v6933_v19  ;;  %v8404_v37 = vunpack.c.h.bf16 %v6933_v19  ;;  %v8405_v52 = vunpack.c.h.bf16 %v6593_v47 }
 0x1bd   : > { %5293 = vrcp.f32 %v6789_v11  ;;  %v2780_v41 = vmax.f32 %v2772_v1, %v2776_v24  ;;  %v2781_v60 = vmax.f32 %v2773_v5, %v2777_v29  ;;  %v8406_v25 = vunpack.c.l.bf16 %v6596_v18 }
 0x1be   : > { %v7003_v7 = vadd.f32 %v2716_v9, %v8403_v46  ;;  %v7007_v32 = vadd.f32 %v2723_v53, %v8404_v37  ;;  %v7012_v56 = vmul.f32 %v6675_v28, %v8405_v52  ;;  %v8407_v31 = vunpack.c.h.bf16 %v6596_v18 }
 0x1bf   : > { %v7018_v23 = vmul.f32 %v6655_v0, %v8406_v25  ;;  %5295 = vrcp.f32 %v6792_v17  ;;  %v2407_v47 = vadd.f32 %v6822_v51, %v6829_v58  ;;  %v2408_v11 = vadd.f32 %v6824_v15, %v6831_v27 }
 0x1c0   : > { %v7023_v19 = vmul.f32 %v6675_v28, %v8407_v31  ;;  %v7032_v48 = vadd.f32 %v6840_v59, %v6838_v61  ;;  %v7035_v0 = vmax.f32 %v2780_v41, %v7003_v7  ;;  %v7038_v18 = vmax.f32 %v2781_v60, %v7007_v32 }
 0x1c1   : > { %v2426_v28 = vmul.f32 %v2424_v49, %v2414_v14  ;;  %v2427_v57 = vmul.f32 %v2420_v2, %v2415_v44  ;;  %v2428_v10 = vmul.f32 %v2424_v49, %v2416_v43  ;;  %v7040_v17 = vadd.f32 %v2425_v54, %v2406_v45 }
 0x1c2   : > { %v2784_v51 = vsub.f32 %v6869_v22, %v7035_v0  ;;  %v2785_v15 = vsub.f32 %v6873_v39, %v7038_v18  ;;  %v2792_v58 = vrot.slane %v7035_v0, 7  ;;  %v2793_v27 = vrot.slane %v7038_v18, 7 }
 0x1c3   : > { %v2802_v61 = vrot.slane %v7035_v0, 6  ;;  %v2803_v59 = vrot.slane %v7038_v18, 6  ;;  %v2812_v50 = vrot.slane %v7035_v0, 5  ;;  %v2813_v2 = vrot.slane %v7038_v18, 5 }
 0x1c4   : > { %v2786_v36 = vmul.f32 1.442695, %v2784_v51  ;;  %v2788_v40 = vmul.f32 1.442695, %v2785_v15  ;;  %v2796_v30 = vsub.f32 %v6881_v4, %v2792_v58  ;;  %v2797_v22 = vsub.f32 %v6885_v20, %v2793_v27 }
 0x1c5   : > { %v2806_v39 = vsub.f32 %v6893_v26, %v2802_v61  ;;  %v2807_v24 = vsub.f32 %v6897_v33, %v2803_v59  ;;  %v2816_v29 = vsub.f32 %v6916_v6, %v2812_v50  ;;  %v2817_v45 = vsub.f32 %v6920_v62, %v2813_v2  ;;  %v8408_v59 = vld [vmem:[#allocation25_spill] sm:$0xff]  ;;  %v8410_v2 = vld [vmem:[#allocation23_spill] sm:$0xff] }
 0x1c6   : > { %5297 = vpow2.f32 %v2786_v36  ;;  %v2798_v14 = vmul.f32 1.442695, %v2796_v30  ;;  %v2800_v9 = vmul.f32 1.442695, %v2797_v22  ;;  %v2822_v53 = vrot.slane %v7035_v0, 4  ;;  %v8412_v36 = vld [vmem:[#allocation24_spill] sm:$0xff] }
 0x1c7   : > { %5299 = vpow2.f32 %v2788_v40  ;;  %v2808_v44 = vmul.f32 1.442695, %v2806_v39  ;;  %v2810_v43 = vmul.f32 1.442695, %v2807_v24  ;;  %v2818_v1 = vmul.f32 1.442695, %v2816_v29 }
 0x1c8   : > { %5301 = vpow2.f32 %v2798_v14  ;;  %v2820_v4 = vmul.f32 1.442695, %v2817_v45  ;;  %v2823_v20 = vrot.slane %v7038_v18, 4  ;;  %v2826_v26 = vsub.f32 %v6937_v55, %v2822_v53  ;;  %v8418_v22 = vld [vmem:[#allocation27_spill] sm:$0xff] }
 0x1c9   : > { %5303 = vpow2.f32 %v2800_v9  ;;  %v2832_v33 = vrot.slane %v7035_v0, 3  ;;  %v2833_v62 = vrot.slane %v7038_v18, 3  ;;  %v2842_v6 = vrot.slane %v7035_v0, 2  ;;  %v7115_v29 = vld [vmem:[%s5756_s25 + $0xa0] sm:$0xff] }
 0x1ca   : > { %5305 = vpow2.f32 %v2808_v44  ;;  %v2827_v5 = vsub.f32 %v6941_v3, %v2823_v20  ;;  %v2828_v49 = vmul.f32 1.442695, %v2826_v26  ;;  %v2843_v54 = vrot.slane %v7038_v18, 2  ;;  %v5294_v46 = vpop.eup %5293  ;;  %v7121_v44 = vld [vmem:[%s5756_s25 + $0xa8] sm:$0xff] }
 0x1cb   : > { %5307 = vpow2.f32 %v2810_v43  ;;  %v2836_v37 = vsub.f32 %v6951_v42, %v2832_v33  ;;  %v2837_v52 = vsub.f32 %v6955_v63, %v2833_v62  ;;  %v2846_v55 = vsub.f32 %v6965_v21, %v2842_v6  ;;  %v7124_v43 = vld [vmem:[%s5756_s25 + $0xb0] sm:$0xff] }
 0x1cc   : > { %v5296_v41 = vpop.eup %5295  ;;  %5309 = vpow2.f32 %v2818_v1  ;;  %v2830_v60 = vmul.f32 1.442695, %v2827_v5  ;;  %v2847_v25 = vsub.f32 %v6969_v34, %v2843_v54  ;;  %v2852_v31 = vrot.slane %v7035_v0, 1 }
 0x1cd   : > { %v2430_v51 = vadd.f32 %v2426_v28, %v2407_v47  ;;  %5311 = vpow2.f32 %v2820_v4  ;;  %v2838_v3 = vmul.f32 1.442695, %v2836_v37  ;;  %v2840_v15 = vmul.f32 1.442695, %v2837_v52 }
 0x1ce   : > { %5313 = vpow2.f32 %v2828_v49  ;;  %v2848_v58 = vmul.f32 1.442695, %v2846_v55  ;;  %v2853_v42 = vrot.slane %v7038_v18, 1  ;;  %v2856_v63 = vsub.f32 %v6984_v13, %v2852_v31 }
 0x1cf   : > { %v2431_v27 = vadd.f32 %v2427_v57, %v2408_v11  ;;  %v2436_v21 = vrot.slane %v5294_v46, %v8362_v12  ;;  %v2440_v61 = vrot.slane %v5296_v41, %v8362_v12  ;;  %5315 = vpow2.f32 %v2830_v60  ;;  %v7086_v57 = vld [vmem:[%s5756_s25 + $0x90] sm:$0xff] }
 0x1d0   : > { %v2432_v34 = vadd.f32 %v2428_v10, %v7032_v48  ;;  %5317 = vpow2.f32 %v2838_v3  ;;  %v2850_v47 = vmul.f32 1.442695, %v2847_v25  ;;  %v2857_v28 = vsub.f32 %v6988_v35, %v2853_v42  ;;  %v8414_v10 = vld [vmem:[#allocation28_spill] sm:$0xff] }
 0x1d1   : > { %v7079_v50 = vadd.f32 %v8408_v59, %v6607_v8  ;;  %v7083_v13 = vadd.f32 %v7012_v56, %v8410_v2  ;;  %5319 = vpow2.f32 %v2840_v15  ;;  %v2858_v11 = vmul.f32 1.442695, %v2856_v63  ;;  %v8416_v8 = vld [vmem:[#allocation3_spill] sm:$0xff]  ;;  %v7101_v56 = vld [vmem:[%s5756_s25 + $0x98] sm:$0xff]  ;;  %v8425_v59 = vld [vmem:[#allocation8_spill] sm:$0xff] }
 0x1d2   : > { %v7090_v48 = vadd.f32 %v7018_v23, %v8412_v36  ;;  %v7094_v35 = vadd.f32 %v7023_v19, %v8414_v10  ;;  %v7098_v40 = vrot.slane %v8416_v8, %v8362_v12  ;;  %5321 = vpow2.f32 %v2848_v58  ;;  %v7145_v58 = vld [vmem:[%s5756_s25 + $0xc0] sm:$0xff]  ;;  %v7161_v8 = vld [vmem:[%s5756_s25 + $0xc8] sm:$0xff] }
 0x1d3   : > { %8409 = vst [vmem:[#allocation25_spill] sm:$0xff] %v7079_v50  ;;  %8411 = vst [vmem:[#allocation23_spill] sm:$0xff] %v7083_v13  ;;  %v5298_v30 = vpop.eup %5297  ;;  %v7105_v39 = vrot.slane %v8418_v22, %v8362_v12  ;;  %v7108_v23 = vmul.f32 %v2436_v21, %v7040_v17  ;;  %v7110_v24 = vmul.f32 %v2440_v61, %v2430_v51  ;;  %5323 = vpow2.f32 %v2850_v47 }
 0x1d4   : > { %8413 = vst [vmem:[#allocation24_spill] sm:$0xff] %v7090_v48  ;;  %8415 = vst [vmem:[#allocation28_spill] sm:$0xff] %v7094_v35  ;;  %v7112_v19 = vmul.f32 %v2436_v21, %v2431_v27  ;;  %v5300_v45 = vpop.eup %5299  ;;  %v7117_v14 = vmul.f32 %v2440_v61, %v2432_v34  ;;  %v2860_v9 = vmul.f32 1.442695, %v2857_v28  ;;  %v2931_v53 = vunpack.c.l.bf16 %v7086_v57  ;;  %v5021_v48 = vld [vmem:[%s5541_s18 + $0x1e0] sm:$0xff] }
 0x1d5   : > { %8417 = vst [vmem:[#allocation3_spill] sm:$0xff] %v7098_v40  ;;  %8419 = vst [vmem:[#allocation27_spill] sm:$0xff] %v7105_v39  ;;  %v5302_v17 = vpop.eup %5301  ;;  %5325 = vpow2.f32 %v2858_v11  ;;  %v2862_v1 = vsub.f32 %v7003_v7, %v7035_v0  ;;  %v2932_v4 = vunpack.c.h.bf16 %v7086_v57  ;;  %v2933_v20 = vunpack.c.l.bf16 %v7101_v56  ;;  %v7136_v7 = vld [vmem:[%s5756_s25 + $0xb8] sm:$0xff] }
 0x1d6   : > { %8420 = vst [vmem:[#allocation33_spill] sm:$0xff] %v7108_v23  ;;  %8421 = vst [vmem:[#allocation34_spill] sm:$0xff] %v7110_v24  ;;  %v5304_v26 = vpop.eup %5303  ;;  %v2870_v33 = vrot.slane %v5302_v17, 1  ;;  %v2934_v62 = vunpack.c.h.bf16 %v7101_v56  ;;  %v2950_v6 = vunpack.c.l.bf16 %v7115_v29  ;;  %v2951_v5 = vunpack.c.h.bf16 %v7115_v29 }
 0x1d7   : > { %8422 = vst [vmem:[#allocation35_spill] sm:$0xff] %v7112_v19  ;;  %8423 = vst [vmem:[#allocation36_spill] sm:$0xff] %v7117_v14  ;;  %v5306_v49 = vpop.eup %5305  ;;  %v2871_v54 = vrot.slane %v5304_v26, 1  ;;  %v2952_v46 = vunpack.c.l.bf16 %v7121_v44  ;;  %v2953_v37 = vunpack.c.h.bf16 %v7121_v44  ;;  %v2973_v0 = vunpack.c.l.bf16 %v7124_v43 }
 0x1d8   : > { %v5308_v52 = vpop.eup %5307  ;;  %5327 = vpow2.f32 %v2860_v9  ;;  %v2874_v55 = vadd.f32 %v5298_v30, %v2870_v33  ;;  %v2878_v41 = vrot.slane %v5306_v49, 2  ;;  %v2974_v60 = vunpack.c.h.bf16 %v7124_v43 }
 0x1d9   : > { %v7140_v25 = vpop.eup %5309  ;;  %v2863_v31 = vsub.f32 %v7007_v32, %v7038_v18  ;;  %v2864_v51 = vmul.f32 1.442695, %v2862_v1  ;;  %v2875_v3 = vadd.f32 %v5300_v45, %v2871_v54  ;;  %v2879_v15 = vrot.slane %v5308_v52, 2  ;;  %v8424_v18 = vld [vmem:[#allocation7_spill] sm:$0xff] }
 0x1da   : > { %v7147_v42 = vpop.eup %5311  ;;  %v2882_v63 = vadd.f32 %v2878_v41, %v2874_v55  ;;  %v2886_v27 = vrot.slane %v7140_v25, 3  ;;  %v2975_v21 = vunpack.c.l.bf16 %v7136_v7  ;;  %v2938_v28 = vrot.slane %v5298_v30, %v8424_v18 }
 0x1db   : > { %v7152_v34 = vpop.eup %5313  ;;  %v2883_v47 = vadd.f32 %v2879_v15, %v2875_v3  ;;  %v2887_v32 = vrot.slane %v7147_v42, 3  ;;  %v2957_v2 = vrot.slane %v5302_v17, %v8425_v59  ;;  %5329 = vpow2.f32 %v2864_v51  ;;  %v7178_v51 = vld [vmem:[%s5756_s25 + $0xd0] sm:$0xff] }
 0x1dc   : > { %v7157_v11 = vpop.eup %5315  ;;  %v2890_v36 = vadd.f32 %v2886_v27, %v2882_v63  ;;  %v2894_v10 = vrot.slane %v7152_v34, 4  ;;  %v2866_v44 = vmul.f32 1.442695, %v2863_v31  ;;  %v2942_v55 = vrot.slane %v5300_v45, %v8424_v18  ;;  %v8426_v27 = vld [vmem:[#allocation9_spill] sm:$0xff] }
 0x1dd   : > { %v7165_v9 = vpop.eup %5317  ;;  %v2891_v1 = vadd.f32 %v2887_v32, %v2883_v47  ;;  %v2895_v30 = vrot.slane %v7157_v11, 4  ;;  %v2961_v41 = vrot.slane %v5304_v26, %v8425_v59  ;;  %v2943_v15 = vmul.f32 %v2938_v28, %v2931_v53 }
 0x1de   : > { %v7168_v17 = vpop.eup %5319  ;;  %v2898_v33 = vadd.f32 %v2894_v10, %v2890_v36  ;;  %v2902_v54 = vrot.slane %v7165_v9, 5  ;;  %v2962_v63 = vmul.f32 %v2957_v2, %v2950_v6  ;;  %v2980_v29 = vrot.slane %v5306_v49, %v8426_v27 }
 0x1df   : > { %v7173_v3 = vpop.eup %5321  ;;  %v2998_v31 = vunpack.c.l.bf16 %v7161_v8  ;;  %v2899_v47 = vadd.f32 %v2895_v30, %v2891_v1  ;;  %v2903_v32 = vrot.slane %v7168_v17, 5  ;;  %v2945_v36 = vmul.f32 %v2938_v28, %v2933_v20 }
 0x1e0   : > { %v2964_v10 = vmul.f32 %v2957_v2, %v2952_v46  ;;  %v7181_v45 = vpop.eup %5323  ;;  %5331 = vpow2.f32 %v2866_v44  ;;  %v2906_v26 = vadd.f32 %v2902_v54, %v2898_v33  ;;  %v2910_v53 = vrot.slane %v7173_v3, 6  ;;  %v5004_v33 = vld [vmem:[%s5756_s25 + $0xd8] sm:$0xff]  ;;  %v7195_v54 = vld [vmem:[%s5756_s25 + $0xe0] sm:$0xff] }
 0x1e1   : > { %v2999_v6 = vunpack.c.h.bf16 %v7161_v8  ;;  %v2944_v22 = vmul.f32 %v2942_v55, %v2932_v4  ;;  %v2946_v1 = vmul.f32 %v2942_v55, %v2934_v62  ;;  %v2963_v20 = vmul.f32 %v2961_v41, %v2951_v5  ;;  %v8427_v55 = vld [vmem:[#allocation10_spill] sm:$0xff] }
 0x1e2   : > { %v7185_v49 = vpop.eup %5325  ;;  %v3019_v46 = vunpack.c.l.bf16 %v7178_v51  ;;  %v2965_v28 = vmul.f32 %v2961_v41, %v2953_v37  ;;  %v2966_v2 = vadd.f32 %v2962_v63, %v2943_v15  ;;  %v2984_v44 = vrot.slane %v5308_v52, %v8426_v27 }
 0x1e3   : > { %v2985_v30 = vmul.f32 %v2980_v29, %v2973_v0  ;;  %v2907_v8 = vadd.f32 %v2903_v32, %v2899_v47  ;;  %v2911_v61 = vrot.slane %v7181_v45, 6  ;;  %v2968_v57 = vadd.f32 %v2964_v10, %v2945_v36 }
 0x1e4   : > { %v3020_v56 = vunpack.c.h.bf16 %v7178_v51  ;;  %v2914_v62 = vadd.f32 %v2910_v53, %v2906_v26  ;;  %v2918_v5 = vrot.slane %v7185_v49, 7  ;;  %v2987_v37 = vmul.f32 %v2980_v29, %v2975_v21  ;;  %v5006_v26 = vld [vmem:[%s5756_s25 + $0xe8] sm:$0xff]  ;;  %v7211_v53 = vld [vmem:[%s5756_s25 + $0xf0] sm:$0xff]  ;;  %v8429_v29 = vld [vmem:[#allocation11_spill] sm:$0xff] }
 0x1e5   : > { %v7199_v4 = vpop.eup %5327  ;;  %v3003_v0 = vrot.slane %v7140_v25, %v8427_v55  ;;  %v2967_v52 = vadd.f32 %v2963_v20, %v2944_v22  ;;  %v3021_v41 = vunpack.c.l.bf16 %v5004_v33  ;;  %v3022_v15 = vunpack.c.h.bf16 %v5004_v33 }
 0x1e6   : > { %v3042_v63 = vunpack.c.l.bf16 %v7195_v54  ;;  %v2969_v47 = vadd.f32 %v2965_v28, %v2946_v1  ;;  %v2986_v32 = vmul.f32 %v2984_v44, %v2974_v60  ;;  %v8428_v51 = vunpack.c.h.bf16 %v7136_v7 }
 0x1e7   : > { %v2989_v10 = vadd.f32 %v2985_v30, %v2966_v2  ;;  %v2915_v21 = vadd.f32 %v2911_v61, %v2907_v8  ;;  %v2919_v25 = vrot.slane %v7199_v4, 7  ;;  %v3007_v22 = vrot.slane %v7147_v42, %v8427_v55 }
 0x1e8   : > { %v2988_v36 = vmul.f32 %v2984_v44, %v8428_v51  ;;  %v3026_v1 = vrot.slane %v7152_v34, %v8429_v29  ;;  %v2922_v43 = vadd.f32 %v2918_v5, %v2914_v62  ;;  %v2991_v60 = vadd.f32 %v2987_v37, %v2968_v57  ;;  %v7220_v2 = vpop.eup %5329  ;;  %v7227_v62 = vld [vmem:[%s5756_s25 + $0xf8] sm:$0xff]  ;;  %v7231_v5 = vld [vmem:[%s5756_s25 + $0x100] sm:$0xff] }
 0x1e9   : > { %v8430_v7 = vunpack.c.l.bf16 %v7145_v58  ;;  %v3010_v28 = vmul.f32 %v3003_v0, %v2998_v31  ;;  %8431 = vst [vmem:[#allocation7_spill] sm:$0xff] %v7220_v2  ;;  %v3043_v61 = vunpack.c.h.bf16 %v7195_v54  ;;  %v3044_v44 = vunpack.c.l.bf16 %v5006_v26 }
 0x1ea   : > { %v3045_v30 = vunpack.c.h.bf16 %v5006_v26  ;;  %v3065_v33 = vunpack.c.l.bf16 %v7211_v53  ;;  %v2990_v42 = vadd.f32 %v2986_v32, %v2967_v52  ;;  %v2992_v8 = vadd.f32 %v2988_v36, %v2969_v47  ;;  %v7236_v26 = vld [vmem:[%s5756_s25 + $0x108] sm:$0xff] }
 0x1eb   : > { %v3008_v20 = vmul.f32 %v3003_v0, %v8430_v7  ;;  %v3030_v34 = vrot.slane %v7157_v11, %v8429_v29  ;;  %v3066_v57 = vunpack.c.h.bf16 %v7211_v53  ;;  %v2923_v31 = vadd.f32 %v2919_v25, %v2915_v21  ;;  %v8434_v53 = vld [vmem:[#allocation12_spill] sm:$0xff] }
 0x1ec   : > { %v8432_v37 = vunpack.c.h.bf16 %v7145_v58  ;;  %v3011_v54 = vmul.f32 %v3007_v22, %v2999_v6  ;;  %v3031_v51 = vmul.f32 %v3026_v1, %v3019_v46  ;;  %v2924_v52 = vadd.f32 %v7220_v2, %v2922_v43  ;;  %v5015_v43 = vld [vmem:[%s5541_s18 + $0x1b0] sm:$0xff] }
 0x1ed   : > { %v3012_v47 = vadd.f32 %v3008_v20, %v2989_v10  ;;  %v3014_v32 = vadd.f32 %v3010_v28, %v2991_v60  ;;  %v3033_v11 = vmul.f32 %v3026_v1, %v3021_v41  ;;  %v7239_v36 = vpop.eup %5331  ;;  %v3049_v7 = vrot.slane %v7165_v9, %v8434_v53  ;;  %v5016_v20 = vld [vmem:[%s5541_s18 + $0x1b8] sm:$0xff]  ;;  %v8435_v58 = vld [vmem:[#allocation17_spill] sm:$0xff] }
 0x1ee   : > { %v3009_v0 = vmul.f32 %v3007_v22, %v8432_v37  ;;  %8433 = vst [vmem:[#allocation8_spill] sm:$0xff] %v7239_v36  ;;  %v3032_v46 = vmul.f32 %v3030_v34, %v3020_v56  ;;  %v3015_v1 = vadd.f32 %v3011_v54, %v2992_v8  ;;  %v3034_v60 = vmul.f32 %v3030_v34, %v3022_v15 }
 0x1ef   : > { %v3053_v9 = vrot.slane %v7168_v17, %v8434_v53  ;;  %v7254_v28 = vadd.f32 %v7239_v36, %v2923_v31  ;;  %5333 = vrcp.f32 %v2924_v52  ;;  %v3035_v37 = vadd.f32 %v3031_v51, %v3012_v47  ;;  %v8436_v51 = vld [vmem:[#allocation31_spill] sm:$0xff]  ;;  %v8437_v47 = vld [vmem:[#allocation32_spill] sm:$0xff] }
 0x1f0   : > { %v3013_v41 = vadd.f32 %v3009_v0, %v2990_v42  ;;  %v3037_v56 = vadd.f32 %v3033_v11, %v3014_v32  ;;  %v3054_v6 = vmul.f32 %v3049_v7, %v3042_v63  ;;  %v3056_v25 = vmul.f32 %v3049_v7, %v3044_v44  ;;  %v5018_v11 = vld [vmem:[%s5541_s18 + $0x1c8] sm:$0xff] }
 0x1f1   : > { %v3160_v22 = vunpack.c.l.bf16 %v5015_v43  ;;  %v3161_v10 = vunpack.c.h.bf16 %v5015_v43  ;;  %v7258_v42 = vrot.slane %v7173_v3, %v8435_v58  ;;  %v7262_v17 = vrot.slane %v7181_v45, %v8435_v58  ;;  %v5017_v3 = vld [vmem:[%s5541_s18 + $0x1c0] sm:$0xff] }
 0x1f2   : > { %v3162_v15 = vunpack.c.l.bf16 %v5016_v20  ;;  %v3163_v8 = vunpack.c.h.bf16 %v5016_v20  ;;  %v3036_v34 = vadd.f32 %v3032_v46, %v3013_v41  ;;  %v3038_v31 = vadd.f32 %v3034_v60, %v3015_v1  ;;  %v5019_v20 = vld [vmem:[%s5541_s18 + $0x1d0] sm:$0xff] }
 0x1f3   : > { %v3055_v0 = vmul.f32 %v3053_v9, %v3043_v61  ;;  %v3057_v54 = vmul.f32 %v3053_v9, %v3045_v30  ;;  %v3164_v63 = vmul.f32 %v3160_v22, %v6802_v16  ;;  %v3165_v44 = vmul.f32 %v3161_v10, %v6804_v38  ;;  %v7285_v30 = vld [vmem:[%s8204_s3 + $0x8] sm:$0x11] }
 0x1f4   : > { %v3166_v52 = vmul.f32 %v3162_v15, %v8436_v51  ;;  %v3167_v32 = vmul.f32 %v3163_v8, %v8437_v47  ;;  %v7270_v7 = vadd.f32 %v3054_v6, %v3035_v37  ;;  %v7272_v45 = vadd.f32 %v3056_v25, %v3037_v56 }
 0x1f5   : > { %v7276_v46 = vrot.slane %v7185_v49, %v8362_v12  ;;  %v7280_v61 = vrot.slane %v7199_v4, %v8362_v12  ;;  %v7288_v22 = vmul.f32 %v7258_v42, %v3065_v33  ;;  %v7291_v6 = vmul.f32 %v7262_v17, %v3066_v57  ;;  %v7296_v4 = vld [vmem:[%s8204_s3 + $0x8] sm:$0x22] }
 0x1f6   : > { %v3168_v25 = vadd.f32 %v3166_v52, %v3164_v63  ;;  %v3175_v49 = vadd.f32 %v3167_v32, %v3165_v44  ;;  %v3190_v10 = vunpack.c.l.bf16 %v5017_v3  ;;  %v3191_v43 = vunpack.c.h.bf16 %v5017_v3  ;;  %v5020_v63 = vld [vmem:[%s5541_s18 + $0x1d8] sm:$0xff] }
 0x1f7   : > { %v3192_v41 = vunpack.c.l.bf16 %v5018_v11  ;;  %v3193_v1 = vunpack.c.h.bf16 %v5018_v11  ;;  %v7298_v60 = vadd.f32 %v3055_v0, %v3036_v34  ;;  %v7300_v9 = vadd.f32 %v3057_v54, %v3038_v31 }
 0x1f8   : > { %v3183_v33 = vunpack.c.l.bf16 %v7285_v30  ;;  %v3184_v57 = vunpack.c.h.bf16 %v7285_v30  ;;  %v3169_v37 = vrot.slane %v3168_v25, 4  ;;  %v3176_v56 = vrot.slane %v3175_v49, 4 }
 0x1f9   : > { %v3194_v15 = vmul.f32 %v3190_v10, %v6802_v16  ;;  %v3195_v8 = vmul.f32 %v3191_v43, %v6804_v38  ;;  %v3196_v44 = vmul.f32 %v3192_v41, %v8436_v51  ;;  %v3197_v34 = vmul.f32 %v3193_v1, %v8437_v47 }
 0x1fa   : > { %v3170_v54 = vadd.f32 %v3169_v37, %v3168_v25  ;;  %v3177_v52 = vadd.f32 %v3176_v56, %v3175_v49  ;;  %v3220_v32 = vunpack.c.l.bf16 %v5019_v20  ;;  %v3221_v3 = vunpack.c.h.bf16 %v5019_v20  ;;  %v5022_v20 = vld [vmem:[%s5541_s18 + $0x1e8] sm:$0xff] }
 0x1fb   : > { %v3198_v11 = vadd.f32 %v3196_v44, %v3194_v15  ;;  %v3205_v30 = vadd.f32 %v3197_v34, %v3195_v8  ;;  %v3222_v21 = vunpack.c.l.bf16 %v5020_v63  ;;  %v3223_v10 = vunpack.c.h.bf16 %v5020_v63 }
 0x1fc   : > { %v7313_v43 = vpop.eup %5333  ;;  %v3171_v40 = vrot.slane %v3170_v54, 2  ;;  %v3178_v41 = vrot.slane %v3177_v52, 2  ;;  %v3224_v1 = vmul.f32 %v3220_v32, %v6802_v16  ;;  %v3225_v31 = vmul.f32 %v3221_v3, %v6804_v38 }
 0x1fd   : > { %8438 = vst [vmem:[#allocation9_spill] sm:$0xff] %v7313_v43  ;;  %v3199_v50 = vrot.slane %v3198_v11, 4  ;;  %v3206_v0 = vrot.slane %v3205_v30, 4  ;;  %v3226_v25 = vmul.f32 %v3222_v21, %v8436_v51  ;;  %v3227_v49 = vmul.f32 %v3223_v10, %v8437_v47 }
 0x1fe   : > { %v3172_v37 = vadd.f32 %v3171_v40, %v3170_v54  ;;  %v3179_v56 = vadd.f32 %v3178_v41, %v3177_v52  ;;  %v3247_v15 = vunpack.c.l.bf16 %v5021_v48  ;;  %v3248_v8 = vunpack.c.h.bf16 %v5021_v48 }
 0x1ff   : > { %v3200_v63 = vadd.f32 %v3199_v50, %v3198_v11  ;;  %v3207_v44 = vadd.f32 %v3206_v0, %v3205_v30  ;;  %v3228_v34 = vadd.f32 %v3226_v25, %v3224_v1  ;;  %v3235_v43 = vadd.f32 %v3227_v49, %v3225_v31  ;;  %v7325_v31 = vld [vmem:[%s8204_s3 + $0x8] sm:$0x44] }
 0x200   : > { %v3173_v19 = vrot.slane %v3172_v37, 1  ;;  %v3180_v23 = vrot.slane %v3179_v56, 1  ;;  %v3249_v32 = vunpack.c.l.bf16 %v5022_v20  ;;  %v3250_v35 = vunpack.c.h.bf16 %v5022_v20 }
 0x201   : > { %v3201_v3 = vrot.slane %v3200_v63, 2  ;;  %v3208_v39 = vrot.slane %v3207_v44, 2  ;;  %v3229_v13 = vrot.slane %v3228_v34, 4  ;;  %v3236_v14 = vrot.slane %v3235_v43, 4 }
 0x202   : > { %v3174_v21 = vadd.f32 %v3173_v19, %v3172_v37  ;;  %v3181_v24 = vadd.f32 %v3180_v23, %v3179_v56  ;;  %v3251_v40 = vmul.f32 %v3247_v15, %v6802_v16  ;;  %v3252_v54 = vmul.f32 %v3248_v8, %v6804_v38  ;;  %v5024_v37 = vld [vmem:[%s5541_s18 + $0x1f8] sm:$0xff] }
 0x203   : > { %v3202_v48 = vadd.f32 %v3201_v3, %v3200_v63  ;;  %v3209_v50 = vadd.f32 %v3208_v39, %v3207_v44  ;;  %v3230_v0 = vadd.f32 %v3229_v13, %v3228_v34  ;;  %v3237_v52 = vadd.f32 %v3236_v14, %v3235_v43  ;;  %v5023_v13 = vld [vmem:[%s5541_s18 + $0x1f0] sm:$0xff] }
 0x204   : > { %v7327_v11 = vadd.f32 %v3183_v33, %v3174_v21  ;;  %v7329_v30 = vadd.f32 %v3184_v57, %v3181_v24  ;;  %v3253_v23 = vmul.f32 %v3249_v32, %v8436_v51  ;;  %v3254_v19 = vmul.f32 %v3250_v35, %v8437_v47 }
 0x205   : > { %v3203_v10 = vrot.slane %v3202_v48, 1  ;;  %v3210_v41 = vrot.slane %v3209_v50, 1  ;;  %v3231_v1 = vrot.slane %v3230_v0, 2  ;;  %v3238_v39 = vrot.slane %v3237_v52, 2 }
 0x206   : > { %v3255_v14 = vadd.f32 %v3253_v23, %v3251_v40  ;;  %v3262_v43 = vadd.f32 %v3254_v19, %v3252_v54  ;;  %v8257_v25 = vunpack.c.l.bf16 %v7325_v31  ;;  %v3277_v35 = vunpack.c.l.bf16 %v5023_v13 }
 0x207   : > { %v3204_v33 = vadd.f32 %v3203_v10, %v3202_v48  ;;  %v3211_v20 = vadd.f32 %v3210_v41, %v3209_v50  ;;  %v3232_v24 = vadd.f32 %v3231_v1, %v3230_v0  ;;  %v3239_v57 = vadd.f32 %v3238_v39, %v3237_v52  ;;  %v5025_v0 = vld [vmem:[%s5541_s18 + $0x200] sm:$0xff] }
 0x208   : > { %v3256_v56 = vrot.slane %v3255_v14, 4  ;;  %v3263_v15 = vrot.slane %v3262_v43, 4  ;;  %v3278_v8 = vunpack.c.h.bf16 %v5023_v13  ;;  %v8439_v63 = vunpack.c.l.bf16 %v7296_v4 }
 0x209   : > { %v8440_v34 = vunpack.c.h.bf16 %v7296_v4  ;;  %v3233_v3 = vrot.slane %v3232_v24, 1  ;;  %v3240_v21 = vrot.slane %v3239_v57, 1  ;;  %v3279_v48 = vunpack.c.l.bf16 %v5024_v37 }
 0x20a   : > { %v7339_v44 = vadd.f32 %v8439_v63, %v3204_v33  ;;  %v3257_v40 = vadd.f32 %v3256_v56, %v3255_v14  ;;  %v3264_v54 = vadd.f32 %v3263_v15, %v3262_v43  ;;  %v3280_v50 = vunpack.c.h.bf16 %v5024_v37  ;;  %v5026_v33 = vld [vmem:[%s5541_s18 + $0x208] sm:$0xff] }
 0x20b   : > { %v7343_v32 = vadd.f32 %v8440_v34, %v3211_v20  ;;  %v3234_v52 = vadd.f32 %v3233_v3, %v3232_v24  ;;  %v3241_v23 = vadd.f32 %v3240_v21, %v3239_v57  ;;  %v3281_v19 = vmul.f32 %v3277_v35, %v6802_v16 }
 0x20c   : > { %v3282_v10 = vmul.f32 %v3278_v8, %v6804_v38  ;;  %v3258_v41 = vrot.slane %v3257_v40, 2  ;;  %v3265_v1 = vrot.slane %v3264_v54, 2  ;;  %v3283_v39 = vmul.f32 %v3279_v48, %v8436_v51 }
 0x20d   : > { %v3284_v13 = vmul.f32 %v3280_v50, %v8437_v47  ;;  %v8441_v20 = vmov %v8439_v63  ;;  %v8442_v43 = vmov %v8440_v34  ;;  %v3304_v24 = vunpack.c.l.bf16 %v5025_v0  ;;  %v7362_v63 = vld [vmem:[%s8204_s3 + $0x8] sm:$0x88] }
 0x20e   : > { %v7353_v14 = vadd.f32 %v3234_v52, %v8441_v20  ;;  %v7357_v37 = vadd.f32 %v3241_v23, %v8442_v43  ;;  %v3305_v57 = vunpack.c.h.bf16 %v5025_v0  ;;  %v3259_v56 = vadd.f32 %v3258_v41, %v3257_v40  ;;  %v5027_v40 = vld [vmem:[%s5541_s18 + $0x210] sm:$0xff] }
 0x20f   : > { %v3266_v15 = vadd.f32 %v3265_v1, %v3264_v54  ;;  %v3285_v35 = vadd.f32 %v3283_v39, %v3281_v19  ;;  %v3292_v8 = vadd.f32 %v3284_v13, %v3282_v10  ;;  %v3306_v34 = vunpack.c.l.bf16 %v5026_v33 }
 0x210   : > { %v3307_v3 = vunpack.c.h.bf16 %v5026_v33  ;;  %v3308_v21 = vmul.f32 %v3304_v24, %v6802_v16  ;;  %v3309_v4 = vmul.f32 %v3305_v57, %v6804_v38  ;;  %v3260_v48 = vrot.slane %v3259_v56, 1  ;;  %v5028_v33 = vld [vmem:[%s5541_s18 + $0x218] sm:$0xff] }
 0x211   : > { %v3267_v50 = vrot.slane %v3266_v15, 1  ;;  %v3286_v52 = vrot.slane %v3285_v35, 4  ;;  %v3293_v0 = vrot.slane %v3292_v8, 4  ;;  %v3310_v54 = vmul.f32 %v3306_v34, %v8436_v51 }
 0x212   : > { %v3311_v23 = vmul.f32 %v3307_v3, %v8437_v47  ;;  %v3261_v41 = vadd.f32 %v3260_v48, %v3259_v56  ;;  %v3334_v24 = vunpack.c.l.bf16 %v5027_v40  ;;  %v3335_v57 = vunpack.c.h.bf16 %v5027_v40 }
 0x213   : > { %v3268_v1 = vadd.f32 %v3267_v50, %v3266_v15  ;;  %v3287_v39 = vadd.f32 %v3286_v52, %v3285_v35  ;;  %v3294_v13 = vadd.f32 %v3293_v0, %v3292_v8  ;;  %v3312_v20 = vadd.f32 %v3310_v54, %v3308_v21  ;;  %v5029_v50 = vld [vmem:[%s5541_s18 + $0x220] sm:$0xff] }
 0x214   : > { %v3319_v43 = vadd.f32 %v3311_v23, %v3309_v4  ;;  %v7374_v49 = vadd.f32 %v8257_v25, %v3261_v41  ;;  %v8443_v34 = vunpack.c.h.bf16 %v7325_v31  ;;  %v3336_v35 = vunpack.c.l.bf16 %v5028_v33 }
 0x215   : > { %v3288_v10 = vrot.slane %v3287_v39, 2  ;;  %v3295_v56 = vrot.slane %v3294_v13, 2  ;;  %v3313_v15 = vrot.slane %v3312_v20, 4  ;;  %v3337_v8 = vunpack.c.h.bf16 %v5028_v33 }
 0x216   : > { %v7378_v3 = vadd.f32 %v8443_v34, %v3268_v1  ;;  %v3320_v48 = vrot.slane %v3319_v43, 4  ;;  %v3338_v52 = vmul.f32 %v3334_v24, %v6802_v16  ;;  %v3339_v0 = vmul.f32 %v3335_v57, %v6804_v38  ;;  %v5030_v1 = vld [vmem:[%s5541_s18 + $0x228] sm:$0xff] }
 0x217   : > { %v3289_v21 = vadd.f32 %v3288_v10, %v3287_v39  ;;  %v3296_v4 = vadd.f32 %v3295_v56, %v3294_v13  ;;  %v3314_v40 = vadd.f32 %v3313_v15, %v3312_v20  ;;  %v3340_v23 = vmul.f32 %v3336_v35, %v8436_v51 }
 0x218   : > { %v3321_v54 = vadd.f32 %v3320_v48, %v3319_v43  ;;  %v3341_v41 = vmul.f32 %v3337_v8, %v8437_v47  ;;  %v3361_v25 = vunpack.c.l.bf16 %v5029_v50  ;;  %v3362_v2 = vunpack.c.h.bf16 %v5029_v50  ;;  %v7389_v48 = vld [vmem:[%s8204_s3 + $0x10] sm:$0x11] }
 0x219   : > { %v3290_v34 = vrot.slane %v3289_v21, 1  ;;  %v3297_v19 = vrot.slane %v3296_v4, 1  ;;  %v3315_v36 = vrot.slane %v3314_v40, 2  ;;  %v3342_v12 = vadd.f32 %v3340_v23, %v3338_v52 }
 0x21a   : > { %v3322_v33 = vrot.slane %v3321_v54, 2  ;;  %v3349_v10 = vadd.f32 %v3341_v41, %v3339_v0  ;;  %v3363_v24 = vunpack.c.l.bf16 %v5030_v1  ;;  %v3364_v57 = vunpack.c.h.bf16 %v5030_v1 }
 0x21b   : > { %v3291_v39 = vadd.f32 %v3290_v34, %v3289_v21  ;;  %v3298_v13 = vadd.f32 %v3297_v19, %v3296_v4  ;;  %v3316_v20 = vadd.f32 %v3315_v36, %v3314_v40  ;;  %v3343_v56 = vrot.slane %v3342_v12, 4 }
 0x21c   : > { %v3323_v43 = vadd.f32 %v3322_v33, %v3321_v54  ;;  %v3350_v15 = vrot.slane %v3349_v10, 4  ;;  %v8444_v35 = vunpack.c.l.bf16 %v7325_v31  ;;  %v8445_v50 = vunpack.c.h.bf16 %v7325_v31  ;;  %v5031_v54 = vld [vmem:[%s5541_s18 + $0x230] sm:$0xff] }
 0x21d   : > { %v3365_v19 = vmul.f32 %v3361_v25, %v6802_v16  ;;  %v3366_v36 = vmul.f32 %v3362_v2, %v6804_v38  ;;  %v3317_v4 = vrot.slane %v3316_v20, 1  ;;  %v3344_v0 = vadd.f32 %v3343_v56, %v3342_v12  ;;  %v5032_v25 = vld [vmem:[%s5541_s18 + $0x238] sm:$0xff] }
 0x21e   : > { %v7393_v8 = vadd.f32 %v3291_v39, %v8444_v35  ;;  %v7397_v21 = vadd.f32 %v3298_v13, %v8445_v50  ;;  %v3324_v52 = vrot.slane %v3323_v43, 1  ;;  %v3351_v40 = vadd.f32 %v3350_v15, %v3349_v10 }
 0x21f   : > { %v3367_v23 = vmul.f32 %v3363_v24, %v8436_v51  ;;  %v3368_v41 = vmul.f32 %v3364_v57, %v8437_v47  ;;  %v3318_v34 = vadd.f32 %v3317_v4, %v3316_v20  ;;  %v3345_v39 = vrot.slane %v3344_v0, 2 }
 0x220   : > { %v3325_v33 = vadd.f32 %v3324_v52, %v3323_v43  ;;  %v3352_v13 = vrot.slane %v3351_v40, 2  ;;  %v3391_v50 = vunpack.c.l.bf16 %v5031_v54  ;;  %v3392_v58 = vunpack.c.h.bf16 %v5031_v54 }
 0x221   : > { %v3369_v35 = vadd.f32 %v3367_v23, %v3365_v19  ;;  %v3376_v2 = vadd.f32 %v3368_v41, %v3366_v36  ;;  %v8446_v12 = vunpack.c.l.bf16 %v7362_v63  ;;  %v8447_v24 = vunpack.c.h.bf16 %v7362_v63 }
 0x222   : > { %v3346_v56 = vadd.f32 %v3345_v39, %v3344_v0  ;;  %v3353_v15 = vadd.f32 %v3352_v13, %v3351_v40  ;;  %v3393_v43 = vunpack.c.l.bf16 %v5032_v25  ;;  %v3394_v4 = vunpack.c.h.bf16 %v5032_v25 }
 0x223   : > { %v7409_v10 = vadd.f32 %v8446_v12, %v3318_v34  ;;  %v7413_v57 = vadd.f32 %v8447_v24, %v3325_v33  ;;  %v3370_v31 = vrot.slane %v3369_v35, 4  ;;  %v3377_v20 = vrot.slane %v3376_v2, 4 }
 0x224   : > { %v3347_v52 = vrot.slane %v3346_v56, 1  ;;  %v3354_v1 = vrot.slane %v3353_v15, 1  ;;  %v3395_v19 = vmul.f32 %v3391_v50, %v6802_v16  ;;  %v3396_v36 = vmul.f32 %v3392_v58, %v6804_v38 }
 0x225   : > { %v3371_v54 = vadd.f32 %v3370_v31, %v3369_v35  ;;  %v3378_v23 = vadd.f32 %v3377_v20, %v3376_v2  ;;  %v3397_v41 = vmul.f32 %v3393_v43, %v8436_v51  ;;  %v3398_v34 = vmul.f32 %v3394_v4, %v8437_v47 }
 0x226   : > { %v3348_v33 = vadd.f32 %v3347_v52, %v3346_v56  ;;  %v3355_v12 = vadd.f32 %v3354_v1, %v3353_v15  ;;  %v3417_v0 = vrot.slane %v7339_v44, 1  ;;  %v3418_v40 = vrot.slane %v7343_v32, 1 }
 0x227   : > { %v3372_v39 = vrot.slane %v3371_v54, 2  ;;  %v3379_v13 = vrot.slane %v3378_v23, 2  ;;  %v3399_v25 = vadd.f32 %v3397_v41, %v3395_v19  ;;  %v3406_v24 = vadd.f32 %v3398_v34, %v3396_v36 }
 0x228   : > { %v8448_v50 = vunpack.c.l.bf16 %v7362_v63  ;;  %v8449_v58 = vunpack.c.h.bf16 %v7362_v63  ;;  %v3421_v35 = vmax.f32 %v7327_v11, %v3417_v0  ;;  %v3422_v1 = vmax.f32 %v7329_v30, %v3418_v40 }
 0x229   : > { %v3373_v2 = vadd.f32 %v3372_v39, %v3371_v54  ;;  %v3380_v56 = vadd.f32 %v3379_v13, %v3378_v23  ;;  %v3400_v15 = vrot.slane %v3399_v25, 4  ;;  %v3407_v20 = vrot.slane %v3406_v24, 4 }
 0x22a   : > { %v7423_v16 = vadd.f32 %v3348_v33, %v8448_v50  ;;  %v7427_v31 = vadd.f32 %v3355_v12, %v8449_v58  ;;  %v3425_v43 = vrot.slane %v7353_v14, 2  ;;  %v3426_v4 = vrot.slane %v7357_v37, 2 }
 0x22b   : > { %v3433_v52 = vrot.slane %v7374_v49, 3  ;;  %v3434_v19 = vrot.slane %v7378_v3, 3  ;;  %v3374_v36 = vrot.slane %v3373_v2, 1  ;;  %v3381_v63 = vrot.slane %v3380_v56, 1 }
 0x22c   : > { %v3401_v41 = vadd.f32 %v3400_v15, %v3399_v25  ;;  %v3408_v34 = vadd.f32 %v3407_v20, %v3406_v24  ;;  %v3429_v33 = vmax.f32 %v3421_v35, %v3425_v43  ;;  %v3430_v12 = vmax.f32 %v3422_v1, %v3426_v4 }
 0x22d   : > { %v3441_v0 = vrot.slane %v7393_v8, 4  ;;  %v3442_v54 = vrot.slane %v7397_v21, 4  ;;  %v3375_v23 = vadd.f32 %v3374_v36, %v3373_v2  ;;  %v3382_v40 = vadd.f32 %v3381_v63, %v3380_v56 }
 0x22e   : > { %v3402_v39 = vrot.slane %v3401_v41, 2  ;;  %v3409_v13 = vrot.slane %v3408_v34, 2  ;;  %v3437_v50 = vmax.f32 %v3429_v33, %v3433_v52  ;;  %v3438_v58 = vmax.f32 %v3430_v12, %v3434_v19 }
 0x22f   : > { %v3449_v47 = vrot.slane %v7409_v10, 5  ;;  %v3450_v51 = vrot.slane %v7413_v57, 5  ;;  %v8450_v38 = vunpack.c.l.bf16 %v7389_v48  ;;  %v8451_v24 = vunpack.c.h.bf16 %v7389_v48 }
 0x230   : > { %v3403_v1 = vadd.f32 %v3402_v39, %v3401_v41  ;;  %v3410_v15 = vadd.f32 %v3409_v13, %v3408_v34  ;;  %v3445_v2 = vmax.f32 %v3437_v50, %v3441_v0  ;;  %v3446_v56 = vmax.f32 %v3438_v58, %v3442_v54 }
 0x231   : > { %v7441_v25 = vadd.f32 %v8450_v38, %v3375_v23  ;;  %v7445_v35 = vadd.f32 %v8451_v24, %v3382_v40  ;;  %v3457_v20 = vrot.slane %v7423_v16, 6  ;;  %v3458_v43 = vrot.slane %v7427_v31, 6  ;;  %v7473_v23 = vld [vmem:[%s5756_s25 + $0x110] sm:$0xff] }
 0x232   : > { %v8452_v4 = vunpack.c.l.bf16 %v7227_v62  ;;  %v8453_v38 = vunpack.c.h.bf16 %v7227_v62  ;;  %v3404_v36 = vrot.slane %v3403_v1, 1  ;;  %v3411_v63 = vrot.slane %v3410_v15, 1  ;;  %8458 = vst [vmem:[#allocation12_spill] sm:$0xff] %v7473_v23 }
 0x233   : > { %v3453_v41 = vmax.f32 %v3445_v2, %v3449_v47  ;;  %v3454_v34 = vmax.f32 %v3446_v56, %v3450_v51  ;;  %v3465_v33 = vrot.slane %v7441_v25, 7  ;;  %v3466_v12 = vrot.slane %v7445_v35, 7  ;;  %v7508_v56 = vld [vmem:[%s5756_s25 + $0x1c8] sm:$0xff] }
 0x234   : > { %v3079_v52 = vmul.f32 %v7258_v42, %v8452_v4  ;;  %v3080_v19 = vmul.f32 %v7262_v17, %v8453_v38  ;;  %5335 = vrcp.f32 %v7254_v28  ;;  %v7460_v0 = vadd.f32 %v7288_v22, %v7270_v7  ;;  %v7476_v7 = vld [vmem:[%s5756_s25 + $0x1b0] sm:$0xff] }
 0x235   : > { %v3405_v42 = vadd.f32 %v3404_v36, %v3403_v1  ;;  %v3412_v62 = vadd.f32 %v3411_v63, %v3410_v15  ;;  %v8455_v17 = vunpack.c.l.bf16 %v7231_v5  ;;  %v8457_v51 = vunpack.c.h.bf16 %v7231_v5  ;;  %v7496_v1 = vld [vmem:[%s5756_s25 + $0x1b8] sm:$0xff] }
 0x236   : > { %8454 = vst [vmem:[#allocation10_spill] sm:$0xff] %v7460_v0  ;;  %v3461_v28 = vmax.f32 %v3453_v41, %v3457_v20  ;;  %v3462_v40 = vmax.f32 %v3454_v34, %v3458_v43  ;;  %v7480_v22 = vadd.f32 %v7291_v6, %v7298_v60  ;;  %v8459_v39 = vunpack.c.l.bf16 %v7236_v26 }
 0x237   : > { %v7465_v54 = vmul.f32 %v7276_v46, %v8455_v17  ;;  %v7470_v47 = vmul.f32 %v7280_v61, %v8457_v51  ;;  %v8461_v5 = vunpack.c.l.bf16 %v7389_v48  ;;  %v8462_v58 = vmov %v8451_v24 }
 0x238   : > { %v7485_v13 = vmul.f32 %v7276_v46, %v8459_v39  ;;  %v7493_v24 = vadd.f32 %v3412_v62, %v8462_v58  ;;  %v7499_v15 = vadd.f32 %v3079_v52, %v7272_v45  ;;  %v7502_v6 = vadd.f32 %v3080_v19, %v7300_v9  ;;  %v7505_v46 = vld [vmem:[%s5756_s25 + $0x1c0] sm:$0xff] }
 0x239   : > { %8456 = vst [vmem:[#allocation11_spill] sm:$0xff] %v7465_v54  ;;  %v7489_v50 = vadd.f32 %v3405_v42, %v8461_v5  ;;  %v3469_v60 = vmax.f32 %v3461_v28, %v3465_v33  ;;  %v3470_v2 = vmax.f32 %v3462_v40, %v3466_v12  ;;  %v8465_v20 = vunpack.c.h.bf16 %v7236_v26 }
 0x23a   : > { %8460 = vst [vmem:[#allocation37_spill] sm:$0xff] %v7485_v13  ;;  %8463 = vst [vmem:[#allocation38_spill] sm:$0xff] %v7499_v15  ;;  %v3620_v45 = vunpack.c.l.bf16 %v7476_v7  ;;  %v3621_v38 = vunpack.c.h.bf16 %v7476_v7  ;;  %v3622_v19 = vunpack.c.l.bf16 %v7496_v1  ;;  %v3623_v26 = vunpack.c.h.bf16 %v7496_v1 }
 0x23b   : > { %8464 = vst [vmem:[#allocation39_spill] sm:$0xff] %v7502_v6  ;;  %v7513_v48 = vmul.f32 %v7280_v61, %v8465_v20  ;;  %v7519_v9 = vmax.f32 %v3469_v60, %v7489_v50  ;;  %v7522_v52 = vmax.f32 %v3470_v2, %v7493_v24  ;;  %v3639_v61 = vunpack.c.l.bf16 %v7505_v46 }
 0x23c   : > { %v3640_v36 = vunpack.c.h.bf16 %v7505_v46  ;;  %v3641_v63 = vunpack.c.l.bf16 %v7508_v56 }
 0x23d   : > { %8466 = vst [vmem:[#allocation40_spill] sm:$0xff] %v7513_v48  ;;  %v3473_v41 = vsub.f32 %v7327_v11, %v7519_v9  ;;  %v3474_v34 = vsub.f32 %v7329_v30, %v7522_v52  ;;  %v3481_v33 = vrot.slane %v7519_v9, 7  ;;  %v3482_v12 = vrot.slane %v7522_v52, 7 }
 0x23e   : > { %v3491_v42 = vrot.slane %v7519_v9, 6  ;;  %v3492_v62 = vrot.slane %v7522_v52, 6  ;;  %v3501_v17 = vrot.slane %v7519_v9, 5  ;;  %v3502_v51 = vrot.slane %v7522_v52, 5 }
 0x23f   : > { %v3475_v28 = vmul.f32 1.442695, %v3473_v41  ;;  %v3477_v40 = vmul.f32 1.442695, %v3474_v34  ;;  %v3485_v39 = vsub.f32 %v7339_v44, %v3481_v33  ;;  %v3486_v11 = vsub.f32 %v7343_v32, %v3482_v12 }
 0x240   : > { %v3495_v30 = vsub.f32 %v7353_v14, %v3491_v42  ;;  %v3496_v5 = vsub.f32 %v7357_v37, %v3492_v62  ;;  %v3505_v58 = vsub.f32 %v7374_v49, %v3501_v17  ;;  %v3506_v60 = vsub.f32 %v7378_v3, %v3502_v51 }
 0x241   : > { %5337 = vpow2.f32 %v3475_v28  ;;  %v3487_v2 = vmul.f32 1.442695, %v3485_v39  ;;  %v3489_v20 = vmul.f32 1.442695, %v3486_v11  ;;  %v3511_v43 = vrot.slane %v7519_v9, 4  ;;  %v7547_v44 = vpop.eup %5335  ;;  %v7562_v39 = vld [vmem:[%s5756_s25 + $0x1d0] sm:$0xff] }
 0x242   : > { %5339 = vpow2.f32 %v3477_v40  ;;  %v3497_v41 = vmul.f32 1.442695, %v3495_v30  ;;  %v3499_v34 = vmul.f32 1.442695, %v3496_v5  ;;  %v3507_v4 = vmul.f32 1.442695, %v3505_v58 }
 0x243   : > { %8467 = vst [vmem:[#allocation41_spill] sm:$0xff] %v7547_v44  ;;  %5341 = vpow2.f32 %v3487_v2  ;;  %v3509_v32 = vmul.f32 1.442695, %v3506_v60  ;;  %v3512_v14 = vrot.slane %v7522_v52, 4  ;;  %v3515_v37 = vsub.f32 %v7393_v8, %v3511_v43 }
 0x244   : > { %5343 = vpow2.f32 %v3489_v20  ;;  %v3521_v49 = vrot.slane %v7519_v9, 3  ;;  %v3522_v3 = vrot.slane %v7522_v52, 3  ;;  %v3531_v33 = vrot.slane %v7519_v9, 2 }
 0x245   : > { %5345 = vpow2.f32 %v3497_v41  ;;  %v3516_v12 = vsub.f32 %v7397_v21, %v3512_v14  ;;  %v3517_v42 = vmul.f32 1.442695, %v3515_v37  ;;  %v3532_v62 = vrot.slane %v7522_v52, 2  ;;  %v7585_v37 = vld [vmem:[%s5756_s25 + $0x1f0] sm:$0xff] }
 0x246   : > { %5347 = vpow2.f32 %v3499_v34  ;;  %v3525_v17 = vsub.f32 %v7409_v10, %v3521_v49  ;;  %v3526_v8 = vsub.f32 %v7413_v57, %v3522_v3  ;;  %v3535_v43 = vsub.f32 %v7423_v16, %v3531_v33  ;;  %v7590_v49 = vld [vmem:[%s5756_s25 + $0x1f8] sm:$0xff] }
 0x247   : > { %5349 = vpow2.f32 %v3507_v4  ;;  %v3519_v51 = vmul.f32 1.442695, %v3516_v12  ;;  %v3536_v28 = vsub.f32 %v7427_v31, %v3532_v62  ;;  %v3541_v40 = vrot.slane %v7519_v9, 1  ;;  %v7568_v4 = vld [vmem:[%s5756_s25 + $0x1d8] sm:$0xff]  ;;  %v7571_v31 = vld [vmem:[%s5756_s25 + $0x1e0] sm:$0xff] }
 0x248   : > { %5351 = vpow2.f32 %v3509_v32  ;;  %v3527_v21 = vmul.f32 1.442695, %v3525_v17  ;;  %v3529_v11 = vmul.f32 1.442695, %v3526_v8  ;;  %v3642_v10 = vunpack.c.h.bf16 %v7508_v56 }
 0x249   : > { %5353 = vpow2.f32 %v3517_v42  ;;  %v3537_v30 = vmul.f32 1.442695, %v3535_v43  ;;  %v3542_v57 = vrot.slane %v7522_v52, 1  ;;  %v3545_v16 = vsub.f32 %v7441_v25, %v3541_v40  ;;  %v7579_v25 = vld [vmem:[%s5756_s25 + $0x1e8] sm:$0xff] }
 0x24a   : > { %5355 = vpow2.f32 %v3519_v51  ;;  %v3539_v5 = vmul.f32 1.442695, %v3536_v28  ;;  %v3551_v58 = vsub.f32 %v7489_v50, %v7519_v9  ;;  %v3662_v60 = vunpack.c.l.bf16 %v7562_v39 }
 0x24b   : > { %5357 = vpow2.f32 %v3527_v21  ;;  %v3546_v2 = vsub.f32 %v7445_v35, %v3542_v57  ;;  %v3547_v20 = vmul.f32 1.442695, %v3545_v16  ;;  %v3663_v41 = vunpack.c.h.bf16 %v7562_v39 }
 0x24c   : > { %5359 = vpow2.f32 %v3529_v11  ;;  %v3664_v34 = vunpack.c.l.bf16 %v7568_v4  ;;  %v3665_v32 = vunpack.c.h.bf16 %v7568_v4  ;;  %v3685_v14 = vunpack.c.l.bf16 %v7571_v31  ;;  %v5044_v4 = vld [vmem:[%s5756_s25 + $0x208] sm:$0xff] }
 0x24d   : > { %5361 = vpow2.f32 %v3537_v30  ;;  %v3549_v50 = vmul.f32 1.442695, %v3546_v2  ;;  %v3552_v9 = vsub.f32 %v7493_v24, %v7522_v52  ;;  %v3553_v35 = vmul.f32 1.442695, %v3551_v58 }
 0x24e   : > { %v5338_v3 = vpop.eup %5337  ;;  %5363 = vpow2.f32 %v3539_v5  ;;  %v3686_v33 = vunpack.c.h.bf16 %v7571_v31  ;;  %v3687_v12 = vunpack.c.l.bf16 %v7579_v25 }
 0x24f   : > { %v5340_v62 = vpop.eup %5339  ;;  %5365 = vpow2.f32 %v3547_v20  ;;  %v3627_v17 = vrot.slane %v5338_v3, %v8424_v18  ;;  %v3555_v21 = vmul.f32 1.442695, %v3552_v9 }
 0x250   : > { %v5342_v24 = vpop.eup %5341  ;;  %5367 = vpow2.f32 %v3549_v50  ;;  %v3631_v52 = vrot.slane %v5340_v62, %v8424_v18 }
 0x251   : > { %v5344_v40 = vpop.eup %5343  ;;  %5369 = vpow2.f32 %v3553_v35  ;;  %v3559_v11 = vrot.slane %v5342_v24, 1  ;;  %v3632_v30 = vmul.f32 %v3627_v17, %v3620_v45  ;;  %v3634_v58 = vmul.f32 %v3627_v17, %v3622_v19 }
 0x252   : > { %v5346_v57 = vpop.eup %5345  ;;  %v3560_v16 = vrot.slane %v5344_v40, 1  ;;  %v3633_v5 = vmul.f32 %v3631_v52, %v3621_v38  ;;  %v3635_v2 = vmul.f32 %v3631_v52, %v3623_v26  ;;  %v3646_v9 = vrot.slane %v5342_v24, %v8425_v59 }
 0x253   : > { %v5348_v20 = vpop.eup %5347  ;;  %v3563_v50 = vadd.f32 %v5338_v3, %v3559_v11  ;;  %v3567_v51 = vrot.slane %v5346_v57, 2  ;;  %v3650_v35 = vrot.slane %v5344_v40, %v8425_v59  ;;  %v3669_v8 = vrot.slane %v5346_v57, %v8426_v27 }
 0x254   : > { %v5350_v28 = vpop.eup %5349  ;;  %v3564_v45 = vadd.f32 %v5340_v62, %v3560_v16  ;;  %v3568_v43 = vrot.slane %v5348_v20, 2  ;;  %v3673_v7 = vrot.slane %v5348_v20, %v8426_v27  ;;  %v3651_v1 = vmul.f32 %v3646_v9, %v3639_v61  ;;  %v7622_v20 = vld [vmem:[%s5756_s25 + $0x200] sm:$0xff] }
 0x255   : > { %v5352_v38 = vpop.eup %5351  ;;  %v3571_v19 = vadd.f32 %v3567_v51, %v3563_v50  ;;  %v3575_v17 = vrot.slane %v5350_v28, 3  ;;  %v3652_v26 = vmul.f32 %v3650_v35, %v3640_v36  ;;  %5371 = vpow2.f32 %v3555_v21 }
 0x256   : > { %v5354_v3 = vpop.eup %5353  ;;  %v3572_v24 = vadd.f32 %v3568_v43, %v3564_v45  ;;  %v3576_v52 = vrot.slane %v5352_v38, 3  ;;  %v3654_v62 = vmul.f32 %v3650_v35, %v3642_v10  ;;  %v3653_v51 = vmul.f32 %v3646_v9, %v3641_v63 }
 0x257   : > { %v5356_v40 = vpop.eup %5355  ;;  %v3579_v11 = vadd.f32 %v3575_v17, %v3571_v19  ;;  %v3583_v57 = vrot.slane %v5354_v3, 4  ;;  %v3655_v16 = vadd.f32 %v3651_v1, %v3632_v30  ;;  %v3656_v36 = vadd.f32 %v3652_v26, %v3633_v5 }
 0x258   : > { %v5358_v61 = vpop.eup %5357  ;;  %v3580_v50 = vadd.f32 %v3576_v52, %v3572_v24  ;;  %v3584_v46 = vrot.slane %v5356_v40, 4  ;;  %v3658_v42 = vadd.f32 %v3654_v62, %v3635_v2  ;;  %v3674_v10 = vmul.f32 %v3669_v8, %v3662_v60 }
 0x259   : > { %v5360_v21 = vpop.eup %5359  ;;  %v3587_v43 = vadd.f32 %v3583_v57, %v3579_v11  ;;  %v3591_v45 = vrot.slane %v5358_v61, 5  ;;  %v3675_v35 = vmul.f32 %v3673_v7, %v3663_v41  ;;  %v3677_v30 = vmul.f32 %v3673_v7, %v3665_v32 }
 0x25a   : > { %v5362_v19 = vpop.eup %5361  ;;  %v3588_v56 = vadd.f32 %v3584_v46, %v3580_v50  ;;  %v3592_v63 = vrot.slane %v5360_v21, 5  ;;  %v3731_v9 = vunpack.c.l.bf16 %v7622_v20  ;;  %v3657_v1 = vadd.f32 %v3653_v51, %v3634_v58 }
 0x25b   : > { %v5364_v17 = vpop.eup %5363  ;;  %v3595_v5 = vadd.f32 %v3591_v45, %v3587_v43  ;;  %v3599_v2 = vrot.slane %v5362_v19, 6  ;;  %v3732_v26 = vunpack.c.h.bf16 %v7622_v20  ;;  %v3676_v41 = vmul.f32 %v3669_v8, %v3664_v34 }
 0x25c   : > { %v7632_v24 = vpop.eup %5365  ;;  %v3596_v60 = vadd.f32 %v3592_v63, %v3588_v56  ;;  %v3600_v39 = vrot.slane %v5364_v17, 6  ;;  %v3678_v52 = vadd.f32 %v3674_v10, %v3655_v16  ;;  %v3679_v32 = vadd.f32 %v3675_v35, %v3656_v36 }
 0x25d   : > { %v5368_v62 = vpop.eup %5367  ;;  %v3681_v7 = vadd.f32 %v3677_v30, %v3658_v42  ;;  %v3692_v11 = vrot.slane %v5350_v28, %v8427_v55  ;;  %v3696_v57 = vrot.slane %v5352_v38, %v8427_v55  ;;  %v3603_v51 = vadd.f32 %v3599_v2, %v3595_v5  ;;  %v5045_v28 = vld [vmem:[%s5756_s25 + $0x210] sm:$0xff] }
 0x25e   : > { %v7638_v58 = vpop.eup %5369  ;;  %v3607_v20 = vrot.slane %v7632_v24, 7  ;;  %v3715_v50 = vrot.slane %v5354_v3, %v8429_v29  ;;  %v3719_v46 = vrot.slane %v5356_v40, %v8429_v29  ;;  %v3604_v34 = vadd.f32 %v3600_v39, %v3596_v60  ;;  %v5046_v39 = vld [vmem:[%s5756_s25 + $0x218] sm:$0xff] }
 0x25f   : > { %v3608_v8 = vrot.slane %v5368_v62, 7  ;;  %v3697_v16 = vmul.f32 %v3692_v11, %v3685_v14  ;;  %v3698_v42 = vmul.f32 %v3696_v57, %v3686_v33  ;;  %v3680_v38 = vadd.f32 %v3676_v41, %v3657_v1 }
 0x260   : > { %v3699_v36 = vmul.f32 %v3692_v11, %v3687_v12  ;;  %v8468_v43 = vunpack.c.h.bf16 %v7579_v25  ;;  %v8469_v40 = vunpack.c.l.bf16 %v7585_v37  ;;  %v8470_v56 = vunpack.c.h.bf16 %v7585_v37 }
 0x261   : > { %v3701_v10 = vadd.f32 %v3697_v16, %v3678_v52  ;;  %v3702_v35 = vadd.f32 %v3698_v42, %v3679_v32  ;;  %v3733_v63 = vunpack.c.l.bf16 %v5044_v4  ;;  %v8471_v33 = vunpack.c.h.bf16 %v7590_v49  ;;  %v5047_v42 = vld [vmem:[%s5756_s25 + $0x220] sm:$0xff] }
 0x262   : > { %v3700_v3 = vmul.f32 %v3696_v57, %v8468_v43  ;;  %v3720_v45 = vmul.f32 %v3715_v50, %v8469_v40  ;;  %v3721_v14 = vmul.f32 %v3719_v46, %v8470_v56  ;;  %v3734_v5 = vunpack.c.h.bf16 %v5044_v4  ;;  %v5372_v1 = vpop.eup %5371  ;;  %v8473_v4 = vld [vmem:[#allocation17_spill] sm:$0xff] }
 0x263   : > { %v3723_v30 = vmul.f32 %v3719_v46, %v8471_v33  ;;  %v3754_v2 = vunpack.c.l.bf16 %v5045_v28  ;;  %v3611_v12 = vadd.f32 %v3607_v20, %v3603_v51  ;;  %v3612_v60 = vadd.f32 %v3608_v8, %v3604_v34 }
 0x264   : > { %v3704_v31 = vadd.f32 %v3700_v3, %v3681_v7  ;;  %v3738_v25 = vrot.slane %v5358_v61, %v8434_v53  ;;  %v3755_v41 = vunpack.c.h.bf16 %v5045_v28  ;;  %v3703_v52 = vadd.f32 %v3699_v36, %v3680_v38  ;;  %v5048_v38 = vld [vmem:[%s5756_s25 + $0x228] sm:$0xff] }
 0x265   : > { %v8472_v37 = vunpack.c.l.bf16 %v7590_v49  ;;  %v3724_v11 = vadd.f32 %v3720_v45, %v3701_v10  ;;  %v3742_v7 = vrot.slane %v5360_v21, %v8434_v53  ;;  %v3725_v57 = vadd.f32 %v3721_v14, %v3702_v35  ;;  %v7672_v49 = vld [vmem:[%s5756_s25 + $0x118] sm:$0xff]  ;;  %v5053_v14 = vld [vmem:[%s5541_s18 + $0x2d0] sm:$0xff] }
 0x266   : > { %v3743_v46 = vmul.f32 %v3738_v25, %v3731_v9  ;;  %v3761_v16 = vrot.slane %v5362_v19, %v8473_v4  ;;  %v3765_v51 = vrot.slane %v5364_v17, %v8473_v4  ;;  %v3727_v20 = vadd.f32 %v3723_v30, %v3704_v31  ;;  %8475 = vst [vmem:[#allocation42_spill] sm:$0xff] %v7672_v49  ;;  %v8476_v45 = vld [vmem:[#allocation6_spill] sm:$0xff] }
 0x267   : > { %v3722_v32 = vmul.f32 %v3715_v50, %v8472_v37  ;;  %v3744_v34 = vmul.f32 %v3742_v7, %v3732_v26  ;;  %v3746_v61 = vmul.f32 %v3742_v7, %v3734_v5  ;;  %v3757_v8 = vunpack.c.h.bf16 %v5046_v39  ;;  %v5054_v30 = vld [vmem:[%s5541_s18 + $0x2d8] sm:$0xff] }
 0x268   : > { %v7669_v28 = vadd.f32 %v7470_v47, %v7480_v22  ;;  %v3613_v50 = vadd.f32 %v7638_v58, %v3611_v12  ;;  %v3614_v21 = vadd.f32 %v5372_v1, %v3612_v60  ;;  %v3756_v9 = vunpack.c.l.bf16 %v5046_v39 }
 0x269   : > { %v3726_v19 = vadd.f32 %v3722_v32, %v3703_v52  ;;  %v3745_v36 = vmul.f32 %v3738_v25, %v3733_v63  ;;  %v3747_v17 = vadd.f32 %v3743_v46, %v3724_v11  ;;  %v3766_v26 = vmul.f32 %v3761_v16, %v3754_v2  ;;  %v7688_v32 = vld [vmem:[%s5756_s25 + $0x238] sm:$0xff] }
 0x26a   : > { %8474 = vst [vmem:[#allocation17_spill] sm:$0xff] %v7669_v28  ;;  %v3748_v43 = vadd.f32 %v3744_v34, %v3725_v57  ;;  %v3767_v3 = vmul.f32 %v3765_v51, %v3755_v41  ;;  %v3778_v40 = vunpack.c.h.bf16 %v5047_v42  ;;  %v3788_v47 = vrot.slane %v5368_v62, %v8476_v45  ;;  %v7685_v62 = vld [vmem:[%s5756_s25 + $0x230] sm:$0xff]  ;;  %v8478_v34 = vld [vmem:[#allocation30_spill] sm:$0xff] }
 0x26b   : > { %v3750_v10 = vadd.f32 %v3746_v61, %v3727_v20  ;;  %v3769_v35 = vmul.f32 %v3765_v51, %v3757_v8  ;;  %v3780_v56 = vunpack.c.h.bf16 %v5048_v38  ;;  %5373 = vrcp.f32 %v3613_v50  ;;  %v8477_v51 = vld [vmem:[#allocation29_spill] sm:$0xff]  ;;  %v8479_v8 = vld [vmem:[#allocation31_spill] sm:$0xff]  ;;  %v8480_v50 = vld [vmem:[#allocation32_spill] sm:$0xff] }
 0x26c   : > { %v3777_v31 = vunpack.c.l.bf16 %v5047_v42  ;;  %v3779_v33 = vunpack.c.l.bf16 %v5048_v38  ;;  %v3784_v63 = vrot.slane %v7632_v24, %v8476_v45  ;;  %5375 = vrcp.f32 %v3614_v21  ;;  %v5056_v38 = vld [vmem:[%s5541_s18 + $0x2e8] sm:$0xff] }
 0x26d   : > { %v3749_v5 = vadd.f32 %v3745_v36, %v3726_v19  ;;  %v3768_v2 = vmul.f32 %v3761_v16, %v3756_v9  ;;  %v7682_v12 = vadd.f32 %v3766_v26, %v3747_v17  ;;  %v3771_v60 = vadd.f32 %v3767_v3, %v3748_v43  ;;  %v5055_v9 = vld [vmem:[%s5541_s18 + $0x2e0] sm:$0xff]  ;;  %v7713_v26 = vld [vmem:[%s8204_s3 + $0x8] sm:$0x11] }
 0x26e   : > { %v3790_v25 = vmul.f32 %v3788_v47, %v3778_v40  ;;  %v3849_v39 = vunpack.c.l.bf16 %v5053_v14  ;;  %v3850_v41 = vunpack.c.h.bf16 %v5053_v14  ;;  %v3773_v52 = vadd.f32 %v3769_v35, %v3750_v10 }
 0x26f   : > { %v3792_v37 = vmul.f32 %v3788_v47, %v3780_v56  ;;  %v3851_v11 = vunpack.c.l.bf16 %v5054_v30  ;;  %v3852_v24 = vunpack.c.h.bf16 %v5054_v30  ;;  %v7690_v7 = vmul.f32 %v3784_v63, %v3777_v31  ;;  %v7721_v31 = vld [vmem:[%s8204_s3 + $0x8] sm:$0x22] }
 0x270   : > { %v7692_v57 = vmul.f32 %v3784_v63, %v3779_v33  ;;  %v3801_v46 = vunpack.c.h.bf16 %v7685_v62  ;;  %v7696_v16 = vrot.slane %v5372_v1, %v8424_v18  ;;  %v3853_v20 = vmul.f32 %v3849_v39, %v8477_v51 }
 0x271   : > { %v3854_v61 = vmul.f32 %v3850_v41, %v8478_v34  ;;  %v3855_v42 = vmul.f32 %v3851_v11, %v8479_v8  ;;  %v3856_v21 = vmul.f32 %v3852_v24, %v8480_v50  ;;  %v7704_v19 = vadd.f32 %v3768_v2, %v3749_v5  ;;  %v5057_v2 = vld [vmem:[%s5541_s18 + $0x2f0] sm:$0xff] }
 0x272   : > { %v7706_v36 = vadd.f32 %v3790_v25, %v3771_v60  ;;  %v7715_v43 = vadd.f32 %v3792_v37, %v3773_v52  ;;  %v3879_v10 = vunpack.c.l.bf16 %v5055_v9  ;;  %v3880_v35 = vunpack.c.h.bf16 %v5055_v9  ;;  %v5058_v52 = vld [vmem:[%s5541_s18 + $0x2f8] sm:$0xff] }
 0x273   : > { %v3857_v40 = vadd.f32 %v3855_v42, %v3853_v20  ;;  %v3864_v47 = vadd.f32 %v3856_v21, %v3854_v61  ;;  %v3881_v56 = vunpack.c.l.bf16 %v5056_v38  ;;  %v3882_v14 = vunpack.c.h.bf16 %v5056_v38 }
 0x274   : > { %8481 = vst [vmem:[#allocation6_spill] sm:$0xff] %v7706_v36  ;;  %8482 = vst [vmem:[#allocation29_spill] sm:$0xff] %v7715_v43  ;;  %v7725_v33 = vrot.slane %v7638_v58, %v8424_v18  ;;  %v7728_v63 = vmul.f32 %v7696_v16, %v3801_v46  ;;  %v3872_v30 = vunpack.c.l.bf16 %v7713_v26  ;;  %v3873_v5 = vunpack.c.h.bf16 %v7713_v26 }
 0x275   : > { %v3858_v60 = vrot.slane %v3857_v40, 4  ;;  %v3865_v25 = vrot.slane %v3864_v47, 4  ;;  %v3883_v39 = vmul.f32 %v3879_v10, %v8477_v51  ;;  %v3884_v41 = vmul.f32 %v3880_v35, %v8478_v34  ;;  %v5059_v35 = vld [vmem:[%s5541_s18 + $0x300] sm:$0xff] }
 0x276   : > { %8483 = vst [vmem:[#allocation30_spill] sm:$0xff] %v7728_v63  ;;  %v3885_v37 = vmul.f32 %v3881_v56, %v8479_v8  ;;  %v3886_v58 = vmul.f32 %v3882_v14, %v8480_v50  ;;  %v3909_v61 = vunpack.c.l.bf16 %v5057_v2  ;;  %v3910_v42 = vunpack.c.h.bf16 %v5057_v2 }
 0x277   : > { %v3859_v46 = vadd.f32 %v3858_v60, %v3857_v40  ;;  %v3866_v20 = vadd.f32 %v3865_v25, %v3864_v47  ;;  %v3911_v26 = vunpack.c.l.bf16 %v5058_v52  ;;  %v3912_v10 = vunpack.c.h.bf16 %v5058_v52  ;;  %v5060_v25 = vld [vmem:[%s5541_s18 + $0x308] sm:$0xff] }
 0x278   : > { %v7740_v21 = vpop.eup %5373  ;;  %v3887_v9 = vadd.f32 %v3885_v37, %v3883_v39  ;;  %v3894_v38 = vadd.f32 %v3886_v58, %v3884_v41  ;;  %v3913_v1 = vmul.f32 %v3909_v61, %v8477_v51  ;;  %v3914_v17 = vmul.f32 %v3910_v42, %v8478_v34 }
 0x279   : > { %8484 = vst [vmem:[#allocation31_spill] sm:$0xff] %v7740_v21  ;;  %v7743_v22 = vpop.eup %5375  ;;  %v3860_v56 = vrot.slane %v3859_v46, 2  ;;  %v3867_v14 = vrot.slane %v3866_v20, 2  ;;  %v3915_v2 = vmul.f32 %v3911_v26, %v8479_v8  ;;  %v3916_v60 = vmul.f32 %v3912_v10, %v8480_v50 }
 0x27a   : > { %8485 = vst [vmem:[#allocation32_spill] sm:$0xff] %v7743_v22  ;;  %v3888_v40 = vrot.slane %v3887_v9, 4  ;;  %v3895_v47 = vrot.slane %v3894_v38, 4  ;;  %v3936_v37 = vunpack.c.l.bf16 %v5059_v35  ;;  %v3937_v52 = vunpack.c.h.bf16 %v5059_v35 }
 0x27b   : > { %v3861_v39 = vadd.f32 %v3860_v56, %v3859_v46  ;;  %v3868_v41 = vadd.f32 %v3867_v14, %v3866_v20  ;;  %v3917_v24 = vadd.f32 %v3915_v2, %v3913_v1  ;;  %v3924_v11 = vadd.f32 %v3916_v60, %v3914_v17  ;;  %v7755_v17 = vld [vmem:[%s8204_s3 + $0x8] sm:$0x44]  ;;  %v5062_v60 = vld [vmem:[%s5541_s18 + $0x318] sm:$0xff] }
 0x27c   : > { %v3889_v58 = vadd.f32 %v3888_v40, %v3887_v9  ;;  %v3896_v3 = vadd.f32 %v3895_v47, %v3894_v38  ;;  %v3938_v61 = vunpack.c.l.bf16 %v5060_v25  ;;  %v3939_v13 = vunpack.c.h.bf16 %v5060_v25 }
 0x27d   : > { %v3862_v44 = vrot.slane %v3861_v39, 1  ;;  %v3869_v28 = vrot.slane %v3868_v41, 1  ;;  %v3918_v54 = vrot.slane %v3917_v24, 4  ;;  %v3925_v0 = vrot.slane %v3924_v11, 4 }
 0x27e   : > { %v3890_v42 = vrot.slane %v3889_v58, 2  ;;  %v3897_v15 = vrot.slane %v3896_v3, 2  ;;  %v3940_v46 = vmul.f32 %v3936_v37, %v8477_v51  ;;  %v3941_v20 = vmul.f32 %v3937_v52, %v8478_v34 }
 0x27f   : > { %v3863_v26 = vadd.f32 %v3862_v44, %v3861_v39  ;;  %v3870_v21 = vadd.f32 %v3869_v28, %v3868_v41  ;;  %v3919_v38 = vadd.f32 %v3918_v54, %v3917_v24  ;;  %v3926_v1 = vadd.f32 %v3925_v0, %v3924_v11  ;;  %v5061_v54 = vld [vmem:[%s5541_s18 + $0x310] sm:$0xff] }
 0x280   : > { %v3891_v10 = vadd.f32 %v3890_v42, %v3889_v58  ;;  %v3898_v9 = vadd.f32 %v3897_v15, %v3896_v3  ;;  %v3942_v44 = vmul.f32 %v3938_v61, %v8479_v8  ;;  %v3943_v28 = vmul.f32 %v3939_v13, %v8480_v50 }
 0x281   : > { %v7757_v35 = vadd.f32 %v3872_v30, %v3863_v26  ;;  %v7759_v56 = vadd.f32 %v3873_v5, %v3870_v21  ;;  %v3920_v47 = vrot.slane %v3919_v38, 2  ;;  %v3927_v15 = vrot.slane %v3926_v1, 2 }
 0x282   : > { %v3892_v14 = vrot.slane %v3891_v10, 1  ;;  %v3899_v40 = vrot.slane %v3898_v9, 1  ;;  %v3944_v0 = vadd.f32 %v3942_v44, %v3940_v46  ;;  %v3951_v3 = vadd.f32 %v3943_v28, %v3941_v20 }
 0x283   : > { %v8268_v11 = vunpack.c.l.bf16 %v7755_v17  ;;  %v3921_v5 = vadd.f32 %v3920_v47, %v3919_v38  ;;  %v3928_v21 = vadd.f32 %v3927_v15, %v3926_v1  ;;  %v3966_v13 = vunpack.c.l.bf16 %v5061_v54  ;;  %v5063_v38 = vld [vmem:[%s5541_s18 + $0x320] sm:$0xff] }
 0x284   : > { %v3893_v30 = vadd.f32 %v3892_v14, %v3891_v10  ;;  %v3900_v2 = vadd.f32 %v3899_v40, %v3898_v9  ;;  %v3945_v25 = vrot.slane %v3944_v0, 4  ;;  %v3952_v39 = vrot.slane %v3951_v3, 4 }
 0x285   : > { %v3967_v41 = vunpack.c.h.bf16 %v5061_v54  ;;  %v8486_v37 = vunpack.c.l.bf16 %v7721_v31  ;;  %v8487_v58 = vunpack.c.h.bf16 %v7721_v31  ;;  %v3922_v42 = vrot.slane %v3921_v5, 1 }
 0x286   : > { %v3929_v26 = vrot.slane %v3928_v21, 1  ;;  %v3946_v46 = vadd.f32 %v3945_v25, %v3944_v0  ;;  %v3953_v20 = vadd.f32 %v3952_v39, %v3951_v3  ;;  %v3968_v10 = vunpack.c.l.bf16 %v5062_v60 }
 0x287   : > { %v7769_v52 = vadd.f32 %v8486_v37, %v3893_v30  ;;  %v7773_v61 = vadd.f32 %v8487_v58, %v3900_v2  ;;  %v3969_v9 = vunpack.c.h.bf16 %v5062_v60  ;;  %v3923_v1 = vadd.f32 %v3922_v42, %v3921_v5  ;;  %v5064_v30 = vld [vmem:[%s5541_s18 + $0x328] sm:$0xff] }
 0x288   : > { %v3930_v44 = vadd.f32 %v3929_v26, %v3928_v21  ;;  %v3970_v28 = vmul.f32 %v3966_v13, %v8477_v51  ;;  %v3971_v14 = vmul.f32 %v3967_v41, %v8478_v34  ;;  %v3947_v40 = vrot.slane %v3946_v46, 2 }
 0x289   : > { %v3954_v47 = vrot.slane %v3953_v20, 2  ;;  %v3972_v15 = vmul.f32 %v3968_v10, %v8479_v8  ;;  %v3973_v54 = vmul.f32 %v3969_v9, %v8480_v50  ;;  %v8488_v2 = vmov %v8486_v37  ;;  %v7792_v37 = vld [vmem:[%s8204_s3 + $0x8] sm:$0x88] }
 0x28a   : > { %v7783_v0 = vadd.f32 %v3923_v1, %v8488_v2  ;;  %v8489_v3 = vmov %v8487_v58  ;;  %v3993_v5 = vunpack.c.l.bf16 %v5063_v38  ;;  %v3994_v21 = vunpack.c.h.bf16 %v5063_v38 }
 0x28b   : > { %v7787_v60 = vadd.f32 %v3930_v44, %v8489_v3  ;;  %v3948_v25 = vadd.f32 %v3947_v40, %v3946_v46  ;;  %v3955_v39 = vadd.f32 %v3954_v47, %v3953_v20  ;;  %v3974_v13 = vadd.f32 %v3972_v15, %v3970_v28  ;;  %v5065_v46 = vld [vmem:[%s5541_s18 + $0x330] sm:$0xff] }
 0x28c   : > { %v3981_v41 = vadd.f32 %v3973_v54, %v3971_v14  ;;  %v3995_v58 = vunpack.c.l.bf16 %v5064_v30  ;;  %v3996_v42 = vunpack.c.h.bf16 %v5064_v30  ;;  %v3997_v26 = vmul.f32 %v3993_v5, %v8477_v51  ;;  %v5066_v30 = vld [vmem:[%s5541_s18 + $0x338] sm:$0xff] }
 0x28d   : > { %v3998_v31 = vmul.f32 %v3994_v21, %v8478_v34  ;;  %v3949_v10 = vrot.slane %v3948_v25, 1  ;;  %v3956_v9 = vrot.slane %v3955_v39, 1  ;;  %v3975_v1 = vrot.slane %v3974_v13, 4 }
 0x28e   : > { %v3982_v38 = vrot.slane %v3981_v41, 4  ;;  %v3999_v20 = vmul.f32 %v3995_v58, %v8479_v8  ;;  %v4000_v44 = vmul.f32 %v3996_v42, %v8480_v50  ;;  %v4023_v5 = vunpack.c.l.bf16 %v5065_v46 }
 0x28f   : > { %v3950_v40 = vadd.f32 %v3949_v10, %v3948_v25  ;;  %v3957_v47 = vadd.f32 %v3956_v9, %v3955_v39  ;;  %v3976_v15 = vadd.f32 %v3975_v1, %v3974_v13  ;;  %v4024_v21 = vunpack.c.h.bf16 %v5065_v46  ;;  %v5067_v9 = vld [vmem:[%s5541_s18 + $0x340] sm:$0xff] }
 0x290   : > { %v3983_v54 = vadd.f32 %v3982_v38, %v3981_v41  ;;  %v4001_v2 = vadd.f32 %v3999_v20, %v3997_v26  ;;  %v4008_v3 = vadd.f32 %v4000_v44, %v3998_v31  ;;  %v8490_v58 = vunpack.c.h.bf16 %v7755_v17 }
 0x291   : > { %v7804_v24 = vadd.f32 %v8268_v11, %v3950_v40  ;;  %v3977_v14 = vrot.slane %v3976_v15, 2  ;;  %v4025_v13 = vunpack.c.l.bf16 %v5066_v30  ;;  %v4026_v41 = vunpack.c.h.bf16 %v5066_v30 }
 0x292   : > { %v7808_v42 = vadd.f32 %v8490_v58, %v3957_v47  ;;  %v3984_v25 = vrot.slane %v3983_v54, 2  ;;  %v4002_v39 = vrot.slane %v4001_v2, 4  ;;  %v4009_v10 = vrot.slane %v4008_v3, 4  ;;  %v5068_v47 = vld [vmem:[%s5541_s18 + $0x348] sm:$0xff] }
 0x293   : > { %v3978_v26 = vadd.f32 %v3977_v14, %v3976_v15  ;;  %v4027_v1 = vmul.f32 %v4023_v5, %v8477_v51  ;;  %v4028_v38 = vmul.f32 %v4024_v21, %v8478_v34  ;;  %v4029_v44 = vmul.f32 %v4025_v13, %v8479_v8 }
 0x294   : > { %v3985_v31 = vadd.f32 %v3984_v25, %v3983_v54  ;;  %v4003_v46 = vadd.f32 %v4002_v39, %v4001_v2  ;;  %v4010_v20 = vadd.f32 %v4009_v10, %v4008_v3  ;;  %v4030_v40 = vmul.f32 %v4026_v41, %v8480_v50  ;;  %v7819_v10 = vld [vmem:[%s8204_s3 + $0x10] sm:$0x11] }
 0x295   : > { %v3979_v58 = vrot.slane %v3978_v26, 1  ;;  %v4050_v11 = vunpack.c.l.bf16 %v5067_v9  ;;  %v4051_v49 = vunpack.c.h.bf16 %v5067_v9  ;;  %v4031_v48 = vadd.f32 %v4029_v44, %v4027_v1 }
 0x296   : > { %v3986_v28 = vrot.slane %v3985_v31, 1  ;;  %v4004_v23 = vrot.slane %v4003_v46, 2  ;;  %v4011_v30 = vrot.slane %v4010_v20, 2  ;;  %v4038_v14 = vadd.f32 %v4030_v40, %v4028_v38 }
 0x297   : > { %v3980_v15 = vadd.f32 %v3979_v58, %v3978_v26  ;;  %v4052_v5 = vunpack.c.l.bf16 %v5068_v47  ;;  %v4053_v21 = vunpack.c.h.bf16 %v5068_v47  ;;  %v4032_v25 = vrot.slane %v4031_v48, 4 }
 0x298   : > { %v3987_v54 = vadd.f32 %v3986_v28, %v3985_v31  ;;  %v4005_v2 = vadd.f32 %v4004_v23, %v4003_v46  ;;  %v4012_v3 = vadd.f32 %v4011_v30, %v4010_v20  ;;  %v4039_v39 = vrot.slane %v4038_v14, 4  ;;  %v5069_v20 = vld [vmem:[%s5541_s18 + $0x350] sm:$0xff] }
 0x299   : > { %v8491_v13 = vunpack.c.l.bf16 %v7755_v17  ;;  %v8492_v9 = vunpack.c.h.bf16 %v7755_v17  ;;  %v4054_v28 = vmul.f32 %v4050_v11, %v8477_v51  ;;  %v4055_v23 = vmul.f32 %v4051_v49, %v8478_v34  ;;  %v5070_v11 = vld [vmem:[%s5541_s18 + $0x358] sm:$0xff] }
 0x29a   : > { %v4006_v31 = vrot.slane %v4005_v2, 1  ;;  %v4013_v1 = vrot.slane %v4012_v3, 1  ;;  %v4033_v38 = vadd.f32 %v4032_v25, %v4031_v48  ;;  %v4040_v46 = vadd.f32 %v4039_v39, %v4038_v14 }
 0x29b   : > { %v7823_v41 = vadd.f32 %v3980_v15, %v8491_v13  ;;  %v7827_v26 = vadd.f32 %v3987_v54, %v8492_v9  ;;  %v4056_v44 = vmul.f32 %v4052_v5, %v8479_v8  ;;  %v4057_v40 = vmul.f32 %v4053_v21, %v8480_v50 }
 0x29c   : > { %v4007_v58 = vadd.f32 %v4006_v31, %v4005_v2  ;;  %v4014_v30 = vadd.f32 %v4013_v1, %v4012_v3  ;;  %v4034_v15 = vrot.slane %v4033_v38, 2  ;;  %v4041_v54 = vrot.slane %v4040_v46, 2 }
 0x29d   : > { %v4058_v13 = vadd.f32 %v4056_v44, %v4054_v28  ;;  %v4065_v49 = vadd.f32 %v4057_v40, %v4055_v23  ;;  %v4080_v9 = vunpack.c.l.bf16 %v5069_v20  ;;  %v4081_v6 = vunpack.c.h.bf16 %v5069_v20 }
 0x29e   : > { %v8493_v48 = vunpack.c.l.bf16 %v7792_v37  ;;  %v8494_v5 = vunpack.c.h.bf16 %v7792_v37  ;;  %v4035_v25 = vadd.f32 %v4034_v15, %v4033_v38  ;;  %v4042_v39 = vadd.f32 %v4041_v54, %v4040_v46 }
 0x29f   : > { %v4059_v17 = vrot.slane %v4058_v13, 4  ;;  %v4066_v2 = vrot.slane %v4065_v49, 4  ;;  %v4082_v3 = vunpack.c.l.bf16 %v5070_v11  ;;  %v4083_v31 = vunpack.c.h.bf16 %v5070_v11 }
 0x2a0   : > { %v7839_v14 = vadd.f32 %v8493_v48, %v4007_v58  ;;  %v7843_v21 = vadd.f32 %v8494_v5, %v4014_v30  ;;  %v4036_v1 = vrot.slane %v4035_v25, 1  ;;  %v4043_v47 = vrot.slane %v4042_v39, 1 }
 0x2a1   : > { %v4084_v28 = vmul.f32 %v4080_v9, %v8477_v51  ;;  %v4085_v23 = vmul.f32 %v4081_v6, %v8478_v34  ;;  %v4060_v20 = vadd.f32 %v4059_v17, %v4058_v13  ;;  %v4067_v44 = vadd.f32 %v4066_v2, %v4065_v49 }
 0x2a2   : > { %v4086_v40 = vmul.f32 %v4082_v3, %v8479_v8  ;;  %v4087_v58 = vmul.f32 %v4083_v31, %v8480_v50  ;;  %v4037_v30 = vadd.f32 %v4036_v1, %v4035_v25  ;;  %v4044_v48 = vadd.f32 %v4043_v47, %v4042_v39 }
 0x2a3   : > { %v4106_v38 = vrot.slane %v7769_v52, 1  ;;  %v4107_v46 = vrot.slane %v7773_v61, 1  ;;  %v4061_v15 = vrot.slane %v4060_v20, 2  ;;  %v4068_v54 = vrot.slane %v4067_v44, 2 }
 0x2a4   : > { %v4088_v11 = vadd.f32 %v4086_v40, %v4084_v28  ;;  %v4095_v5 = vadd.f32 %v4087_v58, %v4085_v23  ;;  %v8495_v51 = vunpack.c.l.bf16 %v7792_v37  ;;  %v8496_v6 = vunpack.c.h.bf16 %v7792_v37 }
 0x2a5   : > { %v4110_v8 = vmax.f32 %v7757_v35, %v4106_v38  ;;  %v4111_v50 = vmax.f32 %v7759_v56, %v4107_v46  ;;  %v4062_v47 = vadd.f32 %v4061_v15, %v4060_v20  ;;  %v4069_v17 = vadd.f32 %v4068_v54, %v4067_v44 }
 0x2a6   : > { %v7853_v9 = vadd.f32 %v4037_v30, %v8495_v51  ;;  %v7857_v34 = vadd.f32 %v4044_v48, %v8496_v6  ;;  %v4089_v13 = vrot.slane %v4088_v11, 4  ;;  %v4096_v49 = vrot.slane %v4095_v5, 4 }
 0x2a7   : > { %v4114_v25 = vrot.slane %v7783_v0, 2  ;;  %v4115_v39 = vrot.slane %v7787_v60, 2  ;;  %v4122_v2 = vrot.slane %v7804_v24, 3  ;;  %v4123_v3 = vrot.slane %v7808_v42, 3 }
 0x2a8   : > { %v4063_v31 = vrot.slane %v4062_v47, 1  ;;  %v4070_v37 = vrot.slane %v4069_v17, 1  ;;  %v4090_v1 = vadd.f32 %v4089_v13, %v4088_v11  ;;  %v4097_v28 = vadd.f32 %v4096_v49, %v4095_v5 }
 0x2a9   : > { %v4118_v23 = vmax.f32 %v4110_v8, %v4114_v25  ;;  %v4119_v40 = vmax.f32 %v4111_v50, %v4115_v39  ;;  %v4130_v20 = vrot.slane %v7823_v41, 4  ;;  %v4131_v44 = vrot.slane %v7827_v26, 4 }
 0x2aa   : > { %v4064_v58 = vadd.f32 %v4063_v31, %v4062_v47  ;;  %v4071_v30 = vadd.f32 %v4070_v37, %v4069_v17  ;;  %v4091_v48 = vrot.slane %v4090_v1, 2  ;;  %v4098_v38 = vrot.slane %v4097_v28, 2  ;;  %v7878_v17 = vld [vmem:[%s5756_s25 + $0x2d0] sm:$0xff] }
 0x2ab   : > { %v4126_v46 = vmax.f32 %v4118_v23, %v4122_v2  ;;  %v4127_v15 = vmax.f32 %v4119_v40, %v4123_v3  ;;  %v4138_v54 = vrot.slane %v7839_v14, 5  ;;  %v4139_v11 = vrot.slane %v7843_v21, 5  ;;  %v7883_v2 = vld [vmem:[%s5756_s25 + $0x2d8] sm:$0xff] }
 0x2ac   : > { %v8497_v5 = vunpack.c.l.bf16 %v7819_v10  ;;  %v8498_v6 = vunpack.c.h.bf16 %v7819_v10  ;;  %v4092_v50 = vadd.f32 %v4091_v48, %v4090_v1  ;;  %v4099_v47 = vadd.f32 %v4098_v38, %v4097_v28  ;;  %v7888_v1 = vld [vmem:[%s5756_s25 + $0x2e0] sm:$0xff] }
 0x2ad   : > { %v4134_v13 = vmax.f32 %v4126_v46, %v4130_v20  ;;  %v4135_v49 = vmax.f32 %v4127_v15, %v4131_v44  ;;  %v4146_v25 = vrot.slane %v7853_v9, 6  ;;  %v4147_v39 = vrot.slane %v7857_v34, 6  ;;  %v7898_v15 = vld [vmem:[%s5756_s25 + $0x2f0] sm:$0xff] }
 0x2ae   : > { %v7871_v51 = vadd.f32 %v8497_v5, %v4064_v58  ;;  %v7875_v8 = vadd.f32 %v8498_v6, %v4071_v30  ;;  %v4093_v3 = vrot.slane %v4092_v50, 1  ;;  %v4100_v31 = vrot.slane %v4099_v47, 1  ;;  %v7893_v58 = vld [vmem:[%s5756_s25 + $0x2e8] sm:$0xff]  ;;  %v7924_v44 = vld [vmem:[%s5756_s25 + $0x310] sm:$0xff] }
 0x2af   : > { %v4142_v28 = vmax.f32 %v4134_v13, %v4138_v54  ;;  %v4143_v40 = vmax.f32 %v4135_v49, %v4139_v11  ;;  %v7903_v13 = vld [vmem:[%s5756_s25 + $0x2f8] sm:$0xff]  ;;  %v7906_v49 = vld [vmem:[%s5756_s25 + $0x300] sm:$0xff] }
 0x2b0   : > { %v4154_v37 = vrot.slane %v7871_v51, 7  ;;  %v4155_v23 = vrot.slane %v7875_v8, 7  ;;  %v4094_v30 = vadd.f32 %v4093_v3, %v4092_v50  ;;  %v4101_v48 = vadd.f32 %v4100_v31, %v4099_v47 }
 0x2b1   : > { %v4150_v5 = vmax.f32 %v4142_v28, %v4146_v25  ;;  %v4151_v54 = vmax.f32 %v4143_v40, %v4147_v39  ;;  %v8499_v50 = vunpack.c.l.bf16 %v7819_v10  ;;  %v8500_v3 = vmov %v8498_v6  ;;  %v7919_v28 = vld [vmem:[%s5756_s25 + $0x308] sm:$0xff] }
 0x2b2   : > { %v7914_v31 = vadd.f32 %v4101_v48, %v8500_v3 }
 0x2b3   : > { %v7910_v47 = vadd.f32 %v4094_v30, %v8499_v50  ;;  %v4158_v40 = vmax.f32 %v4150_v5, %v4154_v37  ;;  %v4159_v6 = vmax.f32 %v4151_v54, %v4155_v23  ;;  %v7927_v30 = vld [vmem:[%s5756_s25 + $0x318] sm:$0xff] }
 0x2b5   : > { %v7934_v39 = vmax.f32 %v4158_v40, %v7910_v47  ;;  %v7937_v37 = vmax.f32 %v4159_v6, %v7914_v31 }
 0x2b7   : > { %v4162_v3 = vsub.f32 %v7757_v35, %v7934_v39  ;;  %v4163_v40 = vsub.f32 %v7759_v56, %v7937_v37  ;;  %v4170_v6 = vrot.slane %v7934_v39, 7  ;;  %v4171_v23 = vrot.slane %v7937_v37, 7 }
 0x2b8   : > { %v4180_v5 = vrot.slane %v7934_v39, 6  ;;  %v4181_v54 = vrot.slane %v7937_v37, 6  ;;  %v4190_v10 = vrot.slane %v7934_v39, 5  ;;  %v4191_v48 = vrot.slane %v7937_v37, 5 }
 0x2b9   : > { %v4164_v46 = vmul.f32 1.442695, %v4162_v3  ;;  %v4166_v50 = vmul.f32 1.442695, %v4163_v40  ;;  %v4174_v11 = vsub.f32 %v7769_v52, %v4170_v6  ;;  %v4175_v35 = vsub.f32 %v7773_v61, %v4171_v23 }
 0x2ba   : > { %v4184_v56 = vsub.f32 %v7783_v0, %v4180_v5  ;;  %v4185_v25 = vsub.f32 %v7787_v60, %v4181_v54  ;;  %v4194_v38 = vsub.f32 %v7804_v24, %v4190_v10  ;;  %v4195_v20 = vsub.f32 %v7808_v42, %v4191_v48  ;;  %v7975_v10 = vld [vmem:[%s5756_s25 + $0x320] sm:$0xff]  ;;  %v7988_v54 = vld [vmem:[%s5756_s25 + $0x330] sm:$0xff] }
 0x2bb   : > { %5377 = vpow2.f32 %v4164_v46  ;;  %v4176_v22 = vmul.f32 1.442695, %v4174_v11  ;;  %v4178_v43 = vmul.f32 1.442695, %v4175_v35  ;;  %v4200_v63 = vrot.slane %v7934_v39, 4 }
 0x2bc   : > { %5379 = vpow2.f32 %v4166_v50  ;;  %v4186_v3 = vmul.f32 1.442695, %v4184_v56  ;;  %v4188_v40 = vmul.f32 1.442695, %v4185_v25  ;;  %v4196_v36 = vmul.f32 1.442695, %v4194_v38 }
 0x2bd   : > { %5381 = vpow2.f32 %v4176_v22  ;;  %v4198_v52 = vmul.f32 1.442695, %v4195_v20  ;;  %v4201_v61 = vrot.slane %v7937_v37, 4  ;;  %v4204_v0 = vsub.f32 %v7823_v41, %v4200_v63  ;;  %v7993_v56 = vld [vmem:[%s5756_s25 + $0x338] sm:$0xff] }
 0x2be   : > { %5383 = vpow2.f32 %v4178_v43  ;;  %v4210_v24 = vrot.slane %v7934_v39, 3  ;;  %v4211_v60 = vrot.slane %v7937_v37, 3  ;;  %v4220_v42 = vrot.slane %v7934_v39, 2 }
 0x2bf   : > { %5385 = vpow2.f32 %v4186_v3  ;;  %v4205_v46 = vsub.f32 %v7827_v26, %v4201_v61  ;;  %v4206_v11 = vmul.f32 1.442695, %v4204_v0  ;;  %v4221_v38 = vrot.slane %v7937_v37, 2  ;;  %v8002_v61 = vld [vmem:[%s5756_s25 + $0x348] sm:$0xff] }
 0x2c0   : > { %5387 = vpow2.f32 %v4188_v40  ;;  %v4214_v22 = vsub.f32 %v7839_v14, %v4210_v24  ;;  %v4215_v63 = vsub.f32 %v7843_v21, %v4211_v60  ;;  %v4224_v43 = vsub.f32 %v7853_v9, %v4220_v42 }
 0x2c1   : > { %5389 = vpow2.f32 %v4196_v36  ;;  %v4208_v41 = vmul.f32 1.442695, %v4205_v46  ;;  %v4225_v20 = vsub.f32 %v7857_v34, %v4221_v38  ;;  %v4230_v25 = vrot.slane %v7934_v39, 1  ;;  %v7980_v36 = vld [vmem:[%s5756_s25 + $0x328] sm:$0xff] }
 0x2c2   : > { %5391 = vpow2.f32 %v4198_v52  ;;  %v4216_v26 = vmul.f32 1.442695, %v4214_v22  ;;  %v4218_v48 = vmul.f32 1.442695, %v4215_v63  ;;  %v4226_v50 = vmul.f32 1.442695, %v4224_v43 }
 0x2c3   : > { %5393 = vpow2.f32 %v4206_v11  ;;  %v4228_v14 = vmul.f32 1.442695, %v4225_v20  ;;  %v4231_v21 = vrot.slane %v7937_v37, 1  ;;  %v4234_v9 = vsub.f32 %v7871_v51, %v4230_v25 }
 0x2c4   : > { %5395 = vpow2.f32 %v4208_v41  ;;  %v4240_v34 = vsub.f32 %v7910_v47, %v7934_v39  ;;  %v4241_v23 = vsub.f32 %v7914_v31, %v7937_v37  ;;  %v4420_v5 = vunpack.c.l.bf16 %v7975_v10  ;;  %v7997_v39 = vld [vmem:[%s5756_s25 + $0x340] sm:$0xff] }
 0x2c5   : > { %5397 = vpow2.f32 %v4216_v26  ;;  %v4235_v6 = vsub.f32 %v7875_v8, %v4231_v21  ;;  %v4236_v35 = vmul.f32 1.442695, %v4234_v9  ;;  %v8501_v26 = vunpack.c.l.bf16 %v7878_v17 }
 0x2c6   : > { %5399 = vpow2.f32 %v4218_v48  ;;  %v4242_v3 = vmul.f32 1.442695, %v4240_v34  ;;  %v4244_v40 = vmul.f32 1.442695, %v4241_v23  ;;  %v8503_v34 = vunpack.c.h.bf16 %v7878_v17 }
 0x2c7   : > { %5401 = vpow2.f32 %v4226_v50  ;;  %v4238_v31 = vmul.f32 1.442695, %v4235_v6  ;;  %v8502_v50 = vunpack.c.l.bf16 %v7883_v2  ;;  %v8504_v6 = vunpack.c.h.bf16 %v7883_v2 }
 0x2c8   : > { %v5378_v8 = vpop.eup %5377  ;;  %5403 = vpow2.f32 %v4228_v14  ;;  %v8505_v2 = vunpack.c.l.bf16 %v7888_v1 }
 0x2c9   : > { %v5380_v42 = vpop.eup %5379  ;;  %5405 = vpow2.f32 %v4236_v35  ;;  %v4316_v46 = vrot.slane %v5378_v8, %v8424_v18 }
 0x2ca   : > { %v5382_v22 = vpop.eup %5381  ;;  %5407 = vpow2.f32 %v4238_v31  ;;  %v4320_v63 = vrot.slane %v5380_v42, %v8424_v18 }
 0x2cb   : > { %v5384_v20 = vpop.eup %5383  ;;  %5409 = vpow2.f32 %v4242_v3  ;;  %v4248_v25 = vrot.slane %v5382_v22, 1  ;;  %v4321_v48 = vmul.f32 %v4316_v46, %v8501_v26  ;;  %v4323_v14 = vmul.f32 %v4316_v46, %v8502_v50 }
 0x2cc   : > { %v5386_v21 = vpop.eup %5385  ;;  %5411 = vpow2.f32 %v4244_v40  ;;  %v4249_v9 = vrot.slane %v5384_v20, 1  ;;  %v4322_v23 = vmul.f32 %v4320_v63, %v8503_v34  ;;  %v4324_v35 = vmul.f32 %v4320_v63, %v8504_v6 }
 0x2cd   : > { %v5388_v31 = vpop.eup %5387  ;;  %v4252_v41 = vadd.f32 %v5378_v8, %v4248_v25  ;;  %v4256_v43 = vrot.slane %v5386_v21, 2  ;;  %v4335_v3 = vrot.slane %v5382_v22, %v8425_v59  ;;  %v4339_v38 = vrot.slane %v5384_v20, %v8425_v59 }
 0x2ce   : > { %v5390_v26 = vpop.eup %5389  ;;  %v4253_v11 = vadd.f32 %v5380_v42, %v4249_v9  ;;  %v4257_v60 = vrot.slane %v5388_v31, 2  ;;  %v4358_v46 = vrot.slane %v5386_v21, %v8426_v27  ;;  %v4362_v40 = vrot.slane %v5388_v31, %v8426_v27 }
 0x2cf   : > { %v5392_v50 = vpop.eup %5391  ;;  %v4260_v17 = vadd.f32 %v4256_v43, %v4252_v41  ;;  %v4264_v34 = vrot.slane %v5390_v26, 3  ;;  %v4340_v63 = vmul.f32 %v4335_v3, %v8505_v2  ;;  %v8506_v8 = vunpack.c.h.bf16 %v7888_v1 }
 0x2d0   : > { %v5394_v6 = vpop.eup %5393  ;;  %v4261_v22 = vadd.f32 %v4257_v60, %v4253_v11  ;;  %v4265_v24 = vrot.slane %v5392_v50, 3  ;;  %v8507_v59 = vunpack.c.l.bf16 %v7893_v58  ;;  %v8508_v20 = vunpack.c.h.bf16 %v7893_v58 }
 0x2d1   : > { %v4341_v25 = vmul.f32 %v4339_v38, %v8506_v8  ;;  %v5396_v9 = vpop.eup %5395  ;;  %v4268_v27 = vadd.f32 %v4264_v34, %v4260_v17  ;;  %v4272_v31 = vrot.slane %v5394_v6, 4  ;;  %v4344_v43 = vadd.f32 %v4340_v63, %v4321_v48 }
 0x2d2   : > { %v4342_v42 = vmul.f32 %v4335_v3, %v8507_v59  ;;  %v4343_v21 = vmul.f32 %v4339_v38, %v8508_v20  ;;  %v5398_v0 = vpop.eup %5397  ;;  %v4269_v52 = vadd.f32 %v4265_v24, %v4261_v22  ;;  %v4273_v2 = vrot.slane %v5396_v9, 4 }
 0x2d3   : > { %v4345_v41 = vadd.f32 %v4341_v25, %v4322_v23  ;;  %v5400_v8 = vpop.eup %5399  ;;  %v4276_v51 = vadd.f32 %v4272_v31, %v4268_v27  ;;  %v4280_v60 = vrot.slane %v5398_v0, 5  ;;  %v8509_v11 = vunpack.c.l.bf16 %v7898_v15 }
 0x2d4   : > { %v4346_v37 = vadd.f32 %v4342_v42, %v4323_v14  ;;  %v4347_v1 = vadd.f32 %v4343_v21, %v4324_v35  ;;  %v8510_v3 = vunpack.c.h.bf16 %v7898_v15  ;;  %v5402_v38 = vpop.eup %5401  ;;  %v4277_v59 = vadd.f32 %v4273_v2, %v4269_v52 }
 0x2d5   : > { %v4363_v47 = vmul.f32 %v4358_v46, %v8509_v11  ;;  %v4281_v17 = vrot.slane %v5400_v8, 5  ;;  %v8511_v48 = vunpack.c.l.bf16 %v7903_v13  ;;  %v8512_v24 = vunpack.c.h.bf16 %v7903_v13  ;;  %v5404_v14 = vpop.eup %5403 }
 0x2d6   : > { %v4364_v58 = vmul.f32 %v4362_v40, %v8510_v3  ;;  %v4284_v35 = vadd.f32 %v4280_v60, %v4276_v51  ;;  %v4288_v63 = vrot.slane %v5402_v38, 6  ;;  %v5406_v42 = vpop.eup %5405  ;;  %v4289_v21 = vrot.slane %v5404_v14, 6 }
 0x2d7   : > { %v4365_v23 = vmul.f32 %v4358_v46, %v8511_v48  ;;  %v4366_v34 = vmul.f32 %v4362_v40, %v8512_v24  ;;  %v4367_v25 = vadd.f32 %v4363_v47, %v4344_v43  ;;  %v4285_v20 = vadd.f32 %v4281_v17, %v4277_v59  ;;  %v5408_v31 = vpop.eup %5407 }
 0x2d8   : > { %v4368_v22 = vadd.f32 %v4364_v58, %v4345_v41  ;;  %v4292_v11 = vadd.f32 %v4288_v63, %v4284_v35  ;;  %v4296_v52 = vrot.slane %v5406_v42, 7  ;;  %v4381_v2 = vrot.slane %v5390_v26, %v8427_v55  ;;  %v8043_v3 = vpop.eup %5409 }
 0x2d9   : > { %v4369_v27 = vadd.f32 %v4365_v23, %v4346_v37  ;;  %v4370_v15 = vadd.f32 %v4366_v34, %v4347_v1  ;;  %v4385_v46 = vrot.slane %v5392_v50, %v8427_v55  ;;  %v4293_v13 = vadd.f32 %v4289_v21, %v4285_v20  ;;  %v5412_v43 = vpop.eup %5411 }
 0x2da   : > { %v4297_v40 = vrot.slane %v5408_v31, 7  ;;  %v4404_v51 = vrot.slane %v5394_v6, %v8429_v29  ;;  %v4408_v47 = vrot.slane %v5396_v9, %v8429_v29  ;;  %v4300_v41 = vadd.f32 %v4296_v52, %v4292_v11 }
 0x2db   : > { %v8513_v37 = vunpack.c.l.bf16 %v7906_v49  ;;  %v8514_v60 = vunpack.c.h.bf16 %v7906_v49  ;;  %v8515_v26 = vunpack.c.l.bf16 %v7919_v28  ;;  %v8516_v50 = vunpack.c.h.bf16 %v7919_v28 }
 0x2dc   : > { %v4301_v55 = vadd.f32 %v4297_v40, %v4293_v13  ;;  %v8517_v48 = vunpack.c.l.bf16 %v7924_v44  ;;  %v8518_v29 = vunpack.c.h.bf16 %v7924_v44  ;;  %v4302_v23 = vadd.f32 %v8043_v3, %v4300_v41 }
 0x2dd   : > { %v4386_v1 = vmul.f32 %v4381_v2, %v8513_v37  ;;  %v4387_v58 = vmul.f32 %v4385_v46, %v8514_v60  ;;  %v4388_v59 = vmul.f32 %v4381_v2, %v8515_v26  ;;  %v4389_v17 = vmul.f32 %v4385_v46, %v8516_v50 }
 0x2de   : > { %v4409_v6 = vmul.f32 %v4404_v51, %v8517_v48  ;;  %v4410_v9 = vmul.f32 %v4408_v47, %v8518_v29  ;;  %v4303_v49 = vadd.f32 %v5412_v43, %v4301_v55  ;;  %v8519_v20 = vunpack.c.l.bf16 %v7927_v30  ;;  %v5087_v55 = vld [vmem:[%s5756_s25 + $0x350] sm:$0xff] }
 0x2df   : > { %v4390_v24 = vadd.f32 %v4386_v1, %v4367_v25  ;;  %v4391_v34 = vadd.f32 %v4387_v58, %v4368_v22  ;;  %v4392_v35 = vadd.f32 %v4388_v59, %v4369_v27  ;;  %v4393_v63 = vadd.f32 %v4389_v17, %v4370_v15 }
 0x2e0   : > { %v4411_v21 = vmul.f32 %v4404_v51, %v8519_v20  ;;  %v8520_v11 = vunpack.c.h.bf16 %v7927_v30  ;;  %5413 = vrcp.f32 %v4302_v23  ;;  %v4427_v46 = vrot.slane %v5398_v0, %v8434_v53 }
 0x2e1   : > { %v4413_v52 = vadd.f32 %v4409_v6, %v4390_v24  ;;  %v4414_v2 = vadd.f32 %v4410_v9, %v4391_v34  ;;  %5415 = vrcp.f32 %v4303_v49  ;;  %v4431_v25 = vrot.slane %v5400_v8, %v8434_v53 }
 0x2e2   : > { %v4412_v28 = vmul.f32 %v4408_v47, %v8520_v11  ;;  %v4415_v44 = vadd.f32 %v4411_v21, %v4392_v35  ;;  %v4432_v22 = vmul.f32 %v4427_v46, %v4420_v5  ;;  %v8521_v27 = vunpack.c.l.bf16 %v7980_v36 }
 0x2e3   : > { %v4450_v30 = vrot.slane %v5402_v38, %v8473_v4  ;;  %v4454_v40 = vrot.slane %v5404_v14, %v8473_v4  ;;  %v8522_v51 = vunpack.c.h.bf16 %v7975_v10  ;;  %v8523_v47 = vunpack.c.h.bf16 %v7980_v36 }
 0x2e4   : > { %v4416_v13 = vadd.f32 %v4412_v28, %v4393_v63  ;;  %v4434_v15 = vmul.f32 %v4427_v46, %v8521_v27  ;;  %v4473_v53 = vrot.slane %v5406_v42, %v8476_v45  ;;  %v4477_v8 = vrot.slane %v5408_v31, %v8476_v45  ;;  %v5088_v42 = vld [vmem:[%s5756_s25 + $0x358] sm:$0xff] }
 0x2e5   : > { %v4433_v0 = vmul.f32 %v4431_v25, %v8522_v51  ;;  %v4435_v41 = vmul.f32 %v4431_v25, %v8523_v47  ;;  %v4436_v5 = vadd.f32 %v4432_v22, %v4413_v52  ;;  %v8524_v1 = vunpack.c.l.bf16 %v7988_v54 }
 0x2e6   : > { %v4438_v37 = vadd.f32 %v4434_v15, %v4415_v44  ;;  %v8525_v58 = vunpack.c.h.bf16 %v7988_v54  ;;  %v8526_v10 = vunpack.c.l.bf16 %v7993_v56  ;;  %v8527_v36 = vunpack.c.h.bf16 %v7993_v56 }
 0x2e7   : > { %v4455_v60 = vmul.f32 %v4450_v30, %v8524_v1  ;;  %v4437_v26 = vadd.f32 %v4433_v0, %v4414_v2  ;;  %v4439_v4 = vadd.f32 %v4435_v41, %v4416_v13  ;;  %v8528_v31 = vunpack.c.l.bf16 %v7997_v39  ;;  %v8537_v0 = vld [vmem:[#allocation30_spill] sm:$0xff]  ;;  %v8538_v41 = vld [vmem:[#allocation29_spill] sm:$0xff] }
 0x2e8   : > { %v4456_v38 = vmul.f32 %v4454_v40, %v8525_v58  ;;  %v4457_v14 = vmul.f32 %v4450_v30, %v8526_v10  ;;  %v4458_v59 = vmul.f32 %v4454_v40, %v8527_v36  ;;  %v8529_v48 = vunpack.c.h.bf16 %v7997_v39  ;;  %v5417_v10 = vld [vmem:[%s5756_s25 + $0x118] sm:$0xff] }
 0x2e9   : > { %v4459_v50 = vadd.f32 %v4455_v60, %v4436_v5  ;;  %v4478_v17 = vmul.f32 %v4473_v53, %v8528_v31  ;;  %v8530_v54 = vunpack.c.l.bf16 %v8002_v61  ;;  %v8531_v34 = vunpack.c.h.bf16 %v8002_v61  ;;  %v8533_v61 = vld [vmem:[#allocation8_spill] sm:$0xff] }
 0x2ea   : > { %v4479_v6 = vmul.f32 %v4477_v8, %v8529_v48  ;;  %v4460_v9 = vadd.f32 %v4456_v38, %v4437_v26  ;;  %v4461_v23 = vadd.f32 %v4457_v14, %v4438_v37  ;;  %v4462_v24 = vadd.f32 %v4458_v59, %v4439_v4  ;;  %v8540_v26 = vld [vmem:[#allocation39_spill] sm:$0xff]  ;;  %v8541_v4 = vld [vmem:[#allocation40_spill] sm:$0xff] }
 0x2eb   : > { %v4480_v29 = vmul.f32 %v4473_v53, %v8530_v54  ;;  %v4481_v35 = vmul.f32 %v4477_v8, %v8531_v34  ;;  %v8532_v56 = vunpack.c.h.bf16 %v7688_v32  ;;  %v4489_v63 = vunpack.c.l.bf16 %v5087_v55  ;;  %v8539_v8 = vld [vmem:[#allocation32_spill] sm:$0xff]  ;;  %v8542_v59 = vld [vmem:[#allocation7_spill] sm:$0xff] }
 0x2ec   : > { %v4490_v20 = vunpack.c.h.bf16 %v5087_v55  ;;  %v4491_v21 = vunpack.c.l.bf16 %v5088_v42  ;;  %v4482_v11 = vadd.f32 %v4478_v17, %v4459_v50  ;;  %v4483_v28 = vadd.f32 %v4479_v6, %v4460_v9  ;;  %v8545_v17 = vld [vmem:[#allocation42_spill] sm:$0xff] }
 0x2ed   : > { %v3815_v49 = vmul.f32 %v7696_v16, %v8532_v56  ;;  %v4484_v39 = vadd.f32 %v4480_v29, %v4461_v23  ;;  %v4492_v52 = vunpack.c.h.bf16 %v5088_v42  ;;  %v4485_v2 = vadd.f32 %v4481_v35, %v4462_v24  ;;  %v8543_v42 = vld [vmem:[#allocation12_spill] sm:$0xff]  ;;  %v4554_v9 = vld [vmem:[%s8206_s5 + $0x18] sm:$0xff] }
 0x2ee   : > { %v4496_v46 = vrot.slane %v8043_v3, %v8424_v18  ;;  %v4500_v44 = vrot.slane %v5412_v43, %v8424_v18  ;;  %v3122_v13 = vrot.slane %v8533_v61, %v8424_v18  ;;  %v3793_v25 = vadd.f32 %v7690_v7, %v7682_v12  ;;  %v4551_v43 = vld [vmem:[%s8206_s5] sm:$0xff]  ;;  %v4553_v12 = vld [vmem:[%s8206_s5 + $0x10] sm:$0xff]  ;;  %v5414_v7 = vpop.eup %5413  ;;  %v4552_v29 = vld [vmem:[%s8206_s5 + $0x8] sm:$0xff] }
 0x2ef   : > { %v3795_v16 = vadd.f32 %v7692_v57, %v7704_v19  ;;  %v8534_v22 = vunpack.c.l.bf16 %v7685_v62  ;;  %v5442_v15 = vmov 0   ;;  %v8535_v62 = vunpack.c.l.bf16 %v7688_v32  ;;  %v8536_v19 = vld [vmem:[#allocation6_spill] sm:$0xff]  ;;  %v5416_v37 = vpop.eup %5415 }
 0x2f0   : > { %4684 = vmatprep.mubr.bf16.mxu0 %v5442_v15  ;;  %v4501_v30 = vmul.f32 %v4496_v46, %v4489_v63  ;;  %v4502_v40 = vmul.f32 %v4500_v44, %v4490_v20  ;;  %v4503_v3 = vmul.f32 %v4496_v46, %v4491_v21  ;;  %v4504_v51 = vmul.f32 %v4500_v44, %v4492_v52  ;;  %v8550_v46 = vld [vmem:[#allocation23_spill] sm:$0xff] }
 0x2f1   : > { %v3812_v27 = vmul.f32 %v7725_v33, %v8534_v22  ;;  %4694 = vmatprep.mubr.bf16.mxu1 %v5442_v15  ;;  %v3814_v57 = vmul.f32 %v7725_v33, %v8535_v62  ;;  %v3817_v47 = vadd.f32 %v8537_v0, %v8536_v19  ;;  %v3819_v53 = vadd.f32 %v3815_v49, %v8538_v41  ;;  %v8547_v49 = vld [vmem:[#allocation31_spill] sm:$0xff]  ;;  %v8553_v22 = vld [vmem:[#allocation10_spill] sm:$0xff]  ;;  %v8559_v19 = vld [vmem:[#allocation33_spill] sm:$0xff] }
 0x2f2   : > { %v3827_v5 = vrot.slane %v8539_v8, %v8424_v18  ;;  %5174 = vset.pattern.permute.xlu1 %v5442_v15  ;;  %v4505_v1 = vadd.f32 %v4501_v30, %v4482_v11  ;;  %v4506_v60 = vadd.f32 %v4502_v40, %v4483_v28  ;;  %v4507_v58 = vadd.f32 %v4503_v3, %v4484_v39  ;;  %v8548_v11 = vld [vmem:[#allocation34_spill] sm:$0xff]  ;;  %v8549_v28 = vld [vmem:[#allocation36_spill] sm:$0xff]  ;;  %v8551_v44 = vld [vmem:[#allocation27_spill] sm:$0xff] }
 0x2f3   : > { %v4508_v38 = vadd.f32 %v4504_v51, %v4485_v2  ;;  %5173 = vset.pattern.permute.xlu0 %v5442_v15  ;;  %v3107_v32 = vadd.f32 %v8541_v4, %v8540_v26  ;;  %v3113_v33 = vunpack.c.l.bf16 %v5417_v10  ;;  %v4512_v14 = vrot.slane %v5414_v7, %v8424_v18  ;;  %4567 = vperm.xlu1 %5174, %v4553_v12   ;;  %v8555_v15 = vld [vmem:[#allocation38_spill] sm:$0xff]  ;;  %v8556_v30 = vld [vmem:[#allocation37_spill] sm:$0xff]  ;;  %v8560_v0 = vld [vmem:[#allocation35_spill] sm:$0xff] }
 0x2f4   : > { %v4516_v36 = vrot.slane %v5416_v37, %v8424_v18  ;;  %4557 = vperm.xlu0 %5173, %v4551_v43   ;;  %v3118_v55 = vrot.slane %v8542_v59, %v8424_v18  ;;  %v8544_v50 = vunpack.c.h.bf16 %v8543_v42  ;;  %v8546_v48 = vunpack.c.h.bf16 %v8545_v17  ;;  %v8558_v12 = vld [vmem:[#allocation17_spill] sm:$0xff]  ;;  %v8562_v37 = vld [vmem:[#allocation16_spill] sm:$0xff] }
 0x2f5   : > { %v3816_v54 = vadd.f32 %v3812_v27, %v3793_v25  ;;  %v4517_v23 = vmul.f32 %v4512_v14, %v4505_v1  ;;  %v4519_v34 = vmul.f32 %v4512_v14, %v4507_v58  ;;  %v3818_v56 = vadd.f32 %v3814_v57, %v3795_v16  ;;  %v8554_v16 = vld [vmem:[#allocation11_spill] sm:$0xff]  ;;  %v8563_v1 = vld [vmem:[#allocation14_spill] sm:$0xff]  ;;  %v8564_v58 = vld [vmem:[#allocation13_spill] sm:$0xff] }
 0x2f6   : > { %v3124_v31 = vmul.f32 %v3122_v13, %v8544_v50  ;;  %v3126_v6 = vmul.f32 %v3122_v13, %v8546_v48  ;;  %v4518_v24 = vmul.f32 %v4516_v36, %v4506_v60  ;;  %v4520_v35 = vmul.f32 %v4516_v36, %v4508_v38  ;;  %v8552_v13 = vld [vmem:[#allocation28_spill] sm:$0xff]  ;;  %v8565_v38 = vld [vmem:[#allocation19_spill] sm:$0xff]  ;;  %v8567_v10 = vld [vmem:[#allocation21_spill] sm:$0xff] }
 0x2f7   : > { %v3823_v63 = vrot.slane %v8547_v49, %v8424_v18  ;;  %v3829_v20 = vmul.f32 %v3827_v5, %v3817_v47  ;;  %v3831_v21 = vmul.f32 %v3827_v5, %v3819_v53  ;;  %v5132_v39 = vpack.c.bf16 %v8549_v28, %v8548_v11  ;;  %4572 = vperm.xlu1 %5174, %v4554_v9   ;;  %v8561_v53 = vld [vmem:[#allocation41_spill] sm:$0xff]  ;;  %v8566_v4 = vld [vmem:[#allocation4_spill] sm:$0xff]  ;;  %v8568_v14 = vld [vmem:[#allocation26_spill] sm:$0xff] }
 0x2f8   : > { %v5133_v52 = vpack.c.bf16 %v4519_v34, %v4517_v23  ;;  %v5134_v2 = vpack.c.bf16 %v4520_v35, %v4518_v24  ;;  %4562 = vperm.xlu0 %5173, %v4552_v29   ;;  %v1753_v61 = vmul.f32 %v8551_v44, %v8550_v46  ;;  %v1755_v25 = vmul.f32 %v8551_v44, %v8552_v13  ;;  %v8569_v36 = vld [vmem:[#allocation5_spill] sm:$0xff]  ;;  %v8572_v50 = vld [vmem:[#allocation3_spill] sm:$0xff]  ;;  %v8573_v17 = vld [vmem:[#allocation24_spill] sm:$0xff] }
 0x2f9   : > { %v3104_v27 = vadd.f32 %v8554_v16, %v8553_v22  ;;  %v3106_v40 = vadd.f32 %v8556_v30, %v8555_v15  ;;  %v8557_v3 = vunpack.c.l.bf16 %v8543_v42  ;;  %v3125_v43 = vmul.f32 %v3118_v55, %v3113_v33  ;;  %v8571_v42 = vld [vmem:[#allocation25_spill] sm:$0xff]  ;;  %v5175_v22 = vld [vmem:[%s8205_s4] sm:$0xff]   ;;  %v5176_v16 = vld [vmem:[%s8205_s4 + $0x8] sm:$0xff]  }
 0x2fa   : > { %v3128_v7 = vadd.f32 %v3124_v31, %v8558_v12  ;;  %4656 = vmatprep.subr.bf16.mxu0 %v5134_v2  ;;  %5135 = vmatprep.subr.bf16.mxu1 %v5134_v2  ;;  %v3828_v62 = vmul.f32 %v3823_v63, %v3816_v54  ;;  %v3830_v57 = vmul.f32 %v3823_v63, %v3818_v56  ;;  %v8574_v29 = vld [vmem:[#allocation9_spill] sm:$0xff]  ;;  %v8575_v56 = vld [vmem:[#allocation20_spill] sm:$0xff]  ;;  %v8576_v63 = vld [vmem:[#allocation22_spill] sm:$0xff] }
 0x2fb   : > { %v3123_v51 = vmul.f32 %v3118_v55, %v8557_v3  ;;  %v5131_v47 = vpack.c.bf16 %v8560_v0, %v8559_v19  ;;  %4657 = vmatpush1.bf16.msra.mxu0 %v5133_v52  ;;  %5141 = vmatpush1.bf16.msra.mxu1 %v5133_v52  ;;  %v3130_v41 = vadd.f32 %v3126_v6, %v3107_v32  ;;  %v8570_v32 = vld [vmem:[#allocation18_spill] sm:$0xff] }
 0x2fc   : > { %v3138_v8 = vrot.slane %v8561_v53, %v8424_v18  ;;  %v5130_v5 = vpack.c.bf16 %v3831_v21, %v3829_v20  ;;  %4658 = vmatprep.subr.bf16.mxu0 %v5132_v39  ;;  %5136 = vmatprep.subr.bf16.mxu1 %v5132_v39  ;;  %v1028_v60 = vadd.f32 %v8563_v1, %v8562_v37  ;;  %v8577_v21 = vld [vmem:[#allocation15_spill] sm:$0xff] }
 0x2fd   : > { %v1030_v26 = vadd.f32 %v8565_v38, %v8564_v58  ;;  %v1052_v33 = vadd.f32 %v8567_v10, %v8566_v4  ;;  %v1054_v59 = vadd.f32 %v8569_v36, %v8568_v14  ;;  %v1062_v55 = vrot.slane %v8570_v32, %v8476_v45 }
 0x2fe   : > { %v1752_v31 = vmul.f32 %v8572_v50, %v8571_v42  ;;  %v1754_v48 = vmul.f32 %v8572_v50, %v8573_v17  ;;  %v3127_v6 = vadd.f32 %v3123_v51, %v3104_v27  ;;  %v3129_v54 = vadd.f32 %v3125_v43, %v3106_v40 }
 0x2ff   : > { %v3134_v9 = vrot.slane %v8574_v29, %v8424_v18  ;;  %v5129_v23 = vpack.c.bf16 %v3830_v57, %v3828_v62  ;;  %4659 = vmatpush1.bf16.msra.mxu0 %v5131_v47  ;;  %5142 = vmatpush1.bf16.msra.mxu1 %v5131_v47  ;;  %v3140_v24 = vmul.f32 %v3138_v8, %v3128_v7 }
 0x300   : > { %v3142_v34 = vmul.f32 %v3138_v8, %v3130_v41  ;;  %v5128_v35 = vpack.c.bf16 %v1755_v25, %v1753_v61  ;;  %4660 = vmatprep.subr.bf16.mxu0 %v5130_v5  ;;  %5137 = vmatprep.subr.bf16.mxu1 %v5130_v5  ;;  %v1051_v49 = vadd.f32 %v8575_v56, %v1028_v60 }
 0x301   : > { %v1053_v20 = vadd.f32 %v8576_v63, %v1030_v26  ;;  %v1058_v11 = vrot.slane %v8577_v21, %v8476_v45  ;;  %v3139_v28 = vmul.f32 %v3134_v9, %v3127_v6  ;;  %v3141_v39 = vmul.f32 %v3134_v9, %v3129_v54 }
 0x302   : > { %v5127_v52 = vpack.c.bf16 %v1754_v48, %v1752_v31  ;;  %v1064_v18 = vmul.f32 %v1062_v55, %v1052_v33  ;;  %v1066_v2 = vmul.f32 %v1062_v55, %v1054_v59  ;;  %v5126_v46 = vpack.c.bf16 %v3142_v34, %v3140_v24 }
 0x303   : > { %4661 = vmatpush1.bf16.msra.mxu0 %v5129_v23  ;;  %5143 = vmatpush1.bf16.msra.mxu1 %v5129_v23  ;;  %v1063_v44 = vmul.f32 %v1058_v11, %v1051_v49  ;;  %v1065_v61 = vmul.f32 %v1058_v11, %v1053_v20  ;;  %v5125_v13 = vpack.c.bf16 %v3141_v39, %v3139_v28 }
 0x304   : > { %4662 = vmatprep.subr.bf16.mxu0 %v5128_v35  ;;  %5138 = vmatprep.subr.bf16.mxu1 %v5128_v35  ;;  %v5124_v25 = vpack.c.bf16 %v1066_v2, %v1064_v18 }
 0x305   : > { %v5123_v45 = vpack.c.bf16 %v1065_v61, %v1063_v44 }
 0x307   : > { %4663 = vmatpush1.bf16.msra.mxu0 %v5127_v52  ;;  %5144 = vmatpush1.bf16.msra.mxu1 %v5127_v52 }
 0x308   : > { %4664 = vmatprep.subr.bf16.mxu0 %v5126_v46  ;;  %5139 = vmatprep.subr.bf16.mxu1 %v5126_v46 }
 0x30b   : > { %4665 = vmatpush1.bf16.msra.mxu0 %v5125_v13  ;;  %5145 = vmatpush1.bf16.msra.mxu1 %v5125_v13 }
 0x30c   : > { %4666 = vmatprep.subr.bf16.mxu0 %v5124_v25  ;;  %5140 = vmatprep.subr.bf16.mxu1 %v5124_v25 }
 0x30f   : > { %4667 = vmatpush1.bf16.msra.mxu0 %v5123_v45  ;;  %5146 = vmatpush1.bf16.msra.mxu1 %v5123_v45 }
 0x312   : > { %5105 = vmatmul.mubr.msk.bf16.vlgmr.msra.gmra.mxu0 %vm4645_vm0, %v5175_v22  ;;  %5106 = vmatmul.mubr.msk.bf16.vlgmr.msra.gmra.mxu1 %vm4645_vm0, %v5176_v16 }
 0x36e   : > { %v4568_v27 = vpop.permute.xlu1 %4567 }
 0x36f   : > { %v4558_v15 = vpop.permute.xlu0 %4557 }
 0x372   : > { %v4573_v7 = vpop.permute.xlu1 %4572 }
 0x373   : > { %v4563_v62 = vpop.permute.xlu0 %4562 }
 0x3d2   : > { %v4686_v30 = vpop.f32.mrf.mxu0  ;;  %v4696_v40 = vpop.f32.mrf.mxu1 }
 0x3d3   : > { %v4687_v3 = vadd.f32 %v4686_v30, %v4558_v15  ;;  %v4697_v51 = vadd.f32 %v4696_v40, %v4568_v27 }
 0x3d4   : > { %v4688_v43 = vpop.f32.mrf.mxu0  ;;  %v4698_v12 = vpop.f32.mrf.mxu1 }
 0x3d5   : > { %4705 = vst [vmem:[%s383_s14] sm:$0xff] %v4687_v3  ;;  %4709 = vst [vmem:[%s383_s14 + $0x20] sm:$0xff] %v4697_v51  ;;  %v4689_v57 = vadd.f32 %v4688_v43, %v4558_v15  ;;  %v4699_v19 = vadd.f32 %v4698_v12, %v4568_v27 }
 0x3d6   : > { %v4690_v0 = vpop.f32.mrf.mxu0  ;;  %v4700_v47 = vpop.f32.mrf.mxu1 }
 0x3d7   : > { %4706 = vst [vmem:[%s383_s14 + $0x8] sm:$0xff] %v4689_v57  ;;  %4710 = vst [vmem:[%s383_s14 + $0x28] sm:$0xff] %v4699_v19  ;;  %v4691_v41 = vadd.f32 %v4690_v0, %v4563_v62  ;;  %v4701_v53 = vadd.f32 %v4700_v47, %v4573_v7 }
 0x3d8   : > { %v4692_v8 = vpop.f32.mrf.mxu0  ;;  %v4702_v5 = vpop.f32.mrf.mxu1 }
 0x3d9   : > { %v4693_v37 = vadd.f32 %v4692_v8, %v4563_v62  ;;  %4707 = vst [vmem:[%s383_s14 + $0x10] sm:$0xff] %v4691_v41  ;;  %v4703_v1 = vadd.f32 %v4702_v5, %v4573_v7  ;;  %4711 = vst [vmem:[%s383_s14 + $0x30] sm:$0xff] %v4701_v53 }
 0x3db   : > { %4708 = vst [vmem:[%s383_s14 + $0x18] sm:$0xff] %v4693_v37  ;;  %4712 = vst [vmem:[%s383_s14 + $0x38] sm:$0xff] %v4703_v1 }
 0x3dc PF: > { %s16_s23 = sadd.s32 1, %s5440_s23   ;;  %s8578_s21 = smov %s5436_s22 }
 0x3dd   : > { %p13_p5 = scmp.ge.s32.totalorder %s16_s23, 4   ;;  %s8579_s22 = smov %s8581_s24 }
 0x3df   :  { %15 = sbr.rel (!%p13_p5) target bundleno = 2 (0x2), region = 190 }

</bundles_post_ra>
